<compile_context>
chip_gen: v7x
topology: tpu7x:2x2x1
jax: 0.10.0
libtpu: 0.0.40
codegen_flags: <defaults>
</compile_context>

<pallas_src>
import functools

import jax
import jax.numpy as jnp
from jax.experimental import pallas as pl
from jax.experimental.pallas import tpu as pltpu

NEG_SLOPE = 0.1                     # YOLOv3 LeakyReLU slope
NUM_CLASSES = 20
NUM_ANCHORS = 3
PRED_CH = NUM_ANCHORS * (5 + NUM_CLASSES)   # 75 raw channels per scale

LANE = 128                          # lane-dense output width (pad N up to this)
VMEM_LIMIT = 32 * 1024 * 1024       # explicit budget: safe on v5e/v6e/v7x


def _default_tm():
    """M-tile: per-generation sweep knob (smaller on v5e's 16 MiB scoped VMEM)."""
    try:
        kind = jax.devices()[0].device_kind.lower()
    except Exception:
        return 512
    if "v5 lite" in kind or "v5e" in kind:
        return 256
    return 512


TM = _default_tm()


# ----------------------------------------------------------------------------
# Pallas kernel: fused split-K matmul + bias + optional LeakyReLU + residual
# ----------------------------------------------------------------------------
def _fused_matmul_kernel(*refs, n_in, has_res, leaky):
    # refs = x_0..x_{n-1}, w_0..w_{n-1}, bias, [residual], out
    o_ref = refs[-1]
    b_ref = refs[2 * n_in]
    acc = jnp.dot(refs[0][...], refs[n_in][...],
                  preferred_element_type=jnp.float32)
    for i in range(1, n_in):
        acc = acc + jnp.dot(refs[i][...], refs[n_in + i][...],
                            preferred_element_type=jnp.float32)
    acc = acc + b_ref[...]                       # bias is f32
    if leaky:
        acc = jnp.where(acc >= 0.0, acc, NEG_SLOPE * acc)
    if has_res:
        acc = acc + refs[2 * n_in + 1][...].astype(jnp.float32)
    o_ref[...] = acc.astype(o_ref.dtype)


def fused_matmul_bias_act(xs, ws, bias, *, n_true, leaky, residual=None,
                          out_dtype=jnp.bfloat16):
    """sum_i(xs[i] @ ws[i]) + bias, optional LeakyReLU and fused residual add.

    xs[i]: [M, K_i] (cast to bf16), ws[i]: [K_i, N_pad] bf16 (N zero-padded to a
    multiple of 128), bias: [N_pad] f32. Returns [M, n_true] in out_dtype.
    """
    M = xs[0].shape[0]
    n_pad = ws[0].shape[1]
    n_in = len(xs)

    # ---- M tiling (pad rows with zeros so every tile is full / 8-aligned) ----
    if M <= TM:
        tm, m_pad = M, M
    else:
        tm = TM
        m_pad = ((M + tm - 1) // tm) * tm

    def pad_rows(a):
        if a.shape[0] == m_pad:
            return a
        return jnp.pad(a, ((0, m_pad - a.shape[0]), (0, 0)))

    xs = [pad_rows(x.astype(jnp.bfloat16)) for x in xs]
    ws = [w.astype(jnp.bfloat16) for w in ws]
    bias2d = bias.reshape(1, n_pad).astype(jnp.float32)

    operands = list(xs) + list(ws) + [bias2d]
    in_specs = (
        [pl.BlockSpec((tm, x.shape[1]), lambda i: (i, 0)) for x in xs]
        + [pl.BlockSpec((w.shape[0], n_pad), lambda i: (0, 0)) for w in ws]
        + [pl.BlockSpec((1, n_pad), lambda i: (0, 0))]
    )

    has_res = residual is not None
    if has_res:
        res = residual.reshape(M, -1).astype(jnp.bfloat16)
        res = jnp.pad(res, ((0, m_pad - M), (0, n_pad - res.shape[1])))
        operands.append(res)
        in_specs.append(pl.BlockSpec((tm, n_pad), lambda i: (i, 0)))

    k_total = sum(x.shape[1] for x in xs)
    cost = pl.CostEstimate(
        flops=2 * m_pad * k_total * n_pad,
        transcendentals=0,
        bytes_accessed=int(
            sum(int(a.size) * a.dtype.itemsize for a in operands)
            + m_pad * n_pad * jnp.dtype(out_dtype).itemsize),
    )

    out = pl.pallas_call(
        functools.partial(_fused_matmul_kernel, n_in=n_in,
                          has_res=has_res, leaky=leaky),
        out_shape=jax.ShapeDtypeStruct((m_pad, n_pad), out_dtype),
        grid=(m_pad // tm,),
        in_specs=in_specs,
        out_specs=pl.BlockSpec((tm, n_pad), lambda i: (i, 0)),
        compiler_params=pltpu.CompilerParams(
            dimension_semantics=("parallel",),
            vmem_limit_bytes=VMEM_LIMIT,
        ),
        cost_estimate=cost,
    )(*operands)
    return out[:M, :n_true]


# ----------------------------------------------------------------------------
# Conv glue: im2col patch extraction (pure data movement, stays in JAX, bf16)
# ----------------------------------------------------------------------------
# TODO(synk): accumulate the 9 taps of 3x3 convs inside the kernel (split-K grid
# axis over taps reading shifted windows) to avoid the 9x im2col materialization.
def im2col(x, k, stride):
    """x: NHWC -> patches [N, Ho, Wo, k*k*C] with 'same'-style padding (pad=k//2)."""
    N, H, W, C = x.shape
    pad = k // 2
    Ho = (H + 2 * pad - k) // stride + 1
    Wo = (W + 2 * pad - k) // stride + 1
    if k == 1 and stride == 1:
        return x, Ho, Wo
    xp = jnp.pad(x, ((0, 0), (pad, pad), (pad, pad), (0, 0)))
    cols = []
    for dy in range(k):
        ye = dy + (Ho - 1) * stride + 1
        for dx in range(k):
            xe = dx + (Wo - 1) * stride + 1
            cols.append(xp[:, dy:ye:stride, dx:xe:stride, :])
    return jnp.concatenate(cols, axis=-1), Ho, Wo


def conv_block(x, p, stride=1, leaky=True, residual=None, out_dtype=jnp.bfloat16):
    """Conv(+folded BN)(+LeakyReLU)(+optional fused residual add)."""
    cols, Ho, Wo = im2col(x, p["k"], stride)
    n = x.shape[0]
    M = n * Ho * Wo
    flat = cols.reshape(M, -1)
    out = fused_matmul_bias_act([flat], [p["w"]], p["b"], n_true=p["cout"],
                                leaky=leaky, residual=residual,
                                out_dtype=out_dtype)
    return out.reshape(n, Ho, Wo, p["cout"])


def residual_block(x, pa, pb):
    y = conv_block(x, pa)                    # 1x1  C -> C/2
    return conv_block(y, pb, residual=x)     # 3x3  C/2 -> C, + x fused in kernel


def fpn_concat_conv1x1(u, lat, p, leaky=True):
    """leaky(conv1x1(concat([u, lat], ch))) without materializing the concat."""
    n, H, W, cu = u.shape
    cl = lat.shape[-1]
    M = n * H * W
    xs = [u.reshape(M, cu), lat.reshape(M, cl)]
    ws = [p["w"][:cu], p["w"][cu:cu + cl]]    # split-K over the two sources
    out = fused_matmul_bias_act(xs, ws, p["b"], n_true=p["cout"], leaky=leaky)
    return out.reshape(n, H, W, p["cout"])


# TODO(synk): fold the nearest 2x upsample into the next kernel via BlockSpec
# index mapping (read each source row/col twice) instead of materializing it.
def upsample2x(x):
    x = jnp.repeat(x, 2, axis=1)
    return jnp.repeat(x, 2, axis=2)


# ----------------------------------------------------------------------------
# Deterministic parameter initialization (BatchNorm folded into conv w/b).
# Weights stored bf16, output channels zero-padded to a multiple of 128.
# ----------------------------------------------------------------------------
def init_params(key):
    ctr = [0]

    def conv(cin, cout, k):
        ctr[0] += 1
        kk = jax.random.fold_in(key, ctr[0])
        kw, kb = jax.random.split(kk)
        fan_in = cin * k * k
        w = jax.random.normal(kw, (k, k, cin, cout), jnp.float32) * (2.0 / fan_in) ** 0.5
        b = jax.random.normal(kb, (cout,), jnp.float32) * 0.01
        n_pad = ((cout + LANE - 1) // LANE) * LANE
        wp = jnp.zeros((k * k * cin, n_pad), jnp.float32)
        wp = wp.at[:, :cout].set(w.reshape(k * k * cin, cout))
        bp = jnp.zeros((n_pad,), jnp.float32).at[:cout].set(b)
        return {"w": wp.astype(jnp.bfloat16), "b": bp, "k": k, "cout": cout}

    params = {
        # ---- V3Backbone (tiny Darknet-53 style) ----
        "stem": conv(3, 4, 3),
        "d1": conv(4, 8, 3),    "r1a": conv(8, 4, 1),    "r1b": conv(4, 8, 3),
        "d2": conv(8, 16, 3),   "r2a": conv(16, 8, 1),   "r2b": conv(8, 16, 3),
        "d3": conv(16, 32, 3),  "r3a": conv(32, 16, 1),  "r3b": conv(16, 32, 3),
        "d4": conv(32, 64, 3),  "r4a": conv(64, 32, 1),  "r4b": conv(32, 64, 3),
        "d5": conv(64, 128, 3), "r5a": conv(128, 64, 1), "r5b": conv(64, 128, 3),
        # ---- YoloV3Neck (FPN) ----
        "cs13": [conv(128, 64, 1), conv(64, 128, 3), conv(128, 64, 1),
                 conv(64, 128, 3), conv(128, 64, 1)],
        "up13": conv(64, 32, 1),
        "cs26": [conv(96, 32, 1), conv(32, 64, 3), conv(64, 32, 1),
                 conv(32, 64, 3), conv(64, 32, 1)],
        "up26": conv(32, 16, 1),
        "cs52": [conv(48, 16, 1), conv(16, 32, 3), conv(32, 16, 1),
                 conv(16, 32, 3), conv(32, 16, 1)],
        # ---- YoloV3Predict ----
        "h13": conv(64, 128, 3), "o13": conv(128, PRED_CH, 1),
        "h26": conv(32, 64, 3),  "o26": conv(64, PRED_CH, 1),
        "h52": conv(16, 32, 3),  "o52": conv(32, PRED_CH, 1),
    }
    return params


# ----------------------------------------------------------------------------
# Forward pass (mirrors YoloV3.forward: backbone -> neck -> predict)
# ----------------------------------------------------------------------------
def yolov3_forward(params, x_nchw):
    p = params
    x = jnp.transpose(x_nchw, (0, 2, 3, 1)).astype(jnp.bfloat16)  # NCHW -> NHWC

    # ---- backbone ----
    x = conv_block(x, p["stem"])
    x = conv_block(x, p["d1"], stride=2)
    x = residual_block(x, p["r1a"], p["r1b"])
    x = conv_block(x, p["d2"], stride=2)
    x = residual_block(x, p["r2a"], p["r2b"])
    x = conv_block(x, p["d3"], stride=2)
    x52 = residual_block(x, p["r3a"], p["r3b"])          # stride 8 feature
    x = conv_block(x52, p["d4"], stride=2)
    x26 = residual_block(x, p["r4a"], p["r4b"])          # stride 16 feature
    x = conv_block(x26, p["d5"], stride=2)
    x13 = residual_block(x, p["r5a"], p["r5b"])          # stride 32 feature

    # ---- neck (FPN) ----
    t = x13
    for blk in p["cs13"]:
        t = conv_block(t, blk)
    p13 = t
    u = upsample2x(conv_block(p13, p["up13"]))
    t = fpn_concat_conv1x1(u, x26, p["cs26"][0])         # concat fused as split-K
    for blk in p["cs26"][1:]:
        t = conv_block(t, blk)
    p26 = t
    u = upsample2x(conv_block(p26, p["up26"]))
    t = fpn_concat_conv1x1(u, x52, p["cs52"][0])
    for blk in p["cs52"][1:]:
        t = conv_block(t, blk)
    p52 = t

    # ---- predict (raw logits, f32) ----
    o13 = conv_block(conv_block(p13, p["h13"]), p["o13"],
                     leaky=False, out_dtype=jnp.float32)
    o26 = conv_block(conv_block(p26, p["h26"]), p["o26"],
                     leaky=False, out_dtype=jnp.float32)
    o52 = conv_block(conv_block(p52, p["h52"]), p["o52"],
                     leaky=False, out_dtype=jnp.float32)

    to_nchw = lambda a: jnp.transpose(a, (0, 3, 1, 2))
    # Raw detection logits at the three scales, NCHW, 75 = 3*(5+20) channels.
    return to_nchw(o13), to_nchw(o26), to_nchw(o52)


if __name__ == "__main__":
    key = jax.random.PRNGKey(0)
    params = init_params(key)
    x = jax.random.normal(jax.random.fold_in(key, 999), (2, 3, 32, 32), jnp.float32)

    # Weights are small; close over them so metadata (k, cout) stays static.
    forward = jax.jit(lambda inp: yolov3_forward(params, inp))

    outs = forward(x)
    outs = jax.block_until_ready(outs)

    assert outs[0].shape == (2, PRED_CH, 1, 1), outs[0].shape
    assert outs[1].shape == (2, PRED_CH, 2, 2), outs[1].shape
    assert outs[2].shape == (2, PRED_CH, 4, 4), outs[2].shape
    assert all(o.dtype == jnp.float32 for o in outs)
    assert all(bool(jnp.isfinite(o).all()) for o in outs)
    print("KERNEL_OK")
</pallas_src>

<mosaic_0001>
module attributes {stable_mosaic.version = 11 : i64} {
  func.func @_fused_matmul_kernel(%arg0: i32, %arg1: memref<512x27xbf16, #tpu.memory_space<vmem>>, %arg2: memref<27x128xbf16, #tpu.memory_space<vmem>>, %arg3: memref<1x128xf32, #tpu.memory_space<vmem>>, %arg4: memref<512x128xbf16, #tpu.memory_space<vmem>>) attributes {dimension_semantics = [#tpu.dimension_semantics<parallel>], iteration_bounds = array<i64: 4>, scalar_prefetch = 0 : i64, scratch_operands = 0 : i64, tpu.core_type = #tpu.core_type<tc>, window_params = [{transform_indices = @transform_0, window_bounds = array<i64: 512, 27>}, {pipeline_mode = #tpu.pipeline_mode<synchronous>, transform_indices = @transform_1, window_bounds = array<i64: 27, 128>}, {pipeline_mode = #tpu.pipeline_mode<synchronous>, transform_indices = @transform_2, window_bounds = array<i64: 1, 128>}, {transform_indices = @transform_3, window_bounds = array<i64: 512, 128>}]} {
    %c0 = arith.constant 0 : index
    %c0_0 = arith.constant 0 : index
    %0 = vector.load %arg1[%c0, %c0_0] : memref<512x27xbf16, #tpu.memory_space<vmem>>, vector<512x27xbf16>
    %c0_1 = arith.constant 0 : index
    %c0_2 = arith.constant 0 : index
    %1 = vector.load %arg2[%c0_1, %c0_2] : memref<27x128xbf16, #tpu.memory_space<vmem>>, vector<27x128xbf16>
    %cst = arith.constant dense<0.000000e+00> : vector<512x128xf32>
    %2 = tpu.matmul %0, %1, %cst {dimension_numbers = #tpu.dot_dimension_numbers<[1], [0], [0], [1], [0, 0, 1, 1], [], []>} : vector<512x27xbf16>, vector<27x128xbf16>, vector<512x128xf32> -> vector<512x128xf32>
    %c0_3 = arith.constant 0 : index
    %c0_4 = arith.constant 0 : index
    %3 = vector.load %arg3[%c0_3, %c0_4] : memref<1x128xf32, #tpu.memory_space<vmem>>, vector<1x128xf32>
    %4 = vector.broadcast %3 : vector<1x128xf32> to vector<512x128xf32>
    %5 = arith.addf %2, %4 : vector<512x128xf32>
    %cst_5 = arith.constant 0.000000e+00 : f32
    %6 = vector.broadcast %cst_5 : f32 to vector<512x128xf32>
    %7 = arith.cmpf oge, %5, %6 : vector<512x128xf32>
    %cst_6 = arith.constant 1.000000e-01 : f32
    %8 = vector.broadcast %cst_6 : f32 to vector<512x128xf32>
    %9 = arith.mulf %8, %5 : vector<512x128xf32>
    %10 = arith.select %7, %5, %9 : vector<512x128xi1>, vector<512x128xf32>
    %11 = arith.truncf %10 : vector<512x128xf32> to vector<512x128xbf16>
    %c0_7 = arith.constant 0 : index
    %c0_8 = arith.constant 0 : index
    %12 = vector.load %arg4[%c0_7, %c0_8] : memref<512x128xbf16, #tpu.memory_space<vmem>>, vector<512x128xbf16>
    tpu.vector_store %arg4[%c0_7, %c0_8], %11 {strides = array<i32>} : memref<512x128xbf16, #tpu.memory_space<vmem>>, vector<512x128xbf16>,
    return
  }
  func.func @transform_0(%arg0: i32) -> (i32, i32) {
    %c0_i32 = arith.constant 0 : i32
    %c0_i32_0 = arith.constant 0 : i32
    return %arg0, %c0_i32 : i32, i32
  }
  func.func @transform_1(%arg0: i32) -> (i32, i32) {
    %c0_i32 = arith.constant 0 : i32
    %c0_i32_0 = arith.constant 0 : i32
    %c0_i32_1 = arith.constant 0 : i32
    return %c0_i32, %c0_i32_0 : i32, i32
  }
  func.func @transform_2(%arg0: i32) -> (i32, i32) {
    %c0_i32 = arith.constant 0 : i32
    %c0_i32_0 = arith.constant 0 : i32
    %c0_i32_1 = arith.constant 0 : i32
    return %c0_i32, %c0_i32_0 : i32, i32
  }
  func.func @transform_3(%arg0: i32) -> (i32, i32) {
    %c0_i32 = arith.constant 0 : i32
    %c0_i32_0 = arith.constant 0 : i32
    return %arg0, %c0_i32 : i32, i32
  }
}

module attributes {stable_mosaic.version = 11 : i64} {
  func.func @_fused_matmul_kernel(%arg0: i32, %arg1: memref<512x36xbf16, #tpu.memory_space<vmem>>, %arg2: memref<36x128xbf16, #tpu.memory_space<vmem>>, %arg3: memref<1x128xf32, #tpu.memory_space<vmem>>, %arg4: memref<512x128xbf16, #tpu.memory_space<vmem>>) attributes {dimension_semantics = [#tpu.dimension_semantics<parallel>], iteration_bounds = array<i64: 1>, scalar_prefetch = 0 : i64, scratch_operands = 0 : i64, tpu.core_type = #tpu.core_type<tc>, window_params = [{transform_indices = @transform_0, window_bounds = array<i64: 512, 36>}, {pipeline_mode = #tpu.pipeline_mode<synchronous>, transform_indices = @transform_1, window_bounds = array<i64: 36, 128>}, {pipeline_mode = #tpu.pipeline_mode<synchronous>, transform_indices = @transform_2, window_bounds = array<i64: 1, 128>}, {transform_indices = @transform_3, window_bounds = array<i64: 512, 128>}]} {
    %c0 = arith.constant 0 : index
    %c0_0 = arith.constant 0 : index
    %0 = vector.load %arg1[%c0, %c0_0] : memref<512x36xbf16, #tpu.memory_space<vmem>>, vector<512x36xbf16>
    %c0_1 = arith.constant 0 : index
    %c0_2 = arith.constant 0 : index
    %1 = vector.load %arg2[%c0_1, %c0_2] : memref<36x128xbf16, #tpu.memory_space<vmem>>, vector<36x128xbf16>
    %cst = arith.constant dense<0.000000e+00> : vector<512x128xf32>
    %2 = tpu.matmul %0, %1, %cst {dimension_numbers = #tpu.dot_dimension_numbers<[1], [0], [0], [1], [0, 0, 1, 1], [], []>} : vector<512x36xbf16>, vector<36x128xbf16>, vector<512x128xf32> -> vector<512x128xf32>
    %c0_3 = arith.constant 0 : index
    %c0_4 = arith.constant 0 : index
    %3 = vector.load %arg3[%c0_3, %c0_4] : memref<1x128xf32, #tpu.memory_space<vmem>>, vector<1x128xf32>
    %4 = vector.broadcast %3 : vector<1x128xf32> to vector<512x128xf32>
    %5 = arith.addf %2, %4 : vector<512x128xf32>
    %cst_5 = arith.constant 0.000000e+00 : f32
    %6 = vector.broadcast %cst_5 : f32 to vector<512x128xf32>
    %7 = arith.cmpf oge, %5, %6 : vector<512x128xf32>
    %cst_6 = arith.constant 1.000000e-01 : f32
    %8 = vector.broadcast %cst_6 : f32 to vector<512x128xf32>
    %9 = arith.mulf %8, %5 : vector<512x128xf32>
    %10 = arith.select %7, %5, %9 : vector<512x128xi1>, vector<512x128xf32>
    %11 = arith.truncf %10 : vector<512x128xf32> to vector<512x128xbf16>
    %c0_7 = arith.constant 0 : index
    %c0_8 = arith.constant 0 : index
    %12 = vector.load %arg4[%c0_7, %c0_8] : memref<512x128xbf16, #tpu.memory_space<vmem>>, vector<512x128xbf16>
    tpu.vector_store %arg4[%c0_7, %c0_8], %11 {strides = array<i32>} : memref<512x128xbf16, #tpu.memory_space<vmem>>, vector<512x128xbf16>,
    return
  }
  func.func @transform_0(%arg0: i32) -> (i32, i32) {
    %c0_i32 = arith.constant 0 : i32
    %c0_i32_0 = arith.constant 0 : i32
    return %arg0, %c0_i32 : i32, i32
  }
  func.func @transform_1(%arg0: i32) -> (i32, i32) {
    %c0_i32 = arith.constant 0 : i32
    %c0_i32_0 = arith.constant 0 : i32
    %c0_i32_1 = arith.constant 0 : i32
    return %c0_i32, %c0_i32_0 : i32, i32
  }
  func.func @transform_2(%arg0: i32) -> (i32, i32) {
    %c0_i32 = arith.constant 0 : i32
    %c0_i32_0 = arith.constant 0 : i32
    %c0_i32_1 = arith.constant 0 : i32
    return %c0_i32, %c0_i32_0 : i32, i32
  }
  func.func @transform_3(%arg0: i32) -> (i32, i32) {
    %c0_i32 = arith.constant 0 : i32
    %c0_i32_0 = arith.constant 0 : i32
    return %arg0, %c0_i32 : i32, i32
  }
}

module attributes {stable_mosaic.version = 11 : i64} {
  func.func @_fused_matmul_kernel(%arg0: i32, %arg1: memref<512x8xbf16, #tpu.memory_space<vmem>>, %arg2: memref<8x128xbf16, #tpu.memory_space<vmem>>, %arg3: memref<1x128xf32, #tpu.memory_space<vmem>>, %arg4: memref<512x128xbf16, #tpu.memory_space<vmem>>) attributes {dimension_semantics = [#tpu.dimension_semantics<parallel>], iteration_bounds = array<i64: 1>, scalar_prefetch = 0 : i64, scratch_operands = 0 : i64, tpu.core_type = #tpu.core_type<tc>, window_params = [{transform_indices = @transform_0, window_bounds = array<i64: 512, 8>}, {pipeline_mode = #tpu.pipeline_mode<synchronous>, transform_indices = @transform_1, window_bounds = array<i64: 8, 128>}, {pipeline_mode = #tpu.pipeline_mode<synchronous>, transform_indices = @transform_2, window_bounds = array<i64: 1, 128>}, {transform_indices = @transform_3, window_bounds = array<i64: 512, 128>}]} {
    %c0 = arith.constant 0 : index
    %c0_0 = arith.constant 0 : index
    %0 = vector.load %arg1[%c0, %c0_0] : memref<512x8xbf16, #tpu.memory_space<vmem>>, vector<512x8xbf16>
    %c0_1 = arith.constant 0 : index
    %c0_2 = arith.constant 0 : index
    %1 = vector.load %arg2[%c0_1, %c0_2] : memref<8x128xbf16, #tpu.memory_space<vmem>>, vector<8x128xbf16>
    %cst = arith.constant dense<0.000000e+00> : vector<512x128xf32>
    %2 = tpu.matmul %0, %1, %cst {dimension_numbers = #tpu.dot_dimension_numbers<[1], [0], [0], [1], [0, 0, 1, 1], [], []>} : vector<512x8xbf16>, vector<8x128xbf16>, vector<512x128xf32> -> vector<512x128xf32>
    %c0_3 = arith.constant 0 : index
    %c0_4 = arith.constant 0 : index
    %3 = vector.load %arg3[%c0_3, %c0_4] : memref<1x128xf32, #tpu.memory_space<vmem>>, vector<1x128xf32>
    %4 = vector.broadcast %3 : vector<1x128xf32> to vector<512x128xf32>
    %5 = arith.addf %2, %4 : vector<512x128xf32>
    %cst_5 = arith.constant 0.000000e+00 : f32
    %6 = vector.broadcast %cst_5 : f32 to vector<512x128xf32>
    %7 = arith.cmpf oge, %5, %6 : vector<512x128xf32>
    %cst_6 = arith.constant 1.000000e-01 : f32
    %8 = vector.broadcast %cst_6 : f32 to vector<512x128xf32>
    %9 = arith.mulf %8, %5 : vector<512x128xf32>
    %10 = arith.select %7, %5, %9 : vector<512x128xi1>, vector<512x128xf32>
    %11 = arith.truncf %10 : vector<512x128xf32> to vector<512x128xbf16>
    %c0_7 = arith.constant 0 : index
    %c0_8 = arith.constant 0 : index
    %12 = vector.load %arg4[%c0_7, %c0_8] : memref<512x128xbf16, #tpu.memory_space<vmem>>, vector<512x128xbf16>
    tpu.vector_store %arg4[%c0_7, %c0_8], %11 {strides = array<i32>} : memref<512x128xbf16, #tpu.memory_space<vmem>>, vector<512x128xbf16>,
    return
  }
  func.func @transform_0(%arg0: i32) -> (i32, i32) {
    %c0_i32 = arith.constant 0 : i32
    %c0_i32_0 = arith.constant 0 : i32
    return %arg0, %c0_i32 : i32, i32
  }
  func.func @transform_1(%arg0: i32) -> (i32, i32) {
    %c0_i32 = arith.constant 0 : i32
    %c0_i32_0 = arith.constant 0 : i32
    %c0_i32_1 = arith.constant 0 : i32
    return %c0_i32, %c0_i32_0 : i32, i32
  }
  func.func @transform_2(%arg0: i32) -> (i32, i32) {
    %c0_i32 = arith.constant 0 : i32
    %c0_i32_0 = arith.constant 0 : i32
    %c0_i32_1 = arith.constant 0 : i32
    return %c0_i32, %c0_i32_0 : i32, i32
  }
  func.func @transform_3(%arg0: i32) -> (i32, i32) {
    %c0_i32 = arith.constant 0 : i32
    %c0_i32_0 = arith.constant 0 : i32
    return %arg0, %c0_i32 : i32, i32
  }
}

module attributes {stable_mosaic.version = 11 : i64} {
  func.func @_fused_matmul_kernel(%arg0: i32, %arg1: memref<512x36xbf16, #tpu.memory_space<vmem>>, %arg2: memref<36x128xbf16, #tpu.memory_space<vmem>>, %arg3: memref<1x128xf32, #tpu.memory_space<vmem>>, %arg4: memref<512x128xbf16, #tpu.memory_space<vmem>>, %arg5: memref<512x128xbf16, #tpu.memory_space<vmem>>) attributes {dimension_semantics = [#tpu.dimension_semantics<parallel>], iteration_bounds = array<i64: 1>, scalar_prefetch = 0 : i64, scratch_operands = 0 : i64, tpu.core_type = #tpu.core_type<tc>, window_params = [{transform_indices = @transform_0, window_bounds = array<i64: 512, 36>}, {pipeline_mode = #tpu.pipeline_mode<synchronous>, transform_indices = @transform_1, window_bounds = array<i64: 36, 128>}, {pipeline_mode = #tpu.pipeline_mode<synchronous>, transform_indices = @transform_2, window_bounds = array<i64: 1, 128>}, {transform_indices = @transform_3, window_bounds = array<i64: 512, 128>}, {transform_indices = @transform_4, window_bounds = array<i64: 512, 128>}]} {
    %c0 = arith.constant 0 : index
    %c0_0 = arith.constant 0 : index
    %0 = vector.load %arg1[%c0, %c0_0] : memref<512x36xbf16, #tpu.memory_space<vmem>>, vector<512x36xbf16>
    %c0_1 = arith.constant 0 : index
    %c0_2 = arith.constant 0 : index
    %1 = vector.load %arg2[%c0_1, %c0_2] : memref<36x128xbf16, #tpu.memory_space<vmem>>, vector<36x128xbf16>
    %cst = arith.constant dense<0.000000e+00> : vector<512x128xf32>
    %2 = tpu.matmul %0, %1, %cst {dimension_numbers = #tpu.dot_dimension_numbers<[1], [0], [0], [1], [0, 0, 1, 1], [], []>} : vector<512x36xbf16>, vector<36x128xbf16>, vector<512x128xf32> -> vector<512x128xf32>
    %c0_3 = arith.constant 0 : index
    %c0_4 = arith.constant 0 : index
    %3 = vector.load %arg3[%c0_3, %c0_4] : memref<1x128xf32, #tpu.memory_space<vmem>>, vector<1x128xf32>
    %4 = vector.broadcast %3 : vector<1x128xf32> to vector<512x128xf32>
    %5 = arith.addf %2, %4 : vector<512x128xf32>
    %cst_5 = arith.constant 0.000000e+00 : f32
    %6 = vector.broadcast %cst_5 : f32 to vector<512x128xf32>
    %7 = arith.cmpf oge, %5, %6 : vector<512x128xf32>
    %cst_6 = arith.constant 1.000000e-01 : f32
    %8 = vector.broadcast %cst_6 : f32 to vector<512x128xf32>
    %9 = arith.mulf %8, %5 : vector<512x128xf32>
    %10 = arith.select %7, %5, %9 : vector<512x128xi1>, vector<512x128xf32>
    %c0_7 = arith.constant 0 : index
    %c0_8 = arith.constant 0 : index
    %11 = vector.load %arg4[%c0_7, %c0_8] : memref<512x128xbf16, #tpu.memory_space<vmem>>, vector<512x128xbf16>
    %12 = arith.extf %11 : vector<512x128xbf16> to vector<512x128xf32>
    %13 = arith.addf %10, %12 : vector<512x128xf32>
    %14 = arith.truncf %13 : vector<512x128xf32> to vector<512x128xbf16>
    %c0_9 = arith.constant 0 : index
    %c0_10 = arith.constant 0 : index
    %15 = vector.load %arg5[%c0_9, %c0_10] : memref<512x128xbf16, #tpu.memory_space<vmem>>, vector<512x128xbf16>
    tpu.vector_store %arg5[%c0_9, %c0_10], %14 {strides = array<i32>} : memref<512x128xbf16, #tpu.memory_space<vmem>>, vector<512x128xbf16>,
    return
  }
  func.func @transform_0(%arg0: i32) -> (i32, i32) {
    %c0_i32 = arith.constant 0 : i32
    %c0_i32_0 = arith.constant 0 : i32
    return %arg0, %c0_i32 : i32, i32
  }
  func.func @transform_1(%arg0: i32) -> (i32, i32) {
    %c0_i32 = arith.constant 0 : i32
    %c0_i32_0 = arith.constant 0 : i32
    %c0_i32_1 = arith.constant 0 : i32
    return %c0_i32, %c0_i32_0 : i32, i32
  }
  func.func @transform_2(%arg0: i32) -> (i32, i32) {
    %c0_i32 = arith.constant 0 : i32
    %c0_i32_0 = arith.constant 0 : i32
    %c0_i32_1 = arith.constant 0 : i32
    return %c0_i32, %c0_i32_0 : i32, i32
  }
  func.func @transform_3(%arg0: i32) -> (i32, i32) {
    %c0_i32 = arith.constant 0 : i32
    %c0_i32_0 = arith.constant 0 : i32
    return %arg0, %c0_i32 : i32, i32
  }
  func.func @transform_4(%arg0: i32) -> (i32, i32) {
    %c0_i32 = arith.constant 0 : i32
    %c0_i32_0 = arith.constant 0 : i32
    return %arg0, %c0_i32 : i32, i32
  }
}

module attributes {stable_mosaic.version = 11 : i64} {
  func.func @_fused_matmul_kernel(%arg0: i32, %arg1: memref<128x72xbf16, #tpu.memory_space<vmem>>, %arg2: memref<72x128xbf16, #tpu.memory_space<vmem>>, %arg3: memref<1x128xf32, #tpu.memory_space<vmem>>, %arg4: memref<128x128xbf16, #tpu.memory_space<vmem>>) attributes {dimension_semantics = [#tpu.dimension_semantics<parallel>], iteration_bounds = array<i64: 1>, scalar_prefetch = 0 : i64, scratch_operands = 0 : i64, tpu.core_type = #tpu.core_type<tc>, window_params = [{transform_indices = @transform_0, window_bounds = array<i64: 128, 72>}, {pipeline_mode = #tpu.pipeline_mode<synchronous>, transform_indices = @transform_1, window_bounds = array<i64: 72, 128>}, {pipeline_mode = #tpu.pipeline_mode<synchronous>, transform_indices = @transform_2, window_bounds = array<i64: 1, 128>}, {transform_indices = @transform_3, window_bounds = array<i64: 128, 128>}]} {
    %c0 = arith.constant 0 : index
    %c0_0 = arith.constant 0 : index
    %0 = vector.load %arg1[%c0, %c0_0] : memref<128x72xbf16, #tpu.memory_space<vmem>>, vector<128x72xbf16>
    %c0_1 = arith.constant 0 : index
    %c0_2 = arith.constant 0 : index
    %1 = vector.load %arg2[%c0_1, %c0_2] : memref<72x128xbf16, #tpu.memory_space<vmem>>, vector<72x128xbf16>
    %cst = arith.constant dense<0.000000e+00> : vector<128x128xf32>
    %2 = tpu.matmul %0, %1, %cst {dimension_numbers = #tpu.dot_dimension_numbers<[1], [0], [0], [1], [0, 0, 1, 1], [], []>} : vector<128x72xbf16>, vector<72x128xbf16>, vector<128x128xf32> -> vector<128x128xf32>
    %c0_3 = arith.constant 0 : index
    %c0_4 = arith.constant 0 : index
    %3 = vector.load %arg3[%c0_3, %c0_4] : memref<1x128xf32, #tpu.memory_space<vmem>>, vector<1x128xf32>
    %4 = vector.broadcast %3 : vector<1x128xf32> to vector<128x128xf32>
    %5 = arith.addf %2, %4 : vector<128x128xf32>
    %cst_5 = arith.constant 0.000000e+00 : f32
    %6 = vector.broadcast %cst_5 : f32 to vector<128x128xf32>
    %7 = arith.cmpf oge, %5, %6 : vector<128x128xf32>
    %cst_6 = arith.constant 1.000000e-01 : f32
    %8 = vector.broadcast %cst_6 : f32 to vector<128x128xf32>
    %9 = arith.mulf %8, %5 : vector<128x128xf32>
    %10 = arith.select %7, %5, %9 : vector<128x128xi1>, vector<128x128xf32>
    %11 = arith.truncf %10 : vector<128x128xf32> to vector<128x128xbf16>
    %c0_7 = arith.constant 0 : index
    %c0_8 = arith.constant 0 : index
    %12 = vector.load %arg4[%c0_7, %c0_8] : memref<128x128xbf16, #tpu.memory_space<vmem>>, vector<128x128xbf16>
    tpu.vector_store %arg4[%c0_7, %c0_8], %11 {strides = array<i32>} : memref<128x128xbf16, #tpu.memory_space<vmem>>, vector<128x128xbf16>,
    return
  }
  func.func @transform_0(%arg0: i32) -> (i32, i32) {
    %c0_i32 = arith.constant 0 : i32
    %c0_i32_0 = arith.constant 0 : i32
    return %arg0, %c0_i32 : i32, i32
  }
  func.func @transform_1(%arg0: i32) -> (i32, i32) {
    %c0_i32 = arith.constant 0 : i32
    %c0_i32_0 = arith.constant 0 : i32
    %c0_i32_1 = arith.constant 0 : i32
    return %c0_i32, %c0_i32_0 : i32, i32
  }
  func.func @transform_2(%arg0: i32) -> (i32, i32) {
    %c0_i32 = arith.constant 0 : i32
    %c0_i32_0 = arith.constant 0 : i32
    %c0_i32_1 = arith.constant 0 : i32
    return %c0_i32, %c0_i32_0 : i32, i32
  }
  func.func @transform_3(%arg0: i32) -> (i32, i32) {
    %c0_i32 = arith.constant 0 : i32
    %c0_i32_0 = arith.constant 0 : i32
    return %arg0, %c0_i32 : i32, i32
  }
}

module attributes {stable_mosaic.version = 11 : i64} {
  func.func @_fused_matmul_kernel(%arg0: i32, %arg1: memref<128x16xbf16, #tpu.memory_space<vmem>>, %arg2: memref<16x128xbf16, #tpu.memory_space<vmem>>, %arg3: memref<1x128xf32, #tpu.memory_space<vmem>>, %arg4: memref<128x128xbf16, #tpu.memory_space<vmem>>) attributes {dimension_semantics = [#tpu.dimension_semantics<parallel>], iteration_bounds = array<i64: 1>, scalar_prefetch = 0 : i64, scratch_operands = 0 : i64, tpu.core_type = #tpu.core_type<tc>, window_params = [{transform_indices = @transform_0, window_bounds = array<i64: 128, 16>}, {pipeline_mode = #tpu.pipeline_mode<synchronous>, transform_indices = @transform_1, window_bounds = array<i64: 16, 128>}, {pipeline_mode = #tpu.pipeline_mode<synchronous>, transform_indices = @transform_2, window_bounds = array<i64: 1, 128>}, {transform_indices = @transform_3, window_bounds = array<i64: 128, 128>}]} {
    %c0 = arith.constant 0 : index
    %c0_0 = arith.constant 0 : index
    %0 = vector.load %arg1[%c0, %c0_0] : memref<128x16xbf16, #tpu.memory_space<vmem>>, vector<128x16xbf16>
    %c0_1 = arith.constant 0 : index
    %c0_2 = arith.constant 0 : index
    %1 = vector.load %arg2[%c0_1, %c0_2] : memref<16x128xbf16, #tpu.memory_space<vmem>>, vector<16x128xbf16>
    %cst = arith.constant dense<0.000000e+00> : vector<128x128xf32>
    %2 = tpu.matmul %0, %1, %cst {dimension_numbers = #tpu.dot_dimension_numbers<[1], [0], [0], [1], [0, 0, 1, 1], [], []>} : vector<128x16xbf16>, vector<16x128xbf16>, vector<128x128xf32> -> vector<128x128xf32>
    %c0_3 = arith.constant 0 : index
    %c0_4 = arith.constant 0 : index
    %3 = vector.load %arg3[%c0_3, %c0_4] : memref<1x128xf32, #tpu.memory_space<vmem>>, vector<1x128xf32>
    %4 = vector.broadcast %3 : vector<1x128xf32> to vector<128x128xf32>
    %5 = arith.addf %2, %4 : vector<128x128xf32>
    %cst_5 = arith.constant 0.000000e+00 : f32
    %6 = vector.broadcast %cst_5 : f32 to vector<128x128xf32>
    %7 = arith.cmpf oge, %5, %6 : vector<128x128xf32>
    %cst_6 = arith.constant 1.000000e-01 : f32
    %8 = vector.broadcast %cst_6 : f32 to vector<128x128xf32>
    %9 = arith.mulf %8, %5 : vector<128x128xf32>
    %10 = arith.select %7, %5, %9 : vector<128x128xi1>, vector<128x128xf32>
    %11 = arith.truncf %10 : vector<128x128xf32> to vector<128x128xbf16>
    %c0_7 = arith.constant 0 : index
    %c0_8 = arith.constant 0 : index
    %12 = vector.load %arg4[%c0_7, %c0_8] : memref<128x128xbf16, #tpu.memory_space<vmem>>, vector<128x128xbf16>
    tpu.vector_store %arg4[%c0_7, %c0_8], %11 {strides = array<i32>} : memref<128x128xbf16, #tpu.memory_space<vmem>>, vector<128x128xbf16>,
    return
  }
  func.func @transform_0(%arg0: i32) -> (i32, i32) {
    %c0_i32 = arith.constant 0 : i32
    %c0_i32_0 = arith.constant 0 : i32
    return %arg0, %c0_i32 : i32, i32
  }
  func.func @transform_1(%arg0: i32) -> (i32, i32) {
    %c0_i32 = arith.constant 0 : i32
    %c0_i32_0 = arith.constant 0 : i32
    %c0_i32_1 = arith.constant 0 : i32
    return %c0_i32, %c0_i32_0 : i32, i32
  }
  func.func @transform_2(%arg0: i32) -> (i32, i32) {
    %c0_i32 = arith.constant 0 : i32
    %c0_i32_0 = arith.constant 0 : i32
    %c0_i32_1 = arith.constant 0 : i32
    return %c0_i32, %c0_i32_0 : i32, i32
  }
  func.func @transform_3(%arg0: i32) -> (i32, i32) {
    %c0_i32 = arith.constant 0 : i32
    %c0_i32_0 = arith.constant 0 : i32
    return %arg0, %c0_i32 : i32, i32
  }
}

module attributes {stable_mosaic.version = 11 : i64} {
  func.func @_fused_matmul_kernel(%arg0: i32, %arg1: memref<128x72xbf16, #tpu.memory_space<vmem>>, %arg2: memref<72x128xbf16, #tpu.memory_space<vmem>>, %arg3: memref<1x128xf32, #tpu.memory_space<vmem>>, %arg4: memref<128x128xbf16, #tpu.memory_space<vmem>>, %arg5: memref<128x128xbf16, #tpu.memory_space<vmem>>) attributes {dimension_semantics = [#tpu.dimension_semantics<parallel>], iteration_bounds = array<i64: 1>, scalar_prefetch = 0 : i64, scratch_operands = 0 : i64, tpu.core_type = #tpu.core_type<tc>, window_params = [{transform_indices = @transform_0, window_bounds = array<i64: 128, 72>}, {pipeline_mode = #tpu.pipeline_mode<synchronous>, transform_indices = @transform_1, window_bounds = array<i64: 72, 128>}, {pipeline_mode = #tpu.pipeline_mode<synchronous>, transform_indices = @transform_2, window_bounds = array<i64: 1, 128>}, {transform_indices = @transform_3, window_bounds = array<i64: 128, 128>}, {transform_indices = @transform_4, window_bounds = array<i64: 128, 128>}]} {
    %c0 = arith.constant 0 : index
    %c0_0 = arith.constant 0 : index
    %0 = vector.load %arg1[%c0, %c0_0] : memref<128x72xbf16, #tpu.memory_space<vmem>>, vector<128x72xbf16>
    %c0_1 = arith.constant 0 : index
    %c0_2 = arith.constant 0 : index
    %1 = vector.load %arg2[%c0_1, %c0_2] : memref<72x128xbf16, #tpu.memory_space<vmem>>, vector<72x128xbf16>
    %cst = arith.constant dense<0.000000e+00> : vector<128x128xf32>
    %2 = tpu.matmul %0, %1, %cst {dimension_numbers = #tpu.dot_dimension_numbers<[1], [0], [0], [1], [0, 0, 1, 1], [], []>} : vector<128x72xbf16>, vector<72x128xbf16>, vector<128x128xf32> -> vector<128x128xf32>
    %c0_3 = arith.constant 0 : index
    %c0_4 = arith.constant 0 : index
    %3 = vector.load %arg3[%c0_3, %c0_4] : memref<1x128xf32, #tpu.memory_space<vmem>>, vector<1x128xf32>
    %4 = vector.broadcast %3 : vector<1x128xf32> to vector<128x128xf32>
    %5 = arith.addf %2, %4 : vector<128x128xf32>
    %cst_5 = arith.constant 0.000000e+00 : f32
    %6 = vector.broadcast %cst_5 : f32 to vector<128x128xf32>
    %7 = arith.cmpf oge, %5, %6 : vector<128x128xf32>
    %cst_6 = arith.constant 1.000000e-01 : f32
    %8 = vector.broadcast %cst_6 : f32 to vector<128x128xf32>
    %9 = arith.mulf %8, %5 : vector<128x128xf32>
    %10 = arith.select %7, %5, %9 : vector<128x128xi1>, vector<128x128xf32>
    %c0_7 = arith.constant 0 : index
    %c0_8 = arith.constant 0 : index
    %11 = vector.load %arg4[%c0_7, %c0_8] : memref<128x128xbf16, #tpu.memory_space<vmem>>, vector<128x128xbf16>
    %12 = arith.extf %11 : vector<128x128xbf16> to vector<128x128xf32>
    %13 = arith.addf %10, %12 : vector<128x128xf32>
    %14 = arith.truncf %13 : vector<128x128xf32> to vector<128x128xbf16>
    %c0_9 = arith.constant 0 : index
    %c0_10 = arith.constant 0 : index
    %15 = vector.load %arg5[%c0_9, %c0_10] : memref<128x128xbf16, #tpu.memory_space<vmem>>, vector<128x128xbf16>
    tpu.vector_store %arg5[%c0_9, %c0_10], %14 {strides = array<i32>} : memref<128x128xbf16, #tpu.memory_space<vmem>>, vector<128x128xbf16>,
    return
  }
  func.func @transform_0(%arg0: i32) -> (i32, i32) {
    %c0_i32 = arith.constant 0 : i32
    %c0_i32_0 = arith.constant 0 : i32
    return %arg0, %c0_i32 : i32, i32
  }
  func.func @transform_1(%arg0: i32) -> (i32, i32) {
    %c0_i32 = arith.constant 0 : i32
    %c0_i32_0 = arith.constant 0 : i32
    %c0_i32_1 = arith.constant 0 : i32
    return %c0_i32, %c0_i32_0 : i32, i32
  }
  func.func @transform_2(%arg0: i32) -> (i32, i32) {
    %c0_i32 = arith.constant 0 : i32
    %c0_i32_0 = arith.constant 0 : i32
    %c0_i32_1 = arith.constant 0 : i32
    return %c0_i32, %c0_i32_0 : i32, i32
  }
  func.func @transform_3(%arg0: i32) -> (i32, i32) {
    %c0_i32 = arith.constant 0 : i32
    %c0_i32_0 = arith.constant 0 : i32
    return %arg0, %c0_i32 : i32, i32
  }
  func.func @transform_4(%arg0: i32) -> (i32, i32) {
    %c0_i32 = arith.constant 0 : i32
    %c0_i32_0 = arith.constant 0 : i32
    return %arg0, %c0_i32 : i32, i32
  }
}

module attributes {stable_mosaic.version = 11 : i64} {
  func.func @_fused_matmul_kernel(%arg0: i32, %arg1: memref<32x32xbf16, #tpu.memory_space<vmem>>, %arg2: memref<32x128xbf16, #tpu.memory_space<vmem>>, %arg3: memref<1x128xf32, #tpu.memory_space<vmem>>, %arg4: memref<32x128xbf16, #tpu.memory_space<vmem>>) attributes {dimension_semantics = [#tpu.dimension_semantics<parallel>], iteration_bounds = array<i64: 1>, scalar_prefetch = 0 : i64, scratch_operands = 0 : i64, tpu.core_type = #tpu.core_type<tc>, window_params = [{transform_indices = @transform_0, window_bounds = array<i64: 32, 32>}, {pipeline_mode = #tpu.pipeline_mode<synchronous>, transform_indices = @transform_1, window_bounds = array<i64: 32, 128>}, {pipeline_mode = #tpu.pipeline_mode<synchronous>, transform_indices = @transform_2, window_bounds = array<i64: 1, 128>}, {transform_indices = @transform_3, window_bounds = array<i64: 32, 128>}]} {
    %c0 = arith.constant 0 : index
    %c0_0 = arith.constant 0 : index
    %0 = vector.load %arg1[%c0, %c0_0] : memref<32x32xbf16, #tpu.memory_space<vmem>>, vector<32x32xbf16>
    %c0_1 = arith.constant 0 : index
    %c0_2 = arith.constant 0 : index
    %1 = vector.load %arg2[%c0_1, %c0_2] : memref<32x128xbf16, #tpu.memory_space<vmem>>, vector<32x128xbf16>
    %cst = arith.constant dense<0.000000e+00> : vector<32x128xf32>
    %2 = tpu.matmul %0, %1, %cst {dimension_numbers = #tpu.dot_dimension_numbers<[1], [0], [0], [1], [0, 0, 1, 1], [], []>} : vector<32x32xbf16>, vector<32x128xbf16>, vector<32x128xf32> -> vector<32x128xf32>
    %c0_3 = arith.constant 0 : index
    %c0_4 = arith.constant 0 : index
    %3 = vector.load %arg3[%c0_3, %c0_4] : memref<1x128xf32, #tpu.memory_space<vmem>>, vector<1x128xf32>
    %4 = vector.broadcast %3 : vector<1x128xf32> to vector<32x128xf32>
    %5 = arith.addf %2, %4 : vector<32x128xf32>
    %cst_5 = arith.constant 0.000000e+00 : f32
    %6 = vector.broadcast %cst_5 : f32 to vector<32x128xf32>
    %7 = arith.cmpf oge, %5, %6 : vector<32x128xf32>
    %cst_6 = arith.constant 1.000000e-01 : f32
    %8 = vector.broadcast %cst_6 : f32 to vector<32x128xf32>
    %9 = arith.mulf %8, %5 : vector<32x128xf32>
    %10 = arith.select %7, %5, %9 : vector<32x128xi1>, vector<32x128xf32>
    %11 = arith.truncf %10 : vector<32x128xf32> to vector<32x128xbf16>
    %c0_7 = arith.constant 0 : index
    %c0_8 = arith.constant 0 : index
    %12 = vector.load %arg4[%c0_7, %c0_8] : memref<32x128xbf16, #tpu.memory_space<vmem>>, vector<32x128xbf16>
    tpu.vector_store %arg4[%c0_7, %c0_8], %11 {strides = array<i32>} : memref<32x128xbf16, #tpu.memory_space<vmem>>, vector<32x128xbf16>,
    return
  }
  func.func @transform_0(%arg0: i32) -> (i32, i32) {
    %c0_i32 = arith.constant 0 : i32
    %c0_i32_0 = arith.constant 0 : i32
    return %arg0, %c0_i32 : i32, i32
  }
  func.func @transform_1(%arg0: i32) -> (i32, i32) {
    %c0_i32 = arith.constant 0 : i32
    %c0_i32_0 = arith.constant 0 : i32
    %c0_i32_1 = arith.constant 0 : i32
    return %c0_i32, %c0_i32_0 : i32, i32
  }
  func.func @transform_2(%arg0: i32) -> (i32, i32) {
    %c0_i32 = arith.constant 0 : i32
    %c0_i32_0 = arith.constant 0 : i32
    %c0_i32_1 = arith.constant 0 : i32
    return %c0_i32, %c0_i32_0 : i32, i32
  }
  func.func @transform_3(%arg0: i32) -> (i32, i32) {
    %c0_i32 = arith.constant 0 : i32
    %c0_i32_0 = arith.constant 0 : i32
    return %arg0, %c0_i32 : i32, i32
  }
}

module attributes {stable_mosaic.version = 11 : i64} {
  func.func @_fused_matmul_kernel(%arg0: i32, %arg1: memref<32x144xbf16, #tpu.memory_space<vmem>>, %arg2: memref<144x128xbf16, #tpu.memory_space<vmem>>, %arg3: memref<1x128xf32, #tpu.memory_space<vmem>>, %arg4: memref<32x128xbf16, #tpu.memory_space<vmem>>) attributes {dimension_semantics = [#tpu.dimension_semantics<parallel>], iteration_bounds = array<i64: 1>, scalar_prefetch = 0 : i64, scratch_operands = 0 : i64, tpu.core_type = #tpu.core_type<tc>, window_params = [{transform_indices = @transform_0, window_bounds = array<i64: 32, 144>}, {pipeline_mode = #tpu.pipeline_mode<synchronous>, transform_indices = @transform_1, window_bounds = array<i64: 144, 128>}, {pipeline_mode = #tpu.pipeline_mode<synchronous>, transform_indices = @transform_2, window_bounds = array<i64: 1, 128>}, {transform_indices = @transform_3, window_bounds = array<i64: 32, 128>}]} {
    %c0 = arith.constant 0 : index
    %c0_0 = arith.constant 0 : index
    %0 = vector.load %arg1[%c0, %c0_0] : memref<32x144xbf16, #tpu.memory_space<vmem>>, vector<32x144xbf16>
    %c0_1 = arith.constant 0 : index
    %c0_2 = arith.constant 0 : index
    %1 = vector.load %arg2[%c0_1, %c0_2] : memref<144x128xbf16, #tpu.memory_space<vmem>>, vector<144x128xbf16>
    %cst = arith.constant dense<0.000000e+00> : vector<32x128xf32>
    %2 = tpu.matmul %0, %1, %cst {dimension_numbers = #tpu.dot_dimension_numbers<[1], [0], [0], [1], [0, 0, 1, 1], [], []>} : vector<32x144xbf16>, vector<144x128xbf16>, vector<32x128xf32> -> vector<32x128xf32>
    %c0_3 = arith.constant 0 : index
    %c0_4 = arith.constant 0 : index
    %3 = vector.load %arg3[%c0_3, %c0_4] : memref<1x128xf32, #tpu.memory_space<vmem>>, vector<1x128xf32>
    %4 = vector.broadcast %3 : vector<1x128xf32> to vector<32x128xf32>
    %5 = arith.addf %2, %4 : vector<32x128xf32>
    %cst_5 = arith.constant 0.000000e+00 : f32
    %6 = vector.broadcast %cst_5 : f32 to vector<32x128xf32>
    %7 = arith.cmpf oge, %5, %6 : vector<32x128xf32>
    %cst_6 = arith.constant 1.000000e-01 : f32
    %8 = vector.broadcast %cst_6 : f32 to vector<32x128xf32>
    %9 = arith.mulf %8, %5 : vector<32x128xf32>
    %10 = arith.select %7, %5, %9 : vector<32x128xi1>, vector<32x128xf32>
    %11 = arith.truncf %10 : vector<32x128xf32> to vector<32x128xbf16>
    %c0_7 = arith.constant 0 : index
    %c0_8 = arith.constant 0 : index
    %12 = vector.load %arg4[%c0_7, %c0_8] : memref<32x128xbf16, #tpu.memory_space<vmem>>, vector<32x128xbf16>
    tpu.vector_store %arg4[%c0_7, %c0_8], %11 {strides = array<i32>} : memref<32x128xbf16, #tpu.memory_space<vmem>>, vector<32x128xbf16>,
    return
  }
  func.func @transform_0(%arg0: i32) -> (i32, i32) {
    %c0_i32 = arith.constant 0 : i32
    %c0_i32_0 = arith.constant 0 : i32
    return %arg0, %c0_i32 : i32, i32
  }
  func.func @transform_1(%arg0: i32) -> (i32, i32) {
    %c0_i32 = arith.constant 0 : i32
    %c0_i32_0 = arith.constant 0 : i32
    %c0_i32_1 = arith.constant 0 : i32
    return %c0_i32, %c0_i32_0 : i32, i32
  }
  func.func @transform_2(%arg0: i32) -> (i32, i32) {
    %c0_i32 = arith.constant 0 : i32
    %c0_i32_0 = arith.constant 0 : i32
    %c0_i32_1 = arith.constant 0 : i32
    return %c0_i32, %c0_i32_0 : i32, i32
  }
  func.func @transform_3(%arg0: i32) -> (i32, i32) {
    %c0_i32 = arith.constant 0 : i32
    %c0_i32_0 = arith.constant 0 : i32
    return %arg0, %c0_i32 : i32, i32
  }
}

module attributes {stable_mosaic.version = 11 : i64} {
  func.func @_fused_matmul_kernel(%arg0: i32, %arg1: memref<32x144xbf16, #tpu.memory_space<vmem>>, %arg2: memref<144x128xbf16, #tpu.memory_space<vmem>>, %arg3: memref<1x128xf32, #tpu.memory_space<vmem>>, %arg4: memref<32x128xbf16, #tpu.memory_space<vmem>>, %arg5: memref<32x128xbf16, #tpu.memory_space<vmem>>) attributes {dimension_semantics = [#tpu.dimension_semantics<parallel>], iteration_bounds = array<i64: 1>, scalar_prefetch = 0 : i64, scratch_operands = 0 : i64, tpu.core_type = #tpu.core_type<tc>, window_params = [{transform_indices = @transform_0, window_bounds = array<i64: 32, 144>}, {pipeline_mode = #tpu.pipeline_mode<synchronous>, transform_indices = @transform_1, window_bounds = array<i64: 144, 128>}, {pipeline_mode = #tpu.pipeline_mode<synchronous>, transform_indices = @transform_2, window_bounds = array<i64: 1, 128>}, {transform_indices = @transform_3, window_bounds = array<i64: 32, 128>}, {transform_indices = @transform_4, window_bounds = array<i64: 32, 128>}]} {
    %c0 = arith.constant 0 : index
    %c0_0 = arith.constant 0 : index
    %0 = vector.load %arg1[%c0, %c0_0] : memref<32x144xbf16, #tpu.memory_space<vmem>>, vector<32x144xbf16>
    %c0_1 = arith.constant 0 : index
    %c0_2 = arith.constant 0 : index
    %1 = vector.load %arg2[%c0_1, %c0_2] : memref<144x128xbf16, #tpu.memory_space<vmem>>, vector<144x128xbf16>
    %cst = arith.constant dense<0.000000e+00> : vector<32x128xf32>
    %2 = tpu.matmul %0, %1, %cst {dimension_numbers = #tpu.dot_dimension_numbers<[1], [0], [0], [1], [0, 0, 1, 1], [], []>} : vector<32x144xbf16>, vector<144x128xbf16>, vector<32x128xf32> -> vector<32x128xf32>
    %c0_3 = arith.constant 0 : index
    %c0_4 = arith.constant 0 : index
    %3 = vector.load %arg3[%c0_3, %c0_4] : memref<1x128xf32, #tpu.memory_space<vmem>>, vector<1x128xf32>
    %4 = vector.broadcast %3 : vector<1x128xf32> to vector<32x128xf32>
    %5 = arith.addf %2, %4 : vector<32x128xf32>
    %cst_5 = arith.constant 0.000000e+00 : f32
    %6 = vector.broadcast %cst_5 : f32 to vector<32x128xf32>
    %7 = arith.cmpf oge, %5, %6 : vector<32x128xf32>
    %cst_6 = arith.constant 1.000000e-01 : f32
    %8 = vector.broadcast %cst_6 : f32 to vector<32x128xf32>
    %9 = arith.mulf %8, %5 : vector<32x128xf32>
    %10 = arith.select %7, %5, %9 : vector<32x128xi1>, vector<32x128xf32>
    %c0_7 = arith.constant 0 : index
    %c0_8 = arith.constant 0 : index
    %11 = vector.load %arg4[%c0_7, %c0_8] : memref<32x128xbf16, #tpu.memory_space<vmem>>, vector<32x128xbf16>
    %12 = arith.extf %11 : vector<32x128xbf16> to vector<32x128xf32>
    %13 = arith.addf %10, %12 : vector<32x128xf32>
    %14 = arith.truncf %13 : vector<32x128xf32> to vector<32x128xbf16>
    %c0_9 = arith.constant 0 : index
    %c0_10 = arith.constant 0 : index
    %15 = vector.load %arg5[%c0_9, %c0_10] : memref<32x128xbf16, #tpu.memory_space<vmem>>, vector<32x128xbf16>
    tpu.vector_store %arg5[%c0_9, %c0_10], %14 {strides = array<i32>} : memref<32x128xbf16, #tpu.memory_space<vmem>>, vector<32x128xbf16>,
    return
  }
  func.func @transform_0(%arg0: i32) -> (i32, i32) {
    %c0_i32 = arith.constant 0 : i32
    %c0_i32_0 = arith.constant 0 : i32
    return %arg0, %c0_i32 : i32, i32
  }
  func.func @transform_1(%arg0: i32) -> (i32, i32) {
    %c0_i32 = arith.constant 0 : i32
    %c0_i32_0 = arith.constant 0 : i32
    %c0_i32_1 = arith.constant 0 : i32
    return %c0_i32, %c0_i32_0 : i32, i32
  }
  func.func @transform_2(%arg0: i32) -> (i32, i32) {
    %c0_i32 = arith.constant 0 : i32
    %c0_i32_0 = arith.constant 0 : i32
    %c0_i32_1 = arith.constant 0 : i32
    return %c0_i32, %c0_i32_0 : i32, i32
  }
  func.func @transform_3(%arg0: i32) -> (i32, i32) {
    %c0_i32 = arith.constant 0 : i32
    %c0_i32_0 = arith.constant 0 : i32
    return %arg0, %c0_i32 : i32, i32
  }
  func.func @transform_4(%arg0: i32) -> (i32, i32) {
    %c0_i32 = arith.constant 0 : i32
    %c0_i32_0 = arith.constant 0 : i32
    return %arg0, %c0_i32 : i32, i32
  }
}

module attributes {stable_mosaic.version = 11 : i64} {
  func.func @_fused_matmul_kernel(%arg0: i32, %arg1: memref<8x288xbf16, #tpu.memory_space<vmem>>, %arg2: memref<288x128xbf16, #tpu.memory_space<vmem>>, %arg3: memref<1x128xf32, #tpu.memory_space<vmem>>, %arg4: memref<8x128xbf16, #tpu.memory_space<vmem>>) attributes {dimension_semantics = [#tpu.dimension_semantics<parallel>], iteration_bounds = array<i64: 1>, scalar_prefetch = 0 : i64, scratch_operands = 0 : i64, tpu.core_type = #tpu.core_type<tc>, window_params = [{transform_indices = @transform_0, window_bounds = array<i64: 8, 288>}, {pipeline_mode = #tpu.pipeline_mode<synchronous>, transform_indices = @transform_1, window_bounds = array<i64: 288, 128>}, {pipeline_mode = #tpu.pipeline_mode<synchronous>, transform_indices = @transform_2, window_bounds = array<i64: 1, 128>}, {transform_indices = @transform_3, window_bounds = array<i64: 8, 128>}]} {
    %c0 = arith.constant 0 : index
    %c0_0 = arith.constant 0 : index
    %0 = vector.load %arg1[%c0, %c0_0] : memref<8x288xbf16, #tpu.memory_space<vmem>>, vector<8x288xbf16>
    %c0_1 = arith.constant 0 : index
    %c0_2 = arith.constant 0 : index
    %1 = vector.load %arg2[%c0_1, %c0_2] : memref<288x128xbf16, #tpu.memory_space<vmem>>, vector<288x128xbf16>
    %cst = arith.constant dense<0.000000e+00> : vector<8x128xf32>
    %2 = tpu.matmul %0, %1, %cst {dimension_numbers = #tpu.dot_dimension_numbers<[1], [0], [0], [1], [0, 0, 1, 1], [], []>} : vector<8x288xbf16>, vector<288x128xbf16>, vector<8x128xf32> -> vector<8x128xf32>
    %c0_3 = arith.constant 0 : index
    %c0_4 = arith.constant 0 : index
    %3 = vector.load %arg3[%c0_3, %c0_4] : memref<1x128xf32, #tpu.memory_space<vmem>>, vector<1x128xf32>
    %4 = vector.broadcast %3 : vector<1x128xf32> to vector<8x128xf32>
    %5 = arith.addf %2, %4 : vector<8x128xf32>
    %cst_5 = arith.constant 0.000000e+00 : f32
    %6 = vector.broadcast %cst_5 : f32 to vector<8x128xf32>
    %7 = arith.cmpf oge, %5, %6 : vector<8x128xf32>
    %cst_6 = arith.constant 1.000000e-01 : f32
    %8 = vector.broadcast %cst_6 : f32 to vector<8x128xf32>
    %9 = arith.mulf %8, %5 : vector<8x128xf32>
    %10 = arith.select %7, %5, %9 : vector<8x128xi1>, vector<8x128xf32>
    %11 = arith.truncf %10 : vector<8x128xf32> to vector<8x128xbf16>
    %c0_7 = arith.constant 0 : index
    %c0_8 = arith.constant 0 : index
    %12 = vector.load %arg4[%c0_7, %c0_8] : memref<8x128xbf16, #tpu.memory_space<vmem>>, vector<8x128xbf16>
    tpu.vector_store %arg4[%c0_7, %c0_8], %11 {strides = array<i32>} : memref<8x128xbf16, #tpu.memory_space<vmem>>, vector<8x128xbf16>,
    return
  }
  func.func @transform_0(%arg0: i32) -> (i32, i32) {
    %c0_i32 = arith.constant 0 : i32
    %c0_i32_0 = arith.constant 0 : i32
    return %arg0, %c0_i32 : i32, i32
  }
  func.func @transform_1(%arg0: i32) -> (i32, i32) {
    %c0_i32 = arith.constant 0 : i32
    %c0_i32_0 = arith.constant 0 : i32
    %c0_i32_1 = arith.constant 0 : i32
    return %c0_i32, %c0_i32_0 : i32, i32
  }
  func.func @transform_2(%arg0: i32) -> (i32, i32) {
    %c0_i32 = arith.constant 0 : i32
    %c0_i32_0 = arith.constant 0 : i32
    %c0_i32_1 = arith.constant 0 : i32
    return %c0_i32, %c0_i32_0 : i32, i32
  }
  func.func @transform_3(%arg0: i32) -> (i32, i32) {
    %c0_i32 = arith.constant 0 : i32
    %c0_i32_0 = arith.constant 0 : i32
    return %arg0, %c0_i32 : i32, i32
  }
}

module attributes {stable_mosaic.version = 11 : i64} {
  func.func @_fused_matmul_kernel(%arg0: i32, %arg1: memref<8x64xbf16, #tpu.memory_space<vmem>>, %arg2: memref<64x128xbf16, #tpu.memory_space<vmem>>, %arg3: memref<1x128xf32, #tpu.memory_space<vmem>>, %arg4: memref<8x128xbf16, #tpu.memory_space<vmem>>) attributes {dimension_semantics = [#tpu.dimension_semantics<parallel>], iteration_bounds = array<i64: 1>, scalar_prefetch = 0 : i64, scratch_operands = 0 : i64, tpu.core_type = #tpu.core_type<tc>, window_params = [{transform_indices = @transform_0, window_bounds = array<i64: 8, 64>}, {pipeline_mode = #tpu.pipeline_mode<synchronous>, transform_indices = @transform_1, window_bounds = array<i64: 64, 128>}, {pipeline_mode = #tpu.pipeline_mode<synchronous>, transform_indices = @transform_2, window_bounds = array<i64: 1, 128>}, {transform_indices = @transform_3, window_bounds = array<i64: 8, 128>}]} {
    %c0 = arith.constant 0 : index
    %c0_0 = arith.constant 0 : index
    %0 = vector.load %arg1[%c0, %c0_0] : memref<8x64xbf16, #tpu.memory_space<vmem>>, vector<8x64xbf16>
    %c0_1 = arith.constant 0 : index
    %c0_2 = arith.constant 0 : index
    %1 = vector.load %arg2[%c0_1, %c0_2] : memref<64x128xbf16, #tpu.memory_space<vmem>>, vector<64x128xbf16>
    %cst = arith.constant dense<0.000000e+00> : vector<8x128xf32>
    %2 = tpu.matmul %0, %1, %cst {dimension_numbers = #tpu.dot_dimension_numbers<[1], [0], [0], [1], [0, 0, 1, 1], [], []>} : vector<8x64xbf16>, vector<64x128xbf16>, vector<8x128xf32> -> vector<8x128xf32>
    %c0_3 = arith.constant 0 : index
    %c0_4 = arith.constant 0 : index
    %3 = vector.load %arg3[%c0_3, %c0_4] : memref<1x128xf32, #tpu.memory_space<vmem>>, vector<1x128xf32>
    %4 = vector.broadcast %3 : vector<1x128xf32> to vector<8x128xf32>
    %5 = arith.addf %2, %4 : vector<8x128xf32>
    %cst_5 = arith.constant 0.000000e+00 : f32
    %6 = vector.broadcast %cst_5 : f32 to vector<8x128xf32>
    %7 = arith.cmpf oge, %5, %6 : vector<8x128xf32>
    %cst_6 = arith.constant 1.000000e-01 : f32
    %8 = vector.broadcast %cst_6 : f32 to vector<8x128xf32>
    %9 = arith.mulf %8, %5 : vector<8x128xf32>
    %10 = arith.select %7, %5, %9 : vector<8x128xi1>, vector<8x128xf32>
    %11 = arith.truncf %10 : vector<8x128xf32> to vector<8x128xbf16>
    %c0_7 = arith.constant 0 : index
    %c0_8 = arith.constant 0 : index
    %12 = vector.load %arg4[%c0_7, %c0_8] : memref<8x128xbf16, #tpu.memory_space<vmem>>, vector<8x128xbf16>
    tpu.vector_store %arg4[%c0_7, %c0_8], %11 {strides = array<i32>} : memref<8x128xbf16, #tpu.memory_space<vmem>>, vector<8x128xbf16>,
    return
  }
  func.func @transform_0(%arg0: i32) -> (i32, i32) {
    %c0_i32 = arith.constant 0 : i32
    %c0_i32_0 = arith.constant 0 : i32
    return %arg0, %c0_i32 : i32, i32
  }
  func.func @transform_1(%arg0: i32) -> (i32, i32) {
    %c0_i32 = arith.constant 0 : i32
    %c0_i32_0 = arith.constant 0 : i32
    %c0_i32_1 = arith.constant 0 : i32
    return %c0_i32, %c0_i32_0 : i32, i32
  }
  func.func @transform_2(%arg0: i32) -> (i32, i32) {
    %c0_i32 = arith.constant 0 : i32
    %c0_i32_0 = arith.constant 0 : i32
    %c0_i32_1 = arith.constant 0 : i32
    return %c0_i32, %c0_i32_0 : i32, i32
  }
  func.func @transform_3(%arg0: i32) -> (i32, i32) {
    %c0_i32 = arith.constant 0 : i32
    %c0_i32_0 = arith.constant 0 : i32
    return %arg0, %c0_i32 : i32, i32
  }
}

module attributes {stable_mosaic.version = 11 : i64} {
  func.func @_fused_matmul_kernel(%arg0: i32, %arg1: memref<8x288xbf16, #tpu.memory_space<vmem>>, %arg2: memref<288x128xbf16, #tpu.memory_space<vmem>>, %arg3: memref<1x128xf32, #tpu.memory_space<vmem>>, %arg4: memref<8x128xbf16, #tpu.memory_space<vmem>>, %arg5: memref<8x128xbf16, #tpu.memory_space<vmem>>) attributes {dimension_semantics = [#tpu.dimension_semantics<parallel>], iteration_bounds = array<i64: 1>, scalar_prefetch = 0 : i64, scratch_operands = 0 : i64, tpu.core_type = #tpu.core_type<tc>, window_params = [{transform_indices = @transform_0, window_bounds = array<i64: 8, 288>}, {pipeline_mode = #tpu.pipeline_mode<synchronous>, transform_indices = @transform_1, window_bounds = array<i64: 288, 128>}, {pipeline_mode = #tpu.pipeline_mode<synchronous>, transform_indices = @transform_2, window_bounds = array<i64: 1, 128>}, {transform_indices = @transform_3, window_bounds = array<i64: 8, 128>}, {transform_indices = @transform_4, window_bounds = array<i64: 8, 128>}]} {
    %c0 = arith.constant 0 : index
    %c0_0 = arith.constant 0 : index
    %0 = vector.load %arg1[%c0, %c0_0] : memref<8x288xbf16, #tpu.memory_space<vmem>>, vector<8x288xbf16>
    %c0_1 = arith.constant 0 : index
    %c0_2 = arith.constant 0 : index
    %1 = vector.load %arg2[%c0_1, %c0_2] : memref<288x128xbf16, #tpu.memory_space<vmem>>, vector<288x128xbf16>
    %cst = arith.constant dense<0.000000e+00> : vector<8x128xf32>
    %2 = tpu.matmul %0, %1, %cst {dimension_numbers = #tpu.dot_dimension_numbers<[1], [0], [0], [1], [0, 0, 1, 1], [], []>} : vector<8x288xbf16>, vector<288x128xbf16>, vector<8x128xf32> -> vector<8x128xf32>
    %c0_3 = arith.constant 0 : index
    %c0_4 = arith.constant 0 : index
    %3 = vector.load %arg3[%c0_3, %c0_4] : memref<1x128xf32, #tpu.memory_space<vmem>>, vector<1x128xf32>
    %4 = vector.broadcast %3 : vector<1x128xf32> to vector<8x128xf32>
    %5 = arith.addf %2, %4 : vector<8x128xf32>
    %cst_5 = arith.constant 0.000000e+00 : f32
    %6 = vector.broadcast %cst_5 : f32 to vector<8x128xf32>
    %7 = arith.cmpf oge, %5, %6 : vector<8x128xf32>
    %cst_6 = arith.constant 1.000000e-01 : f32
    %8 = vector.broadcast %cst_6 : f32 to vector<8x128xf32>
    %9 = arith.mulf %8, %5 : vector<8x128xf32>
    %10 = arith.select %7, %5, %9 : vector<8x128xi1>, vector<8x128xf32>
    %c0_7 = arith.constant 0 : index
    %c0_8 = arith.constant 0 : index
    %11 = vector.load %arg4[%c0_7, %c0_8] : memref<8x128xbf16, #tpu.memory_space<vmem>>, vector<8x128xbf16>
    %12 = arith.extf %11 : vector<8x128xbf16> to vector<8x128xf32>
    %13 = arith.addf %10, %12 : vector<8x128xf32>
    %14 = arith.truncf %13 : vector<8x128xf32> to vector<8x128xbf16>
    %c0_9 = arith.constant 0 : index
    %c0_10 = arith.constant 0 : index
    %15 = vector.load %arg5[%c0_9, %c0_10] : memref<8x128xbf16, #tpu.memory_space<vmem>>, vector<8x128xbf16>
    tpu.vector_store %arg5[%c0_9, %c0_10], %14 {strides = array<i32>} : memref<8x128xbf16, #tpu.memory_space<vmem>>, vector<8x128xbf16>,
    return
  }
  func.func @transform_0(%arg0: i32) -> (i32, i32) {
    %c0_i32 = arith.constant 0 : i32
    %c0_i32_0 = arith.constant 0 : i32
    return %arg0, %c0_i32 : i32, i32
  }
  func.func @transform_1(%arg0: i32) -> (i32, i32) {
    %c0_i32 = arith.constant 0 : i32
    %c0_i32_0 = arith.constant 0 : i32
    %c0_i32_1 = arith.constant 0 : i32
    return %c0_i32, %c0_i32_0 : i32, i32
  }
  func.func @transform_2(%arg0: i32) -> (i32, i32) {
    %c0_i32 = arith.constant 0 : i32
    %c0_i32_0 = arith.constant 0 : i32
    %c0_i32_1 = arith.constant 0 : i32
    return %c0_i32, %c0_i32_0 : i32, i32
  }
  func.func @transform_3(%arg0: i32) -> (i32, i32) {
    %c0_i32 = arith.constant 0 : i32
    %c0_i32_0 = arith.constant 0 : i32
    return %arg0, %c0_i32 : i32, i32
  }
  func.func @transform_4(%arg0: i32) -> (i32, i32) {
    %c0_i32 = arith.constant 0 : i32
    %c0_i32_0 = arith.constant 0 : i32
    return %arg0, %c0_i32 : i32, i32
  }
}

module attributes {stable_mosaic.version = 11 : i64} {
  func.func @_fused_matmul_kernel(%arg0: i32, %arg1: memref<2x576xbf16, #tpu.memory_space<vmem>>, %arg2: memref<576x128xbf16, #tpu.memory_space<vmem>>, %arg3: memref<1x128xf32, #tpu.memory_space<vmem>>, %arg4: memref<2x128xbf16, #tpu.memory_space<vmem>>) attributes {dimension_semantics = [#tpu.dimension_semantics<parallel>], iteration_bounds = array<i64: 1>, scalar_prefetch = 0 : i64, scratch_operands = 0 : i64, tpu.core_type = #tpu.core_type<tc>, window_params = [{transform_indices = @transform_0, window_bounds = array<i64: 2, 576>}, {pipeline_mode = #tpu.pipeline_mode<synchronous>, transform_indices = @transform_1, window_bounds = array<i64: 576, 128>}, {pipeline_mode = #tpu.pipeline_mode<synchronous>, transform_indices = @transform_2, window_bounds = array<i64: 1, 128>}, {transform_indices = @transform_3, window_bounds = array<i64: 2, 128>}]} {
    %c0 = arith.constant 0 : index
    %c0_0 = arith.constant 0 : index
    %0 = vector.load %arg1[%c0, %c0_0] : memref<2x576xbf16, #tpu.memory_space<vmem>>, vector<2x576xbf16>
    %c0_1 = arith.constant 0 : index
    %c0_2 = arith.constant 0 : index
    %1 = vector.load %arg2[%c0_1, %c0_2] : memref<576x128xbf16, #tpu.memory_space<vmem>>, vector<576x128xbf16>
    %cst = arith.constant dense<0.000000e+00> : vector<2x128xf32>
    %2 = tpu.matmul %0, %1, %cst {dimension_numbers = #tpu.dot_dimension_numbers<[1], [0], [0], [1], [0, 0, 1, 1], [], []>} : vector<2x576xbf16>, vector<576x128xbf16>, vector<2x128xf32> -> vector<2x128xf32>
    %c0_3 = arith.constant 0 : index
    %c0_4 = arith.constant 0 : index
    %3 = vector.load %arg3[%c0_3, %c0_4] : memref<1x128xf32, #tpu.memory_space<vmem>>, vector<1x128xf32>
    %4 = vector.broadcast %3 : vector<1x128xf32> to vector<2x128xf32>
    %5 = arith.addf %2, %4 : vector<2x128xf32>
    %cst_5 = arith.constant 0.000000e+00 : f32
    %6 = vector.broadcast %cst_5 : f32 to vector<2x128xf32>
    %7 = arith.cmpf oge, %5, %6 : vector<2x128xf32>
    %cst_6 = arith.constant 1.000000e-01 : f32
    %8 = vector.broadcast %cst_6 : f32 to vector<2x128xf32>
    %9 = arith.mulf %8, %5 : vector<2x128xf32>
    %10 = arith.select %7, %5, %9 : vector<2x128xi1>, vector<2x128xf32>
    %11 = arith.truncf %10 : vector<2x128xf32> to vector<2x128xbf16>
    %c0_7 = arith.constant 0 : index
    %c0_8 = arith.constant 0 : index
    %12 = vector.load %arg4[%c0_7, %c0_8] : memref<2x128xbf16, #tpu.memory_space<vmem>>, vector<2x128xbf16>
    tpu.vector_store %arg4[%c0_7, %c0_8], %11 {strides = array<i32>} : memref<2x128xbf16, #tpu.memory_space<vmem>>, vector<2x128xbf16>,
    return
  }
  func.func @transform_0(%arg0: i32) -> (i32, i32) {
    %c0_i32 = arith.constant 0 : i32
    %c0_i32_0 = arith.constant 0 : i32
    return %arg0, %c0_i32 : i32, i32
  }
  func.func @transform_1(%arg0: i32) -> (i32, i32) {
    %c0_i32 = arith.constant 0 : i32
    %c0_i32_0 = arith.constant 0 : i32
    %c0_i32_1 = arith.constant 0 : i32
    return %c0_i32, %c0_i32_0 : i32, i32
  }
  func.func @transform_2(%arg0: i32) -> (i32, i32) {
    %c0_i32 = arith.constant 0 : i32
    %c0_i32_0 = arith.constant 0 : i32
    %c0_i32_1 = arith.constant 0 : i32
    return %c0_i32, %c0_i32_0 : i32, i32
  }
  func.func @transform_3(%arg0: i32) -> (i32, i32) {
    %c0_i32 = arith.constant 0 : i32
    %c0_i32_0 = arith.constant 0 : i32
    return %arg0, %c0_i32 : i32, i32
  }
}

module attributes {stable_mosaic.version = 11 : i64} {
  func.func @_fused_matmul_kernel(%arg0: i32, %arg1: memref<2x128xbf16, #tpu.memory_space<vmem>>, %arg2: memref<128x128xbf16, #tpu.memory_space<vmem>>, %arg3: memref<1x128xf32, #tpu.memory_space<vmem>>, %arg4: memref<2x128xbf16, #tpu.memory_space<vmem>>) attributes {dimension_semantics = [#tpu.dimension_semantics<parallel>], iteration_bounds = array<i64: 1>, scalar_prefetch = 0 : i64, scratch_operands = 0 : i64, tpu.core_type = #tpu.core_type<tc>, window_params = [{transform_indices = @transform_0, window_bounds = array<i64: 2, 128>}, {pipeline_mode = #tpu.pipeline_mode<synchronous>, transform_indices = @transform_1, window_bounds = array<i64: 128, 128>}, {pipeline_mode = #tpu.pipeline_mode<synchronous>, transform_indices = @transform_2, window_bounds = array<i64: 1, 128>}, {transform_indices = @transform_3, window_bounds = array<i64: 2, 128>}]} {
    %c0 = arith.constant 0 : index
    %c0_0 = arith.constant 0 : index
    %0 = vector.load %arg1[%c0, %c0_0] : memref<2x128xbf16, #tpu.memory_space<vmem>>, vector<2x128xbf16>
    %c0_1 = arith.constant 0 : index
    %c0_2 = arith.constant 0 : index
    %1 = vector.load %arg2[%c0_1, %c0_2] : memref<128x128xbf16, #tpu.memory_space<vmem>>, vector<128x128xbf16>
    %cst = arith.constant dense<0.000000e+00> : vector<2x128xf32>
    %2 = tpu.matmul %0, %1, %cst {dimension_numbers = #tpu.dot_dimension_numbers<[1], [0], [0], [1], [0, 0, 1, 1], [], []>} : vector<2x128xbf16>, vector<128x128xbf16>, vector<2x128xf32> -> vector<2x128xf32>
    %c0_3 = arith.constant 0 : index
    %c0_4 = arith.constant 0 : index
    %3 = vector.load %arg3[%c0_3, %c0_4] : memref<1x128xf32, #tpu.memory_space<vmem>>, vector<1x128xf32>
    %4 = vector.broadcast %3 : vector<1x128xf32> to vector<2x128xf32>
    %5 = arith.addf %2, %4 : vector<2x128xf32>
    %cst_5 = arith.constant 0.000000e+00 : f32
    %6 = vector.broadcast %cst_5 : f32 to vector<2x128xf32>
    %7 = arith.cmpf oge, %5, %6 : vector<2x128xf32>
    %cst_6 = arith.constant 1.000000e-01 : f32
    %8 = vector.broadcast %cst_6 : f32 to vector<2x128xf32>
    %9 = arith.mulf %8, %5 : vector<2x128xf32>
    %10 = arith.select %7, %5, %9 : vector<2x128xi1>, vector<2x128xf32>
    %11 = arith.truncf %10 : vector<2x128xf32> to vector<2x128xbf16>
    %c0_7 = arith.constant 0 : index
    %c0_8 = arith.constant 0 : index
    %12 = vector.load %arg4[%c0_7, %c0_8] : memref<2x128xbf16, #tpu.memory_space<vmem>>, vector<2x128xbf16>
    tpu.vector_store %arg4[%c0_7, %c0_8], %11 {strides = array<i32>} : memref<2x128xbf16, #tpu.memory_space<vmem>>, vector<2x128xbf16>,
    return
  }
  func.func @transform_0(%arg0: i32) -> (i32, i32) {
    %c0_i32 = arith.constant 0 : i32
    %c0_i32_0 = arith.constant 0 : i32
    return %arg0, %c0_i32 : i32, i32
  }
  func.func @transform_1(%arg0: i32) -> (i32, i32) {
    %c0_i32 = arith.constant 0 : i32
    %c0_i32_0 = arith.constant 0 : i32
    %c0_i32_1 = arith.constant 0 : i32
    return %c0_i32, %c0_i32_0 : i32, i32
  }
  func.func @transform_2(%arg0: i32) -> (i32, i32) {
    %c0_i32 = arith.constant 0 : i32
    %c0_i32_0 = arith.constant 0 : i32
    %c0_i32_1 = arith.constant 0 : i32
    return %c0_i32, %c0_i32_0 : i32, i32
  }
  func.func @transform_3(%arg0: i32) -> (i32, i32) {
    %c0_i32 = arith.constant 0 : i32
    %c0_i32_0 = arith.constant 0 : i32
    return %arg0, %c0_i32 : i32, i32
  }
}

module attributes {stable_mosaic.version = 11 : i64} {
  func.func @_fused_matmul_kernel(%arg0: i32, %arg1: memref<2x64xbf16, #tpu.memory_space<vmem>>, %arg2: memref<64x128xbf16, #tpu.memory_space<vmem>>, %arg3: memref<1x128xf32, #tpu.memory_space<vmem>>, %arg4: memref<2x128xbf16, #tpu.memory_space<vmem>>) attributes {dimension_semantics = [#tpu.dimension_semantics<parallel>], iteration_bounds = array<i64: 1>, scalar_prefetch = 0 : i64, scratch_operands = 0 : i64, tpu.core_type = #tpu.core_type<tc>, window_params = [{transform_indices = @transform_0, window_bounds = array<i64: 2, 64>}, {pipeline_mode = #tpu.pipeline_mode<synchronous>, transform_indices = @transform_1, window_bounds = array<i64: 64, 128>}, {pipeline_mode = #tpu.pipeline_mode<synchronous>, transform_indices = @transform_2, window_bounds = array<i64: 1, 128>}, {transform_indices = @transform_3, window_bounds = array<i64: 2, 128>}]} {
    %c0 = arith.constant 0 : index
    %c0_0 = arith.constant 0 : index
    %0 = vector.load %arg1[%c0, %c0_0] : memref<2x64xbf16, #tpu.memory_space<vmem>>, vector<2x64xbf16>
    %c0_1 = arith.constant 0 : index
    %c0_2 = arith.constant 0 : index
    %1 = vector.load %arg2[%c0_1, %c0_2] : memref<64x128xbf16, #tpu.memory_space<vmem>>, vector<64x128xbf16>
    %cst = arith.constant dense<0.000000e+00> : vector<2x128xf32>
    %2 = tpu.matmul %0, %1, %cst {dimension_numbers = #tpu.dot_dimension_numbers<[1], [0], [0], [1], [0, 0, 1, 1], [], []>} : vector<2x64xbf16>, vector<64x128xbf16>, vector<2x128xf32> -> vector<2x128xf32>
    %c0_3 = arith.constant 0 : index
    %c0_4 = arith.constant 0 : index
    %3 = vector.load %arg3[%c0_3, %c0_4] : memref<1x128xf32, #tpu.memory_space<vmem>>, vector<1x128xf32>
    %4 = vector.broadcast %3 : vector<1x128xf32> to vector<2x128xf32>
    %5 = arith.addf %2, %4 : vector<2x128xf32>
    %cst_5 = arith.constant 0.000000e+00 : f32
    %6 = vector.broadcast %cst_5 : f32 to vector<2x128xf32>
    %7 = arith.cmpf oge, %5, %6 : vector<2x128xf32>
    %cst_6 = arith.constant 1.000000e-01 : f32
    %8 = vector.broadcast %cst_6 : f32 to vector<2x128xf32>
    %9 = arith.mulf %8, %5 : vector<2x128xf32>
    %10 = arith.select %7, %5, %9 : vector<2x128xi1>, vector<2x128xf32>
    %11 = arith.truncf %10 : vector<2x128xf32> to vector<2x128xbf16>
    %c0_7 = arith.constant 0 : index
    %c0_8 = arith.constant 0 : index
    %12 = vector.load %arg4[%c0_7, %c0_8] : memref<2x128xbf16, #tpu.memory_space<vmem>>, vector<2x128xbf16>
    tpu.vector_store %arg4[%c0_7, %c0_8], %11 {strides = array<i32>} : memref<2x128xbf16, #tpu.memory_space<vmem>>, vector<2x128xbf16>,
    return
  }
  func.func @transform_0(%arg0: i32) -> (i32, i32) {
    %c0_i32 = arith.constant 0 : i32
    %c0_i32_0 = arith.constant 0 : i32
    return %arg0, %c0_i32 : i32, i32
  }
  func.func @transform_1(%arg0: i32) -> (i32, i32) {
    %c0_i32 = arith.constant 0 : i32
    %c0_i32_0 = arith.constant 0 : i32
    %c0_i32_1 = arith.constant 0 : i32
    return %c0_i32, %c0_i32_0 : i32, i32
  }
  func.func @transform_2(%arg0: i32) -> (i32, i32) {
    %c0_i32 = arith.constant 0 : i32
    %c0_i32_0 = arith.constant 0 : i32
    %c0_i32_1 = arith.constant 0 : i32
    return %c0_i32, %c0_i32_0 : i32, i32
  }
  func.func @transform_3(%arg0: i32) -> (i32, i32) {
    %c0_i32 = arith.constant 0 : i32
    %c0_i32_0 = arith.constant 0 : i32
    return %arg0, %c0_i32 : i32, i32
  }
}

module attributes {stable_mosaic.version = 11 : i64} {
  func.func @_fused_matmul_kernel(%arg0: i32, %arg1: memref<2x576xbf16, #tpu.memory_space<vmem>>, %arg2: memref<576x128xbf16, #tpu.memory_space<vmem>>, %arg3: memref<1x128xf32, #tpu.memory_space<vmem>>, %arg4: memref<2x128xbf16, #tpu.memory_space<vmem>>, %arg5: memref<2x128xbf16, #tpu.memory_space<vmem>>) attributes {dimension_semantics = [#tpu.dimension_semantics<parallel>], iteration_bounds = array<i64: 1>, scalar_prefetch = 0 : i64, scratch_operands = 0 : i64, tpu.core_type = #tpu.core_type<tc>, window_params = [{transform_indices = @transform_0, window_bounds = array<i64: 2, 576>}, {pipeline_mode = #tpu.pipeline_mode<synchronous>, transform_indices = @transform_1, window_bounds = array<i64: 576, 128>}, {pipeline_mode = #tpu.pipeline_mode<synchronous>, transform_indices = @transform_2, window_bounds = array<i64: 1, 128>}, {transform_indices = @transform_3, window_bounds = array<i64: 2, 128>}, {transform_indices = @transform_4, window_bounds = array<i64: 2, 128>}]} {
    %c0 = arith.constant 0 : index
    %c0_0 = arith.constant 0 : index
    %0 = vector.load %arg1[%c0, %c0_0] : memref<2x576xbf16, #tpu.memory_space<vmem>>, vector<2x576xbf16>
    %c0_1 = arith.constant 0 : index
    %c0_2 = arith.constant 0 : index
    %1 = vector.load %arg2[%c0_1, %c0_2] : memref<576x128xbf16, #tpu.memory_space<vmem>>, vector<576x128xbf16>
    %cst = arith.constant dense<0.000000e+00> : vector<2x128xf32>
    %2 = tpu.matmul %0, %1, %cst {dimension_numbers = #tpu.dot_dimension_numbers<[1], [0], [0], [1], [0, 0, 1, 1], [], []>} : vector<2x576xbf16>, vector<576x128xbf16>, vector<2x128xf32> -> vector<2x128xf32>
    %c0_3 = arith.constant 0 : index
    %c0_4 = arith.constant 0 : index
    %3 = vector.load %arg3[%c0_3, %c0_4] : memref<1x128xf32, #tpu.memory_space<vmem>>, vector<1x128xf32>
    %4 = vector.broadcast %3 : vector<1x128xf32> to vector<2x128xf32>
    %5 = arith.addf %2, %4 : vector<2x128xf32>
    %cst_5 = arith.constant 0.000000e+00 : f32
    %6 = vector.broadcast %cst_5 : f32 to vector<2x128xf32>
    %7 = arith.cmpf oge, %5, %6 : vector<2x128xf32>
    %cst_6 = arith.constant 1.000000e-01 : f32
    %8 = vector.broadcast %cst_6 : f32 to vector<2x128xf32>
    %9 = arith.mulf %8, %5 : vector<2x128xf32>
    %10 = arith.select %7, %5, %9 : vector<2x128xi1>, vector<2x128xf32>
    %c0_7 = arith.constant 0 : index
    %c0_8 = arith.constant 0 : index
    %11 = vector.load %arg4[%c0_7, %c0_8] : memref<2x128xbf16, #tpu.memory_space<vmem>>, vector<2x128xbf16>
    %12 = arith.extf %11 : vector<2x128xbf16> to vector<2x128xf32>
    %13 = arith.addf %10, %12 : vector<2x128xf32>
    %14 = arith.truncf %13 : vector<2x128xf32> to vector<2x128xbf16>
    %c0_9 = arith.constant 0 : index
    %c0_10 = arith.constant 0 : index
    %15 = vector.load %arg5[%c0_9, %c0_10] : memref<2x128xbf16, #tpu.memory_space<vmem>>, vector<2x128xbf16>
    tpu.vector_store %arg5[%c0_9, %c0_10], %14 {strides = array<i32>} : memref<2x128xbf16, #tpu.memory_space<vmem>>, vector<2x128xbf16>,
    return
  }
  func.func @transform_0(%arg0: i32) -> (i32, i32) {
    %c0_i32 = arith.constant 0 : i32
    %c0_i32_0 = arith.constant 0 : i32
    return %arg0, %c0_i32 : i32, i32
  }
  func.func @transform_1(%arg0: i32) -> (i32, i32) {
    %c0_i32 = arith.constant 0 : i32
    %c0_i32_0 = arith.constant 0 : i32
    %c0_i32_1 = arith.constant 0 : i32
    return %c0_i32, %c0_i32_0 : i32, i32
  }
  func.func @transform_2(%arg0: i32) -> (i32, i32) {
    %c0_i32 = arith.constant 0 : i32
    %c0_i32_0 = arith.constant 0 : i32
    %c0_i32_1 = arith.constant 0 : i32
    return %c0_i32, %c0_i32_0 : i32, i32
  }
  func.func @transform_3(%arg0: i32) -> (i32, i32) {
    %c0_i32 = arith.constant 0 : i32
    %c0_i32_0 = arith.constant 0 : i32
    return %arg0, %c0_i32 : i32, i32
  }
  func.func @transform_4(%arg0: i32) -> (i32, i32) {
    %c0_i32 = arith.constant 0 : i32
    %c0_i32_0 = arith.constant 0 : i32
    return %arg0, %c0_i32 : i32, i32
  }
}

module attributes {stable_mosaic.version = 11 : i64} {
  func.func @_fused_matmul_kernel(%arg0: i32, %arg1: memref<8x32xbf16, #tpu.memory_space<vmem>>, %arg2: memref<8x64xbf16, #tpu.memory_space<vmem>>, %arg3: memref<32x128xbf16, #tpu.memory_space<vmem>>, %arg4: memref<64x128xbf16, #tpu.memory_space<vmem>>, %arg5: memref<1x128xf32, #tpu.memory_space<vmem>>, %arg6: memref<8x128xbf16, #tpu.memory_space<vmem>>) attributes {dimension_semantics = [#tpu.dimension_semantics<parallel>], iteration_bounds = array<i64: 1>, scalar_prefetch = 0 : i64, scratch_operands = 0 : i64, tpu.core_type = #tpu.core_type<tc>, window_params = [{transform_indices = @transform_0, window_bounds = array<i64: 8, 32>}, {transform_indices = @transform_1, window_bounds = array<i64: 8, 64>}, {pipeline_mode = #tpu.pipeline_mode<synchronous>, transform_indices = @transform_2, window_bounds = array<i64: 32, 128>}, {pipeline_mode = #tpu.pipeline_mode<synchronous>, transform_indices = @transform_3, window_bounds = array<i64: 64, 128>}, {pipeline_mode = #tpu.pipeline_mode<synchronous>, transform_indices = @transform_4, window_bounds = array<i64: 1, 128>}, {transform_indices = @transform_5, window_bounds = array<i64: 8, 128>}]} {
    %c0 = arith.constant 0 : index
    %c0_0 = arith.constant 0 : index
    %0 = vector.load %arg1[%c0, %c0_0] : memref<8x32xbf16, #tpu.memory_space<vmem>>, vector<8x32xbf16>
    %c0_1 = arith.constant 0 : index
    %c0_2 = arith.constant 0 : index
    %1 = vector.load %arg3[%c0_1, %c0_2] : memref<32x128xbf16, #tpu.memory_space<vmem>>, vector<32x128xbf16>
    %cst = arith.constant dense<0.000000e+00> : vector<8x128xf32>
    %2 = tpu.matmul %0, %1, %cst {dimension_numbers = #tpu.dot_dimension_numbers<[1], [0], [0], [1], [0, 0, 1, 1], [], []>} : vector<8x32xbf16>, vector<32x128xbf16>, vector<8x128xf32> -> vector<8x128xf32>
    %c0_3 = arith.constant 0 : index
    %c0_4 = arith.constant 0 : index
    %3 = vector.load %arg2[%c0_3, %c0_4] : memref<8x64xbf16, #tpu.memory_space<vmem>>, vector<8x64xbf16>
    %c0_5 = arith.constant 0 : index
    %c0_6 = arith.constant 0 : index
    %4 = vector.load %arg4[%c0_5, %c0_6] : memref<64x128xbf16, #tpu.memory_space<vmem>>, vector<64x128xbf16>
    %cst_7 = arith.constant dense<0.000000e+00> : vector<8x128xf32>
    %5 = tpu.matmul %3, %4, %cst_7 {dimension_numbers = #tpu.dot_dimension_numbers<[1], [0], [0], [1], [0, 0, 1, 1], [], []>} : vector<8x64xbf16>, vector<64x128xbf16>, vector<8x128xf32> -> vector<8x128xf32>
    %6 = arith.addf %2, %5 : vector<8x128xf32>
    %c0_8 = arith.constant 0 : index
    %c0_9 = arith.constant 0 : index
    %7 = vector.load %arg5[%c0_8, %c0_9] : memref<1x128xf32, #tpu.memory_space<vmem>>, vector<1x128xf32>
    %8 = vector.broadcast %7 : vector<1x128xf32> to vector<8x128xf32>
    %9 = arith.addf %6, %8 : vector<8x128xf32>
    %cst_10 = arith.constant 0.000000e+00 : f32
    %10 = vector.broadcast %cst_10 : f32 to vector<8x128xf32>
    %11 = arith.cmpf oge, %9, %10 : vector<8x128xf32>
    %cst_11 = arith.constant 1.000000e-01 : f32
    %12 = vector.broadcast %cst_11 : f32 to vector<8x128xf32>
    %13 = arith.mulf %12, %9 : vector<8x128xf32>
    %14 = arith.select %11, %9, %13 : vector<8x128xi1>, vector<8x128xf32>
    %15 = arith.truncf %14 : vector<8x128xf32> to vector<8x128xbf16>
    %c0_12 = arith.constant 0 : index
    %c0_13 = arith.constant 0 : index
    %16 = vector.load %arg6[%c0_12, %c0_13] : memref<8x128xbf16, #tpu.memory_space<vmem>>, vector<8x128xbf16>
    tpu.vector_store %arg6[%c0_12, %c0_13], %15 {strides = array<i32>} : memref<8x128xbf16, #tpu.memory_space<vmem>>, vector<8x128xbf16>,
    return
  }
  func.func @transform_0(%arg0: i32) -> (i32, i32) {
    %c0_i32 = arith.constant 0 : i32
    %c0_i32_0 = arith.constant 0 : i32
    return %arg0, %c0_i32 : i32, i32
  }
  func.func @transform_1(%arg0: i32) -> (i32, i32) {
    %c0_i32 = arith.constant 0 : i32
    %c0_i32_0 = arith.constant 0 : i32
    return %arg0, %c0_i32 : i32, i32
  }
  func.func @transform_2(%arg0: i32) -> (i32, i32) {
    %c0_i32 = arith.constant 0 : i32
    %c0_i32_0 = arith.constant 0 : i32
    %c0_i32_1 = arith.constant 0 : i32
    return %c0_i32, %c0_i32_0 : i32, i32
  }
  func.func @transform_3(%arg0: i32) -> (i32, i32) {
    %c0_i32 = arith.constant 0 : i32
    %c0_i32_0 = arith.constant 0 : i32
    %c0_i32_1 = arith.constant 0 : i32
    return %c0_i32, %c0_i32_0 : i32, i32
  }
  func.func @transform_4(%arg0: i32) -> (i32, i32) {
    %c0_i32 = arith.constant 0 : i32
    %c0_i32_0 = arith.constant 0 : i32
    %c0_i32_1 = arith.constant 0 : i32
    return %c0_i32, %c0_i32_0 : i32, i32
  }
  func.func @transform_5(%arg0: i32) -> (i32, i32) {
    %c0_i32 = arith.constant 0 : i32
    %c0_i32_0 = arith.constant 0 : i32
    return %arg0, %c0_i32 : i32, i32
  }
}

module attributes {stable_mosaic.version = 11 : i64} {
  func.func @_fused_matmul_kernel(%arg0: i32, %arg1: memref<8x32xbf16, #tpu.memory_space<vmem>>, %arg2: memref<32x128xbf16, #tpu.memory_space<vmem>>, %arg3: memref<1x128xf32, #tpu.memory_space<vmem>>, %arg4: memref<8x128xbf16, #tpu.memory_space<vmem>>) attributes {dimension_semantics = [#tpu.dimension_semantics<parallel>], iteration_bounds = array<i64: 1>, scalar_prefetch = 0 : i64, scratch_operands = 0 : i64, tpu.core_type = #tpu.core_type<tc>, window_params = [{transform_indices = @transform_0, window_bounds = array<i64: 8, 32>}, {pipeline_mode = #tpu.pipeline_mode<synchronous>, transform_indices = @transform_1, window_bounds = array<i64: 32, 128>}, {pipeline_mode = #tpu.pipeline_mode<synchronous>, transform_indices = @transform_2, window_bounds = array<i64: 1, 128>}, {transform_indices = @transform_3, window_bounds = array<i64: 8, 128>}]} {
    %c0 = arith.constant 0 : index
    %c0_0 = arith.constant 0 : index
    %0 = vector.load %arg1[%c0, %c0_0] : memref<8x32xbf16, #tpu.memory_space<vmem>>, vector<8x32xbf16>
    %c0_1 = arith.constant 0 : index
    %c0_2 = arith.constant 0 : index
    %1 = vector.load %arg2[%c0_1, %c0_2] : memref<32x128xbf16, #tpu.memory_space<vmem>>, vector<32x128xbf16>
    %cst = arith.constant dense<0.000000e+00> : vector<8x128xf32>
    %2 = tpu.matmul %0, %1, %cst {dimension_numbers = #tpu.dot_dimension_numbers<[1], [0], [0], [1], [0, 0, 1, 1], [], []>} : vector<8x32xbf16>, vector<32x128xbf16>, vector<8x128xf32> -> vector<8x128xf32>
    %c0_3 = arith.constant 0 : index
    %c0_4 = arith.constant 0 : index
    %3 = vector.load %arg3[%c0_3, %c0_4] : memref<1x128xf32, #tpu.memory_space<vmem>>, vector<1x128xf32>
    %4 = vector.broadcast %3 : vector<1x128xf32> to vector<8x128xf32>
    %5 = arith.addf %2, %4 : vector<8x128xf32>
    %cst_5 = arith.constant 0.000000e+00 : f32
    %6 = vector.broadcast %cst_5 : f32 to vector<8x128xf32>
    %7 = arith.cmpf oge, %5, %6 : vector<8x128xf32>
    %cst_6 = arith.constant 1.000000e-01 : f32
    %8 = vector.broadcast %cst_6 : f32 to vector<8x128xf32>
    %9 = arith.mulf %8, %5 : vector<8x128xf32>
    %10 = arith.select %7, %5, %9 : vector<8x128xi1>, vector<8x128xf32>
    %11 = arith.truncf %10 : vector<8x128xf32> to vector<8x128xbf16>
    %c0_7 = arith.constant 0 : index
    %c0_8 = arith.constant 0 : index
    %12 = vector.load %arg4[%c0_7, %c0_8] : memref<8x128xbf16, #tpu.memory_space<vmem>>, vector<8x128xbf16>
    tpu.vector_store %arg4[%c0_7, %c0_8], %11 {strides = array<i32>} : memref<8x128xbf16, #tpu.memory_space<vmem>>, vector<8x128xbf16>,
    return
  }
  func.func @transform_0(%arg0: i32) -> (i32, i32) {
    %c0_i32 = arith.constant 0 : i32
    %c0_i32_0 = arith.constant 0 : i32
    return %arg0, %c0_i32 : i32, i32
  }
  func.func @transform_1(%arg0: i32) -> (i32, i32) {
    %c0_i32 = arith.constant 0 : i32
    %c0_i32_0 = arith.constant 0 : i32
    %c0_i32_1 = arith.constant 0 : i32
    return %c0_i32, %c0_i32_0 : i32, i32
  }
  func.func @transform_2(%arg0: i32) -> (i32, i32) {
    %c0_i32 = arith.constant 0 : i32
    %c0_i32_0 = arith.constant 0 : i32
    %c0_i32_1 = arith.constant 0 : i32
    return %c0_i32, %c0_i32_0 : i32, i32
  }
  func.func @transform_3(%arg0: i32) -> (i32, i32) {
    %c0_i32 = arith.constant 0 : i32
    %c0_i32_0 = arith.constant 0 : i32
    return %arg0, %c0_i32 : i32, i32
  }
}

module attributes {stable_mosaic.version = 11 : i64} {
  func.func @_fused_matmul_kernel(%arg0: i32, %arg1: memref<32x16xbf16, #tpu.memory_space<vmem>>, %arg2: memref<32x32xbf16, #tpu.memory_space<vmem>>, %arg3: memref<16x128xbf16, #tpu.memory_space<vmem>>, %arg4: memref<32x128xbf16, #tpu.memory_space<vmem>>, %arg5: memref<1x128xf32, #tpu.memory_space<vmem>>, %arg6: memref<32x128xbf16, #tpu.memory_space<vmem>>) attributes {dimension_semantics = [#tpu.dimension_semantics<parallel>], iteration_bounds = array<i64: 1>, scalar_prefetch = 0 : i64, scratch_operands = 0 : i64, tpu.core_type = #tpu.core_type<tc>, window_params = [{transform_indices = @transform_0, window_bounds = array<i64: 32, 16>}, {transform_indices = @transform_1, window_bounds = array<i64: 32, 32>}, {pipeline_mode = #tpu.pipeline_mode<synchronous>, transform_indices = @transform_2, window_bounds = array<i64: 16, 128>}, {pipeline_mode = #tpu.pipeline_mode<synchronous>, transform_indices = @transform_3, window_bounds = array<i64: 32, 128>}, {pipeline_mode = #tpu.pipeline_mode<synchronous>, transform_indices = @transform_4, window_bounds = array<i64: 1, 128>}, {transform_indices = @transform_5, window_bounds = array<i64: 32, 128>}]} {
    %c0 = arith.constant 0 : index
    %c0_0 = arith.constant 0 : index
    %0 = vector.load %arg1[%c0, %c0_0] : memref<32x16xbf16, #tpu.memory_space<vmem>>, vector<32x16xbf16>
    %c0_1 = arith.constant 0 : index
    %c0_2 = arith.constant 0 : index
    %1 = vector.load %arg3[%c0_1, %c0_2] : memref<16x128xbf16, #tpu.memory_space<vmem>>, vector<16x128xbf16>
    %cst = arith.constant dense<0.000000e+00> : vector<32x128xf32>
    %2 = tpu.matmul %0, %1, %cst {dimension_numbers = #tpu.dot_dimension_numbers<[1], [0], [0], [1], [0, 0, 1, 1], [], []>} : vector<32x16xbf16>, vector<16x128xbf16>, vector<32x128xf32> -> vector<32x128xf32>
    %c0_3 = arith.constant 0 : index
    %c0_4 = arith.constant 0 : index
    %3 = vector.load %arg2[%c0_3, %c0_4] : memref<32x32xbf16, #tpu.memory_space<vmem>>, vector<32x32xbf16>
    %c0_5 = arith.constant 0 : index
    %c0_6 = arith.constant 0 : index
    %4 = vector.load %arg4[%c0_5, %c0_6] : memref<32x128xbf16, #tpu.memory_space<vmem>>, vector<32x128xbf16>
    %cst_7 = arith.constant dense<0.000000e+00> : vector<32x128xf32>
    %5 = tpu.matmul %3, %4, %cst_7 {dimension_numbers = #tpu.dot_dimension_numbers<[1], [0], [0], [1], [0, 0, 1, 1], [], []>} : vector<32x32xbf16>, vector<32x128xbf16>, vector<32x128xf32> -> vector<32x128xf32>
    %6 = arith.addf %2, %5 : vector<32x128xf32>
    %c0_8 = arith.constant 0 : index
    %c0_9 = arith.constant 0 : index
    %7 = vector.load %arg5[%c0_8, %c0_9] : memref<1x128xf32, #tpu.memory_space<vmem>>, vector<1x128xf32>
    %8 = vector.broadcast %7 : vector<1x128xf32> to vector<32x128xf32>
    %9 = arith.addf %6, %8 : vector<32x128xf32>
    %cst_10 = arith.constant 0.000000e+00 : f32
    %10 = vector.broadcast %cst_10 : f32 to vector<32x128xf32>
    %11 = arith.cmpf oge, %9, %10 : vector<32x128xf32>
    %cst_11 = arith.constant 1.000000e-01 : f32
    %12 = vector.broadcast %cst_11 : f32 to vector<32x128xf32>
    %13 = arith.mulf %12, %9 : vector<32x128xf32>
    %14 = arith.select %11, %9, %13 : vector<32x128xi1>, vector<32x128xf32>
    %15 = arith.truncf %14 : vector<32x128xf32> to vector<32x128xbf16>
    %c0_12 = arith.constant 0 : index
    %c0_13 = arith.constant 0 : index
    %16 = vector.load %arg6[%c0_12, %c0_13] : memref<32x128xbf16, #tpu.memory_space<vmem>>, vector<32x128xbf16>
    tpu.vector_store %arg6[%c0_12, %c0_13], %15 {strides = array<i32>} : memref<32x128xbf16, #tpu.memory_space<vmem>>, vector<32x128xbf16>,
    return
  }
  func.func @transform_0(%arg0: i32) -> (i32, i32) {
    %c0_i32 = arith.constant 0 : i32
    %c0_i32_0 = arith.constant 0 : i32
    return %arg0, %c0_i32 : i32, i32
  }
  func.func @transform_1(%arg0: i32) -> (i32, i32) {
    %c0_i32 = arith.constant 0 : i32
    %c0_i32_0 = arith.constant 0 : i32
    return %arg0, %c0_i32 : i32, i32
  }
  func.func @transform_2(%arg0: i32) -> (i32, i32) {
    %c0_i32 = arith.constant 0 : i32
    %c0_i32_0 = arith.constant 0 : i32
    %c0_i32_1 = arith.constant 0 : i32
    return %c0_i32, %c0_i32_0 : i32, i32
  }
  func.func @transform_3(%arg0: i32) -> (i32, i32) {
    %c0_i32 = arith.constant 0 : i32
    %c0_i32_0 = arith.constant 0 : i32
    %c0_i32_1 = arith.constant 0 : i32
    return %c0_i32, %c0_i32_0 : i32, i32
  }
  func.func @transform_4(%arg0: i32) -> (i32, i32) {
    %c0_i32 = arith.constant 0 : i32
    %c0_i32_0 = arith.constant 0 : i32
    %c0_i32_1 = arith.constant 0 : i32
    return %c0_i32, %c0_i32_0 : i32, i32
  }
  func.func @transform_5(%arg0: i32) -> (i32, i32) {
    %c0_i32 = arith.constant 0 : i32
    %c0_i32_0 = arith.constant 0 : i32
    return %arg0, %c0_i32 : i32, i32
  }
}

module attributes {stable_mosaic.version = 11 : i64} {
  func.func @_fused_matmul_kernel(%arg0: i32, %arg1: memref<8x64xbf16, #tpu.memory_space<vmem>>, %arg2: memref<64x128xbf16, #tpu.memory_space<vmem>>, %arg3: memref<1x128xf32, #tpu.memory_space<vmem>>, %arg4: memref<8x128xf32, #tpu.memory_space<vmem>>) attributes {dimension_semantics = [#tpu.dimension_semantics<parallel>], iteration_bounds = array<i64: 1>, scalar_prefetch = 0 : i64, scratch_operands = 0 : i64, tpu.core_type = #tpu.core_type<tc>, window_params = [{transform_indices = @transform_0, window_bounds = array<i64: 8, 64>}, {pipeline_mode = #tpu.pipeline_mode<synchronous>, transform_indices = @transform_1, window_bounds = array<i64: 64, 128>}, {pipeline_mode = #tpu.pipeline_mode<synchronous>, transform_indices = @transform_2, window_bounds = array<i64: 1, 128>}, {transform_indices = @transform_3, window_bounds = array<i64: 8, 128>}]} {
    %c0 = arith.constant 0 : index
    %c0_0 = arith.constant 0 : index
    %0 = vector.load %arg1[%c0, %c0_0] : memref<8x64xbf16, #tpu.memory_space<vmem>>, vector<8x64xbf16>
    %c0_1 = arith.constant 0 : index
    %c0_2 = arith.constant 0 : index
    %1 = vector.load %arg2[%c0_1, %c0_2] : memref<64x128xbf16, #tpu.memory_space<vmem>>, vector<64x128xbf16>
    %cst = arith.constant dense<0.000000e+00> : vector<8x128xf32>
    %2 = tpu.matmul %0, %1, %cst {dimension_numbers = #tpu.dot_dimension_numbers<[1], [0], [0], [1], [0, 0, 1, 1], [], []>} : vector<8x64xbf16>, vector<64x128xbf16>, vector<8x128xf32> -> vector<8x128xf32>
    %c0_3 = arith.constant 0 : index
    %c0_4 = arith.constant 0 : index
    %3 = vector.load %arg3[%c0_3, %c0_4] : memref<1x128xf32, #tpu.memory_space<vmem>>, vector<1x128xf32>
    %4 = vector.broadcast %3 : vector<1x128xf32> to vector<8x128xf32>
    %5 = arith.addf %2, %4 : vector<8x128xf32>
    %c0_5 = arith.constant 0 : index
    %c0_6 = arith.constant 0 : index
    %6 = vector.load %arg4[%c0_5, %c0_6] : memref<8x128xf32, #tpu.memory_space<vmem>>, vector<8x128xf32>
    tpu.vector_store %arg4[%c0_5, %c0_6], %5 {strides = array<i32>} : memref<8x128xf32, #tpu.memory_space<vmem>>, vector<8x128xf32>,
    return
  }
  func.func @transform_0(%arg0: i32) -> (i32, i32) {
    %c0_i32 = arith.constant 0 : i32
    %c0_i32_0 = arith.constant 0 : i32
    return %arg0, %c0_i32 : i32, i32
  }
  func.func @transform_1(%arg0: i32) -> (i32, i32) {
    %c0_i32 = arith.constant 0 : i32
    %c0_i32_0 = arith.constant 0 : i32
    %c0_i32_1 = arith.constant 0 : i32
    return %c0_i32, %c0_i32_0 : i32, i32
  }
  func.func @transform_2(%arg0: i32) -> (i32, i32) {
    %c0_i32 = arith.constant 0 : i32
    %c0_i32_0 = arith.constant 0 : i32
    %c0_i32_1 = arith.constant 0 : i32
    return %c0_i32, %c0_i32_0 : i32, i32
  }
  func.func @transform_3(%arg0: i32) -> (i32, i32) {
    %c0_i32 = arith.constant 0 : i32
    %c0_i32_0 = arith.constant 0 : i32
    return %arg0, %c0_i32 : i32, i32
  }
}

module attributes {stable_mosaic.version = 11 : i64} {
  func.func @_fused_matmul_kernel(%arg0: i32, %arg1: memref<2x128xbf16, #tpu.memory_space<vmem>>, %arg2: memref<128x128xbf16, #tpu.memory_space<vmem>>, %arg3: memref<1x128xf32, #tpu.memory_space<vmem>>, %arg4: memref<2x128xf32, #tpu.memory_space<vmem>>) attributes {dimension_semantics = [#tpu.dimension_semantics<parallel>], iteration_bounds = array<i64: 1>, scalar_prefetch = 0 : i64, scratch_operands = 0 : i64, tpu.core_type = #tpu.core_type<tc>, window_params = [{transform_indices = @transform_0, window_bounds = array<i64: 2, 128>}, {pipeline_mode = #tpu.pipeline_mode<synchronous>, transform_indices = @transform_1, window_bounds = array<i64: 128, 128>}, {pipeline_mode = #tpu.pipeline_mode<synchronous>, transform_indices = @transform_2, window_bounds = array<i64: 1, 128>}, {transform_indices = @transform_3, window_bounds = array<i64: 2, 128>}]} {
    %c0 = arith.constant 0 : index
    %c0_0 = arith.constant 0 : index
    %0 = vector.load %arg1[%c0, %c0_0] : memref<2x128xbf16, #tpu.memory_space<vmem>>, vector<2x128xbf16>
    %c0_1 = arith.constant 0 : index
    %c0_2 = arith.constant 0 : index
    %1 = vector.load %arg2[%c0_1, %c0_2] : memref<128x128xbf16, #tpu.memory_space<vmem>>, vector<128x128xbf16>
    %cst = arith.constant dense<0.000000e+00> : vector<2x128xf32>
    %2 = tpu.matmul %0, %1, %cst {dimension_numbers = #tpu.dot_dimension_numbers<[1], [0], [0], [1], [0, 0, 1, 1], [], []>} : vector<2x128xbf16>, vector<128x128xbf16>, vector<2x128xf32> -> vector<2x128xf32>
    %c0_3 = arith.constant 0 : index
    %c0_4 = arith.constant 0 : index
    %3 = vector.load %arg3[%c0_3, %c0_4] : memref<1x128xf32, #tpu.memory_space<vmem>>, vector<1x128xf32>
    %4 = vector.broadcast %3 : vector<1x128xf32> to vector<2x128xf32>
    %5 = arith.addf %2, %4 : vector<2x128xf32>
    %c0_5 = arith.constant 0 : index
    %c0_6 = arith.constant 0 : index
    %6 = vector.load %arg4[%c0_5, %c0_6] : memref<2x128xf32, #tpu.memory_space<vmem>>, vector<2x128xf32>
    tpu.vector_store %arg4[%c0_5, %c0_6], %5 {strides = array<i32>} : memref<2x128xf32, #tpu.memory_space<vmem>>, vector<2x128xf32>,
    return
  }
  func.func @transform_0(%arg0: i32) -> (i32, i32) {
    %c0_i32 = arith.constant 0 : i32
    %c0_i32_0 = arith.constant 0 : i32
    return %arg0, %c0_i32 : i32, i32
  }
  func.func @transform_1(%arg0: i32) -> (i32, i32) {
    %c0_i32 = arith.constant 0 : i32
    %c0_i32_0 = arith.constant 0 : i32
    %c0_i32_1 = arith.constant 0 : i32
    return %c0_i32, %c0_i32_0 : i32, i32
  }
  func.func @transform_2(%arg0: i32) -> (i32, i32) {
    %c0_i32 = arith.constant 0 : i32
    %c0_i32_0 = arith.constant 0 : i32
    %c0_i32_1 = arith.constant 0 : i32
    return %c0_i32, %c0_i32_0 : i32, i32
  }
  func.func @transform_3(%arg0: i32) -> (i32, i32) {
    %c0_i32 = arith.constant 0 : i32
    %c0_i32_0 = arith.constant 0 : i32
    return %arg0, %c0_i32 : i32, i32
  }
}

module attributes {stable_mosaic.version = 11 : i64} {
  func.func @_fused_matmul_kernel(%arg0: i32, %arg1: memref<32x32xbf16, #tpu.memory_space<vmem>>, %arg2: memref<32x128xbf16, #tpu.memory_space<vmem>>, %arg3: memref<1x128xf32, #tpu.memory_space<vmem>>, %arg4: memref<32x128xf32, #tpu.memory_space<vmem>>) attributes {dimension_semantics = [#tpu.dimension_semantics<parallel>], iteration_bounds = array<i64: 1>, scalar_prefetch = 0 : i64, scratch_operands = 0 : i64, tpu.core_type = #tpu.core_type<tc>, window_params = [{transform_indices = @transform_0, window_bounds = array<i64: 32, 32>}, {pipeline_mode = #tpu.pipeline_mode<synchronous>, transform_indices = @transform_1, window_bounds = array<i64: 32, 128>}, {pipeline_mode = #tpu.pipeline_mode<synchronous>, transform_indices = @transform_2, window_bounds = array<i64: 1, 128>}, {transform_indices = @transform_3, window_bounds = array<i64: 32, 128>}]} {
    %c0 = arith.constant 0 : index
    %c0_0 = arith.constant 0 : index
    %0 = vector.load %arg1[%c0, %c0_0] : memref<32x32xbf16, #tpu.memory_space<vmem>>, vector<32x32xbf16>
    %c0_1 = arith.constant 0 : index
    %c0_2 = arith.constant 0 : index
    %1 = vector.load %arg2[%c0_1, %c0_2] : memref<32x128xbf16, #tpu.memory_space<vmem>>, vector<32x128xbf16>
    %cst = arith.constant dense<0.000000e+00> : vector<32x128xf32>
    %2 = tpu.matmul %0, %1, %cst {dimension_numbers = #tpu.dot_dimension_numbers<[1], [0], [0], [1], [0, 0, 1, 1], [], []>} : vector<32x32xbf16>, vector<32x128xbf16>, vector<32x128xf32> -> vector<32x128xf32>
    %c0_3 = arith.constant 0 : index
    %c0_4 = arith.constant 0 : index
    %3 = vector.load %arg3[%c0_3, %c0_4] : memref<1x128xf32, #tpu.memory_space<vmem>>, vector<1x128xf32>
    %4 = vector.broadcast %3 : vector<1x128xf32> to vector<32x128xf32>
    %5 = arith.addf %2, %4 : vector<32x128xf32>
    %c0_5 = arith.constant 0 : index
    %c0_6 = arith.constant 0 : index
    %6 = vector.load %arg4[%c0_5, %c0_6] : memref<32x128xf32, #tpu.memory_space<vmem>>, vector<32x128xf32>
    tpu.vector_store %arg4[%c0_5, %c0_6], %5 {strides = array<i32>} : memref<32x128xf32, #tpu.memory_space<vmem>>, vector<32x128xf32>,
    return
  }
  func.func @transform_0(%arg0: i32) -> (i32, i32) {
    %c0_i32 = arith.constant 0 : i32
    %c0_i32_0 = arith.constant 0 : i32
    return %arg0, %c0_i32 : i32, i32
  }
  func.func @transform_1(%arg0: i32) -> (i32, i32) {
    %c0_i32 = arith.constant 0 : i32
    %c0_i32_0 = arith.constant 0 : i32
    %c0_i32_1 = arith.constant 0 : i32
    return %c0_i32, %c0_i32_0 : i32, i32
  }
  func.func @transform_2(%arg0: i32) -> (i32, i32) {
    %c0_i32 = arith.constant 0 : i32
    %c0_i32_0 = arith.constant 0 : i32
    %c0_i32_1 = arith.constant 0 : i32
    return %c0_i32, %c0_i32_0 : i32, i32
  }
  func.func @transform_3(%arg0: i32) -> (i32, i32) {
    %c0_i32 = arith.constant 0 : i32
    %c0_i32_0 = arith.constant 0 : i32
    return %arg0, %c0_i32 : i32, i32
  }
}

</mosaic_0001>

<bundles_post_ra>
// kernel: _lambda_.39
= control target key start
LH: loop header
LB: loop body
LE: loop exit
PB: predicated region body
PF: predicated region fallthrough
CT: control target
= control target key end

     0   :  { %s1957_s12 = smov 0   ;;  %s2159_s0 = inlined_call_operand.vmem [shape: bf16[2048,27], index: 0, kind: input, shape index: {}]   ;;  %s2160_s1 = inlined_call_operand.vmem [shape: bf16[27,128], index: 1, kind: input, shape index: {}]   ;;  %s2161_s2 = inlined_call_operand.vmem [shape: f32[1,128], index: 2, kind: input, shape index: {}]   ;;  %s2162_s3 = inlined_call_operand.vmem [shape: bf16[2048,128], index: 3, kind: output, shape index: {}]  }
   0x1 LB: > { %s1382_s13 = sadd.s32 4294967295, %s1934_s12   ;;  %p1386_p0 = scmp.ge.s32.totalorder %s1934_s12, 1  ;;  %s1934_s12 = sphi %s1957_s12, %s13_s12  }
   0x2   : > { %p138_p1 = scmp.lt.s32.totalorder %s1934_s12, 5 }
   0x4   : > { %p139_p2 = pnand %p1386_p0, %p138_p1 }
   0x5   : > { %v1894_v0 = vld [vmem:[%s2160_s1] sm:$0xff] (!%p139_p2)   ;;  %vm518_vm0 = vcmask (!%p139_p2), 1044480   ;;  %v1895_v1 = vld [vmem:[%s2160_s1 + $0x8] sm:$0x3f] (!%p139_p2)   ;;  %vm519_vm1 = vcmask (!%p139_p2), 1045504   ;;  %s1387_s18 = sshll.u32 (!%p139_p2), %s1382_s13, 6 }
   0x6   : > { %142 = sbr.rel (%p139_p2) target bundleno = 307 (0x133), region = 32  ;;  %1813 = vmatprep.subr.bf16.mxu0 (!%p139_p2), %v1894_v0  ;;  %1881 = vmatprep.subr.bf16.mxu1 (!%p139_p2), %v1894_v0  ;;  %v1936_v2 = vmov (!%p139_p2), 65535   ;;  %p163_p3 = scmp.lt.s32.totalorder (!%p139_p2), %s1387_s18, 255  ;;  %vm421_vm2 = vcmask (!%p139_p2), 220160   ;;  %v2048_v38 = vld [vmem:[%s2161_s2] ss:$0 sm:$0xff] (!%p139_p2) }
   0x7   : > { %1814 = vmatpush3.bf16.msra.mxu0 (!%p139_p2), %v1894_v0  ;;  %1883 = vmatpush3.bf16.msra.mxu1 (!%p139_p2), %v1894_v0  ;;  %v520_v3 = vsel (!%p139_p2), %vm518_vm0, 4294967295, %v1936_v2 }
   0x8   : > { %v521_v4 = vsel (!%p139_p2), %vm519_vm1, %v520_v3, 0 }
   0x9   : > { %v523_v5 = vand.u32 (!%p139_p2), %v1895_v1, %v521_v4 }
   0xb   : > { %1815 = vmatprep.subr.bf16.mxu0 (!%p139_p2), %v523_v5  ;;  %1882 = vmatprep.subr.bf16.mxu1 (!%p139_p2), %v523_v5 }
   0xc   : > { %1816 = vmatpush3.bf16.msra.mxu0 (!%p139_p2), %v523_v5  ;;  %1884 = vmatpush3.bf16.msra.mxu1 (!%p139_p2), %v523_v5 }
   0xd   : > { %s2164_s18 = smov (!%p163_p3, %s1387_s18), 255 }
   0xe   : > { %s1388_s19 = sshll.u32 %s2164_s18, 2 }
   0xf   : > { %s1979_s22 = scalar_lea.vmem %s2159_s0, %s1388_s19  ;;  %s2063_s27 = scalar_lea.vmem %s2162_s3, %s1388_s19 }
  0x10   : > { %v1896_v6 = vld [vmem:[%s1979_s22] sm:$0xff]   ;;  %v1898_v8 = vld [vmem:[%s1979_s22 + $0x8] sm:$0xff]   ;;  %v1900_v10 = vld [vmem:[%s1979_s22 + $0x10] sm:$0xff]  }
  0x11   : > { %v1897_v7 = vld [vmem:[%s1979_s22 + $0x80] sm:$0xff]   ;;  %1817 = vmatprep.mubr.msk.bf16.mxu0 %vm421_vm2, %v1896_v6  ;;  %v1899_v9 = vld [vmem:[%s1979_s22 + $0x88] sm:$0xff]   ;;  %v1901_v11 = vld [vmem:[%s1979_s22 + $0x90] sm:$0xff]  }
  0x12   : > { %1849 = vmatprep.mubr.msk.bf16.mxu1 %vm421_vm2, %v1897_v7  ;;  %1818 = vmatmul.mubr.msk.bf16.vlgmr.msra.gmra.mrb[0].mxu0 %vm421_vm2, %v1898_v8  ;;  %v1902_v12 = vld [vmem:[%s1979_s22 + $0x18] sm:$0xff]   ;;  %v1904_v14 = vld [vmem:[%s1979_s22 + $0x20] sm:$0xff]   ;;  %v1906_v16 = vld [vmem:[%s1979_s22 + $0x28] sm:$0xff]  }
  0x13   : > { %1850 = vmatmul.mubr.msk.bf16.vlgmr.msra.gmra.mrb[0].mxu1 %vm421_vm2, %v1899_v9  ;;  %1821 = vmatprep.mubr.msk.bf16.mxu0 %vm421_vm2, %v1900_v10  ;;  %v1903_v13 = vld [vmem:[%s1979_s22 + $0x98] sm:$0xff]   ;;  %v1905_v15 = vld [vmem:[%s1979_s22 + $0xa0] sm:$0xff]   ;;  %v1907_v17 = vld [vmem:[%s1979_s22 + $0xa8] sm:$0xff]  }
  0x14   : > { %1853 = vmatprep.mubr.msk.bf16.mxu1 %vm421_vm2, %v1901_v11  ;;  %v1908_v18 = vld [vmem:[%s1979_s22 + $0x30] sm:$0xff]   ;;  %v1910_v20 = vld [vmem:[%s1979_s22 + $0x38] sm:$0xff]   ;;  %v1912_v22 = vld [vmem:[%s1979_s22 + $0x40] sm:$0xff]  }
  0x15   : > { %v1909_v19 = vld [vmem:[%s1979_s22 + $0xb0] sm:$0xff]   ;;  %v1911_v21 = vld [vmem:[%s1979_s22 + $0xb8] sm:$0xff]   ;;  %v1913_v23 = vld [vmem:[%s1979_s22 + $0xc0] sm:$0xff]  }
  0x16   : > { %v1914_v24 = vld [vmem:[%s1979_s22 + $0x48] sm:$0xff]   ;;  %v1916_v26 = vld [vmem:[%s1979_s22 + $0x50] sm:$0xff]   ;;  %v1918_v28 = vld [vmem:[%s1979_s22 + $0x58] sm:$0xff]  }
  0x17   : > { %v1915_v25 = vld [vmem:[%s1979_s22 + $0xc8] sm:$0xff]   ;;  %v1917_v27 = vld [vmem:[%s1979_s22 + $0xd0] sm:$0xff]   ;;  %v1919_v29 = vld [vmem:[%s1979_s22 + $0xd8] sm:$0xff]  }
  0x18   : > { %v1920_v30 = vld [vmem:[%s1979_s22 + $0x60] sm:$0xff]   ;;  %v1922_v32 = vld [vmem:[%s1979_s22 + $0x68] sm:$0xff]   ;;  %v1924_v34 = vld [vmem:[%s1979_s22 + $0x70] sm:$0xff]  }
  0x19   : > { %v1921_v31 = vld [vmem:[%s1979_s22 + $0xe0] sm:$0xff]   ;;  %v1923_v33 = vld [vmem:[%s1979_s22 + $0xe8] sm:$0xff]   ;;  %v1925_v35 = vld [vmem:[%s1979_s22 + $0xf0] sm:$0xff]  }
  0x1a   : > { %1822 = vmatmul.mubr.msk.bf16.gmra.mrb[4].mxu0 %vm421_vm2, %v1902_v12  ;;  %v1926_v36 = vld [vmem:[%s1979_s22 + $0x78] sm:$0xff]  }
  0x1b   : > { %1854 = vmatmul.mubr.msk.bf16.gmra.mrb[4].mxu1 %vm421_vm2, %v1903_v13  ;;  %1825 = vmatprep.mubr.msk.bf16.mxu0 %vm421_vm2, %v1904_v14  ;;  %v1927_v37 = vld [vmem:[%s1979_s22 + $0xf8] sm:$0xff]  }
  0x1c   : > { %1857 = vmatprep.mubr.msk.bf16.mxu1 %vm421_vm2, %v1905_v15 }
  0x22   : > { %1826 = vmatmul.mubr.msk.bf16.gmra.mrb[8].mxu0 %vm421_vm2, %v1906_v16 }
  0x23   : > { %1858 = vmatmul.mubr.msk.bf16.gmra.mrb[8].mxu1 %vm421_vm2, %v1907_v17  ;;  %1829 = vmatprep.mubr.msk.bf16.mxu0 %vm421_vm2, %v1908_v18 }
  0x24   : > { %1861 = vmatprep.mubr.msk.bf16.mxu1 %vm421_vm2, %v1909_v19 }
  0x2a   : > { %1830 = vmatmul.mubr.msk.bf16.gmra.mrb[12].mxu0 %vm421_vm2, %v1910_v20 }
  0x2b   : > { %1862 = vmatmul.mubr.msk.bf16.gmra.mrb[12].mxu1 %vm421_vm2, %v1911_v21  ;;  %1833 = vmatprep.mubr.msk.bf16.mxu0 %vm421_vm2, %v1912_v22 }
  0x2c   : > { %1865 = vmatprep.mubr.msk.bf16.mxu1 %vm421_vm2, %v1913_v23 }
  0x32   : > { %1834 = vmatmul.mubr.msk.bf16.gmra.mrb[16].mxu0 %vm421_vm2, %v1914_v24 }
  0x33   : > { %1866 = vmatmul.mubr.msk.bf16.gmra.mrb[16].mxu1 %vm421_vm2, %v1915_v25  ;;  %1837 = vmatprep.mubr.msk.bf16.mxu0 %vm421_vm2, %v1916_v26 }
  0x34   : > { %1869 = vmatprep.mubr.msk.bf16.mxu1 %vm421_vm2, %v1917_v27 }
  0x3a   : > { %1838 = vmatmul.mubr.msk.bf16.gmra.mrb[20].mxu0 %vm421_vm2, %v1918_v28 }
  0x3b   : > { %1870 = vmatmul.mubr.msk.bf16.gmra.mrb[20].mxu1 %vm421_vm2, %v1919_v29  ;;  %1841 = vmatprep.mubr.msk.bf16.mxu0 %vm421_vm2, %v1920_v30 }
  0x3c   : > { %1873 = vmatprep.mubr.msk.bf16.mxu1 %vm421_vm2, %v1921_v31 }
  0x42   : > { %1842 = vmatmul.mubr.msk.bf16.gmra.mrb[24].mxu0 %vm421_vm2, %v1922_v32 }
  0x43   : > { %1874 = vmatmul.mubr.msk.bf16.gmra.mrb[24].mxu1 %vm421_vm2, %v1923_v33  ;;  %1845 = vmatprep.mubr.msk.bf16.mxu0 %vm421_vm2, %v1924_v34 }
  0x44   : > { %1877 = vmatprep.mubr.msk.bf16.mxu1 %vm421_vm2, %v1925_v35 }
  0x4a   : > { %1846 = vmatmul.mubr.msk.bf16.gmra.mrb[28].mxu0 %vm421_vm2, %v1926_v36 }
  0x4b   : > { %1878 = vmatmul.mubr.msk.bf16.gmra.mrb[28].mxu1 %vm421_vm2, %v1927_v37 }
  0xe5   : > { %v1819_v39 = vpop.f32.mrb[0].mxu0 }
  0xe6   : > { %v568_v40 = vadd.f32 %v1819_v39, %v2048_v38  ;;  %v1851_v41 = vpop.f32.mrb[0].mxu1  ;;  %v559_v42 = vpop.f32.mrb[1].mxu0 }
  0xe7   : > { %v696_v43 = vadd.f32 %v1851_v41, %v2048_v38  ;;  %v560_v44 = vadd.f32 %v2048_v38, %v559_v42  ;;  %v687_v45 = vpop.f32.mrb[1].mxu1  ;;  %v1820_v46 = vpop.f32.mrb[2].mxu0 }
  0xe8   : > { %vm816_vm3 = vcmp.ge.f32.partialorder %v568_v40, 0.0  ;;  %v880_v47 = vmul.f32 0.1, %v568_v40  ;;  %v688_v48 = vadd.f32 %v2048_v38, %v687_v45  ;;  %v571_v49 = vadd.f32 %v1820_v46, %v2048_v38  ;;  %v1852_v50 = vpop.f32.mrb[2].mxu1  ;;  %v562_v51 = vpop.f32.mrb[3].mxu0 }
  0xe9   : > { %vm848_vm4 = vcmp.ge.f32.partialorder %v696_v43, 0.0  ;;  %v912_v52 = vmul.f32 0.1, %v696_v43  ;;  %vm814_vm5 = vcmp.ge.f32.partialorder %v560_v44, 0.0  ;;  %v878_v53 = vmul.f32 0.1, %v560_v44 }
  0xea   : > { %vm846_vm6 = vcmp.ge.f32.partialorder %v688_v48, 0.0  ;;  %v910_v54 = vmul.f32 0.1, %v688_v48  ;;  %vm817_vm7 = vcmp.ge.f32.partialorder %v571_v49, 0.0  ;;  %v690_v55 = vpop.f32.mrb[3].mxu1  ;;  %v944_v56 = vsel %vm816_vm3, %v568_v40, %v880_v47 }
  0xeb   : > { %v881_v57 = vmul.f32 0.1, %v571_v49  ;;  %v699_v58 = vadd.f32 %v1852_v50, %v2048_v38  ;;  %v976_v59 = vsel %vm848_vm4, %v696_v43, %v912_v52  ;;  %v942_v60 = vsel %vm814_vm5, %v560_v44, %v878_v53 }
  0xec   : > { %v563_v61 = vadd.f32 %v2048_v38, %v562_v51  ;;  %v691_v62 = vadd.f32 %v2048_v38, %v690_v55  ;;  %v974_v63 = vsel %vm846_vm6, %v688_v48, %v910_v54 }
  0xed   : > { %v945_v0 = vsel %vm817_vm7, %v571_v49, %v881_v57  ;;  %vm849_vm8 = vcmp.ge.f32.partialorder %v699_v58, 0.0  ;;  %v913_v1 = vmul.f32 0.1, %v699_v58  ;;  %v1823_v2 = vpop.f32.mrb[4].mxu0 }
  0xee   : > { %v1596_v3 = vpack.c.bf16 %v945_v0, %v944_v56  ;;  %vm815_vm9 = vcmp.ge.f32.partialorder %v563_v61, 0.0  ;;  %v879_v4 = vmul.f32 0.1, %v563_v61  ;;  %vm847_vm10 = vcmp.ge.f32.partialorder %v691_v62, 0.0  ;;  %v1855_v5 = vpop.f32.mrb[4].mxu1  ;;  %v575_v6 = vpop.f32.mrb[5].mxu0 }
  0xef   : > { %v977_v7 = vsel %vm849_vm8, %v699_v58, %v913_v1  ;;  %v911_v8 = vmul.f32 0.1, %v691_v62  ;;  %v584_v9 = vadd.f32 %v1823_v2, %v2048_v38  ;;  %v712_v10 = vadd.f32 %v1855_v5, %v2048_v38  ;;  %v703_v11 = vpop.f32.mrb[5].mxu1  ;;  %v1824_v12 = vpop.f32.mrb[6].mxu0 }
  0xf0   : > { %1748 = vst [vmem:[%s2063_s27 + $0x8] sm:$0xff] %v1596_v3   ;;  %v1676_v13 = vpack.c.bf16 %v977_v7, %v976_v59  ;;  %v943_v14 = vsel %vm815_vm9, %v563_v61, %v879_v4  ;;  %v576_v15 = vadd.f32 %v2048_v38, %v575_v6  ;;  %v704_v16 = vadd.f32 %v2048_v38, %v703_v11  ;;  %v1856_v17 = vpop.f32.mrb[6].mxu1  ;;  %v578_v18 = vpop.f32.mrb[7].mxu0 }
  0xf1   : > { %v1591_v19 = vpack.c.bf16 %v943_v14, %v942_v60  ;;  %v975_v20 = vsel %vm847_vm10, %v691_v62, %v911_v8  ;;  %vm820_vm11 = vcmp.ge.f32.partialorder %v584_v9, 0.0  ;;  %v884_v21 = vmul.f32 0.1, %v584_v9  ;;  %v706_v22 = vpop.f32.mrb[7].mxu1 }
  0xf2   : > { %1764 = vst [vmem:[%s2063_s27 + $0x88] sm:$0xff] %v1676_v13   ;;  %v1671_v23 = vpack.c.bf16 %v975_v20, %v974_v63  ;;  %vm852_vm12 = vcmp.ge.f32.partialorder %v712_v10, 0.0  ;;  %v916_v24 = vmul.f32 0.1, %v712_v10  ;;  %vm818_vm13 = vcmp.ge.f32.partialorder %v576_v15, 0.0 }
  0xf3   : > { %1592 = vst [vmem:[%s2063_s27] sm:$0xff] %v1591_v19   ;;  %v948_v25 = vsel %vm820_vm11, %v584_v9, %v884_v21  ;;  %v882_v26 = vmul.f32 0.1, %v576_v15  ;;  %v914_v27 = vmul.f32 0.1, %v704_v16  ;;  %v587_v28 = vadd.f32 %v1824_v12, %v2048_v38 }
  0xf4   : > { %1763 = vst [vmem:[%s2063_s27 + $0x80] sm:$0xff] %v1671_v23   ;;  %v715_v29 = vadd.f32 %v1856_v17, %v2048_v38  ;;  %v579_v30 = vadd.f32 %v2048_v38, %v578_v18  ;;  %v980_v31 = vsel %vm852_vm12, %v712_v10, %v916_v24  ;;  %vm850_vm14 = vcmp.ge.f32.partialorder %v704_v16, 0.0 }
  0xf5   : > { %v946_v32 = vsel %vm818_vm13, %v576_v15, %v882_v26  ;;  %v707_v33 = vadd.f32 %v2048_v38, %v706_v22  ;;  %v1827_v34 = vpop.f32.mrb[8].mxu0  ;;  %vm821_vm15 = vcmp.ge.f32.partialorder %v587_v28, 0.0  ;;  %v885_v35 = vmul.f32 0.1, %v587_v28 }
  0xf6   : > { %vm853_vm0 = vcmp.ge.f32.partialorder %v715_v29, 0.0  ;;  %v917_v36 = vmul.f32 0.1, %v715_v29  ;;  %vm819_vm1 = vcmp.ge.f32.partialorder %v579_v30, 0.0  ;;  %v883_v37 = vmul.f32 0.1, %v579_v30 }
  0xf7   : > { %vm851_vm2 = vcmp.ge.f32.partialorder %v707_v33, 0.0  ;;  %v915_v39 = vmul.f32 0.1, %v707_v33  ;;  %v978_v40 = vsel %vm850_vm14, %v704_v16, %v914_v27  ;;  %v949_v41 = vsel %vm821_vm15, %v587_v28, %v885_v35  ;;  %v1859_v44 = vpop.f32.mrb[8].mxu1  ;;  %v591_v45 = vpop.f32.mrb[9].mxu0 }
  0xf8   : > { %v981_v42 = vsel %vm853_vm0, %v715_v29, %v917_v36  ;;  %v600_v43 = vadd.f32 %v1827_v34, %v2048_v38  ;;  %v1606_v46 = vpack.c.bf16 %v949_v41, %v948_v25  ;;  %v947_v48 = vsel %vm819_vm1, %v579_v30, %v883_v37  ;;  %v719_v50 = vpop.f32.mrb[9].mxu1  ;;  %v1828_v51 = vpop.f32.mrb[10].mxu0 }
  0xf9   : > { %v1686_v47 = vpack.c.bf16 %v981_v42, %v980_v31  ;;  %v979_v49 = vsel %vm851_vm2, %v707_v33, %v915_v39  ;;  %v1601_v52 = vpack.c.bf16 %v947_v48, %v946_v32  ;;  %v1860_v55 = vpop.f32.mrb[10].mxu1  ;;  %v594_v56 = vpop.f32.mrb[11].mxu0  ;;  %v728_v57 = vadd.f32 %v1859_v44, %v2048_v38 }
  0xfa   : > { %v1681_v53 = vpack.c.bf16 %v979_v49, %v978_v40  ;;  %vm824_vm3 = vcmp.ge.f32.partialorder %v600_v43, 0.0  ;;  %v888_v54 = vmul.f32 0.1, %v600_v43  ;;  %1750 = vst [vmem:[%s2063_s27 + $0x18] sm:$0xff] %v1606_v46   ;;  %v592_v58 = vadd.f32 %v2048_v38, %v591_v45  ;;  %v722_v61 = vpop.f32.mrb[11].mxu1 }
  0xfb   : > { %1766 = vst [vmem:[%s2063_s27 + $0x98] sm:$0xff] %v1686_v47   ;;  %v720_v59 = vadd.f32 %v2048_v38, %v719_v50  ;;  %v603_v60 = vadd.f32 %v1828_v51, %v2048_v38  ;;  %1749 = vst [vmem:[%s2063_s27 + $0x10] sm:$0xff] %v1601_v52   ;;  %v731_v63 = vadd.f32 %v1860_v55, %v2048_v38  ;;  %vm856_vm4 = vcmp.ge.f32.partialorder %v728_v57, 0.0 }
  0xfc   : > { %1765 = vst [vmem:[%s2063_s27 + $0x90] sm:$0xff] %v1681_v53   ;;  %v952_v62 = vsel %vm824_vm3, %v600_v43, %v888_v54  ;;  %v595_v0 = vadd.f32 %v2048_v38, %v594_v56  ;;  %v723_v1 = vadd.f32 %v2048_v38, %v722_v61  ;;  %v920_v2 = vmul.f32 0.1, %v728_v57 }
  0xfd   : > { %vm822_vm5 = vcmp.ge.f32.partialorder %v592_v58, 0.0  ;;  %v886_v3 = vmul.f32 0.1, %v592_v58  ;;  %vm854_vm6 = vcmp.ge.f32.partialorder %v720_v59, 0.0  ;;  %v918_v4 = vmul.f32 0.1, %v720_v59 }
  0xfe   : > { %vm825_vm7 = vcmp.ge.f32.partialorder %v603_v60, 0.0  ;;  %v889_v5 = vmul.f32 0.1, %v603_v60  ;;  %v984_v6 = vsel %vm856_vm4, %v728_v57, %v920_v2  ;;  %vm857_vm8 = vcmp.ge.f32.partialorder %v731_v63, 0.0  ;;  %v1831_v9 = vpop.f32.mrb[12].mxu0  ;;  %v1863_v10 = vpop.f32.mrb[12].mxu1 }
  0xff   : > { %v950_v7 = vsel %vm822_vm5, %v592_v58, %v886_v3  ;;  %v921_v8 = vmul.f32 0.1, %v731_v63  ;;  %v982_v11 = vsel %vm854_vm6, %v720_v59, %v918_v4  ;;  %vm823_vm9 = vcmp.ge.f32.partialorder %v595_v0, 0.0  ;;  %v607_v14 = vpop.f32.mrb[13].mxu0  ;;  %v735_v15 = vpop.f32.mrb[13].mxu1 }
 0x100   : > { %v953_v12 = vsel %vm825_vm7, %v603_v60, %v889_v5  ;;  %v887_v13 = vmul.f32 0.1, %v595_v0  ;;  %vm855_vm10 = vcmp.ge.f32.partialorder %v723_v1, 0.0  ;;  %v919_v18 = vmul.f32 0.1, %v723_v1  ;;  %v1832_v19 = vpop.f32.mrb[14].mxu0 }
 0x101   : > { %v1616_v16 = vpack.c.bf16 %v953_v12, %v952_v62  ;;  %v985_v17 = vsel %vm857_vm8, %v731_v63, %v921_v8  ;;  %v1864_v20 = vpop.f32.mrb[14].mxu1  ;;  %v616_v23 = vadd.f32 %v1831_v9, %v2048_v38  ;;  %v744_v24 = vadd.f32 %v1863_v10, %v2048_v38  ;;  %v610_v25 = vpop.f32.mrb[15].mxu0 }
 0x102   : > { %v1696_v21 = vpack.c.bf16 %v985_v17, %v984_v6  ;;  %v951_v22 = vsel %vm823_vm9, %v595_v0, %v887_v13  ;;  %v738_v26 = vpop.f32.mrb[15].mxu1  ;;  %v983_v28 = vsel %vm855_vm10, %v723_v1, %v919_v18  ;;  %v608_v29 = vadd.f32 %v2048_v38, %v607_v14 }
 0x103   : > { %1752 = vst [vmem:[%s2063_s27 + $0x28] sm:$0xff] %v1616_v16   ;;  %v1611_v27 = vpack.c.bf16 %v951_v22, %v950_v7  ;;  %v736_v30 = vadd.f32 %v2048_v38, %v735_v15  ;;  %v1691_v31 = vpack.c.bf16 %v983_v28, %v982_v11  ;;  %vm828_vm11 = vcmp.ge.f32.partialorder %v616_v23, 0.0 }
 0x104   : > { %1768 = vst [vmem:[%s2063_s27 + $0xa8] sm:$0xff] %v1696_v21   ;;  %v892_v32 = vmul.f32 0.1, %v616_v23  ;;  %vm860_vm12 = vcmp.ge.f32.partialorder %v744_v24, 0.0  ;;  %v924_v33 = vmul.f32 0.1, %v744_v24  ;;  %v619_v37 = vadd.f32 %v1832_v19, %v2048_v38 }
 0x105   : > { %1751 = vst [vmem:[%s2063_s27 + $0x20] sm:$0xff] %v1611_v27   ;;  %vm826_vm13 = vcmp.ge.f32.partialorder %v608_v29, 0.0  ;;  %v890_v34 = vmul.f32 0.1, %v608_v29  ;;  %vm858_vm14 = vcmp.ge.f32.partialorder %v736_v30, 0.0  ;;  %1767 = vst [vmem:[%s2063_s27 + $0xa0] sm:$0xff] %v1691_v31   ;;  %v747_v39 = vadd.f32 %v1864_v20, %v2048_v38 }
 0x106   : > { %v956_v35 = vsel %vm828_vm11, %v616_v23, %v892_v32  ;;  %v922_v36 = vmul.f32 0.1, %v736_v30  ;;  %v1835_v40 = vpop.f32.mrb[16].mxu0  ;;  %v1867_v41 = vpop.f32.mrb[16].mxu1  ;;  %v988_v42 = vsel %vm860_vm12, %v744_v24, %v924_v33  ;;  %v611_v44 = vadd.f32 %v2048_v38, %v610_v25 }
 0x107   : > { %v954_v43 = vsel %vm826_vm13, %v608_v29, %v890_v34  ;;  %v739_v45 = vadd.f32 %v2048_v38, %v738_v26  ;;  %v623_v46 = vpop.f32.mrb[17].mxu0  ;;  %v751_v47 = vpop.f32.mrb[17].mxu1  ;;  %vm829_vm15 = vcmp.ge.f32.partialorder %v619_v37, 0.0  ;;  %v893_v49 = vmul.f32 0.1, %v619_v37 }
 0x108   : > { %v986_v48 = vsel %vm858_vm14, %v736_v30, %v922_v36  ;;  %vm861_vm0 = vcmp.ge.f32.partialorder %v747_v39, 0.0  ;;  %v1836_v50 = vpop.f32.mrb[18].mxu0  ;;  %v1868_v51 = vpop.f32.mrb[18].mxu1  ;;  %v925_v52 = vmul.f32 0.1, %v747_v39  ;;  %vm827_vm1 = vcmp.ge.f32.partialorder %v611_v44, 0.0 }
 0x109   : > { %v891_v53 = vmul.f32 0.1, %v611_v44  ;;  %vm859_vm2 = vcmp.ge.f32.partialorder %v739_v45, 0.0  ;;  %v957_v54 = vsel %vm829_vm15, %v619_v37, %v893_v49  ;;  %v923_v55 = vmul.f32 0.1, %v739_v45  ;;  %v626_v58 = vpop.f32.mrb[19].mxu0 }
 0x10a   : > { %v632_v56 = vadd.f32 %v1835_v40, %v2048_v38  ;;  %v760_v57 = vadd.f32 %v1867_v41, %v2048_v38  ;;  %v754_v59 = vpop.f32.mrb[19].mxu1  ;;  %v1626_v60 = vpack.c.bf16 %v957_v54, %v956_v35  ;;  %v989_v61 = vsel %vm861_vm0, %v747_v39, %v925_v52 }
 0x10b   : > { %v955_v62 = vsel %vm827_vm1, %v611_v44, %v891_v53  ;;  %v624_v63 = vadd.f32 %v2048_v38, %v623_v46  ;;  %v1706_v0 = vpack.c.bf16 %v989_v61, %v988_v42  ;;  %v987_v2 = vsel %vm859_vm2, %v739_v45, %v923_v55 }
 0x10c   : > { %v1621_v1 = vpack.c.bf16 %v955_v62, %v954_v43  ;;  %vm832_vm3 = vcmp.ge.f32.partialorder %v632_v56, 0.0  ;;  %1754 = vst [vmem:[%s2063_s27 + $0x38] sm:$0xff] %v1626_v60   ;;  %v1701_v3 = vpack.c.bf16 %v987_v2, %v986_v48  ;;  %v896_v4 = vmul.f32 0.1, %v632_v56 }
 0x10d   : > { %vm864_vm4 = vcmp.ge.f32.partialorder %v760_v57, 0.0  ;;  %v928_v5 = vmul.f32 0.1, %v760_v57  ;;  %v1839_v6 = vpop.f32.mrb[20].mxu0  ;;  %1770 = vst [vmem:[%s2063_s27 + $0xb8] sm:$0xff] %v1706_v0   ;;  %vm830_vm5 = vcmp.ge.f32.partialorder %v624_v63, 0.0  ;;  %v752_v8 = vadd.f32 %v2048_v38, %v751_v47 }
 0x10e   : > { %1753 = vst [vmem:[%s2063_s27 + $0x30] sm:$0xff] %v1621_v1   ;;  %v894_v7 = vmul.f32 0.1, %v624_v63  ;;  %v635_v9 = vadd.f32 %v1836_v50, %v2048_v38  ;;  %v1871_v10 = vpop.f32.mrb[20].mxu1  ;;  %v639_v11 = vpop.f32.mrb[21].mxu0  ;;  %1769 = vst [vmem:[%s2063_s27 + $0xb0] sm:$0xff] %v1701_v3   ;;  %v960_v12 = vsel %vm832_vm3, %v632_v56, %v896_v4  ;;  %v763_v14 = vadd.f32 %v1868_v51, %v2048_v38 }
 0x10f   : > { %v992_v13 = vsel %vm864_vm4, %v760_v57, %v928_v5  ;;  %v627_v15 = vadd.f32 %v2048_v38, %v626_v58  ;;  %v767_v16 = vpop.f32.mrb[21].mxu1  ;;  %v1840_v17 = vpop.f32.mrb[22].mxu0  ;;  %vm862_vm6 = vcmp.ge.f32.partialorder %v752_v8, 0.0  ;;  %v926_v19 = vmul.f32 0.1, %v752_v8 }
 0x110   : > { %v958_v18 = vsel %vm830_vm5, %v624_v63, %v894_v7  ;;  %vm833_vm7 = vcmp.ge.f32.partialorder %v635_v9, 0.0  ;;  %v1872_v20 = vpop.f32.mrb[22].mxu1  ;;  %v642_v21 = vpop.f32.mrb[23].mxu0  ;;  %v897_v22 = vmul.f32 0.1, %v635_v9  ;;  %vm865_vm8 = vcmp.ge.f32.partialorder %v763_v14, 0.0 }
 0x111   : > { %v929_v23 = vmul.f32 0.1, %v763_v14  ;;  %vm831_vm9 = vcmp.ge.f32.partialorder %v627_v15, 0.0  ;;  %v990_v24 = vsel %vm862_vm6, %v752_v8, %v926_v19  ;;  %v895_v25 = vmul.f32 0.1, %v627_v15  ;;  %v770_v28 = vpop.f32.mrb[23].mxu1 }
 0x112   : > { %v755_v26 = vadd.f32 %v2048_v38, %v754_v59  ;;  %v648_v27 = vadd.f32 %v1839_v6, %v2048_v38  ;;  %v961_v29 = vsel %vm833_vm7, %v635_v9, %v897_v22  ;;  %v776_v31 = vadd.f32 %v1871_v10, %v2048_v38 }
 0x113   : > { %v993_v30 = vsel %vm865_vm8, %v763_v14, %v929_v23  ;;  %v640_v32 = vadd.f32 %v2048_v38, %v639_v11  ;;  %v1636_v33 = vpack.c.bf16 %v961_v29, %v960_v12  ;;  %v959_v35 = vsel %vm831_vm9, %v627_v15, %v895_v25 }
 0x114   : > { %v1716_v34 = vpack.c.bf16 %v993_v30, %v992_v13  ;;  %vm863_vm10 = vcmp.ge.f32.partialorder %v755_v26, 0.0  ;;  %v1631_v36 = vpack.c.bf16 %v959_v35, %v958_v18  ;;  %v927_v37 = vmul.f32 0.1, %v755_v26 }
 0x115   : > { %vm836_vm11 = vcmp.ge.f32.partialorder %v648_v27, 0.0  ;;  %v900_v39 = vmul.f32 0.1, %v648_v27  ;;  %v1843_v40 = vpop.f32.mrb[24].mxu0  ;;  %1756 = vst [vmem:[%s2063_s27 + $0x48] sm:$0xff] %v1636_v33   ;;  %vm868_vm12 = vcmp.ge.f32.partialorder %v776_v31, 0.0  ;;  %v768_v45 = vadd.f32 %v2048_v38, %v767_v16 }
 0x116   : > { %1772 = vst [vmem:[%s2063_s27 + $0xc8] sm:$0xff] %v1716_v34   ;;  %v932_v41 = vmul.f32 0.1, %v776_v31  ;;  %vm834_vm13 = vcmp.ge.f32.partialorder %v640_v32, 0.0  ;;  %v898_v42 = vmul.f32 0.1, %v640_v32  ;;  %v991_v43 = vsel %vm863_vm10, %v755_v26, %v927_v37 }
 0x117   : > { %1755 = vst [vmem:[%s2063_s27 + $0x40] sm:$0xff] %v1631_v36   ;;  %v964_v44 = vsel %vm836_vm11, %v648_v27, %v900_v39  ;;  %v651_v46 = vadd.f32 %v1840_v17, %v2048_v38  ;;  %v1875_v47 = vpop.f32.mrb[24].mxu1  ;;  %v655_v48 = vpop.f32.mrb[25].mxu0  ;;  %v1711_v49 = vpack.c.bf16 %v991_v43, %v990_v24  ;;  %v779_v52 = vadd.f32 %v1872_v20, %v2048_v38 }
 0x118   : > { %v996_v50 = vsel %vm868_vm12, %v776_v31, %v932_v41  ;;  %v962_v51 = vsel %vm834_vm13, %v640_v32, %v898_v42  ;;  %v783_v53 = vpop.f32.mrb[25].mxu1  ;;  %v1844_v54 = vpop.f32.mrb[26].mxu0  ;;  %vm866_vm14 = vcmp.ge.f32.partialorder %v768_v45, 0.0  ;;  %v930_v55 = vmul.f32 0.1, %v768_v45 }
 0x119   : > { %vm837_vm15 = vcmp.ge.f32.partialorder %v651_v46, 0.0  ;;  %v901_v56 = vmul.f32 0.1, %v651_v46  ;;  %1771 = vst [vmem:[%s2063_s27 + $0xc0] sm:$0xff] %v1711_v49   ;;  %vm869_vm0 = vcmp.ge.f32.partialorder %v779_v52, 0.0  ;;  %v643_v58 = vadd.f32 %v2048_v38, %v642_v21  ;;  %v1876_v60 = vpop.f32.mrb[26].mxu1 }
 0x11a   : > { %v933_v57 = vmul.f32 0.1, %v779_v52  ;;  %v771_v59 = vadd.f32 %v2048_v38, %v770_v28  ;;  %v658_v61 = vpop.f32.mrb[27].mxu0  ;;  %v994_v62 = vsel %vm866_vm14, %v768_v45, %v930_v55  ;;  %v664_v0 = vadd.f32 %v1843_v40, %v2048_v38  ;;  %v786_v2 = vpop.f32.mrb[27].mxu1 }
 0x11b   : > { %v965_v63 = vsel %vm837_vm15, %v651_v46, %v901_v56  ;;  %v792_v1 = vadd.f32 %v1875_v47, %v2048_v38  ;;  %vm835_vm1 = vcmp.ge.f32.partialorder %v643_v58, 0.0  ;;  %v899_v5 = vmul.f32 0.1, %v643_v58 }
 0x11c   : > { %v1646_v3 = vpack.c.bf16 %v965_v63, %v964_v44  ;;  %v997_v4 = vsel %vm869_vm0, %v779_v52, %v933_v57  ;;  %vm867_vm2 = vcmp.ge.f32.partialorder %v771_v59, 0.0  ;;  %v931_v7 = vmul.f32 0.1, %v771_v59 }
 0x11d   : > { %v1726_v6 = vpack.c.bf16 %v997_v4, %v996_v50  ;;  %vm840_vm3 = vcmp.ge.f32.partialorder %v664_v0, 0.0  ;;  %v1847_v8 = vpop.f32.mrb[28].mxu0  ;;  %v963_v9 = vsel %vm835_vm1, %v643_v58, %v899_v5  ;;  %v904_v10 = vmul.f32 0.1, %v664_v0 }
 0x11e   : > { %1758 = vst [vmem:[%s2063_s27 + $0x58] sm:$0xff] %v1646_v3   ;;  %vm872_vm4 = vcmp.ge.f32.partialorder %v792_v1, 0.0  ;;  %v936_v11 = vmul.f32 0.1, %v792_v1  ;;  %v1879_v12 = vpop.f32.mrb[28].mxu1  ;;  %v1641_v13 = vpack.c.bf16 %v963_v9, %v962_v51  ;;  %v995_v14 = vsel %vm867_vm2, %v771_v59, %v931_v7  ;;  %v671_v17 = vpop.f32.mrb[29].mxu0 }
 0x11f   : > { %1774 = vst [vmem:[%s2063_s27 + $0xd8] sm:$0xff] %v1726_v6   ;;  %v656_v15 = vadd.f32 %v2048_v38, %v655_v48  ;;  %v784_v16 = vadd.f32 %v2048_v38, %v783_v53  ;;  %v799_v18 = vpop.f32.mrb[29].mxu1  ;;  %v1721_v19 = vpack.c.bf16 %v995_v14, %v994_v62  ;;  %v968_v20 = vsel %vm840_vm3, %v664_v0, %v904_v10  ;;  %v1848_v23 = vpop.f32.mrb[30].mxu0 }
 0x120   : > { %v1000_v21 = vsel %vm872_vm4, %v792_v1, %v936_v11  ;;  %v667_v22 = vadd.f32 %v1844_v54, %v2048_v38  ;;  %v1880_v24 = vpop.f32.mrb[30].mxu1  ;;  %1757 = vst [vmem:[%s2063_s27 + $0x50] sm:$0xff] %v1641_v13   ;;  %v795_v28 = vadd.f32 %v1876_v60, %v2048_v38  ;;  %v659_v29 = vadd.f32 %v2048_v38, %v658_v61  ;;  %v674_v30 = vpop.f32.mrb[31].mxu0 }
 0x121   : > { %vm838_vm5 = vcmp.ge.f32.partialorder %v656_v15, 0.0  ;;  %v902_v25 = vmul.f32 0.1, %v656_v15  ;;  %vm870_vm6 = vcmp.ge.f32.partialorder %v784_v16, 0.0  ;;  %v934_v26 = vmul.f32 0.1, %v784_v16 }
 0x122   : > { %1773 = vst [vmem:[%s2063_s27 + $0xd0] sm:$0xff] %v1721_v19   ;;  %vm841_vm7 = vcmp.ge.f32.partialorder %v667_v22, 0.0  ;;  %v905_v27 = vmul.f32 0.1, %v667_v22  ;;  %v802_v31 = vpop.f32.mrb[31].mxu1  ;;  %v787_v34 = vadd.f32 %v2048_v38, %v786_v2  ;;  %v680_v35 = vadd.f32 %v1847_v8, %v2048_v38 }
 0x123   : > { %v966_v32 = vsel %vm838_vm5, %v656_v15, %v902_v25  ;;  %v998_v33 = vsel %vm870_vm6, %v784_v16, %v934_v26  ;;  %vm873_vm8 = vcmp.ge.f32.partialorder %v795_v28, 0.0  ;;  %v937_v37 = vmul.f32 0.1, %v795_v28 }
 0x124   : > { %v969_v36 = vsel %vm841_vm7, %v667_v22, %v905_v27  ;;  %vm839_vm9 = vcmp.ge.f32.partialorder %v659_v29, 0.0  ;;  %v903_v40 = vmul.f32 0.1, %v659_v29  ;;  %vm871_vm10 = vcmp.ge.f32.partialorder %v787_v34, 0.0 }
 0x125   : > { %v1656_v39 = vpack.c.bf16 %v969_v36, %v968_v20  ;;  %v935_v41 = vmul.f32 0.1, %v787_v34  ;;  %v1001_v42 = vsel %vm873_vm8, %v795_v28, %v937_v37  ;;  %vm844_vm11 = vcmp.ge.f32.partialorder %v680_v35, 0.0 }
 0x126   : > { %v908_v43 = vmul.f32 0.1, %v680_v35  ;;  %v808_v44 = vadd.f32 %v1879_v12, %v2048_v38  ;;  %v1736_v45 = vpack.c.bf16 %v1001_v42, %v1000_v21  ;;  %v967_v46 = vsel %vm839_vm9, %v659_v29, %v903_v40 }
 0x127   : > { %1760 = vst [vmem:[%s2063_s27 + $0x68] sm:$0xff] %v1656_v39   ;;  %v999_v47 = vsel %vm871_vm10, %v787_v34, %v935_v41  ;;  %v672_v48 = vadd.f32 %v2048_v38, %v671_v17  ;;  %v1651_v49 = vpack.c.bf16 %v967_v46, %v966_v32  ;;  %v800_v53 = vadd.f32 %v2048_v38, %v799_v18 }
 0x128   : > { %v1731_v50 = vpack.c.bf16 %v999_v47, %v998_v33  ;;  %1776 = vst [vmem:[%s2063_s27 + $0xe8] sm:$0xff] %v1736_v45   ;;  %v972_v51 = vsel %vm844_vm11, %v680_v35, %v908_v43  ;;  %v940_v52 = vmul.f32 0.1, %v808_v44  ;;  %v683_v54 = vadd.f32 %v1848_v23, %v2048_v38 }
 0x129   : > { %1759 = vst [vmem:[%s2063_s27 + $0x60] sm:$0xff] %v1651_v49   ;;  %v811_v55 = vadd.f32 %v1880_v24, %v2048_v38  ;;  %v675_v56 = vadd.f32 %v2048_v38, %v674_v30  ;;  %v803_v57 = vadd.f32 %v2048_v38, %v802_v31  ;;  %vm876_vm12 = vcmp.ge.f32.partialorder %v808_v44, 0.0 }
 0x12a   : > { %1775 = vst [vmem:[%s2063_s27 + $0xe0] sm:$0xff] %v1731_v50   ;;  %vm842_vm13 = vcmp.ge.f32.partialorder %v672_v48, 0.0  ;;  %v906_v58 = vmul.f32 0.1, %v672_v48  ;;  %v938_v59 = vmul.f32 0.1, %v800_v53  ;;  %v1004_v63 = vsel %vm876_vm12, %v808_v44, %v940_v52 }
 0x12b   : > { %vm845_vm14 = vcmp.ge.f32.partialorder %v683_v54, 0.0  ;;  %v909_v60 = vmul.f32 0.1, %v683_v54  ;;  %vm877_vm15 = vcmp.ge.f32.partialorder %v811_v55, 0.0  ;;  %v941_v61 = vmul.f32 0.1, %v811_v55 }
 0x12c   : > { %vm874_vm0 = vcmp.ge.f32.partialorder %v800_v53, 0.0  ;;  %vm843_vm1 = vcmp.ge.f32.partialorder %v675_v56, 0.0  ;;  %v907_v62 = vmul.f32 0.1, %v675_v56  ;;  %vm875_vm2 = vcmp.ge.f32.partialorder %v803_v57, 0.0 }
 0x12d   : > { %v973_v0 = vsel %vm845_vm14, %v683_v54, %v909_v60  ;;  %v1005_v1 = vsel %vm877_vm15, %v811_v55, %v941_v61  ;;  %v939_v38 = vmul.f32 0.1, %v803_v57  ;;  %v970_v2 = vsel %vm842_vm13, %v672_v48, %v906_v58 }
 0x12e   : > { %v1666_v3 = vpack.c.bf16 %v973_v0, %v972_v51  ;;  %v1746_v4 = vpack.c.bf16 %v1005_v1, %v1004_v63  ;;  %v971_v5 = vsel %vm843_vm1, %v675_v56, %v907_v62  ;;  %v1002_v6 = vsel %vm874_vm0, %v800_v53, %v938_v59 }
 0x12f   : > { %v1661_v7 = vpack.c.bf16 %v971_v5, %v970_v2  ;;  %v1003_v8 = vsel %vm875_vm2, %v803_v57, %v939_v38 }
 0x130   : > { %1762 = vst [vmem:[%s2063_s27 + $0x78] sm:$0xff] %v1666_v3   ;;  %1778 = vst [vmem:[%s2063_s27 + $0xf8] sm:$0xff] %v1746_v4   ;;  %v1741_v9 = vpack.c.bf16 %v1003_v8, %v1002_v6 }
 0x131   : > { %1761 = vst [vmem:[%s2063_s27 + $0x70] sm:$0xff] %v1661_v7  }
 0x132   : > { %1777 = vst [vmem:[%s2063_s27 + $0xf0] sm:$0xff] %v1741_v9  }
 0x133 PF: > { %s13_s12 = sadd.s32 1, %s1934_s12  }
 0x134   : > { %p10_p4 = scmp.ge.s32.totalorder %s13_s12, 6  }
 0x136   :  { %12 = sbr.rel (!%p10_p4) target bundleno = 1 (0x1), region = 62 }

// kernel: _lambda_.41
= control target key start
LH: loop header
LB: loop body
LE: loop exit
PB: predicated region body
PF: predicated region fallthrough
CT: control target
= control target key end

     0   :  { %vm344_vm0 = vcmask 1043456   ;;  %vm247_vm1 = vcmask 64512   ;;  %s1991_s1 = inlined_call_operand.vmem [shape: bf16[8,128], index: 1, kind: input, shape index: {}]   ;;  %s1992_s0 = inlined_call_operand.vmem [shape: bf16[512,8], index: 0, kind: input, shape index: {}]   ;;  %s1993_s2 = inlined_call_operand.vmem [shape: f32[1,128], index: 2, kind: input, shape index: {}]   ;;  %s1994_s3 = inlined_call_operand.vmem [shape: bf16[512,128], index: 3, kind: output, shape index: {}]  }
   0x1   :  { %v79_v0 = vld [vmem:[%s1991_s1] sm:$0xf]  ;;  %v1642_v4 = vld [vmem:[%s1992_s0 + $0x8] sm:$0xff]   ;;  %v1644_v6 = vld [vmem:[%s1992_s0 + $0x10] sm:$0xff]  }
   0x2   :  { %1638 = vmatprep.subr.msk.bf16.mxu0 %vm344_vm0, %v79_v0  ;;  %1639 = vmatprep.subr.msk.bf16.mxu1 %vm344_vm0, %v79_v0  ;;  %v346_v1 = vsel %vm344_vm0, %v79_v0, 0  ;;  %v1640_v2 = vld [vmem:[%s1992_s0] sm:$0xff]   ;;  %v1643_v5 = vld [vmem:[%s1992_s0 + $0x88] sm:$0xff]   ;;  %v1645_v7 = vld [vmem:[%s1992_s0 + $0x90] sm:$0xff]  }
   0x3   :  { %1571 = vmatpush3.bf16.msra.mxu0 %v346_v1  ;;  %1637 = vmatpush3.bf16.msra.mxu1 %v346_v1  ;;  %v1641_v3 = vld [vmem:[%s1992_s0 + $0x80] sm:$0xff]   ;;  %v1646_v8 = vld [vmem:[%s1992_s0 + $0x18] sm:$0xff]   ;;  %v1650_v12 = vld [vmem:[%s1992_s0 + $0x28] sm:$0xff]  }
   0x4   :  { %1572 = vmatprep.mubr.msk.bf16.mxu0 %vm247_vm1, %v1640_v2  ;;  %1604 = vmatprep.mubr.msk.bf16.mxu1 %vm247_vm1, %v1641_v3  ;;  %v1647_v9 = vld [vmem:[%s1992_s0 + $0x98] sm:$0xff]   ;;  %v1648_v10 = vld [vmem:[%s1992_s0 + $0x20] sm:$0xff]   ;;  %v1651_v13 = vld [vmem:[%s1992_s0 + $0xa8] sm:$0xff]  }
   0x5   :  { %v1649_v11 = vld [vmem:[%s1992_s0 + $0xa0] sm:$0xff]   ;;  %v1652_v14 = vld [vmem:[%s1992_s0 + $0x30] sm:$0xff]   ;;  %v1654_v16 = vld [vmem:[%s1992_s0 + $0x38] sm:$0xff]  }
   0x6   :  { %1573 = vmatmul.mubr.msk.bf16.vlgmr.msra.gmra.mrb[0].mxu0 %vm247_vm1, %v1642_v4  ;;  %1605 = vmatmul.mubr.msk.bf16.vlgmr.msra.gmra.mrb[0].mxu1 %vm247_vm1, %v1643_v5  ;;  %v1653_v15 = vld [vmem:[%s1992_s0 + $0xb0] sm:$0xff]   ;;  %v1655_v17 = vld [vmem:[%s1992_s0 + $0xb8] sm:$0xff]   ;;  %v1656_v18 = vld [vmem:[%s1992_s0 + $0x40] sm:$0xff]  }
   0x7   :  { %1576 = vmatprep.mubr.msk.bf16.mxu0 %vm247_vm1, %v1644_v6  ;;  %1608 = vmatprep.mubr.msk.bf16.mxu1 %vm247_vm1, %v1645_v7  ;;  %v1657_v19 = vld [vmem:[%s1992_s0 + $0xc0] sm:$0xff]   ;;  %v1658_v20 = vld [vmem:[%s1992_s0 + $0x48] sm:$0xff]   ;;  %v1660_v22 = vld [vmem:[%s1992_s0 + $0x50] sm:$0xff]  }
   0x8   :  { %v1659_v21 = vld [vmem:[%s1992_s0 + $0xc8] sm:$0xff]   ;;  %v1661_v23 = vld [vmem:[%s1992_s0 + $0xd0] sm:$0xff]   ;;  %v1662_v24 = vld [vmem:[%s1992_s0 + $0x58] sm:$0xff]  }
   0x9   :  { %v1663_v25 = vld [vmem:[%s1992_s0 + $0xd8] sm:$0xff]   ;;  %v1664_v26 = vld [vmem:[%s1992_s0 + $0x60] sm:$0xff]   ;;  %v1666_v28 = vld [vmem:[%s1992_s0 + $0x68] sm:$0xff]  }
   0xa   :  { %v1665_v27 = vld [vmem:[%s1992_s0 + $0xe0] sm:$0xff]   ;;  %v1667_v29 = vld [vmem:[%s1992_s0 + $0xe8] sm:$0xff]   ;;  %v1668_v30 = vld [vmem:[%s1992_s0 + $0x70] sm:$0xff]  }
   0xb   :  { %v1669_v31 = vld [vmem:[%s1992_s0 + $0xf0] sm:$0xff]   ;;  %v1670_v32 = vld [vmem:[%s1992_s0 + $0x78] sm:$0xff]   ;;  %v1826_v34 = vld [vmem:[%s1993_s2] ss:$0 sm:$0xff] }
   0xc   :  { %v1671_v33 = vld [vmem:[%s1992_s0 + $0xf8] sm:$0xff]  }
   0xe   :  { %1577 = vmatmul.mubr.msk.bf16.gmra.mrb[4].mxu0 %vm247_vm1, %v1646_v8  ;;  %1609 = vmatmul.mubr.msk.bf16.gmra.mrb[4].mxu1 %vm247_vm1, %v1647_v9 }
   0xf   :  { %1580 = vmatprep.mubr.msk.bf16.mxu0 %vm247_vm1, %v1648_v10  ;;  %1612 = vmatprep.mubr.msk.bf16.mxu1 %vm247_vm1, %v1649_v11 }
  0x16   :  { %1581 = vmatmul.mubr.msk.bf16.gmra.mrb[8].mxu0 %vm247_vm1, %v1650_v12  ;;  %1613 = vmatmul.mubr.msk.bf16.gmra.mrb[8].mxu1 %vm247_vm1, %v1651_v13 }
  0x17   :  { %1584 = vmatprep.mubr.msk.bf16.mxu0 %vm247_vm1, %v1652_v14  ;;  %1616 = vmatprep.mubr.msk.bf16.mxu1 %vm247_vm1, %v1653_v15 }
  0x1e   :  { %1585 = vmatmul.mubr.msk.bf16.gmra.mrb[12].mxu0 %vm247_vm1, %v1654_v16  ;;  %1617 = vmatmul.mubr.msk.bf16.gmra.mrb[12].mxu1 %vm247_vm1, %v1655_v17 }
  0x1f   :  { %1588 = vmatprep.mubr.msk.bf16.mxu0 %vm247_vm1, %v1656_v18  ;;  %1620 = vmatprep.mubr.msk.bf16.mxu1 %vm247_vm1, %v1657_v19 }
  0x26   :  { %1589 = vmatmul.mubr.msk.bf16.gmra.mrb[16].mxu0 %vm247_vm1, %v1658_v20  ;;  %1621 = vmatmul.mubr.msk.bf16.gmra.mrb[16].mxu1 %vm247_vm1, %v1659_v21 }
  0x27   :  { %1592 = vmatprep.mubr.msk.bf16.mxu0 %vm247_vm1, %v1660_v22  ;;  %1624 = vmatprep.mubr.msk.bf16.mxu1 %vm247_vm1, %v1661_v23 }
  0x2e   :  { %1593 = vmatmul.mubr.msk.bf16.gmra.mrb[20].mxu0 %vm247_vm1, %v1662_v24  ;;  %1625 = vmatmul.mubr.msk.bf16.gmra.mrb[20].mxu1 %vm247_vm1, %v1663_v25 }
  0x2f   :  { %1596 = vmatprep.mubr.msk.bf16.mxu0 %vm247_vm1, %v1664_v26  ;;  %1628 = vmatprep.mubr.msk.bf16.mxu1 %vm247_vm1, %v1665_v27 }
  0x36   :  { %1597 = vmatmul.mubr.msk.bf16.gmra.mrb[24].mxu0 %vm247_vm1, %v1666_v28  ;;  %1629 = vmatmul.mubr.msk.bf16.gmra.mrb[24].mxu1 %vm247_vm1, %v1667_v29 }
  0x37   :  { %1600 = vmatprep.mubr.msk.bf16.mxu0 %vm247_vm1, %v1668_v30  ;;  %1632 = vmatprep.mubr.msk.bf16.mxu1 %vm247_vm1, %v1669_v31 }
  0x3e   :  { %1601 = vmatmul.mubr.msk.bf16.gmra.mrb[28].mxu0 %vm247_vm1, %v1670_v32  ;;  %1633 = vmatmul.mubr.msk.bf16.gmra.mrb[28].mxu1 %vm247_vm1, %v1671_v33 }
  0xd9   :  { %v1574_v35 = vpop.f32.mrb[0].mxu0  ;;  %v1606_v37 = vpop.f32.mrb[0].mxu1 }
  0xda   :  { %v391_v36 = vadd.f32 %v1574_v35, %v1826_v34  ;;  %v382_v38 = vpop.f32.mrb[1].mxu0  ;;  %v519_v39 = vadd.f32 %v1606_v37, %v1826_v34  ;;  %v510_v41 = vpop.f32.mrb[1].mxu1 }
  0xdb   :  { %v383_v40 = vadd.f32 %v1826_v34, %v382_v38  ;;  %v1575_v42 = vpop.f32.mrb[2].mxu0  ;;  %v511_v44 = vadd.f32 %v1826_v34, %v510_v41  ;;  %v1607_v46 = vpop.f32.mrb[2].mxu1 }
  0xdc   :  { %vm639_vm2 = vcmp.ge.f32.partialorder %v391_v36, 0.0  ;;  %v703_v43 = vmul.f32 0.1, %v391_v36  ;;  %v394_v45 = vadd.f32 %v1575_v42, %v1826_v34  ;;  %v385_v47 = vpop.f32.mrb[3].mxu0  ;;  %vm671_vm3 = vcmp.ge.f32.partialorder %v519_v39, 0.0  ;;  %v513_v51 = vpop.f32.mrb[3].mxu1 }
  0xdd   :  { %v735_v48 = vmul.f32 0.1, %v519_v39  ;;  %vm637_vm4 = vcmp.ge.f32.partialorder %v383_v40, 0.0  ;;  %v701_v49 = vmul.f32 0.1, %v383_v40  ;;  %vm669_vm5 = vcmp.ge.f32.partialorder %v511_v44, 0.0 }
  0xde   :  { %v733_v50 = vmul.f32 0.1, %v511_v44  ;;  %vm640_vm6 = vcmp.ge.f32.partialorder %v394_v45, 0.0  ;;  %v767_v52 = vsel %vm639_vm2, %v391_v36, %v703_v43  ;;  %v704_v53 = vmul.f32 0.1, %v394_v45 }
  0xdf   :  { %v522_v54 = vadd.f32 %v1607_v46, %v1826_v34  ;;  %v799_v55 = vsel %vm671_vm3, %v519_v39, %v735_v48  ;;  %v765_v56 = vsel %vm637_vm4, %v383_v40, %v701_v49  ;;  %v386_v57 = vadd.f32 %v1826_v34, %v385_v47 }
  0xe0   :  { %v514_v58 = vadd.f32 %v1826_v34, %v513_v51  ;;  %v797_v59 = vsel %vm669_vm5, %v511_v44, %v733_v50  ;;  %v768_v60 = vsel %vm640_vm6, %v394_v45, %v704_v53 }
  0xe1   :  { %vm672_vm7 = vcmp.ge.f32.partialorder %v522_v54, 0.0  ;;  %v736_v61 = vmul.f32 0.1, %v522_v54  ;;  %v1578_v62 = vpop.f32.mrb[4].mxu0  ;;  %v1354_v63 = vpack.c.bf16 %v768_v60, %v767_v52  ;;  %vm638_vm8 = vcmp.ge.f32.partialorder %v386_v57, 0.0  ;;  %v1610_v1 = vpop.f32.mrb[4].mxu1 }
  0xe2   :  { %v702_v0 = vmul.f32 0.1, %v386_v57  ;;  %vm670_vm9 = vcmp.ge.f32.partialorder %v514_v58, 0.0  ;;  %v398_v2 = vpop.f32.mrb[5].mxu0  ;;  %v734_v4 = vmul.f32 0.1, %v514_v58  ;;  %v407_v5 = vadd.f32 %v1578_v62, %v1826_v34 }
  0xe3   :  { %v800_v3 = vsel %vm672_vm7, %v522_v54, %v736_v61  ;;  %v535_v6 = vadd.f32 %v1610_v1, %v1826_v34  ;;  %v526_v7 = vpop.f32.mrb[5].mxu1  ;;  %v1579_v8 = vpop.f32.mrb[6].mxu0  ;;  %1506 = vst [vmem:[%s1994_s3 + $0x8] sm:$0xff] %v1354_v63   ;;  %v399_v11 = vadd.f32 %v1826_v34, %v398_v2 }
  0xe4   :  { %v1434_v9 = vpack.c.bf16 %v800_v3, %v799_v55  ;;  %v766_v10 = vsel %vm638_vm8, %v386_v57, %v702_v0  ;;  %v527_v12 = vadd.f32 %v1826_v34, %v526_v7  ;;  %v1611_v13 = vpop.f32.mrb[6].mxu1  ;;  %v401_v14 = vpop.f32.mrb[7].mxu0  ;;  %v798_v16 = vsel %vm670_vm9, %v514_v58, %v734_v4 }
  0xe5   :  { %v1349_v15 = vpack.c.bf16 %v766_v10, %v765_v56  ;;  %vm643_vm10 = vcmp.ge.f32.partialorder %v407_v5, 0.0  ;;  %v707_v17 = vmul.f32 0.1, %v407_v5  ;;  %v529_v18 = vpop.f32.mrb[7].mxu1  ;;  %v1429_v19 = vpack.c.bf16 %v798_v16, %v797_v59 }
  0xe6   :  { %1522 = vst [vmem:[%s1994_s3 + $0x88] sm:$0xff] %v1434_v9   ;;  %vm675_vm11 = vcmp.ge.f32.partialorder %v535_v6, 0.0  ;;  %v739_v20 = vmul.f32 0.1, %v535_v6  ;;  %vm641_vm12 = vcmp.ge.f32.partialorder %v399_v11, 0.0  ;;  %v410_v24 = vadd.f32 %v1579_v8, %v1826_v34 }
  0xe7   :  { %1350 = vst [vmem:[%s1994_s3] sm:$0xff] %v1349_v15   ;;  %v771_v21 = vsel %vm643_vm10, %v407_v5, %v707_v17  ;;  %v705_v22 = vmul.f32 0.1, %v399_v11  ;;  %1521 = vst [vmem:[%s1994_s3 + $0x80] sm:$0xff] %v1429_v19   ;;  %v737_v23 = vmul.f32 0.1, %v527_v12  ;;  %v538_v25 = vadd.f32 %v1611_v13, %v1826_v34 }
  0xe8   :  { %v402_v26 = vadd.f32 %v1826_v34, %v401_v14  ;;  %v803_v27 = vsel %vm675_vm11, %v535_v6, %v739_v20  ;;  %vm673_vm13 = vcmp.ge.f32.partialorder %v527_v12, 0.0  ;;  %v530_v29 = vadd.f32 %v1826_v34, %v529_v18 }
  0xe9   :  { %v769_v28 = vsel %vm641_vm12, %v399_v11, %v705_v22  ;;  %v1582_v30 = vpop.f32.mrb[8].mxu0  ;;  %vm644_vm14 = vcmp.ge.f32.partialorder %v410_v24, 0.0  ;;  %v708_v31 = vmul.f32 0.1, %v410_v24  ;;  %vm676_vm15 = vcmp.ge.f32.partialorder %v538_v25, 0.0  ;;  %v1614_v40 = vpop.f32.mrb[8].mxu1 }
  0xea   :  { %v740_v32 = vmul.f32 0.1, %v538_v25  ;;  %vm642_vm0 = vcmp.ge.f32.partialorder %v402_v26, 0.0  ;;  %v706_v33 = vmul.f32 0.1, %v402_v26  ;;  %vm674_vm1 = vcmp.ge.f32.partialorder %v530_v29, 0.0 }
  0xeb   :  { %v738_v35 = vmul.f32 0.1, %v530_v29  ;;  %v801_v36 = vsel %vm673_vm13, %v527_v12, %v737_v23  ;;  %v772_v37 = vsel %vm644_vm14, %v410_v24, %v708_v31  ;;  %v423_v39 = vadd.f32 %v1582_v30, %v1826_v34  ;;  %v414_v41 = vpop.f32.mrb[9].mxu0  ;;  %v542_v46 = vpop.f32.mrb[9].mxu1 }
  0xec   :  { %v804_v38 = vsel %vm676_vm15, %v538_v25, %v740_v32  ;;  %v1364_v42 = vpack.c.bf16 %v772_v37, %v771_v21  ;;  %v770_v44 = vsel %vm642_vm0, %v402_v26, %v706_v33  ;;  %v1583_v47 = vpop.f32.mrb[10].mxu0  ;;  %v1615_v51 = vpop.f32.mrb[10].mxu1  ;;  %v551_v53 = vadd.f32 %v1614_v40, %v1826_v34 }
  0xed   :  { %v1444_v43 = vpack.c.bf16 %v804_v38, %v803_v27  ;;  %v802_v45 = vsel %vm674_vm1, %v530_v29, %v738_v35  ;;  %v1359_v48 = vpack.c.bf16 %v770_v44, %v769_v28  ;;  %vm647_vm2 = vcmp.ge.f32.partialorder %v423_v39, 0.0  ;;  %v417_v52 = vpop.f32.mrb[11].mxu0  ;;  %v545_v57 = vpop.f32.mrb[11].mxu1 }
  0xee   :  { %v1439_v49 = vpack.c.bf16 %v802_v45, %v801_v36  ;;  %v711_v50 = vmul.f32 0.1, %v423_v39  ;;  %1508 = vst [vmem:[%s1994_s3 + $0x18] sm:$0xff] %v1364_v42   ;;  %v415_v54 = vadd.f32 %v1826_v34, %v414_v41  ;;  %v543_v55 = vadd.f32 %v1826_v34, %v542_v46 }
  0xef   :  { %1524 = vst [vmem:[%s1994_s3 + $0x98] sm:$0xff] %v1444_v43   ;;  %v426_v56 = vadd.f32 %v1583_v47, %v1826_v34  ;;  %1507 = vst [vmem:[%s1994_s3 + $0x10] sm:$0xff] %v1359_v48   ;;  %v554_v59 = vadd.f32 %v1615_v51, %v1826_v34  ;;  %v418_v60 = vadd.f32 %v1826_v34, %v417_v52  ;;  %vm679_vm3 = vcmp.ge.f32.partialorder %v551_v53, 0.0 }
  0xf0   :  { %1523 = vst [vmem:[%s1994_s3 + $0x90] sm:$0xff] %v1439_v49   ;;  %v775_v58 = vsel %vm647_vm2, %v423_v39, %v711_v50  ;;  %v546_v61 = vadd.f32 %v1826_v34, %v545_v57  ;;  %v743_v62 = vmul.f32 0.1, %v551_v53  ;;  %vm645_vm4 = vcmp.ge.f32.partialorder %v415_v54, 0.0 }
  0xf1   :  { %v709_v63 = vmul.f32 0.1, %v415_v54  ;;  %vm677_vm5 = vcmp.ge.f32.partialorder %v543_v55, 0.0  ;;  %v741_v0 = vmul.f32 0.1, %v543_v55  ;;  %vm648_vm6 = vcmp.ge.f32.partialorder %v426_v56, 0.0 }
  0xf2   :  { %v712_v1 = vmul.f32 0.1, %v426_v56  ;;  %v807_v2 = vsel %vm679_vm3, %v551_v53, %v743_v62  ;;  %vm680_vm7 = vcmp.ge.f32.partialorder %v554_v59, 0.0  ;;  %v744_v4 = vmul.f32 0.1, %v554_v59  ;;  %v1586_v5 = vpop.f32.mrb[12].mxu0 }
  0xf3   :  { %v773_v3 = vsel %vm645_vm4, %v415_v54, %v709_v63  ;;  %v1618_v6 = vpop.f32.mrb[12].mxu1  ;;  %v805_v7 = vsel %vm677_vm5, %v543_v55, %v741_v0  ;;  %vm646_vm8 = vcmp.ge.f32.partialorder %v418_v60, 0.0  ;;  %v710_v9 = vmul.f32 0.1, %v418_v60  ;;  %v430_v10 = vpop.f32.mrb[13].mxu0 }
  0xf4   :  { %v776_v8 = vsel %vm648_vm6, %v426_v56, %v712_v1  ;;  %v558_v11 = vpop.f32.mrb[13].mxu1  ;;  %v808_v13 = vsel %vm680_vm7, %v554_v59, %v744_v4  ;;  %vm678_vm9 = vcmp.ge.f32.partialorder %v546_v61, 0.0  ;;  %v742_v14 = vmul.f32 0.1, %v546_v61  ;;  %v1587_v15 = vpop.f32.mrb[14].mxu0 }
  0xf5   :  { %v1374_v12 = vpack.c.bf16 %v776_v8, %v775_v58  ;;  %v1619_v16 = vpop.f32.mrb[14].mxu1  ;;  %v1454_v17 = vpack.c.bf16 %v808_v13, %v807_v2  ;;  %v774_v18 = vsel %vm646_vm8, %v418_v60, %v710_v9  ;;  %v439_v19 = vadd.f32 %v1586_v5, %v1826_v34  ;;  %v433_v21 = vpop.f32.mrb[15].mxu0 }
  0xf6   :  { %v567_v20 = vadd.f32 %v1618_v6, %v1826_v34  ;;  %v561_v22 = vpop.f32.mrb[15].mxu1  ;;  %v1369_v23 = vpack.c.bf16 %v774_v18, %v773_v3  ;;  %v806_v24 = vsel %vm678_vm9, %v546_v61, %v742_v14  ;;  %v431_v25 = vadd.f32 %v1826_v34, %v430_v10 }
  0xf7   :  { %1510 = vst [vmem:[%s1994_s3 + $0x28] sm:$0xff] %v1374_v12   ;;  %v559_v26 = vadd.f32 %v1826_v34, %v558_v11  ;;  %1526 = vst [vmem:[%s1994_s3 + $0xa8] sm:$0xff] %v1454_v17   ;;  %v1449_v27 = vpack.c.bf16 %v806_v24, %v805_v7  ;;  %vm651_vm10 = vcmp.ge.f32.partialorder %v439_v19, 0.0  ;;  %v715_v28 = vmul.f32 0.1, %v439_v19 }
  0xf8   :  { %vm683_vm11 = vcmp.ge.f32.partialorder %v567_v20, 0.0  ;;  %1509 = vst [vmem:[%s1994_s3 + $0x20] sm:$0xff] %v1369_v23   ;;  %v747_v29 = vmul.f32 0.1, %v567_v20  ;;  %vm649_vm12 = vcmp.ge.f32.partialorder %v431_v25, 0.0  ;;  %v442_v33 = vadd.f32 %v1587_v15, %v1826_v34 }
  0xf9   :  { %v713_v30 = vmul.f32 0.1, %v431_v25  ;;  %vm681_vm13 = vcmp.ge.f32.partialorder %v559_v26, 0.0  ;;  %1525 = vst [vmem:[%s1994_s3 + $0xa0] sm:$0xff] %v1449_v27   ;;  %v779_v31 = vsel %vm651_vm10, %v439_v19, %v715_v28  ;;  %v745_v32 = vmul.f32 0.1, %v559_v26 }
  0xfa   :  { %v570_v35 = vadd.f32 %v1619_v16, %v1826_v34  ;;  %v1590_v36 = vpop.f32.mrb[16].mxu0  ;;  %v1622_v37 = vpop.f32.mrb[16].mxu1  ;;  %v811_v38 = vsel %vm683_vm11, %v567_v20, %v747_v29  ;;  %v434_v40 = vadd.f32 %v1826_v34, %v433_v21  ;;  %v562_v41 = vadd.f32 %v1826_v34, %v561_v22 }
  0xfb   :  { %v777_v39 = vsel %vm649_vm12, %v431_v25, %v713_v30  ;;  %v446_v42 = vpop.f32.mrb[17].mxu0  ;;  %v574_v43 = vpop.f32.mrb[17].mxu1  ;;  %v809_v44 = vsel %vm681_vm13, %v559_v26, %v745_v32  ;;  %vm652_vm14 = vcmp.ge.f32.partialorder %v442_v33, 0.0  ;;  %v716_v45 = vmul.f32 0.1, %v442_v33 }
  0xfc   :  { %vm684_vm15 = vcmp.ge.f32.partialorder %v570_v35, 0.0  ;;  %v1591_v46 = vpop.f32.mrb[18].mxu0  ;;  %v1623_v47 = vpop.f32.mrb[18].mxu1  ;;  %v748_v48 = vmul.f32 0.1, %v570_v35  ;;  %vm650_vm0 = vcmp.ge.f32.partialorder %v434_v40, 0.0  ;;  %v455_v52 = vadd.f32 %v1590_v36, %v1826_v34 }
  0xfd   :  { %v714_v49 = vmul.f32 0.1, %v434_v40  ;;  %vm682_vm1 = vcmp.ge.f32.partialorder %v562_v41, 0.0  ;;  %v780_v50 = vsel %vm652_vm14, %v442_v33, %v716_v45  ;;  %v746_v51 = vmul.f32 0.1, %v562_v41  ;;  %v449_v54 = vpop.f32.mrb[19].mxu0 }
  0xfe   :  { %v583_v53 = vadd.f32 %v1622_v37, %v1826_v34  ;;  %v577_v55 = vpop.f32.mrb[19].mxu1  ;;  %v1384_v56 = vpack.c.bf16 %v780_v50, %v779_v31  ;;  %v812_v57 = vsel %vm684_vm15, %v570_v35, %v748_v48  ;;  %v447_v59 = vadd.f32 %v1826_v34, %v446_v42 }
  0xff   :  { %v778_v58 = vsel %vm650_vm0, %v434_v40, %v714_v49  ;;  %v1464_v60 = vpack.c.bf16 %v812_v57, %v811_v38  ;;  %v810_v62 = vsel %vm682_vm1, %v562_v41, %v746_v51  ;;  %vm655_vm2 = vcmp.ge.f32.partialorder %v455_v52, 0.0 }
 0x100   :  { %v1379_v61 = vpack.c.bf16 %v778_v58, %v777_v39  ;;  %1512 = vst [vmem:[%s1994_s3 + $0x38] sm:$0xff] %v1384_v56   ;;  %v1459_v63 = vpack.c.bf16 %v810_v62, %v809_v44  ;;  %v719_v0 = vmul.f32 0.1, %v455_v52  ;;  %vm687_vm3 = vcmp.ge.f32.partialorder %v583_v53, 0.0 }
 0x101   :  { %v751_v1 = vmul.f32 0.1, %v583_v53  ;;  %v1594_v2 = vpop.f32.mrb[20].mxu0  ;;  %1528 = vst [vmem:[%s1994_s3 + $0xb8] sm:$0xff] %v1464_v60   ;;  %vm653_vm4 = vcmp.ge.f32.partialorder %v447_v59, 0.0  ;;  %v575_v4 = vadd.f32 %v1826_v34, %v574_v43  ;;  %v458_v5 = vadd.f32 %v1591_v46, %v1826_v34  ;;  %v1626_v6 = vpop.f32.mrb[20].mxu1 }
 0x102   :  { %1511 = vst [vmem:[%s1994_s3 + $0x30] sm:$0xff] %v1379_v61   ;;  %v717_v3 = vmul.f32 0.1, %v447_v59  ;;  %v462_v7 = vpop.f32.mrb[21].mxu0  ;;  %1527 = vst [vmem:[%s1994_s3 + $0xb0] sm:$0xff] %v1459_v63   ;;  %v783_v8 = vsel %vm655_vm2, %v455_v52, %v719_v0  ;;  %v586_v10 = vadd.f32 %v1623_v47, %v1826_v34  ;;  %v450_v11 = vadd.f32 %v1826_v34, %v449_v54  ;;  %v590_v12 = vpop.f32.mrb[21].mxu1 }
 0x103   :  { %v815_v9 = vsel %vm687_vm3, %v583_v53, %v751_v1  ;;  %v1595_v13 = vpop.f32.mrb[22].mxu0  ;;  %vm685_vm5 = vcmp.ge.f32.partialorder %v575_v4, 0.0  ;;  %v749_v15 = vmul.f32 0.1, %v575_v4  ;;  %vm656_vm6 = vcmp.ge.f32.partialorder %v458_v5, 0.0  ;;  %v1627_v16 = vpop.f32.mrb[22].mxu1 }
 0x104   :  { %v781_v14 = vsel %vm653_vm4, %v447_v59, %v717_v3  ;;  %v465_v17 = vpop.f32.mrb[23].mxu0  ;;  %v720_v18 = vmul.f32 0.1, %v458_v5  ;;  %vm688_vm7 = vcmp.ge.f32.partialorder %v586_v10, 0.0  ;;  %v752_v19 = vmul.f32 0.1, %v586_v10 }
 0x105   :  { %vm654_vm8 = vcmp.ge.f32.partialorder %v450_v11, 0.0  ;;  %v813_v20 = vsel %vm685_vm5, %v575_v4, %v749_v15  ;;  %v718_v21 = vmul.f32 0.1, %v450_v11  ;;  %v578_v22 = vadd.f32 %v1826_v34, %v577_v55  ;;  %v593_v24 = vpop.f32.mrb[23].mxu1 }
 0x106   :  { %v471_v23 = vadd.f32 %v1594_v2, %v1826_v34  ;;  %v784_v25 = vsel %vm656_vm6, %v458_v5, %v720_v18  ;;  %v816_v26 = vsel %vm688_vm7, %v586_v10, %v752_v19  ;;  %v599_v27 = vadd.f32 %v1626_v6, %v1826_v34 }
 0x107   :  { %v463_v28 = vadd.f32 %v1826_v34, %v462_v7  ;;  %v1394_v29 = vpack.c.bf16 %v784_v25, %v783_v8  ;;  %v1474_v30 = vpack.c.bf16 %v816_v26, %v815_v9  ;;  %v782_v31 = vsel %vm654_vm8, %v450_v11, %v718_v21 }
 0x108   :  { %vm686_vm9 = vcmp.ge.f32.partialorder %v578_v22, 0.0  ;;  %v1389_v32 = vpack.c.bf16 %v782_v31, %v781_v14  ;;  %v750_v33 = vmul.f32 0.1, %v578_v22  ;;  %vm659_vm10 = vcmp.ge.f32.partialorder %v471_v23, 0.0 }
 0x109   :  { %v723_v35 = vmul.f32 0.1, %v471_v23  ;;  %v1598_v36 = vpop.f32.mrb[24].mxu0  ;;  %1514 = vst [vmem:[%s1994_s3 + $0x48] sm:$0xff] %v1394_v29   ;;  %1530 = vst [vmem:[%s1994_s3 + $0xc8] sm:$0xff] %v1474_v30   ;;  %vm691_vm11 = vcmp.ge.f32.partialorder %v599_v27, 0.0  ;;  %v591_v41 = vadd.f32 %v1826_v34, %v590_v12  ;;  %v474_v42 = vadd.f32 %v1595_v13, %v1826_v34 }
 0x10a   :  { %v755_v37 = vmul.f32 0.1, %v599_v27  ;;  %vm657_vm12 = vcmp.ge.f32.partialorder %v463_v28, 0.0  ;;  %v721_v38 = vmul.f32 0.1, %v463_v28  ;;  %1513 = vst [vmem:[%s1994_s3 + $0x40] sm:$0xff] %v1389_v32   ;;  %v814_v39 = vsel %vm686_vm9, %v578_v22, %v750_v33 }
 0x10b   :  { %v787_v40 = vsel %vm659_vm10, %v471_v23, %v723_v35  ;;  %v1630_v43 = vpop.f32.mrb[24].mxu1  ;;  %v478_v44 = vpop.f32.mrb[25].mxu0  ;;  %v1469_v45 = vpack.c.bf16 %v814_v39, %v813_v20  ;;  %v602_v48 = vadd.f32 %v1627_v16, %v1826_v34  ;;  %vm689_vm13 = vcmp.ge.f32.partialorder %v591_v41, 0.0 }
 0x10c   :  { %v819_v46 = vsel %vm691_vm11, %v599_v27, %v755_v37  ;;  %v785_v47 = vsel %vm657_vm12, %v463_v28, %v721_v38  ;;  %v606_v49 = vpop.f32.mrb[25].mxu1  ;;  %v1599_v50 = vpop.f32.mrb[26].mxu0  ;;  %v753_v51 = vmul.f32 0.1, %v591_v41  ;;  %vm660_vm14 = vcmp.ge.f32.partialorder %v474_v42, 0.0 }
 0x10d   :  { %v724_v52 = vmul.f32 0.1, %v474_v42  ;;  %1529 = vst [vmem:[%s1994_s3 + $0xc0] sm:$0xff] %v1469_v45   ;;  %vm692_vm15 = vcmp.ge.f32.partialorder %v602_v48, 0.0  ;;  %v756_v53 = vmul.f32 0.1, %v602_v48  ;;  %v466_v54 = vadd.f32 %v1826_v34, %v465_v17 }
 0x10e   :  { %v594_v55 = vadd.f32 %v1826_v34, %v593_v24  ;;  %v1631_v56 = vpop.f32.mrb[26].mxu1  ;;  %v481_v57 = vpop.f32.mrb[27].mxu0  ;;  %v817_v58 = vsel %vm689_vm13, %v591_v41, %v753_v51  ;;  %v487_v60 = vadd.f32 %v1598_v36, %v1826_v34  ;;  %v615_v61 = vadd.f32 %v1630_v43, %v1826_v34 }
 0x10f   :  { %v788_v59 = vsel %vm660_vm14, %v474_v42, %v724_v52  ;;  %v609_v62 = vpop.f32.mrb[27].mxu1  ;;  %v820_v0 = vsel %vm692_vm15, %v602_v48, %v756_v53  ;;  %vm658_vm0 = vcmp.ge.f32.partialorder %v466_v54, 0.0  ;;  %v722_v1 = vmul.f32 0.1, %v466_v54 }
 0x110   :  { %v1404_v63 = vpack.c.bf16 %v788_v59, %v787_v40  ;;  %v1484_v2 = vpack.c.bf16 %v820_v0, %v819_v46  ;;  %vm690_vm1 = vcmp.ge.f32.partialorder %v594_v55, 0.0  ;;  %v754_v3 = vmul.f32 0.1, %v594_v55 }
 0x111   :  { %vm663_vm2 = vcmp.ge.f32.partialorder %v487_v60, 0.0  ;;  %v1602_v4 = vpop.f32.mrb[28].mxu0  ;;  %v786_v5 = vsel %vm658_vm0, %v466_v54, %v722_v1  ;;  %v727_v6 = vmul.f32 0.1, %v487_v60  ;;  %vm695_vm3 = vcmp.ge.f32.partialorder %v615_v61, 0.0  ;;  %v1634_v8 = vpop.f32.mrb[28].mxu1 }
 0x112   :  { %1516 = vst [vmem:[%s1994_s3 + $0x58] sm:$0xff] %v1404_v63   ;;  %v759_v7 = vmul.f32 0.1, %v615_v61  ;;  %1532 = vst [vmem:[%s1994_s3 + $0xd8] sm:$0xff] %v1484_v2   ;;  %v1399_v9 = vpack.c.bf16 %v786_v5, %v785_v47  ;;  %v818_v10 = vsel %vm690_vm1, %v594_v55, %v754_v3  ;;  %v479_v11 = vadd.f32 %v1826_v34, %v478_v44  ;;  %v494_v13 = vpop.f32.mrb[29].mxu0  ;;  %v622_v14 = vpop.f32.mrb[29].mxu1 }
 0x113   :  { %v607_v12 = vadd.f32 %v1826_v34, %v606_v49  ;;  %v1479_v15 = vpack.c.bf16 %v818_v10, %v817_v58  ;;  %v791_v16 = vsel %vm663_vm2, %v487_v60, %v727_v6  ;;  %v490_v18 = vadd.f32 %v1599_v50, %v1826_v34  ;;  %v1603_v19 = vpop.f32.mrb[30].mxu0  ;;  %v1635_v20 = vpop.f32.mrb[30].mxu1 }
 0x114   :  { %v823_v17 = vsel %vm695_vm3, %v615_v61, %v759_v7  ;;  %1515 = vst [vmem:[%s1994_s3 + $0x50] sm:$0xff] %v1399_v9   ;;  %vm661_vm4 = vcmp.ge.f32.partialorder %v479_v11, 0.0  ;;  %v725_v21 = vmul.f32 0.1, %v479_v11  ;;  %v618_v24 = vadd.f32 %v1631_v56, %v1826_v34  ;;  %v497_v26 = vpop.f32.mrb[31].mxu0  ;;  %v625_v27 = vpop.f32.mrb[31].mxu1 }
 0x115   :  { %vm693_vm5 = vcmp.ge.f32.partialorder %v607_v12, 0.0  ;;  %v757_v22 = vmul.f32 0.1, %v607_v12  ;;  %1531 = vst [vmem:[%s1994_s3 + $0xd0] sm:$0xff] %v1479_v15   ;;  %vm664_vm6 = vcmp.ge.f32.partialorder %v490_v18, 0.0  ;;  %v482_v25 = vadd.f32 %v1826_v34, %v481_v57 }
 0x116   :  { %v728_v23 = vmul.f32 0.1, %v490_v18  ;;  %v789_v28 = vsel %vm661_vm4, %v479_v11, %v725_v21  ;;  %v610_v30 = vadd.f32 %v1826_v34, %v609_v62  ;;  %v503_v31 = vadd.f32 %v1602_v4, %v1826_v34 }
 0x117   :  { %v821_v29 = vsel %vm693_vm5, %v607_v12, %v757_v22  ;;  %vm696_vm7 = vcmp.ge.f32.partialorder %v618_v24, 0.0  ;;  %v760_v33 = vmul.f32 0.1, %v618_v24  ;;  %vm662_vm8 = vcmp.ge.f32.partialorder %v482_v25, 0.0 }
 0x118   :  { %v792_v32 = vsel %vm664_vm6, %v490_v18, %v728_v23  ;;  %v726_v36 = vmul.f32 0.1, %v482_v25  ;;  %vm694_vm9 = vcmp.ge.f32.partialorder %v610_v30, 0.0  ;;  %v758_v37 = vmul.f32 0.1, %v610_v30 }
 0x119   :  { %v1414_v35 = vpack.c.bf16 %v792_v32, %v791_v16  ;;  %v824_v38 = vsel %vm696_vm7, %v618_v24, %v760_v33  ;;  %vm667_vm10 = vcmp.ge.f32.partialorder %v503_v31, 0.0  ;;  %v731_v39 = vmul.f32 0.1, %v503_v31 }
 0x11a   :  { %v631_v40 = vadd.f32 %v1634_v8, %v1826_v34  ;;  %v1494_v41 = vpack.c.bf16 %v824_v38, %v823_v17  ;;  %v790_v42 = vsel %vm662_vm8, %v482_v25, %v726_v36  ;;  %v822_v43 = vsel %vm694_vm9, %v610_v30, %v758_v37 }
 0x11b   :  { %1518 = vst [vmem:[%s1994_s3 + $0x68] sm:$0xff] %v1414_v35   ;;  %v495_v44 = vadd.f32 %v1826_v34, %v494_v13  ;;  %v1409_v45 = vpack.c.bf16 %v790_v42, %v789_v28  ;;  %v1489_v46 = vpack.c.bf16 %v822_v43, %v821_v29  ;;  %v795_v47 = vsel %vm667_vm10, %v503_v31, %v731_v39 }
 0x11c   :  { %1534 = vst [vmem:[%s1994_s3 + $0xe8] sm:$0xff] %v1494_v41   ;;  %v763_v48 = vmul.f32 0.1, %v631_v40  ;;  %v623_v49 = vadd.f32 %v1826_v34, %v622_v14  ;;  %v506_v50 = vadd.f32 %v1603_v19, %v1826_v34  ;;  %v634_v51 = vadd.f32 %v1635_v20, %v1826_v34 }
 0x11d   :  { %1517 = vst [vmem:[%s1994_s3 + $0x60] sm:$0xff] %v1409_v45   ;;  %1533 = vst [vmem:[%s1994_s3 + $0xe0] sm:$0xff] %v1489_v46   ;;  %v498_v52 = vadd.f32 %v1826_v34, %v497_v26  ;;  %v626_v53 = vadd.f32 %v1826_v34, %v625_v27  ;;  %vm699_vm11 = vcmp.ge.f32.partialorder %v631_v40, 0.0  ;;  %vm665_vm12 = vcmp.ge.f32.partialorder %v495_v44, 0.0 }
 0x11e   :  { %v729_v54 = vmul.f32 0.1, %v495_v44  ;;  %v761_v55 = vmul.f32 0.1, %v623_v49  ;;  %vm668_vm13 = vcmp.ge.f32.partialorder %v506_v50, 0.0  ;;  %vm700_vm14 = vcmp.ge.f32.partialorder %v634_v51, 0.0 }
 0x11f   :  { %v732_v56 = vmul.f32 0.1, %v506_v50  ;;  %v764_v57 = vmul.f32 0.1, %v634_v51  ;;  %vm697_vm15 = vcmp.ge.f32.partialorder %v623_v49, 0.0  ;;  %vm666_vm0 = vcmp.ge.f32.partialorder %v498_v52, 0.0 }
 0x120   :  { %v730_v58 = vmul.f32 0.1, %v498_v52  ;;  %vm698_vm1 = vcmp.ge.f32.partialorder %v626_v53, 0.0  ;;  %v827_v59 = vsel %vm699_vm11, %v631_v40, %v763_v48  ;;  %v762_v62 = vmul.f32 0.1, %v626_v53 }
 0x121   :  { %v796_v60 = vsel %vm668_vm13, %v506_v50, %v732_v56  ;;  %v828_v61 = vsel %vm700_vm14, %v634_v51, %v764_v57  ;;  %v793_v63 = vsel %vm665_vm12, %v495_v44, %v729_v54  ;;  %v825_v2 = vsel %vm697_vm15, %v623_v49, %v761_v55 }
 0x122   :  { %v1424_v0 = vpack.c.bf16 %v796_v60, %v795_v47  ;;  %v1504_v1 = vpack.c.bf16 %v828_v61, %v827_v59  ;;  %v794_v34 = vsel %vm666_vm0, %v498_v52, %v730_v58  ;;  %v826_v4 = vsel %vm698_vm1, %v626_v53, %v762_v62 }
 0x123   :  { %v1419_v3 = vpack.c.bf16 %v794_v34, %v793_v63  ;;  %v1499_v5 = vpack.c.bf16 %v826_v4, %v825_v2 }
 0x124   :  { %1520 = vst [vmem:[%s1994_s3 + $0x78] sm:$0xff] %v1424_v0   ;;  %1536 = vst [vmem:[%s1994_s3 + $0xf8] sm:$0xff] %v1504_v1  }
 0x125   :  { %1519 = vst [vmem:[%s1994_s3 + $0x70] sm:$0xff] %v1419_v3   ;;  %1535 = vst [vmem:[%s1994_s3 + $0xf0] sm:$0xff] %v1499_v5  }

// kernel: _lambda_.40
= control target key start
LH: loop header
LB: loop body
LE: loop exit
PB: predicated region body
PF: predicated region fallthrough
CT: control target
= control target key end

     0   :  { %vm266_vm0 = vcmask 293888   ;;  %vm363_vm1 = vcmask 1041408   ;;  %s2038_s1 = inlined_call_operand.vmem [shape: bf16[36,128], index: 1, kind: input, shape index: {}]   ;;  %s2039_s0 = inlined_call_operand.vmem [shape: bf16[512,36], index: 0, kind: input, shape index: {}]   ;;  %s2040_s2 = inlined_call_operand.vmem [shape: f32[1,128], index: 2, kind: input, shape index: {}]   ;;  %s2041_s3 = inlined_call_operand.vmem [shape: bf16[512,128], index: 3, kind: output, shape index: {}]  }
   0x1   :  { %v1672_v0 = vld [vmem:[%s2038_s1] sm:$0xff]   ;;  %v1673_v1 = vld [vmem:[%s2038_s1 + $0x8] sm:$0xff]   ;;  %v1674_v2 = vld [vmem:[%s2038_s1 + $0x10] ss:$0 sps:$4 sm:$0x33]  }
   0x2   :  { %1594 = vmatprep.subr.bf16.mxu0 %v1672_v0  ;;  %1664 = vmatprep.subr.bf16.mxu1 %v1672_v0  ;;  %v1675_v3 = vld [vmem:[%s2039_s0] sm:$0xff]   ;;  %v365_v5 = vsel %vm363_vm1, %v1674_v2, 0  ;;  %v1677_v6 = vld [vmem:[%s2039_s0 + $0x8] sm:$0xff]   ;;  %v1679_v8 = vld [vmem:[%s2039_s0 + $0x10] sm:$0xff]  }
   0x3   :  { %1595 = vmatpush3.bf16.msra.mxu0 %v1672_v0  ;;  %1667 = vmatpush3.bf16.msra.mxu1 %v1672_v0  ;;  %v1676_v4 = vld [vmem:[%s2039_s0 + $0x80] sm:$0xff]   ;;  %v1678_v7 = vld [vmem:[%s2039_s0 + $0x88] sm:$0xff]   ;;  %v1680_v9 = vld [vmem:[%s2039_s0 + $0x90] sm:$0xff]  }
   0x4   :  { %1596 = vmatprep.subr.bf16.mxu0 %v1673_v1  ;;  %1665 = vmatprep.subr.bf16.mxu1 %v1673_v1  ;;  %v1681_v10 = vld [vmem:[%s2039_s0 + $0x18] sm:$0xff]   ;;  %v1683_v12 = vld [vmem:[%s2039_s0 + $0x20] sm:$0xff]   ;;  %v1685_v14 = vld [vmem:[%s2039_s0 + $0x28] sm:$0xff]  }
   0x5   :  { %1600 = vmatprep.mubr.msk.bf16.mxu0 %vm266_vm0, %v1675_v3  ;;  %1632 = vmatprep.mubr.msk.bf16.mxu1 %vm266_vm0, %v1676_v4  ;;  %v1682_v11 = vld [vmem:[%s2039_s0 + $0x98] sm:$0xff]   ;;  %v1684_v13 = vld [vmem:[%s2039_s0 + $0xa0] sm:$0xff]   ;;  %v1686_v15 = vld [vmem:[%s2039_s0 + $0xa8] sm:$0xff]  }
   0x6   :  { %v1687_v16 = vld [vmem:[%s2039_s0 + $0x30] sm:$0xff]   ;;  %v1689_v18 = vld [vmem:[%s2039_s0 + $0x38] sm:$0xff]   ;;  %v1691_v20 = vld [vmem:[%s2039_s0 + $0x40] sm:$0xff]  }
   0x7   :  { %1597 = vmatpush3.bf16.msra.mxu0 %v1673_v1  ;;  %1668 = vmatpush3.bf16.msra.mxu1 %v1673_v1  ;;  %v1688_v17 = vld [vmem:[%s2039_s0 + $0xb0] sm:$0xff]   ;;  %v1690_v19 = vld [vmem:[%s2039_s0 + $0xb8] sm:$0xff]   ;;  %v1692_v21 = vld [vmem:[%s2039_s0 + $0xc0] sm:$0xff]  }
   0x8   :  { %1670 = vmatprep.subr.msk.bf16.mxu0 %vm363_vm1, %v1674_v2  ;;  %1671 = vmatprep.subr.msk.bf16.mxu1 %vm363_vm1, %v1674_v2  ;;  %v1693_v22 = vld [vmem:[%s2039_s0 + $0x48] sm:$0xff]   ;;  %v1695_v24 = vld [vmem:[%s2039_s0 + $0x50] sm:$0xff]   ;;  %v1697_v26 = vld [vmem:[%s2039_s0 + $0x58] sm:$0xff]  }
   0x9   :  { %v1694_v23 = vld [vmem:[%s2039_s0 + $0xc8] sm:$0xff]   ;;  %v1696_v25 = vld [vmem:[%s2039_s0 + $0xd0] sm:$0xff]   ;;  %v1698_v27 = vld [vmem:[%s2039_s0 + $0xd8] sm:$0xff]  }
   0xa   :  { %v1699_v28 = vld [vmem:[%s2039_s0 + $0x60] sm:$0xff]   ;;  %v1701_v30 = vld [vmem:[%s2039_s0 + $0x68] sm:$0xff]   ;;  %v1703_v32 = vld [vmem:[%s2039_s0 + $0x70] sm:$0xff]  }
   0xb   :  { %1599 = vmatpush3.bf16.msra.mxu0 %v365_v5  ;;  %1669 = vmatpush3.bf16.msra.mxu1 %v365_v5  ;;  %v1700_v29 = vld [vmem:[%s2039_s0 + $0xe0] sm:$0xff]   ;;  %v1702_v31 = vld [vmem:[%s2039_s0 + $0xe8] sm:$0xff]   ;;  %v1704_v33 = vld [vmem:[%s2039_s0 + $0xf0] sm:$0xff]  }
   0xc   :  { %v1705_v34 = vld [vmem:[%s2039_s0 + $0x78] sm:$0xff]   ;;  %v1867_v36 = vld [vmem:[%s2040_s2] ss:$0 sm:$0xff] }
   0xd   :  { %v1706_v35 = vld [vmem:[%s2039_s0 + $0xf8] sm:$0xff]  }
   0xe   :  { %1601 = vmatmul.mubr.msk.bf16.vlgmr.msra.gmra.mrb[0].mxu0 %vm266_vm0, %v1677_v6  ;;  %1633 = vmatmul.mubr.msk.bf16.vlgmr.msra.gmra.mrb[0].mxu1 %vm266_vm0, %v1678_v7 }
   0xf   :  { %1604 = vmatprep.mubr.msk.bf16.mxu0 %vm266_vm0, %v1679_v8  ;;  %1636 = vmatprep.mubr.msk.bf16.mxu1 %vm266_vm0, %v1680_v9 }
  0x16   :  { %1605 = vmatmul.mubr.msk.bf16.gmra.mrb[4].mxu0 %vm266_vm0, %v1681_v10  ;;  %1637 = vmatmul.mubr.msk.bf16.gmra.mrb[4].mxu1 %vm266_vm0, %v1682_v11 }
  0x17   :  { %1608 = vmatprep.mubr.msk.bf16.mxu0 %vm266_vm0, %v1683_v12  ;;  %1640 = vmatprep.mubr.msk.bf16.mxu1 %vm266_vm0, %v1684_v13 }
  0x1e   :  { %1609 = vmatmul.mubr.msk.bf16.gmra.mrb[8].mxu0 %vm266_vm0, %v1685_v14  ;;  %1641 = vmatmul.mubr.msk.bf16.gmra.mrb[8].mxu1 %vm266_vm0, %v1686_v15 }
  0x1f   :  { %1612 = vmatprep.mubr.msk.bf16.mxu0 %vm266_vm0, %v1687_v16  ;;  %1644 = vmatprep.mubr.msk.bf16.mxu1 %vm266_vm0, %v1688_v17 }
  0x26   :  { %1613 = vmatmul.mubr.msk.bf16.gmra.mrb[12].mxu0 %vm266_vm0, %v1689_v18  ;;  %1645 = vmatmul.mubr.msk.bf16.gmra.mrb[12].mxu1 %vm266_vm0, %v1690_v19 }
  0x27   :  { %1616 = vmatprep.mubr.msk.bf16.mxu0 %vm266_vm0, %v1691_v20  ;;  %1648 = vmatprep.mubr.msk.bf16.mxu1 %vm266_vm0, %v1692_v21 }
  0x2e   :  { %1617 = vmatmul.mubr.msk.bf16.gmra.mrb[16].mxu0 %vm266_vm0, %v1693_v22  ;;  %1649 = vmatmul.mubr.msk.bf16.gmra.mrb[16].mxu1 %vm266_vm0, %v1694_v23 }
  0x2f   :  { %1620 = vmatprep.mubr.msk.bf16.mxu0 %vm266_vm0, %v1695_v24  ;;  %1652 = vmatprep.mubr.msk.bf16.mxu1 %vm266_vm0, %v1696_v25 }
  0x36   :  { %1621 = vmatmul.mubr.msk.bf16.gmra.mrb[20].mxu0 %vm266_vm0, %v1697_v26  ;;  %1653 = vmatmul.mubr.msk.bf16.gmra.mrb[20].mxu1 %vm266_vm0, %v1698_v27 }
  0x37   :  { %1624 = vmatprep.mubr.msk.bf16.mxu0 %vm266_vm0, %v1699_v28  ;;  %1656 = vmatprep.mubr.msk.bf16.mxu1 %vm266_vm0, %v1700_v29 }
  0x3e   :  { %1625 = vmatmul.mubr.msk.bf16.gmra.mrb[24].mxu0 %vm266_vm0, %v1701_v30  ;;  %1657 = vmatmul.mubr.msk.bf16.gmra.mrb[24].mxu1 %vm266_vm0, %v1702_v31 }
  0x3f   :  { %1628 = vmatprep.mubr.msk.bf16.mxu0 %vm266_vm0, %v1703_v32  ;;  %1660 = vmatprep.mubr.msk.bf16.mxu1 %vm266_vm0, %v1704_v33 }
  0x46   :  { %1629 = vmatmul.mubr.msk.bf16.gmra.mrb[28].mxu0 %vm266_vm0, %v1705_v34  ;;  %1661 = vmatmul.mubr.msk.bf16.gmra.mrb[28].mxu1 %vm266_vm0, %v1706_v35 }
  0xe1   :  { %v1602_v37 = vpop.f32.mrb[0].mxu0  ;;  %v1634_v38 = vpop.f32.mrb[0].mxu1 }
  0xe2   :  { %v410_v39 = vadd.f32 %v1602_v37, %v1867_v36  ;;  %v538_v40 = vadd.f32 %v1634_v38, %v1867_v36  ;;  %v401_v41 = vpop.f32.mrb[1].mxu0  ;;  %v529_v42 = vpop.f32.mrb[1].mxu1 }
  0xe3   :  { %v402_v43 = vadd.f32 %v1867_v36, %v401_v41  ;;  %v530_v44 = vadd.f32 %v1867_v36, %v529_v42  ;;  %v1603_v45 = vpop.f32.mrb[2].mxu0  ;;  %v1635_v46 = vpop.f32.mrb[2].mxu1 }
  0xe4   :  { %vm658_vm2 = vcmp.ge.f32.partialorder %v410_v39, 0.0  ;;  %v722_v47 = vmul.f32 0.1, %v410_v39  ;;  %vm690_vm3 = vcmp.ge.f32.partialorder %v538_v40, 0.0  ;;  %v754_v48 = vmul.f32 0.1, %v538_v40 }
  0xe5   :  { %vm656_vm4 = vcmp.ge.f32.partialorder %v402_v43, 0.0  ;;  %v720_v49 = vmul.f32 0.1, %v402_v43  ;;  %vm688_vm5 = vcmp.ge.f32.partialorder %v530_v44, 0.0  ;;  %v752_v50 = vmul.f32 0.1, %v530_v44 }
  0xe6   :  { %v413_v51 = vadd.f32 %v1603_v45, %v1867_v36  ;;  %v541_v52 = vadd.f32 %v1635_v46, %v1867_v36  ;;  %v404_v53 = vpop.f32.mrb[3].mxu0  ;;  %v532_v54 = vpop.f32.mrb[3].mxu1  ;;  %v786_v55 = vsel %vm658_vm2, %v410_v39, %v722_v47  ;;  %v818_v56 = vsel %vm690_vm3, %v538_v40, %v754_v48 }
  0xe7   :  { %v405_v57 = vadd.f32 %v1867_v36, %v404_v53  ;;  %v533_v58 = vadd.f32 %v1867_v36, %v532_v54  ;;  %v784_v63 = vsel %vm656_vm4, %v402_v43, %v720_v49  ;;  %v816_v0 = vsel %vm688_vm5, %v530_v44, %v752_v50 }
  0xe8   :  { %vm659_vm6 = vcmp.ge.f32.partialorder %v413_v51, 0.0  ;;  %v723_v59 = vmul.f32 0.1, %v413_v51  ;;  %vm691_vm7 = vcmp.ge.f32.partialorder %v541_v52, 0.0  ;;  %v755_v60 = vmul.f32 0.1, %v541_v52 }
  0xe9   :  { %vm657_vm8 = vcmp.ge.f32.partialorder %v405_v57, 0.0  ;;  %v721_v61 = vmul.f32 0.1, %v405_v57  ;;  %vm689_vm9 = vcmp.ge.f32.partialorder %v533_v58, 0.0  ;;  %v753_v62 = vmul.f32 0.1, %v533_v58 }
  0xea   :  { %v787_v1 = vsel %vm659_vm6, %v413_v51, %v723_v59  ;;  %v819_v2 = vsel %vm691_vm7, %v541_v52, %v755_v60  ;;  %v1606_v3 = vpop.f32.mrb[4].mxu0  ;;  %v1638_v4 = vpop.f32.mrb[4].mxu1 }
  0xeb   :  { %v1376_v5 = vpack.c.bf16 %v787_v1, %v786_v55  ;;  %v1456_v6 = vpack.c.bf16 %v819_v2, %v818_v56  ;;  %v785_v7 = vsel %vm657_vm8, %v405_v57, %v721_v61  ;;  %v817_v8 = vsel %vm689_vm9, %v533_v58, %v753_v62  ;;  %v417_v9 = vpop.f32.mrb[5].mxu0  ;;  %v545_v10 = vpop.f32.mrb[5].mxu1 }
  0xec   :  { %v1371_v11 = vpack.c.bf16 %v785_v7, %v784_v63  ;;  %v1451_v12 = vpack.c.bf16 %v817_v8, %v816_v0  ;;  %v426_v13 = vadd.f32 %v1606_v3, %v1867_v36  ;;  %v554_v14 = vadd.f32 %v1638_v4, %v1867_v36  ;;  %v1607_v15 = vpop.f32.mrb[6].mxu0  ;;  %v1639_v16 = vpop.f32.mrb[6].mxu1 }
  0xed   :  { %1528 = vst [vmem:[%s2041_s3 + $0x8] sm:$0xff] %v1376_v5   ;;  %1544 = vst [vmem:[%s2041_s3 + $0x88] sm:$0xff] %v1456_v6   ;;  %v418_v17 = vadd.f32 %v1867_v36, %v417_v9  ;;  %v546_v18 = vadd.f32 %v1867_v36, %v545_v10  ;;  %v429_v19 = vadd.f32 %v1607_v15, %v1867_v36  ;;  %v420_v21 = vpop.f32.mrb[7].mxu0  ;;  %v548_v22 = vpop.f32.mrb[7].mxu1 }
  0xee   :  { %v557_v20 = vadd.f32 %v1639_v16, %v1867_v36  ;;  %1372 = vst [vmem:[%s2041_s3] sm:$0xff] %v1371_v11   ;;  %1543 = vst [vmem:[%s2041_s3 + $0x80] sm:$0xff] %v1451_v12   ;;  %vm662_vm10 = vcmp.ge.f32.partialorder %v426_v13, 0.0  ;;  %v726_v23 = vmul.f32 0.1, %v426_v13  ;;  %vm694_vm11 = vcmp.ge.f32.partialorder %v554_v14, 0.0 }
  0xef   :  { %v758_v24 = vmul.f32 0.1, %v554_v14  ;;  %vm660_vm12 = vcmp.ge.f32.partialorder %v418_v17, 0.0  ;;  %v724_v25 = vmul.f32 0.1, %v418_v17  ;;  %vm692_vm13 = vcmp.ge.f32.partialorder %v546_v18, 0.0 }
  0xf0   :  { %v756_v26 = vmul.f32 0.1, %v546_v18  ;;  %v790_v27 = vsel %vm662_vm10, %v426_v13, %v726_v23  ;;  %vm663_vm14 = vcmp.ge.f32.partialorder %v429_v19, 0.0  ;;  %v727_v29 = vmul.f32 0.1, %v429_v19 }
  0xf1   :  { %v822_v28 = vsel %vm694_vm11, %v554_v14, %v758_v24  ;;  %v788_v30 = vsel %vm660_vm12, %v418_v17, %v724_v25  ;;  %vm695_vm15 = vcmp.ge.f32.partialorder %v557_v20, 0.0  ;;  %v759_v32 = vmul.f32 0.1, %v557_v20  ;;  %v1610_v33 = vpop.f32.mrb[8].mxu0  ;;  %v1642_v34 = vpop.f32.mrb[8].mxu1 }
  0xf2   :  { %v820_v31 = vsel %vm692_vm13, %v546_v18, %v756_v26  ;;  %v791_v35 = vsel %vm663_vm14, %v429_v19, %v727_v29  ;;  %v421_v37 = vadd.f32 %v1867_v36, %v420_v21  ;;  %v549_v38 = vadd.f32 %v1867_v36, %v548_v22  ;;  %v433_v40 = vpop.f32.mrb[9].mxu0  ;;  %v561_v41 = vpop.f32.mrb[9].mxu1 }
  0xf3   :  { %v442_v39 = vadd.f32 %v1610_v33, %v1867_v36  ;;  %v1386_v42 = vpack.c.bf16 %v791_v35, %v790_v27  ;;  %v823_v43 = vsel %vm695_vm15, %v557_v20, %v759_v32  ;;  %v570_v44 = vadd.f32 %v1642_v34, %v1867_v36  ;;  %v1611_v46 = vpop.f32.mrb[10].mxu0  ;;  %v1643_v47 = vpop.f32.mrb[10].mxu1 }
  0xf4   :  { %v434_v45 = vadd.f32 %v1867_v36, %v433_v40  ;;  %v1466_v48 = vpack.c.bf16 %v823_v43, %v822_v28  ;;  %vm661_vm0 = vcmp.ge.f32.partialorder %v421_v37, 0.0  ;;  %v725_v49 = vmul.f32 0.1, %v421_v37  ;;  %v436_v50 = vpop.f32.mrb[11].mxu0  ;;  %v564_v51 = vpop.f32.mrb[11].mxu1 }
  0xf5   :  { %vm693_vm1 = vcmp.ge.f32.partialorder %v549_v38, 0.0  ;;  %1530 = vst [vmem:[%s2041_s3 + $0x18] sm:$0xff] %v1386_v42   ;;  %v757_v52 = vmul.f32 0.1, %v549_v38  ;;  %vm666_vm2 = vcmp.ge.f32.partialorder %v442_v39, 0.0  ;;  %vm698_vm3 = vcmp.ge.f32.partialorder %v570_v44, 0.0 }
  0xf6   :  { %v730_v53 = vmul.f32 0.1, %v442_v39  ;;  %1546 = vst [vmem:[%s2041_s3 + $0x98] sm:$0xff] %v1466_v48   ;;  %v789_v54 = vsel %vm661_vm0, %v421_v37, %v725_v49  ;;  %v762_v55 = vmul.f32 0.1, %v570_v44  ;;  %vm664_vm4 = vcmp.ge.f32.partialorder %v434_v45, 0.0 }
  0xf7   :  { %v728_v56 = vmul.f32 0.1, %v434_v45  ;;  %v1381_v57 = vpack.c.bf16 %v789_v54, %v788_v30  ;;  %v821_v58 = vsel %vm693_vm1, %v549_v38, %v757_v52  ;;  %v562_v60 = vadd.f32 %v1867_v36, %v561_v41 }
  0xf8   :  { %v794_v59 = vsel %vm666_vm2, %v442_v39, %v730_v53  ;;  %v1461_v61 = vpack.c.bf16 %v821_v58, %v820_v31  ;;  %v826_v62 = vsel %vm698_vm3, %v570_v44, %v762_v55  ;;  %v445_v0 = vadd.f32 %v1611_v46, %v1867_v36 }
  0xf9   :  { %v792_v63 = vsel %vm664_vm4, %v434_v45, %v728_v56  ;;  %1529 = vst [vmem:[%s2041_s3 + $0x10] sm:$0xff] %v1381_v57   ;;  %vm696_vm5 = vcmp.ge.f32.partialorder %v562_v60, 0.0  ;;  %v760_v1 = vmul.f32 0.1, %v562_v60  ;;  %v573_v2 = vadd.f32 %v1643_v47, %v1867_v36  ;;  %v1614_v4 = vpop.f32.mrb[12].mxu0  ;;  %v1646_v5 = vpop.f32.mrb[12].mxu1 }
  0xfa   :  { %v437_v3 = vadd.f32 %v1867_v36, %v436_v50  ;;  %1545 = vst [vmem:[%s2041_s3 + $0x90] sm:$0xff] %v1461_v61   ;;  %vm667_vm6 = vcmp.ge.f32.partialorder %v445_v0, 0.0  ;;  %v731_v6 = vmul.f32 0.1, %v445_v0  ;;  %v565_v7 = vadd.f32 %v1867_v36, %v564_v51  ;;  %v449_v9 = vpop.f32.mrb[13].mxu0  ;;  %v577_v10 = vpop.f32.mrb[13].mxu1 }
  0xfb   :  { %v458_v8 = vadd.f32 %v1614_v4, %v1867_v36  ;;  %v824_v11 = vsel %vm696_vm5, %v562_v60, %v760_v1  ;;  %vm699_vm7 = vcmp.ge.f32.partialorder %v573_v2, 0.0  ;;  %v763_v12 = vmul.f32 0.1, %v573_v2  ;;  %v1615_v13 = vpop.f32.mrb[14].mxu0  ;;  %v1647_v14 = vpop.f32.mrb[14].mxu1 }
  0xfc   :  { %vm665_vm8 = vcmp.ge.f32.partialorder %v437_v3, 0.0  ;;  %v795_v15 = vsel %vm667_vm6, %v445_v0, %v731_v6  ;;  %v729_v16 = vmul.f32 0.1, %v437_v3  ;;  %vm697_vm9 = vcmp.ge.f32.partialorder %v565_v7, 0.0  ;;  %v452_v18 = vpop.f32.mrb[15].mxu0  ;;  %v580_v22 = vpop.f32.mrb[15].mxu1 }
  0xfd   :  { %v761_v17 = vmul.f32 0.1, %v565_v7  ;;  %v1396_v19 = vpack.c.bf16 %v795_v15, %v794_v59  ;;  %v827_v20 = vsel %vm699_vm7, %v573_v2, %v763_v12  ;;  %vm670_vm10 = vcmp.ge.f32.partialorder %v458_v8, 0.0 }
  0xfe   :  { %v734_v21 = vmul.f32 0.1, %v458_v8  ;;  %v1476_v23 = vpack.c.bf16 %v827_v20, %v826_v62  ;;  %v793_v24 = vsel %vm665_vm8, %v437_v3, %v729_v16  ;;  %v586_v26 = vadd.f32 %v1646_v5, %v1867_v36 }
  0xff   :  { %v825_v25 = vsel %vm697_vm9, %v565_v7, %v761_v17  ;;  %1532 = vst [vmem:[%s2041_s3 + $0x28] sm:$0xff] %v1396_v19   ;;  %v1391_v27 = vpack.c.bf16 %v793_v24, %v792_v63  ;;  %v450_v30 = vadd.f32 %v1867_v36, %v449_v9  ;;  %v578_v32 = vadd.f32 %v1867_v36, %v577_v10 }
 0x100   :  { %v1471_v28 = vpack.c.bf16 %v825_v25, %v824_v11  ;;  %v798_v29 = vsel %vm670_vm10, %v458_v8, %v734_v21  ;;  %1548 = vst [vmem:[%s2041_s3 + $0xa8] sm:$0xff] %v1476_v23   ;;  %vm702_vm11 = vcmp.ge.f32.partialorder %v586_v26, 0.0  ;;  %v766_v31 = vmul.f32 0.1, %v586_v26 }
 0x101   :  { %v461_v33 = vadd.f32 %v1615_v13, %v1867_v36  ;;  %1531 = vst [vmem:[%s2041_s3 + $0x20] sm:$0xff] %v1391_v27   ;;  %vm668_vm12 = vcmp.ge.f32.partialorder %v450_v30, 0.0  ;;  %v732_v34 = vmul.f32 0.1, %v450_v30  ;;  %v589_v35 = vadd.f32 %v1647_v14, %v1867_v36  ;;  %v1618_v38 = vpop.f32.mrb[16].mxu0  ;;  %v1650_v39 = vpop.f32.mrb[16].mxu1 }
 0x102   :  { %1547 = vst [vmem:[%s2041_s3 + $0xa0] sm:$0xff] %v1471_v28   ;;  %v453_v37 = vadd.f32 %v1867_v36, %v452_v18  ;;  %v830_v40 = vsel %vm702_vm11, %v586_v26, %v766_v31  ;;  %vm700_vm13 = vcmp.ge.f32.partialorder %v578_v32, 0.0  ;;  %v764_v41 = vmul.f32 0.1, %v578_v32  ;;  %v465_v42 = vpop.f32.mrb[17].mxu0  ;;  %v593_v43 = vpop.f32.mrb[17].mxu1 }
 0x103   :  { %vm671_vm14 = vcmp.ge.f32.partialorder %v461_v33, 0.0  ;;  %v796_v44 = vsel %vm668_vm12, %v450_v30, %v732_v34  ;;  %v735_v45 = vmul.f32 0.1, %v461_v33  ;;  %vm703_vm15 = vcmp.ge.f32.partialorder %v589_v35, 0.0  ;;  %v1619_v47 = vpop.f32.mrb[18].mxu0  ;;  %v1651_v51 = vpop.f32.mrb[18].mxu1 }
 0x104   :  { %v767_v46 = vmul.f32 0.1, %v589_v35  ;;  %v828_v48 = vsel %vm700_vm13, %v578_v32, %v764_v41  ;;  %vm669_vm0 = vcmp.ge.f32.partialorder %v453_v37, 0.0  ;;  %v733_v49 = vmul.f32 0.1, %v453_v37  ;;  %v468_v52 = vpop.f32.mrb[19].mxu0 }
 0x105   :  { %v581_v50 = vadd.f32 %v1867_v36, %v580_v22  ;;  %v799_v53 = vsel %vm671_vm14, %v461_v33, %v735_v45  ;;  %v474_v55 = vadd.f32 %v1618_v38, %v1867_v36  ;;  %v602_v56 = vadd.f32 %v1650_v39, %v1867_v36  ;;  %v596_v57 = vpop.f32.mrb[19].mxu1 }
 0x106   :  { %v831_v54 = vsel %vm703_vm15, %v589_v35, %v767_v46  ;;  %v1406_v58 = vpack.c.bf16 %v799_v53, %v798_v29  ;;  %v797_v60 = vsel %vm669_vm0, %v453_v37, %v733_v49  ;;  %v466_v1 = vadd.f32 %v1867_v36, %v465_v42 }
 0x107   :  { %v1486_v59 = vpack.c.bf16 %v831_v54, %v830_v40  ;;  %vm701_vm1 = vcmp.ge.f32.partialorder %v581_v50, 0.0  ;;  %v1401_v61 = vpack.c.bf16 %v797_v60, %v796_v44  ;;  %v765_v62 = vmul.f32 0.1, %v581_v50 }
 0x108   :  { %vm674_vm2 = vcmp.ge.f32.partialorder %v474_v55, 0.0  ;;  %v738_v63 = vmul.f32 0.1, %v474_v55  ;;  %1534 = vst [vmem:[%s2041_s3 + $0x38] sm:$0xff] %v1406_v58   ;;  %vm706_vm3 = vcmp.ge.f32.partialorder %v602_v56, 0.0  ;;  %v594_v2 = vadd.f32 %v1867_v36, %v593_v43 }
 0x109   :  { %1550 = vst [vmem:[%s2041_s3 + $0xb8] sm:$0xff] %v1486_v59   ;;  %v770_v0 = vmul.f32 0.1, %v602_v56  ;;  %1533 = vst [vmem:[%s2041_s3 + $0x30] sm:$0xff] %v1401_v61   ;;  %v829_v3 = vsel %vm701_vm1, %v581_v50, %v765_v62  ;;  %v477_v5 = vadd.f32 %v1619_v47, %v1867_v36  ;;  %v605_v6 = vadd.f32 %v1651_v51, %v1867_v36  ;;  %v1622_v7 = vpop.f32.mrb[20].mxu0  ;;  %v1654_v8 = vpop.f32.mrb[20].mxu1 }
 0x10a   :  { %v802_v4 = vsel %vm674_vm2, %v474_v55, %v738_v63  ;;  %v1481_v9 = vpack.c.bf16 %v829_v3, %v828_v48  ;;  %vm672_vm4 = vcmp.ge.f32.partialorder %v466_v1, 0.0  ;;  %v736_v11 = vmul.f32 0.1, %v466_v1  ;;  %v481_v12 = vpop.f32.mrb[21].mxu0  ;;  %v609_v13 = vpop.f32.mrb[21].mxu1 }
 0x10b   :  { %v834_v10 = vsel %vm706_vm3, %v602_v56, %v770_v0  ;;  %vm704_vm5 = vcmp.ge.f32.partialorder %v594_v2, 0.0  ;;  %v768_v14 = vmul.f32 0.1, %v594_v2  ;;  %vm675_vm6 = vcmp.ge.f32.partialorder %v477_v5, 0.0  ;;  %v1623_v19 = vpop.f32.mrb[22].mxu0  ;;  %v1655_v20 = vpop.f32.mrb[22].mxu1 }
 0x10c   :  { %v739_v15 = vmul.f32 0.1, %v477_v5  ;;  %1549 = vst [vmem:[%s2041_s3 + $0xb0] sm:$0xff] %v1481_v9   ;;  %v800_v16 = vsel %vm672_vm4, %v466_v1, %v736_v11  ;;  %vm707_vm7 = vcmp.ge.f32.partialorder %v605_v6, 0.0  ;;  %v771_v17 = vmul.f32 0.1, %v605_v6 }
 0x10d   :  { %v469_v18 = vadd.f32 %v1867_v36, %v468_v52  ;;  %v832_v21 = vsel %vm704_vm5, %v594_v2, %v768_v14  ;;  %v597_v23 = vadd.f32 %v1867_v36, %v596_v57  ;;  %v490_v24 = vadd.f32 %v1622_v7, %v1867_v36  ;;  %v484_v25 = vpop.f32.mrb[23].mxu0  ;;  %v612_v26 = vpop.f32.mrb[23].mxu1 }
 0x10e   :  { %v803_v22 = vsel %vm675_vm6, %v477_v5, %v739_v15  ;;  %v835_v28 = vsel %vm707_vm7, %v605_v6, %v771_v17  ;;  %v618_v34 = vadd.f32 %v1654_v8, %v1867_v36  ;;  %v482_v35 = vadd.f32 %v1867_v36, %v481_v12 }
 0x10f   :  { %v1416_v27 = vpack.c.bf16 %v803_v22, %v802_v4  ;;  %vm673_vm8 = vcmp.ge.f32.partialorder %v469_v18, 0.0  ;;  %v737_v29 = vmul.f32 0.1, %v469_v18  ;;  %v1496_v30 = vpack.c.bf16 %v835_v28, %v834_v10 }
 0x110   :  { %vm705_vm9 = vcmp.ge.f32.partialorder %v597_v23, 0.0  ;;  %v769_v31 = vmul.f32 0.1, %v597_v23  ;;  %vm678_vm10 = vcmp.ge.f32.partialorder %v490_v24, 0.0  ;;  %v742_v33 = vmul.f32 0.1, %v490_v24 }
 0x111   :  { %1536 = vst [vmem:[%s2041_s3 + $0x48] sm:$0xff] %v1416_v27   ;;  %v801_v32 = vsel %vm673_vm8, %v469_v18, %v737_v29  ;;  %1552 = vst [vmem:[%s2041_s3 + $0xc8] sm:$0xff] %v1496_v30   ;;  %v610_v39 = vadd.f32 %v1867_v36, %v609_v13  ;;  %v493_v40 = vadd.f32 %v1623_v19, %v1867_v36  ;;  %v1626_v41 = vpop.f32.mrb[24].mxu0  ;;  %v1658_v42 = vpop.f32.mrb[24].mxu1  ;;  %vm710_vm11 = vcmp.ge.f32.partialorder %v618_v34, 0.0 }
 0x112   :  { %v1411_v37 = vpack.c.bf16 %v801_v32, %v800_v16  ;;  %v833_v38 = vsel %vm705_vm9, %v597_v23, %v769_v31  ;;  %v774_v44 = vmul.f32 0.1, %v618_v34  ;;  %v497_v45 = vpop.f32.mrb[25].mxu0  ;;  %v625_v46 = vpop.f32.mrb[25].mxu1  ;;  %v806_v47 = vsel %vm678_vm10, %v490_v24, %v742_v33 }
 0x113   :  { %v1491_v43 = vpack.c.bf16 %v833_v38, %v832_v21  ;;  %vm676_vm12 = vcmp.ge.f32.partialorder %v482_v35, 0.0  ;;  %v740_v48 = vmul.f32 0.1, %v482_v35  ;;  %v772_v49 = vmul.f32 0.1, %v610_v39  ;;  %v1627_v52 = vpop.f32.mrb[26].mxu0 }
 0x114   :  { %1535 = vst [vmem:[%s2041_s3 + $0x40] sm:$0xff] %v1411_v37   ;;  %vm708_vm13 = vcmp.ge.f32.partialorder %v610_v39, 0.0  ;;  %vm679_vm14 = vcmp.ge.f32.partialorder %v493_v40, 0.0  ;;  %v743_v50 = vmul.f32 0.1, %v493_v40  ;;  %v621_v51 = vadd.f32 %v1655_v20, %v1867_v36  ;;  %v1659_v53 = vpop.f32.mrb[26].mxu1 }
 0x115   :  { %1551 = vst [vmem:[%s2041_s3 + $0xc0] sm:$0xff] %v1491_v43   ;;  %v838_v54 = vsel %vm710_vm11, %v618_v34, %v774_v44  ;;  %v804_v55 = vsel %vm676_vm12, %v482_v35, %v740_v48  ;;  %v485_v56 = vadd.f32 %v1867_v36, %v484_v25  ;;  %v613_v57 = vadd.f32 %v1867_v36, %v612_v26  ;;  %v500_v58 = vpop.f32.mrb[27].mxu0  ;;  %v628_v59 = vpop.f32.mrb[27].mxu1 }
 0x116   :  { %v807_v60 = vsel %vm679_vm14, %v493_v40, %v743_v50  ;;  %vm711_vm15 = vcmp.ge.f32.partialorder %v621_v51, 0.0  ;;  %v775_v61 = vmul.f32 0.1, %v621_v51  ;;  %v506_v62 = vadd.f32 %v1626_v41, %v1867_v36 }
 0x117   :  { %v1426_v63 = vpack.c.bf16 %v807_v60, %v806_v47  ;;  %vm677_vm0 = vcmp.ge.f32.partialorder %v485_v56, 0.0  ;;  %v741_v0 = vmul.f32 0.1, %v485_v56  ;;  %vm709_vm1 = vcmp.ge.f32.partialorder %v613_v57, 0.0 }
 0x118   :  { %v839_v1 = vsel %vm711_vm15, %v621_v51, %v775_v61  ;;  %v773_v2 = vmul.f32 0.1, %v613_v57  ;;  %vm682_vm2 = vcmp.ge.f32.partialorder %v506_v62, 0.0  ;;  %v746_v3 = vmul.f32 0.1, %v506_v62 }
 0x119   :  { %1538 = vst [vmem:[%s2041_s3 + $0x58] sm:$0xff] %v1426_v63   ;;  %v1506_v4 = vpack.c.bf16 %v839_v1, %v838_v54  ;;  %v805_v5 = vsel %vm677_vm0, %v485_v56, %v741_v0  ;;  %v634_v6 = vadd.f32 %v1658_v42, %v1867_v36  ;;  %v498_v7 = vadd.f32 %v1867_v36, %v497_v45  ;;  %v1630_v8 = vpop.f32.mrb[28].mxu0  ;;  %v1662_v9 = vpop.f32.mrb[28].mxu1 }
 0x11a   :  { %v836_v10 = vsel %vm708_vm13, %v610_v39, %v772_v49  ;;  %v1421_v11 = vpack.c.bf16 %v805_v5, %v804_v55  ;;  %v837_v12 = vsel %vm709_vm1, %v613_v57, %v773_v2  ;;  %v626_v13 = vadd.f32 %v1867_v36, %v625_v46  ;;  %v513_v14 = vpop.f32.mrb[29].mxu0  ;;  %v641_v15 = vpop.f32.mrb[29].mxu1 }
 0x11b   :  { %1554 = vst [vmem:[%s2041_s3 + $0xd8] sm:$0xff] %v1506_v4   ;;  %v1501_v16 = vpack.c.bf16 %v837_v12, %v836_v10  ;;  %vm714_vm3 = vcmp.ge.f32.partialorder %v634_v6, 0.0  ;;  %v778_v17 = vmul.f32 0.1, %v634_v6  ;;  %vm680_vm4 = vcmp.ge.f32.partialorder %v498_v7, 0.0  ;;  %v1631_v18 = vpop.f32.mrb[30].mxu0 }
 0x11c   :  { %v1663_v19 = vpop.f32.mrb[30].mxu1  ;;  %1537 = vst [vmem:[%s2041_s3 + $0x50] sm:$0xff] %v1421_v11   ;;  %v810_v20 = vsel %vm682_vm2, %v506_v62, %v746_v3  ;;  %v744_v21 = vmul.f32 0.1, %v498_v7  ;;  %vm712_vm5 = vcmp.ge.f32.partialorder %v626_v13, 0.0  ;;  %v509_v22 = vadd.f32 %v1627_v52, %v1867_v36  ;;  %v516_v23 = vpop.f32.mrb[31].mxu0 }
 0x11d   :  { %1553 = vst [vmem:[%s2041_s3 + $0xd0] sm:$0xff] %v1501_v16   ;;  %v776_v24 = vmul.f32 0.1, %v626_v13  ;;  %v637_v25 = vadd.f32 %v1659_v53, %v1867_v36  ;;  %v501_v26 = vadd.f32 %v1867_v36, %v500_v58  ;;  %v629_v27 = vadd.f32 %v1867_v36, %v628_v59  ;;  %v644_v28 = vpop.f32.mrb[31].mxu1 }
 0x11e   :  { %v842_v29 = vsel %vm714_vm3, %v634_v6, %v778_v17  ;;  %v808_v30 = vsel %vm680_vm4, %v498_v7, %v744_v21  ;;  %vm683_vm6 = vcmp.ge.f32.partialorder %v509_v22, 0.0  ;;  %v747_v31 = vmul.f32 0.1, %v509_v22 }
 0x11f   :  { %vm715_vm7 = vcmp.ge.f32.partialorder %v637_v25, 0.0  ;;  %v779_v32 = vmul.f32 0.1, %v637_v25  ;;  %vm681_vm8 = vcmp.ge.f32.partialorder %v501_v26, 0.0  ;;  %v745_v33 = vmul.f32 0.1, %v501_v26 }
 0x120   :  { %v811_v34 = vsel %vm683_vm6, %v509_v22, %v747_v31  ;;  %vm713_vm9 = vcmp.ge.f32.partialorder %v629_v27, 0.0  ;;  %v777_v35 = vmul.f32 0.1, %v629_v27  ;;  %v522_v37 = vadd.f32 %v1630_v8, %v1867_v36 }
 0x121   :  { %v1436_v38 = vpack.c.bf16 %v811_v34, %v810_v20  ;;  %v843_v39 = vsel %vm715_vm7, %v637_v25, %v779_v32  ;;  %v809_v40 = vsel %vm681_vm8, %v501_v26, %v745_v33  ;;  %v650_v41 = vadd.f32 %v1662_v9, %v1867_v36 }
 0x122   :  { %v840_v42 = vsel %vm712_vm5, %v626_v13, %v776_v24  ;;  %v1516_v43 = vpack.c.bf16 %v843_v39, %v842_v29  ;;  %v1431_v44 = vpack.c.bf16 %v809_v40, %v808_v30  ;;  %v841_v45 = vsel %vm713_vm9, %v629_v27, %v777_v35 }
 0x123   :  { %1540 = vst [vmem:[%s2041_s3 + $0x68] sm:$0xff] %v1436_v38   ;;  %v1511_v46 = vpack.c.bf16 %v841_v45, %v840_v42  ;;  %vm686_vm10 = vcmp.ge.f32.partialorder %v522_v37, 0.0  ;;  %v750_v47 = vmul.f32 0.1, %v522_v37  ;;  %v782_v48 = vmul.f32 0.1, %v650_v41 }
 0x124   :  { %1556 = vst [vmem:[%s2041_s3 + $0xe8] sm:$0xff] %v1516_v43   ;;  %1539 = vst [vmem:[%s2041_s3 + $0x60] sm:$0xff] %v1431_v44   ;;  %v514_v49 = vadd.f32 %v1867_v36, %v513_v14  ;;  %v642_v50 = vadd.f32 %v1867_v36, %v641_v15  ;;  %v525_v51 = vadd.f32 %v1631_v18, %v1867_v36  ;;  %vm718_vm11 = vcmp.ge.f32.partialorder %v650_v41, 0.0 }
 0x125   :  { %v653_v52 = vadd.f32 %v1663_v19, %v1867_v36  ;;  %1555 = vst [vmem:[%s2041_s3 + $0xe0] sm:$0xff] %v1511_v46   ;;  %v517_v53 = vadd.f32 %v1867_v36, %v516_v23  ;;  %v645_v54 = vadd.f32 %v1867_v36, %v644_v28  ;;  %v814_v55 = vsel %vm686_vm10, %v522_v37, %v750_v47 }
 0x126   :  { %vm684_vm12 = vcmp.ge.f32.partialorder %v514_v49, 0.0  ;;  %v748_v56 = vmul.f32 0.1, %v514_v49  ;;  %v780_v57 = vmul.f32 0.1, %v642_v50  ;;  %vm687_vm13 = vcmp.ge.f32.partialorder %v525_v51, 0.0 }
 0x127   :  { %v751_v58 = vmul.f32 0.1, %v525_v51  ;;  %vm719_vm14 = vcmp.ge.f32.partialorder %v653_v52, 0.0  ;;  %v783_v59 = vmul.f32 0.1, %v653_v52  ;;  %v846_v60 = vsel %vm718_vm11, %v650_v41, %v782_v48 }
 0x128   :  { %vm716_vm15 = vcmp.ge.f32.partialorder %v642_v50, 0.0  ;;  %vm685_vm0 = vcmp.ge.f32.partialorder %v517_v53, 0.0  ;;  %v749_v61 = vmul.f32 0.1, %v517_v53  ;;  %vm717_vm1 = vcmp.ge.f32.partialorder %v645_v54, 0.0 }
 0x129   :  { %v815_v62 = vsel %vm687_vm13, %v525_v51, %v751_v58  ;;  %v847_v63 = vsel %vm719_vm14, %v653_v52, %v783_v59  ;;  %v781_v0 = vmul.f32 0.1, %v645_v54  ;;  %v812_v1 = vsel %vm684_vm12, %v514_v49, %v748_v56 }
 0x12a   :  { %v1446_v2 = vpack.c.bf16 %v815_v62, %v814_v55  ;;  %v1526_v3 = vpack.c.bf16 %v847_v63, %v846_v60  ;;  %v813_v36 = vsel %vm685_vm0, %v517_v53, %v749_v61  ;;  %v844_v4 = vsel %vm716_vm15, %v642_v50, %v780_v57 }
 0x12b   :  { %v1441_v5 = vpack.c.bf16 %v813_v36, %v812_v1  ;;  %v845_v6 = vsel %vm717_vm1, %v645_v54, %v781_v0 }
 0x12c   :  { %1542 = vst [vmem:[%s2041_s3 + $0x78] sm:$0xff] %v1446_v2   ;;  %1558 = vst [vmem:[%s2041_s3 + $0xf8] sm:$0xff] %v1526_v3   ;;  %v1521_v7 = vpack.c.bf16 %v845_v6, %v844_v4 }
 0x12d   :  { %1541 = vst [vmem:[%s2041_s3 + $0x70] sm:$0xff] %v1441_v5  }
 0x12e   :  { %1557 = vst [vmem:[%s2041_s3 + $0xf0] sm:$0xff] %v1521_v7  }

// kernel: _lambda_.42
= control target key start
LH: loop header
LB: loop body
LE: loop exit
PB: predicated region body
PF: predicated region fallthrough
CT: control target
= control target key end

     0   :  { %vm269_vm0 = vcmask 293888   ;;  %vm366_vm1 = vcmask 1041408   ;;  %s2833_s1 = inlined_call_operand.vmem [shape: bf16[36,128], index: 1, kind: input, shape index: {}]   ;;  %s2834_s0 = inlined_call_operand.vmem [shape: bf16[512,36], index: 0, kind: input, shape index: {}]   ;;  %s2835_s3 = inlined_call_operand.vmem [shape: bf16[512,128], index: 3, kind: input, shape index: {}]   ;;  %s2836_s2 = inlined_call_operand.vmem [shape: f32[1,128], index: 2, kind: input, shape index: {}]   ;;  %s2837_s4 = inlined_call_operand.vmem [shape: bf16[512,128], index: 4, kind: output, shape index: {}]  }
   0x1   :  { %v2026_v0 = vld [vmem:[%s2833_s1] sm:$0xff]   ;;  %v2027_v1 = vld [vmem:[%s2833_s1 + $0x8] sm:$0xff]   ;;  %v2028_v2 = vld [vmem:[%s2833_s1 + $0x10] ss:$0 sps:$4 sm:$0x33]  }
   0x2   :  { %1948 = vmatprep.subr.bf16.mxu0 %v2026_v0  ;;  %2018 = vmatprep.subr.bf16.mxu1 %v2026_v0  ;;  %v2029_v3 = vld [vmem:[%s2834_s0] sm:$0xff]   ;;  %v368_v5 = vsel %vm366_vm1, %v2028_v2, 0  ;;  %v2031_v6 = vld [vmem:[%s2834_s0 + $0x8] sm:$0xff]   ;;  %v2033_v8 = vld [vmem:[%s2834_s0 + $0x10] sm:$0xff]  }
   0x3   :  { %1949 = vmatpush3.bf16.msra.mxu0 %v2026_v0  ;;  %2021 = vmatpush3.bf16.msra.mxu1 %v2026_v0  ;;  %v2030_v4 = vld [vmem:[%s2834_s0 + $0x80] sm:$0xff]   ;;  %v2032_v7 = vld [vmem:[%s2834_s0 + $0x88] sm:$0xff]   ;;  %v2034_v9 = vld [vmem:[%s2834_s0 + $0x90] sm:$0xff]  }
   0x4   :  { %1950 = vmatprep.subr.bf16.mxu0 %v2027_v1  ;;  %2019 = vmatprep.subr.bf16.mxu1 %v2027_v1  ;;  %v2035_v10 = vld [vmem:[%s2834_s0 + $0x18] sm:$0xff]   ;;  %v2037_v12 = vld [vmem:[%s2834_s0 + $0x20] sm:$0xff]   ;;  %v2039_v14 = vld [vmem:[%s2834_s0 + $0x28] sm:$0xff]  }
   0x5   :  { %1954 = vmatprep.mubr.msk.bf16.mxu0 %vm269_vm0, %v2029_v3  ;;  %1986 = vmatprep.mubr.msk.bf16.mxu1 %vm269_vm0, %v2030_v4  ;;  %v2036_v11 = vld [vmem:[%s2834_s0 + $0x98] sm:$0xff]   ;;  %v2038_v13 = vld [vmem:[%s2834_s0 + $0xa0] sm:$0xff]   ;;  %v2040_v15 = vld [vmem:[%s2834_s0 + $0xa8] sm:$0xff]  }
   0x6   :  { %v2041_v16 = vld [vmem:[%s2834_s0 + $0x30] sm:$0xff]   ;;  %v2043_v18 = vld [vmem:[%s2834_s0 + $0x38] sm:$0xff]   ;;  %v2045_v20 = vld [vmem:[%s2834_s0 + $0x40] sm:$0xff]  }
   0x7   :  { %1951 = vmatpush3.bf16.msra.mxu0 %v2027_v1  ;;  %2022 = vmatpush3.bf16.msra.mxu1 %v2027_v1  ;;  %v2042_v17 = vld [vmem:[%s2834_s0 + $0xb0] sm:$0xff]   ;;  %v2044_v19 = vld [vmem:[%s2834_s0 + $0xb8] sm:$0xff]   ;;  %v2046_v21 = vld [vmem:[%s2834_s0 + $0xc0] sm:$0xff]  }
   0x8   :  { %2024 = vmatprep.subr.msk.bf16.mxu0 %vm366_vm1, %v2028_v2  ;;  %2025 = vmatprep.subr.msk.bf16.mxu1 %vm366_vm1, %v2028_v2  ;;  %v2047_v22 = vld [vmem:[%s2834_s0 + $0x48] sm:$0xff]   ;;  %v2049_v24 = vld [vmem:[%s2834_s0 + $0x50] sm:$0xff]   ;;  %v2051_v26 = vld [vmem:[%s2834_s0 + $0x58] sm:$0xff]  }
   0x9   :  { %v2048_v23 = vld [vmem:[%s2834_s0 + $0xc8] sm:$0xff]   ;;  %v2050_v25 = vld [vmem:[%s2834_s0 + $0xd0] sm:$0xff]   ;;  %v2052_v27 = vld [vmem:[%s2834_s0 + $0xd8] sm:$0xff]  }
   0xa   :  { %v2053_v28 = vld [vmem:[%s2834_s0 + $0x60] sm:$0xff]   ;;  %v2055_v30 = vld [vmem:[%s2834_s0 + $0x68] sm:$0xff]   ;;  %v2057_v32 = vld [vmem:[%s2834_s0 + $0x70] sm:$0xff]  }
   0xb   :  { %1953 = vmatpush3.bf16.msra.mxu0 %v368_v5  ;;  %2023 = vmatpush3.bf16.msra.mxu1 %v368_v5  ;;  %v2054_v29 = vld [vmem:[%s2834_s0 + $0xe0] sm:$0xff]   ;;  %v2056_v31 = vld [vmem:[%s2834_s0 + $0xe8] sm:$0xff]   ;;  %v2058_v33 = vld [vmem:[%s2834_s0 + $0xf0] sm:$0xff]  }
   0xc   :  { %v2059_v34 = vld [vmem:[%s2834_s0 + $0x78] sm:$0xff]   ;;  %v2226_v36 = vld [vmem:[%s2835_s3 + $0x8] sm:$0xff]   ;;  %v2236_v38 = vld [vmem:[%s2835_s3] sm:$0xff]  }
   0xd   :  { %v2060_v35 = vld [vmem:[%s2834_s0 + $0xf8] sm:$0xff]   ;;  %v2231_v37 = vld [vmem:[%s2835_s3 + $0x88] sm:$0xff]   ;;  %v2241_v39 = vld [vmem:[%s2835_s3 + $0x80] sm:$0xff]   ;;  %v1569_v42 = vunpack.c.l.bf16 %v2226_v36  ;;  %v1565_v46 = vunpack.c.l.bf16 %v2236_v38  ;;  %v1570_v48 = vunpack.c.h.bf16 %v2226_v36  ;;  %v1566_v52 = vunpack.c.h.bf16 %v2236_v38 }
   0xe   :  { %1955 = vmatmul.mubr.msk.bf16.vlgmr.msra.gmra.mrb[0].mxu0 %vm269_vm0, %v2031_v6  ;;  %1987 = vmatmul.mubr.msk.bf16.vlgmr.msra.gmra.mrb[0].mxu1 %vm269_vm0, %v2032_v7  ;;  %v2246_v40 = vld [vmem:[%s2835_s3 + $0x18] sm:$0xff]   ;;  %v1633_v43 = vunpack.c.l.bf16 %v2231_v37  ;;  %v2258_v44 = vld [vmem:[%s2835_s3 + $0x10] sm:$0xff]   ;;  %v1629_v47 = vunpack.c.l.bf16 %v2241_v39  ;;  %v1634_v49 = vunpack.c.h.bf16 %v2231_v37  ;;  %v2272_v50 = vld [vmem:[%s2835_s3 + $0x28] sm:$0xff]   ;;  %v1630_v53 = vunpack.c.h.bf16 %v2241_v39 }
   0xf   :  { %1958 = vmatprep.mubr.msk.bf16.mxu0 %vm269_vm0, %v2033_v8  ;;  %1990 = vmatprep.mubr.msk.bf16.mxu1 %vm269_vm0, %v2034_v9  ;;  %v2251_v41 = vld [vmem:[%s2835_s3 + $0x98] sm:$0xff]   ;;  %v2263_v45 = vld [vmem:[%s2835_s3 + $0x90] sm:$0xff]   ;;  %v2277_v51 = vld [vmem:[%s2835_s3 + $0xa8] sm:$0xff]   ;;  %v1577_v54 = vunpack.c.l.bf16 %v2246_v40 }
  0x10   :  { %v1641_v55 = vunpack.c.l.bf16 %v2251_v41  ;;  %v2286_v56 = vld [vmem:[%s2835_s3 + $0x20] sm:$0xff]   ;;  %v2300_v62 = vld [vmem:[%s2835_s3 + $0x38] sm:$0xff]   ;;  %v2314_v4 = vld [vmem:[%s2835_s3 + $0x30] sm:$0xff]  }
  0x11   :  { %v2291_v57 = vld [vmem:[%s2835_s3 + $0xa0] sm:$0xff]   ;;  %v2305_v63 = vld [vmem:[%s2835_s3 + $0xb8] sm:$0xff]   ;;  %v2319_v5 = vld [vmem:[%s2835_s3 + $0xb0] sm:$0xff]  }
  0x16   :  { %1959 = vmatmul.mubr.msk.bf16.gmra.mrb[4].mxu0 %vm269_vm0, %v2035_v10  ;;  %1991 = vmatmul.mubr.msk.bf16.gmra.mrb[4].mxu1 %vm269_vm0, %v2036_v11  ;;  %v2328_v10 = vld [vmem:[%s2835_s3 + $0x48] sm:$0xff]  }
  0x17   :  { %1962 = vmatprep.mubr.msk.bf16.mxu0 %vm269_vm0, %v2037_v12  ;;  %1994 = vmatprep.mubr.msk.bf16.mxu1 %vm269_vm0, %v2038_v13  ;;  %v2333_v11 = vld [vmem:[%s2835_s3 + $0xc8] sm:$0xff]  }
  0x1e   :  { %1963 = vmatmul.mubr.msk.bf16.gmra.mrb[8].mxu0 %vm269_vm0, %v2039_v14  ;;  %1995 = vmatmul.mubr.msk.bf16.gmra.mrb[8].mxu1 %vm269_vm0, %v2040_v15 }
  0x1f   :  { %1966 = vmatprep.mubr.msk.bf16.mxu0 %vm269_vm0, %v2041_v16  ;;  %1998 = vmatprep.mubr.msk.bf16.mxu1 %vm269_vm0, %v2042_v17  ;;  %v2342_v16 = vld [vmem:[%s2835_s3 + $0x40] sm:$0xff]  }
  0x20   :  { %v2347_v17 = vld [vmem:[%s2835_s3 + $0xc0] sm:$0xff]  }
  0x26   :  { %1967 = vmatmul.mubr.msk.bf16.gmra.mrb[12].mxu0 %vm269_vm0, %v2043_v18  ;;  %1999 = vmatmul.mubr.msk.bf16.gmra.mrb[12].mxu1 %vm269_vm0, %v2044_v19  ;;  %v2421_v18 = vld [vmem:[%s2835_s3 + $0x78] sm:$0xff]  }
  0x27   :  { %1970 = vmatprep.mubr.msk.bf16.mxu0 %vm269_vm0, %v2045_v20  ;;  %2002 = vmatprep.mubr.msk.bf16.mxu1 %vm269_vm0, %v2046_v21 }
  0x2e   :  { %1971 = vmatmul.mubr.msk.bf16.gmra.mrb[16].mxu0 %vm269_vm0, %v2047_v22  ;;  %2003 = vmatmul.mubr.msk.bf16.gmra.mrb[16].mxu1 %vm269_vm0, %v2048_v23  ;;  %v2356_v22 = vld [vmem:[%s2835_s3 + $0x58] sm:$0xff]  }
  0x2f   :  { %1974 = vmatprep.mubr.msk.bf16.mxu0 %vm269_vm0, %v2049_v24  ;;  %2006 = vmatprep.mubr.msk.bf16.mxu1 %vm269_vm0, %v2050_v25  ;;  %v2361_v23 = vld [vmem:[%s2835_s3 + $0xd8] sm:$0xff]  }
  0x36   :  { %1975 = vmatmul.mubr.msk.bf16.gmra.mrb[20].mxu0 %vm269_vm0, %v2051_v26  ;;  %2007 = vmatmul.mubr.msk.bf16.gmra.mrb[20].mxu1 %vm269_vm0, %v2052_v27  ;;  %v2403_v26 = vld [vmem:[%s2835_s3 + $0xe0] sm:$0xff]  }
  0x37   :  { %1978 = vmatprep.mubr.msk.bf16.mxu0 %vm269_vm0, %v2053_v28  ;;  %2010 = vmatprep.mubr.msk.bf16.mxu1 %vm269_vm0, %v2054_v29  ;;  %v2370_v28 = vld [vmem:[%s2835_s3 + $0x50] sm:$0xff]   ;;  %v2408_v27 = vld [vmem:[%s2836_s2] ss:$0 sm:$0xff] }
  0x38   :  { %v2375_v29 = vld [vmem:[%s2835_s3 + $0xd0] sm:$0xff]  }
  0x3e   :  { %1979 = vmatmul.mubr.msk.bf16.gmra.mrb[24].mxu0 %vm269_vm0, %v2055_v30  ;;  %2011 = vmatmul.mubr.msk.bf16.gmra.mrb[24].mxu1 %vm269_vm0, %v2056_v31  ;;  %v2426_v31 = vld [vmem:[%s2835_s3 + $0xf8] sm:$0xff]  }
  0x3f   :  { %1982 = vmatprep.mubr.msk.bf16.mxu0 %vm269_vm0, %v2057_v32  ;;  %2014 = vmatprep.mubr.msk.bf16.mxu1 %vm269_vm0, %v2058_v33  ;;  %v2398_v33 = vld [vmem:[%s2835_s3 + $0x60] sm:$0xff]  }
  0x46   :  { %1983 = vmatmul.mubr.msk.bf16.gmra.mrb[28].mxu0 %vm269_vm0, %v2059_v34  ;;  %2015 = vmatmul.mubr.msk.bf16.gmra.mrb[28].mxu1 %vm269_vm0, %v2060_v35  ;;  %v2384_v34 = vld [vmem:[%s2835_s3 + $0x68] sm:$0xff]  }
  0x47   :  { %v2389_v35 = vld [vmem:[%s2835_s3 + $0xe8] sm:$0xff]  }
  0xe1   :  { %v1956_v32 = vpop.f32.mrb[0].mxu0  ;;  %v1988_v25 = vpop.f32.mrb[0].mxu1 }
  0xe2   :  { %v413_v30 = vadd.f32 %v1956_v32, %v2408_v27  ;;  %v541_v15 = vadd.f32 %v1988_v25, %v2408_v27  ;;  %v404_v14 = vpop.f32.mrb[1].mxu0  ;;  %v532_v13 = vpop.f32.mrb[1].mxu1  ;;  %v2443_v25 = vld [vmem:[%s2835_s3 + $0x70] sm:$0xff]  }
  0xe3   :  { %v405_v8 = vadd.f32 %v2408_v27, %v404_v14  ;;  %v533_v24 = vadd.f32 %v2408_v27, %v532_v13  ;;  %v1957_v7 = vpop.f32.mrb[2].mxu0  ;;  %v1989_v21 = vpop.f32.mrb[2].mxu1 }
  0xe4   :  { %vm661_vm2 = vcmp.ge.f32.partialorder %v413_v30, 0.0  ;;  %v725_v32 = vmul.f32 0.1, %v413_v30  ;;  %vm693_vm3 = vcmp.ge.f32.partialorder %v541_v15, 0.0  ;;  %v757_v12 = vmul.f32 0.1, %v541_v15 }
  0xe5   :  { %vm659_vm4 = vcmp.ge.f32.partialorder %v405_v8, 0.0  ;;  %v723_v9 = vmul.f32 0.1, %v405_v8  ;;  %vm691_vm5 = vcmp.ge.f32.partialorder %v533_v24, 0.0  ;;  %v755_v14 = vmul.f32 0.1, %v533_v24 }
  0xe6   :  { %v789_v13 = vsel %vm661_vm2, %v413_v30, %v725_v32  ;;  %v821_v6 = vsel %vm693_vm3, %v541_v15, %v757_v12  ;;  %v416_v3 = vadd.f32 %v1957_v7, %v2408_v27  ;;  %v544_v20 = vadd.f32 %v1989_v21, %v2408_v27  ;;  %v407_v19 = vpop.f32.mrb[3].mxu0  ;;  %v535_v2 = vpop.f32.mrb[3].mxu1 }
  0xe7   :  { %v981_v1 = vadd.f32 %v1569_v42, %v789_v13  ;;  %v787_v0 = vsel %vm659_vm4, %v405_v8, %v723_v9  ;;  %v819_v61 = vsel %vm691_vm5, %v533_v24, %v755_v14  ;;  %v1013_v59 = vadd.f32 %v1633_v43, %v821_v6 }
  0xe8   :  { %v979_v30 = vadd.f32 %v1565_v46, %v787_v0  ;;  %vm662_vm6 = vcmp.ge.f32.partialorder %v416_v3, 0.0  ;;  %v726_v12 = vmul.f32 0.1, %v416_v3  ;;  %vm694_vm7 = vcmp.ge.f32.partialorder %v544_v20, 0.0 }
  0xe9   :  { %v758_v7 = vmul.f32 0.1, %v544_v20  ;;  %v408_v15 = vadd.f32 %v2408_v27, %v407_v19  ;;  %v536_v21 = vadd.f32 %v2408_v27, %v535_v2  ;;  %v1960_v32 = vpop.f32.mrb[4].mxu0  ;;  %v1992_v42 = vpop.f32.mrb[4].mxu1  ;;  %v1011_v8 = vadd.f32 %v1629_v47, %v819_v61 }
  0xea   :  { %v790_v9 = vsel %vm662_vm6, %v416_v3, %v726_v12  ;;  %v429_v24 = vadd.f32 %v1960_v32, %v2408_v27  ;;  %v557_v43 = vadd.f32 %v1992_v42, %v2408_v27  ;;  %v420_v6 = vpop.f32.mrb[5].mxu0  ;;  %v548_v46 = vpop.f32.mrb[5].mxu1 }
  0xeb   :  { %v982_v0 = vadd.f32 %v1570_v48, %v790_v9  ;;  %v822_v14 = vsel %vm694_vm7, %v544_v20, %v758_v7  ;;  %vm660_vm8 = vcmp.ge.f32.partialorder %v408_v15, 0.0  ;;  %v724_v19 = vmul.f32 0.1, %v408_v15  ;;  %v1961_v13 = vpop.f32.mrb[6].mxu0  ;;  %v1993_v2 = vpop.f32.mrb[6].mxu1 }
  0xec   :  { %v1014_v60 = vadd.f32 %v1634_v49, %v822_v14  ;;  %vm692_vm9 = vcmp.ge.f32.partialorder %v536_v21, 0.0  ;;  %v756_v47 = vmul.f32 0.1, %v536_v21  ;;  %vm665_vm10 = vcmp.ge.f32.partialorder %v429_v24, 0.0  ;;  %v423_v61 = vpop.f32.mrb[7].mxu0  ;;  %v551_v3 = vpop.f32.mrb[7].mxu1 }
  0xed   :  { %v1699_v12 = vpack.c.bf16 %v982_v0, %v981_v1  ;;  %v788_v32 = vsel %vm660_vm8, %v408_v15, %v724_v19  ;;  %v729_v42 = vmul.f32 0.1, %v429_v24  ;;  %vm697_vm11 = vcmp.ge.f32.partialorder %v557_v43, 0.0 }
  0xee   :  { %v1779_v58 = vpack.c.bf16 %v1014_v60, %v1013_v59  ;;  %v980_v36 = vadd.f32 %v1566_v52, %v788_v32  ;;  %v820_v48 = vsel %vm692_vm9, %v536_v21, %v756_v47  ;;  %v761_v20 = vmul.f32 0.1, %v557_v43 }
  0xef   :  { %1882 = vst [vmem:[%s2837_s4 + $0x8] sm:$0xff] %v1699_v12   ;;  %v1012_v37 = vadd.f32 %v1630_v53, %v820_v48  ;;  %v793_v49 = vsel %vm665_vm10, %v429_v24, %v729_v42  ;;  %v421_v7 = vadd.f32 %v2408_v27, %v420_v6  ;;  %v549_v1 = vadd.f32 %v2408_v27, %v548_v46 }
  0xf0   :  { %1898 = vst [vmem:[%s2837_s4 + $0x88] sm:$0xff] %v1779_v58   ;;  %v1694_v38 = vpack.c.bf16 %v980_v36, %v979_v30  ;;  %v985_v52 = vadd.f32 %v1577_v54, %v793_v49  ;;  %v825_v59 = vsel %vm697_vm11, %v557_v43, %v761_v20  ;;  %v432_v60 = vadd.f32 %v1961_v13, %v2408_v27 }
  0xf1   :  { %v1774_v15 = vpack.c.bf16 %v1012_v37, %v1011_v8  ;;  %v1017_v39 = vadd.f32 %v1641_v55, %v825_v59  ;;  %vm663_vm12 = vcmp.ge.f32.partialorder %v421_v7, 0.0  ;;  %v727_v53 = vmul.f32 0.1, %v421_v7  ;;  %v1964_v21 = vpop.f32.mrb[8].mxu0  ;;  %v1996_v9 = vpop.f32.mrb[8].mxu1 }
  0xf2   :  { %1695 = vst [vmem:[%s2837_s4] sm:$0xff] %v1694_v38   ;;  %vm695_vm13 = vcmp.ge.f32.partialorder %v549_v1, 0.0  ;;  %v759_v58 = vmul.f32 0.1, %v549_v1  ;;  %vm666_vm14 = vcmp.ge.f32.partialorder %v432_v60, 0.0  ;;  %v730_v30 = vmul.f32 0.1, %v432_v60 }
  0xf3   :  { %1897 = vst [vmem:[%s2837_s4 + $0x80] sm:$0xff] %v1774_v15   ;;  %v791_v54 = vsel %vm663_vm12, %v421_v7, %v727_v53  ;;  %v560_v8 = vadd.f32 %v1993_v2, %v2408_v27  ;;  %v424_v55 = vadd.f32 %v2408_v27, %v423_v61  ;;  %v552_v24 = vadd.f32 %v2408_v27, %v551_v3  ;;  %v436_v43 = vpop.f32.mrb[9].mxu0  ;;  %v564_v6 = vpop.f32.mrb[9].mxu1 }
  0xf4   :  { %v2838_v46 = vunpack.c.l.bf16 %v2258_v44  ;;  %v823_v14 = vsel %vm695_vm13, %v549_v1, %v759_v58  ;;  %v794_v19 = vsel %vm666_vm14, %v432_v60, %v730_v30  ;;  %v445_v13 = vadd.f32 %v1964_v21, %v2408_v27  ;;  %v1965_v47 = vpop.f32.mrb[10].mxu0  ;;  %v1997_v12 = vpop.f32.mrb[10].mxu1 }
  0xf5   :  { %v2839_v32 = vunpack.c.l.bf16 %v2263_v45  ;;  %v2840_v2 = vunpack.c.h.bf16 %v2246_v40  ;;  %vm698_vm15 = vcmp.ge.f32.partialorder %v560_v8, 0.0  ;;  %v762_v61 = vmul.f32 0.1, %v560_v8  ;;  %v439_v3 = vpop.f32.mrb[11].mxu0  ;;  %v567_v48 = vpop.f32.mrb[11].mxu1 }
  0xf6   :  { %v983_v0 = vadd.f32 %v2838_v46, %v791_v54  ;;  %vm664_vm0 = vcmp.ge.f32.partialorder %v424_v55, 0.0  ;;  %v728_v20 = vmul.f32 0.1, %v424_v55  ;;  %vm696_vm1 = vcmp.ge.f32.partialorder %v552_v24, 0.0 }
  0xf7   :  { %v1015_v42 = vadd.f32 %v2839_v32, %v823_v14  ;;  %v986_v36 = vadd.f32 %v2840_v2, %v794_v19  ;;  %v760_v37 = vmul.f32 0.1, %v552_v24  ;;  %v826_v7 = vsel %vm698_vm15, %v560_v8, %v762_v61 }
  0xf8   :  { %vm669_vm2 = vcmp.ge.f32.partialorder %v445_v13, 0.0  ;;  %v733_v1 = vmul.f32 0.1, %v445_v13  ;;  %v2841_v38 = vunpack.c.h.bf16 %v2251_v41  ;;  %v792_v60 = vsel %vm664_vm0, %v424_v55, %v728_v20 }
  0xf9   :  { %v1709_v49 = vpack.c.bf16 %v986_v36, %v985_v52  ;;  %v824_v15 = vsel %vm696_vm1, %v552_v24, %v760_v37  ;;  %v573_v40 = vadd.f32 %v1996_v9, %v2408_v27  ;;  %v2842_v53 = vunpack.c.h.bf16 %v2258_v44  ;;  %v1968_v8 = vpop.f32.mrb[12].mxu0  ;;  %v2000_v41 = vpop.f32.mrb[12].mxu1 }
  0xfa   :  { %v1018_v59 = vadd.f32 %v2841_v38, %v826_v7  ;;  %v2843_v58 = vunpack.c.h.bf16 %v2263_v45  ;;  %v797_v30 = vsel %vm669_vm2, %v445_v13, %v733_v1  ;;  %v437_v54 = vadd.f32 %v2408_v27, %v436_v43  ;;  %v452_v14 = vpop.f32.mrb[13].mxu0  ;;  %v580_v19 = vpop.f32.mrb[13].mxu1 }
  0xfb   :  { %1884 = vst [vmem:[%s2837_s4 + $0x18] sm:$0xff] %v1709_v49   ;;  %v984_v21 = vadd.f32 %v2842_v53, %v792_v60  ;;  %v2844_v55 = vunpack.c.l.bf16 %v2272_v50  ;;  %vm701_vm3 = vcmp.ge.f32.partialorder %v573_v40, 0.0  ;;  %v765_v9 = vmul.f32 0.1, %v573_v40  ;;  %v2512_v45 = vpop.f32.mrb[14].mxu0  ;;  %v2514_v13 = vpop.f32.mrb[14].mxu1 }
  0xfc   :  { %v1016_v52 = vadd.f32 %v2843_v58, %v824_v15  ;;  %v1789_v46 = vpack.c.bf16 %v1018_v59, %v1017_v39  ;;  %vm667_vm4 = vcmp.ge.f32.partialorder %v437_v54, 0.0  ;;  %v731_v2 = vmul.f32 0.1, %v437_v54  ;;  %v455_v20 = vpop.f32.mrb[15].mxu0 }
  0xfd   :  { %v2510_v24 = vadd.f32 %v2844_v55, %v797_v30  ;;  %v1704_v32 = vpack.c.bf16 %v984_v21, %v983_v0  ;;  %v829_v39 = vsel %vm701_vm3, %v573_v40, %v765_v9  ;;  %v565_v43 = vadd.f32 %v2408_v27, %v564_v6  ;;  %v583_v0 = vpop.f32.mrb[15].mxu1 }
  0xfe   :  { %v1784_v44 = vpack.c.bf16 %v1016_v52, %v1015_v42  ;;  %1900 = vst [vmem:[%s2837_s4 + $0x98] sm:$0xff] %v1789_v46   ;;  %v448_v36 = vadd.f32 %v1965_v47, %v2408_v27  ;;  %v576_v61 = vadd.f32 %v1997_v12, %v2408_v27  ;;  %v2845_v42 = vunpack.c.l.bf16 %v2277_v51 }
  0xff   :  { %1883 = vst [vmem:[%s2837_s4 + $0x10] sm:$0xff] %v1704_v32   ;;  %v795_v49 = vsel %vm667_vm4, %v437_v54, %v731_v2  ;;  %v440_v6 = vadd.f32 %v2408_v27, %v439_v3  ;;  %v568_v47 = vadd.f32 %v2408_v27, %v567_v48  ;;  %v2846_v12 = vunpack.c.l.bf16 %v2286_v56 }
 0x100   :  { %1899 = vst [vmem:[%s2837_s4 + $0x90] sm:$0xff] %v1784_v44   ;;  %v1021_v37 = vadd.f32 %v2845_v42, %v829_v39  ;;  %vm699_vm5 = vcmp.ge.f32.partialorder %v565_v43, 0.0  ;;  %v763_v1 = vmul.f32 0.1, %v565_v43  ;;  %vm670_vm6 = vcmp.ge.f32.partialorder %v448_v36, 0.0 }
 0x101   :  { %v987_v7 = vadd.f32 %v2846_v12, %v795_v49  ;;  %v734_v38 = vmul.f32 0.1, %v448_v36  ;;  %vm702_vm7 = vcmp.ge.f32.partialorder %v576_v61, 0.0  ;;  %v766_v59 = vmul.f32 0.1, %v576_v61  ;;  %v1972_v52 = vpop.f32.mrb[16].mxu0 }
 0x102   :  { %vm668_vm8 = vcmp.ge.f32.partialorder %v440_v6, 0.0  ;;  %v827_v60 = vsel %vm699_vm5, %v565_v43, %v763_v1  ;;  %v732_v15 = vmul.f32 0.1, %v440_v6  ;;  %vm700_vm9 = vcmp.ge.f32.partialorder %v568_v47, 0.0  ;;  %v2004_v30 = vpop.f32.mrb[16].mxu1  ;;  %v468_v2 = vpop.f32.mrb[17].mxu0 }
 0x103   :  { %v764_v40 = vmul.f32 0.1, %v568_v47  ;;  %v2847_v53 = vunpack.c.l.bf16 %v2291_v57  ;;  %v798_v3 = vsel %vm670_vm6, %v448_v36, %v734_v38  ;;  %v830_v58 = vsel %vm702_vm7, %v576_v61, %v766_v59  ;;  %v2541_v39 = vpop.f32.mrb[17].mxu1  ;;  %v2547_v49 = vpop.f32.mrb[18].mxu0 }
 0x104   :  { %v461_v48 = vadd.f32 %v1968_v8, %v2408_v27  ;;  %v2848_v54 = vunpack.c.h.bf16 %v2272_v50  ;;  %v2849_v55 = vunpack.c.h.bf16 %v2277_v51  ;;  %v796_v32 = vsel %vm668_vm8, %v440_v6, %v732_v15  ;;  %v2549_v50 = vpop.f32.mrb[18].mxu1  ;;  %v2554_v1 = vpop.f32.mrb[19].mxu0 }
 0x105   :  { %v1019_v21 = vadd.f32 %v2847_v53, %v827_v60  ;;  %v828_v44 = vsel %vm700_vm9, %v568_v47, %v764_v40  ;;  %v2850_v43 = vunpack.c.h.bf16 %v2286_v56  ;;  %v2851_v36 = vunpack.c.h.bf16 %v2291_v57  ;;  %v2556_v56 = vpop.f32.mrb[19].mxu1 }
 0x106   :  { %v990_v46 = vadd.f32 %v2848_v54, %v798_v3  ;;  %v1022_v9 = vadd.f32 %v2849_v55, %v830_v58  ;;  %vm673_vm10 = vcmp.ge.f32.partialorder %v461_v48, 0.0  ;;  %v737_v8 = vmul.f32 0.1, %v461_v48 }
 0x107   :  { %v988_v42 = vadd.f32 %v2850_v43, %v796_v32  ;;  %v1020_v61 = vadd.f32 %v2851_v36, %v828_v44  ;;  %v589_v6 = vadd.f32 %v2000_v41, %v2408_v27  ;;  %v453_v47 = vadd.f32 %v2408_v27, %v452_v14 }
 0x108   :  { %v1719_v51 = vpack.c.bf16 %v990_v46, %v2510_v24  ;;  %v1799_v12 = vpack.c.bf16 %v1022_v9, %v1021_v37  ;;  %v801_v59 = vsel %vm673_vm10, %v461_v48, %v737_v8  ;;  %v581_v60 = vadd.f32 %v2408_v27, %v580_v19 }
 0x109   :  { %v1714_v38 = vpack.c.bf16 %v988_v42, %v987_v7  ;;  %v1794_v57 = vpack.c.bf16 %v1020_v61, %v1019_v21  ;;  %v2852_v41 = vunpack.c.l.bf16 %v2300_v62  ;;  %vm705_vm11 = vcmp.ge.f32.partialorder %v589_v6, 0.0  ;;  %v2581_v46 = vpop.f32.mrb[20].mxu0  ;;  %v2583_v55 = vpop.f32.mrb[20].mxu1 }
 0x10a   :  { %1886 = vst [vmem:[%s2837_s4 + $0x28] sm:$0xff] %v1719_v51   ;;  %1902 = vst [vmem:[%s2837_s4 + $0xa8] sm:$0xff] %v1799_v12   ;;  %v769_v14 = vmul.f32 0.1, %v589_v6  ;;  %vm671_vm12 = vcmp.ge.f32.partialorder %v453_v47, 0.0  ;;  %vm703_vm13 = vcmp.ge.f32.partialorder %v581_v60, 0.0  ;;  %v464_v7 = vadd.f32 %v2512_v45, %v2408_v27 }
 0x10b   :  { %v993_v24 = vadd.f32 %v2852_v41, %v801_v59  ;;  %1885 = vst [vmem:[%s2837_s4 + $0x20] sm:$0xff] %v1714_v38   ;;  %1901 = vst [vmem:[%s2837_s4 + $0xa0] sm:$0xff] %v1794_v57   ;;  %v735_v19 = vmul.f32 0.1, %v453_v47  ;;  %v767_v37 = vmul.f32 0.1, %v581_v60  ;;  %v592_v40 = vadd.f32 %v2514_v13, %v2408_v27 }
 0x10c   :  { %v833_v15 = vsel %vm705_vm11, %v589_v6, %v769_v14  ;;  %v456_v53 = vadd.f32 %v2408_v27, %v455_v20  ;;  %v584_v21 = vadd.f32 %v2408_v27, %v583_v0  ;;  %v2853_v3 = vunpack.c.l.bf16 %v2305_v63  ;;  %v2589_v20 = vpop.f32.mrb[21].mxu0  ;;  %v2591_v0 = vpop.f32.mrb[21].mxu1 }
 0x10d   :  { %v799_v48 = vsel %vm671_vm12, %v453_v47, %v735_v19  ;;  %v831_v54 = vsel %vm703_vm13, %v581_v60, %v767_v37  ;;  %vm674_vm14 = vcmp.ge.f32.partialorder %v464_v7, 0.0  ;;  %v2854_v45 = vunpack.c.l.bf16 %v2314_v4  ;;  %v2595_v12 = vpop.f32.mrb[22].mxu0  ;;  %v2597_v6 = vpop.f32.mrb[22].mxu1 }
 0x10e   :  { %v1025_v58 = vadd.f32 %v2853_v3, %v833_v15  ;;  %v2855_v32 = vunpack.c.l.bf16 %v2319_v5  ;;  %v738_v44 = vmul.f32 0.1, %v464_v7  ;;  %vm706_vm15 = vcmp.ge.f32.partialorder %v592_v40, 0.0  ;;  %v2602_v41 = vpop.f32.mrb[23].mxu0  ;;  %v2604_v14 = vpop.f32.mrb[23].mxu1 }
 0x10f   :  { %v991_v9 = vadd.f32 %v2854_v45, %v799_v48  ;;  %v770_v43 = vmul.f32 0.1, %v592_v40  ;;  %vm672_vm0 = vcmp.ge.f32.partialorder %v456_v53, 0.0  ;;  %v736_v42 = vmul.f32 0.1, %v456_v53 }
 0x110   :  { %v1023_v13 = vadd.f32 %v2855_v32, %v831_v54  ;;  %vm704_vm1 = vcmp.ge.f32.partialorder %v584_v21, 0.0  ;;  %v802_v36 = vsel %vm674_vm14, %v464_v7, %v738_v44  ;;  %v768_v61 = vmul.f32 0.1, %v584_v21 }
 0x111   :  { %v477_v8 = vadd.f32 %v1972_v52, %v2408_v27  ;;  %v605_v51 = vadd.f32 %v2004_v30, %v2408_v27  ;;  %v2856_v47 = vunpack.c.h.bf16 %v2300_v62  ;;  %v834_v57 = vsel %vm706_vm15, %v592_v40, %v770_v43 }
 0x112   :  { %v800_v59 = vsel %vm672_vm0, %v456_v53, %v736_v42  ;;  %v469_v60 = vadd.f32 %v2408_v27, %v468_v2  ;;  %v2857_v19 = vunpack.c.h.bf16 %v2305_v63  ;;  %v2858_v30 = vunpack.c.h.bf16 %v2314_v4 }
 0x113   :  { %v994_v38 = vadd.f32 %v2856_v47, %v802_v36  ;;  %v832_v7 = vsel %vm704_vm1, %v584_v21, %v768_v61  ;;  %vm677_vm2 = vcmp.ge.f32.partialorder %v477_v8, 0.0  ;;  %v2859_v62 = vunpack.c.h.bf16 %v2319_v5  ;;  %v2619_v5 = vpop.f32.mrb[24].mxu1 }
 0x114   :  { %v1026_v52 = vadd.f32 %v2857_v19, %v834_v57  ;;  %v992_v37 = vadd.f32 %v2858_v30, %v800_v59  ;;  %v741_v40 = vmul.f32 0.1, %v477_v8  ;;  %vm709_vm3 = vcmp.ge.f32.partialorder %v605_v51, 0.0  ;;  %v2635_v44 = vpop.f32.mrb[25].mxu1 }
 0x115   :  { %v1729_v15 = vpack.c.bf16 %v994_v38, %v993_v24  ;;  %v1024_v3 = vadd.f32 %v2859_v62, %v832_v7  ;;  %v773_v48 = vmul.f32 0.1, %v605_v51  ;;  %vm675_vm4 = vcmp.ge.f32.partialorder %v469_v60, 0.0  ;;  %v2617_v24 = vpop.f32.mrb[24].mxu0 }
 0x116   :  { %v1809_v53 = vpack.c.bf16 %v1026_v52, %v1025_v58  ;;  %v1724_v2 = vpack.c.bf16 %v992_v37, %v991_v9  ;;  %v805_v54 = vsel %vm677_vm2, %v477_v8, %v741_v40  ;;  %v739_v4 = vmul.f32 0.1, %v469_v60 }
 0x117   :  { %1888 = vst [vmem:[%s2837_s4 + $0x38] sm:$0xff] %v1729_v15   ;;  %v1804_v63 = vpack.c.bf16 %v1024_v3, %v1023_v13  ;;  %v597_v21 = vadd.f32 %v2408_v27, %v2541_v39  ;;  %v2860_v58 = vunpack.c.l.bf16 %v2328_v10  ;;  %v837_v9 = vsel %vm709_vm3, %v605_v51, %v773_v48  ;;  %v2633_v13 = vpop.f32.mrb[25].mxu0 }
 0x118   :  { %1904 = vst [vmem:[%s2837_s4 + $0xb8] sm:$0xff] %v1809_v53   ;;  %1887 = vst [vmem:[%s2837_s4 + $0x30] sm:$0xff] %v1724_v2   ;;  %v480_v32 = vadd.f32 %v2547_v49, %v2408_v27  ;;  %v608_v39 = vadd.f32 %v2549_v50, %v2408_v27  ;;  %v2861_v43 = vunpack.c.l.bf16 %v2333_v11  ;;  %v803_v36 = vsel %vm675_vm4, %v469_v60, %v739_v4  ;;  %v2643_v8 = vpop.f32.mrb[26].mxu0  ;;  %v2645_v49 = vpop.f32.mrb[26].mxu1 }
 0x119   :  { %v997_v45 = vadd.f32 %v2860_v58, %v805_v54  ;;  %1903 = vst [vmem:[%s2837_s4 + $0xb0] sm:$0xff] %v1804_v63   ;;  %vm707_vm5 = vcmp.ge.f32.partialorder %v597_v21, 0.0  ;;  %v771_v61 = vmul.f32 0.1, %v597_v21  ;;  %v2862_v50 = vunpack.c.l.bf16 %v2342_v16  ;;  %v2649_v38 = vpop.f32.mrb[27].mxu0  ;;  %v2651_v57 = vpop.f32.mrb[27].mxu1 }
 0x11a   :  { %v1029_v42 = vadd.f32 %v2861_v43, %v837_v9  ;;  %vm678_vm6 = vcmp.ge.f32.partialorder %v480_v32, 0.0  ;;  %v742_v47 = vmul.f32 0.1, %v480_v32  ;;  %vm710_vm7 = vcmp.ge.f32.partialorder %v608_v39, 0.0 }
 0x11b   :  { %v995_v51 = vadd.f32 %v2862_v50, %v803_v36  ;;  %v835_v59 = vsel %vm707_vm5, %v597_v21, %v771_v61  ;;  %v774_v19 = vmul.f32 0.1, %v608_v39  ;;  %v472_v60 = vadd.f32 %v2408_v27, %v2554_v1  ;;  %v2669_v21 = vpop.f32.mrb[28].mxu1 }
 0x11c   :  { %v600_v52 = vadd.f32 %v2408_v27, %v2556_v56  ;;  %v2863_v30 = vunpack.c.l.bf16 %v2347_v17  ;;  %v806_v7 = vsel %vm678_vm6, %v480_v32, %v742_v47  ;;  %v493_v15 = vadd.f32 %v2581_v46, %v2408_v27  ;;  %v2667_v46 = vpop.f32.mrb[28].mxu0 }
 0x11d   :  { %v621_v62 = vadd.f32 %v2583_v55, %v2408_v27  ;;  %v2864_v3 = vunpack.c.h.bf16 %v2328_v10  ;;  %v838_v53 = vsel %vm710_vm7, %v608_v39, %v774_v19  ;;  %vm676_vm8 = vcmp.ge.f32.partialorder %v472_v60, 0.0  ;;  %v2674_v10 = vld [vmem:[%s2835_s3 + $0xf0] sm:$0xff]   ;;  %v2678_v39 = vpop.f32.mrb[29].mxu0 }
 0x11e   :  { %v1027_v37 = vadd.f32 %v2863_v30, %v835_v59  ;;  %v740_v2 = vmul.f32 0.1, %v472_v60  ;;  %v2865_v1 = vunpack.c.h.bf16 %v2333_v11  ;;  %vm708_vm9 = vcmp.ge.f32.partialorder %v600_v52, 0.0  ;;  %v2692_v50 = vpop.f32.mrb[30].mxu0 }
 0x11f   :  { %v998_v40 = vadd.f32 %v2864_v3, %v806_v7  ;;  %v772_v56 = vmul.f32 0.1, %v600_v52  ;;  %vm681_vm10 = vcmp.ge.f32.partialorder %v493_v15, 0.0  ;;  %v745_v4 = vmul.f32 0.1, %v493_v15 }
 0x120   :  { %v1030_v48 = vadd.f32 %v2865_v1, %v838_v53  ;;  %v804_v54 = vsel %vm676_vm8, %v472_v60, %v740_v2  ;;  %vm713_vm11 = vcmp.ge.f32.partialorder %v621_v62, 0.0  ;;  %v2866_v11 = vunpack.c.h.bf16 %v2342_v16 }
 0x121   :  { %v1739_v63 = vpack.c.bf16 %v998_v40, %v997_v45  ;;  %v836_v9 = vsel %vm708_vm9, %v600_v52, %v772_v56  ;;  %v777_v32 = vmul.f32 0.1, %v621_v62  ;;  %v2680_v45 = vpop.f32.mrb[29].mxu1  ;;  %v2867_v43 = vunpack.c.h.bf16 %v2347_v17  ;;  %v2704_v52 = vpop.f32.mrb[31].mxu0 }
 0x122   :  { %v1819_v55 = vpack.c.bf16 %v1030_v48, %v1029_v42  ;;  %v996_v58 = vadd.f32 %v2866_v11, %v804_v54  ;;  %v809_v61 = vsel %vm681_vm10, %v493_v15, %v745_v4  ;;  %v485_v42 = vadd.f32 %v2408_v27, %v2589_v20  ;;  %v2694_v47 = vpop.f32.mrb[30].mxu1 }
 0x123   :  { %1890 = vst [vmem:[%s2837_s4 + $0x48] sm:$0xff] %v1739_v63   ;;  %v1028_v36 = vadd.f32 %v2867_v43, %v836_v9  ;;  %v613_v16 = vadd.f32 %v2408_v27, %v2591_v0  ;;  %v2868_v17 = vunpack.c.l.bf16 %v2356_v22  ;;  %v496_v60 = vadd.f32 %v2595_v12, %v2408_v27  ;;  %v2706_v0 = vpop.f32.mrb[31].mxu1 }
 0x124   :  { %1906 = vst [vmem:[%s2837_s4 + $0xc8] sm:$0xff] %v1819_v55   ;;  %v1734_v59 = vpack.c.bf16 %v996_v58, %v995_v51  ;;  %v1685_v20 = vunpack.c.l.bf16 %v2674_v10  ;;  %v841_v7 = vsel %vm713_vm11, %v621_v62, %v777_v32  ;;  %vm679_vm12 = vcmp.ge.f32.partialorder %v485_v42, 0.0 }
 0x125   :  { %v1001_v19 = vadd.f32 %v2868_v17, %v809_v61  ;;  %v1814_v30 = vpack.c.bf16 %v1028_v36, %v1027_v37  ;;  %v743_v15 = vmul.f32 0.1, %v485_v42  ;;  %vm711_vm13 = vcmp.ge.f32.partialorder %v613_v16, 0.0 }
 0x126   :  { %1889 = vst [vmem:[%s2837_s4 + $0x40] sm:$0xff] %v1734_v59   ;;  %v775_v51 = vmul.f32 0.1, %v613_v16  ;;  %vm682_vm14 = vcmp.ge.f32.partialorder %v496_v60, 0.0  ;;  %v746_v3 = vmul.f32 0.1, %v496_v60  ;;  %v624_v37 = vadd.f32 %v2597_v6, %v2408_v27 }
 0x127   :  { %1905 = vst [vmem:[%s2837_s4 + $0xc0] sm:$0xff] %v1814_v30   ;;  %v807_v12 = vsel %vm679_vm12, %v485_v42, %v743_v15  ;;  %v488_v62 = vadd.f32 %v2408_v27, %v2602_v41  ;;  %v616_v40 = vadd.f32 %v2408_v27, %v2604_v14  ;;  %v2869_v53 = vunpack.c.l.bf16 %v2361_v23 }
 0x128   :  { %v2870_v1 = vunpack.c.l.bf16 %v2370_v28  ;;  %v810_v56 = vsel %vm682_vm14, %v496_v60, %v746_v3  ;;  %v509_v63 = vadd.f32 %v2617_v24, %v2408_v27  ;;  %v839_v54 = vsel %vm711_vm13, %v613_v16, %v775_v51 }
 0x129   :  { %v1033_v2 = vadd.f32 %v2869_v53, %v841_v7  ;;  %v2871_v4 = vunpack.c.h.bf16 %v2356_v22  ;;  %vm714_vm15 = vcmp.ge.f32.partialorder %v624_v37, 0.0  ;;  %v778_v55 = vmul.f32 0.1, %v624_v37 }
 0x12a   :  { %v999_v48 = vadd.f32 %v2870_v1, %v807_v12  ;;  %vm680_vm0 = vcmp.ge.f32.partialorder %v488_v62, 0.0  ;;  %v744_v41 = vmul.f32 0.1, %v488_v62  ;;  %vm712_vm1 = vcmp.ge.f32.partialorder %v616_v40, 0.0 }
 0x12b   :  { %v1002_v6 = vadd.f32 %v2871_v4, %v810_v56  ;;  %v776_v14 = vmul.f32 0.1, %v616_v40  ;;  %v842_v58 = vsel %vm714_vm15, %v624_v37, %v778_v55  ;;  %vm685_vm2 = vcmp.ge.f32.partialorder %v509_v63, 0.0 }
 0x12c   :  { %v749_v9 = vmul.f32 0.1, %v509_v63  ;;  %v2872_v32 = vunpack.c.h.bf16 %v2361_v23  ;;  %v808_v36 = vsel %vm680_vm0, %v488_v62, %v744_v41  ;;  %v637_v24 = vadd.f32 %v2619_v5, %v2408_v27 }
 0x12d   :  { %v1749_v11 = vpack.c.bf16 %v1002_v6, %v1001_v19  ;;  %v840_v61 = vsel %vm712_vm1, %v616_v40, %v776_v14  ;;  %v2873_v22 = vunpack.c.l.bf16 %v2375_v29  ;;  %v2874_v16 = vunpack.c.h.bf16 %v2370_v28 }
 0x12e   :  { %v1034_v43 = vadd.f32 %v2872_v32, %v842_v58  ;;  %v2875_v17 = vunpack.c.h.bf16 %v2375_v29  ;;  %v501_v23 = vadd.f32 %v2408_v27, %v2633_v13  ;;  %v813_v30 = vsel %vm685_vm2, %v509_v63, %v749_v9 }
 0x12f   :  { %v1031_v42 = vadd.f32 %v2873_v22, %v839_v54  ;;  %1892 = vst [vmem:[%s2837_s4 + $0x58] sm:$0xff] %v1749_v11   ;;  %v1000_v59 = vadd.f32 %v2874_v16, %v808_v36  ;;  %vm717_vm3 = vcmp.ge.f32.partialorder %v637_v24, 0.0  ;;  %v781_v5 = vmul.f32 0.1, %v637_v24 }
 0x130   :  { %v1032_v19 = vadd.f32 %v2875_v17, %v840_v61  ;;  %v1829_v60 = vpack.c.bf16 %v1034_v43, %v1033_v2  ;;  %vm683_vm4 = vcmp.ge.f32.partialorder %v501_v23, 0.0  ;;  %v747_v51 = vmul.f32 0.1, %v501_v23 }
 0x131   :  { %v1744_v7 = vpack.c.bf16 %v1000_v59, %v999_v48  ;;  %v629_v28 = vadd.f32 %v2408_v27, %v2635_v44  ;;  %v512_v29 = vadd.f32 %v2643_v8, %v2408_v27  ;;  %v640_v13 = vadd.f32 %v2645_v49, %v2408_v27 }
 0x132   :  { %v1824_v15 = vpack.c.bf16 %v1032_v19, %v1031_v42  ;;  %1908 = vst [vmem:[%s2837_s4 + $0xd8] sm:$0xff] %v1829_v60   ;;  %v1626_v3 = vunpack.c.h.bf16 %v2421_v18  ;;  %v2876_v12 = vunpack.c.l.bf16 %v2384_v34  ;;  %v845_v44 = vsel %vm717_vm3, %v637_v24, %v781_v5 }
 0x133   :  { %1891 = vst [vmem:[%s2837_s4 + $0x50] sm:$0xff] %v1744_v7   ;;  %v504_v8 = vadd.f32 %v2408_v27, %v2649_v38  ;;  %v632_v49 = vadd.f32 %v2408_v27, %v2651_v57  ;;  %v811_v62 = vsel %vm683_vm4, %v501_v23, %v747_v51  ;;  %vm715_vm5 = vcmp.ge.f32.partialorder %v629_v28, 0.0 }
 0x134   :  { %1907 = vst [vmem:[%s2837_s4 + $0xd0] sm:$0xff] %v1824_v15   ;;  %v1005_v37 = vadd.f32 %v2876_v12, %v813_v30  ;;  %v779_v40 = vmul.f32 0.1, %v629_v28  ;;  %vm686_vm6 = vcmp.ge.f32.partialorder %v512_v29, 0.0  ;;  %v750_v53 = vmul.f32 0.1, %v512_v29 }
 0x135   :  { %vm718_vm7 = vcmp.ge.f32.partialorder %v640_v13, 0.0  ;;  %v782_v2 = vmul.f32 0.1, %v640_v13  ;;  %vm684_vm8 = vcmp.ge.f32.partialorder %v504_v8, 0.0  ;;  %v748_v48 = vmul.f32 0.1, %v504_v8 }
 0x136   :  { %v843_v1 = vsel %vm715_vm5, %v629_v28, %v779_v40  ;;  %vm716_vm9 = vcmp.ge.f32.partialorder %v632_v49, 0.0  ;;  %v780_v56 = vmul.f32 0.1, %v632_v49  ;;  %v2877_v63 = vunpack.c.l.bf16 %v2389_v35 }
 0x137   :  { %v814_v4 = vsel %vm686_vm6, %v512_v29, %v750_v53  ;;  %v846_v38 = vsel %vm718_vm7, %v640_v13, %v782_v2  ;;  %v525_v57 = vadd.f32 %v2667_v46, %v2408_v27  ;;  %v2878_v6 = vunpack.c.h.bf16 %v2384_v34 }
 0x138   :  { %v1037_v54 = vadd.f32 %v2877_v63, %v845_v44  ;;  %v2879_v41 = vunpack.c.h.bf16 %v2389_v35  ;;  %v812_v11 = vsel %vm684_vm8, %v504_v8, %v748_v48  ;;  %v844_v58 = vsel %vm716_vm9, %v632_v49, %v780_v56 }
 0x139   :  { %v1006_v55 = vadd.f32 %v2878_v6, %v814_v4  ;;  %v2880_v9 = vunpack.c.l.bf16 %v2398_v33  ;;  %v2881_v43 = vunpack.c.l.bf16 %v2403_v26  ;;  %v2882_v61 = vunpack.c.h.bf16 %v2398_v33 }
 0x13a   :  { %v1038_v14 = vadd.f32 %v2879_v41, %v846_v38  ;;  %v2883_v22 = vunpack.c.h.bf16 %v2403_v26  ;;  %v653_v35 = vadd.f32 %v2669_v21, %v2408_v27  ;;  %v517_v16 = vadd.f32 %v2408_v27, %v2678_v39 }
 0x13b   :  { %v1003_v32 = vadd.f32 %v2880_v9, %v811_v62  ;;  %v1035_v36 = vadd.f32 %v2881_v43, %v843_v1  ;;  %v1004_v24 = vadd.f32 %v2882_v61, %v812_v11  ;;  %v1759_v42 = vpack.c.bf16 %v1006_v55, %v1005_v37 }
 0x13c   :  { %v1036_v46 = vadd.f32 %v2883_v22, %v844_v58  ;;  %v1839_v34 = vpack.c.bf16 %v1038_v14, %v1037_v54  ;;  %v753_v19 = vmul.f32 0.1, %v525_v57  ;;  %v645_v23 = vadd.f32 %v2408_v27, %v2680_v45 }
 0x13d   :  { %v1754_v59 = vpack.c.bf16 %v1004_v24, %v1003_v32  ;;  %1894 = vst [vmem:[%s2837_s4 + $0x68] sm:$0xff] %v1759_v42   ;;  %vm689_vm10 = vcmp.ge.f32.partialorder %v525_v57, 0.0  ;;  %v785_v26 = vmul.f32 0.1, %v653_v35  ;;  %v1690_v33 = vunpack.c.h.bf16 %v2426_v31 }
 0x13e   :  { %v1834_v17 = vpack.c.bf16 %v1036_v46, %v1035_v36  ;;  %1910 = vst [vmem:[%s2837_s4 + $0xe8] sm:$0xff] %v1839_v34   ;;  %v1622_v21 = vunpack.c.h.bf16 %v2443_v25  ;;  %vm721_vm11 = vcmp.ge.f32.partialorder %v653_v35, 0.0  ;;  %vm687_vm12 = vcmp.ge.f32.partialorder %v517_v16, 0.0 }
 0x13f   :  { %1893 = vst [vmem:[%s2837_s4 + $0x60] sm:$0xff] %v1754_v59   ;;  %v751_v39 = vmul.f32 0.1, %v517_v16  ;;  %v528_v45 = vadd.f32 %v2692_v50, %v2408_v27  ;;  %v783_v60 = vmul.f32 0.1, %v645_v23  ;;  %v656_v30 = vadd.f32 %v2694_v47, %v2408_v27 }
 0x140   :  { %1909 = vst [vmem:[%s2837_s4 + $0xe0] sm:$0xff] %v1834_v17   ;;  %v520_v5 = vadd.f32 %v2408_v27, %v2704_v52  ;;  %v648_v7 = vadd.f32 %v2408_v27, %v2706_v0  ;;  %v817_v15 = vsel %vm689_vm10, %v525_v57, %v753_v19  ;;  %vm719_vm13 = vcmp.ge.f32.partialorder %v645_v23, 0.0 }
 0x141   :  { %vm690_vm14 = vcmp.ge.f32.partialorder %v528_v45, 0.0  ;;  %v1686_v51 = vunpack.c.h.bf16 %v2674_v10  ;;  %v849_v28 = vsel %vm721_vm11, %v653_v35, %v785_v26  ;;  %v815_v29 = vsel %vm687_vm12, %v517_v16, %v751_v39 }
 0x142   :  { %v754_v13 = vmul.f32 0.1, %v528_v45  ;;  %vm722_vm15 = vcmp.ge.f32.partialorder %v656_v30, 0.0  ;;  %v786_v50 = vmul.f32 0.1, %v656_v30  ;;  %vm688_vm0 = vcmp.ge.f32.partialorder %v520_v5, 0.0 }
 0x143   :  { %v752_v12 = vmul.f32 0.1, %v520_v5  ;;  %vm720_vm1 = vcmp.ge.f32.partialorder %v648_v7, 0.0  ;;  %v2884_v47 = vunpack.c.l.bf16 %v2421_v18  ;;  %v847_v52 = vsel %vm719_vm13, %v645_v23, %v783_v60 }
 0x144   :  { %v818_v44 = vsel %vm690_vm14, %v528_v45, %v754_v13  ;;  %v784_v8 = vmul.f32 0.1, %v648_v7  ;;  %v2885_v27 = vunpack.c.l.bf16 %v2426_v31  ;;  %v850_v62 = vsel %vm722_vm15, %v656_v30, %v786_v50 }
 0x145   :  { %v1009_v37 = vadd.f32 %v2884_v47, %v817_v15  ;;  %v1010_v49 = vadd.f32 %v1626_v3, %v818_v44  ;;  %v816_v40 = vsel %vm688_vm0, %v520_v5, %v752_v12  ;;  %v2886_v53 = vunpack.c.l.bf16 %v2443_v25 }
 0x146   :  { %v1041_v0 = vadd.f32 %v2885_v27, %v849_v28  ;;  %v1042_v1 = vadd.f32 %v1690_v33, %v850_v62  ;;  %v1008_v48 = vadd.f32 %v1622_v21, %v816_v40  ;;  %v848_v56 = vsel %vm720_vm1, %v648_v7, %v784_v8 }
 0x147   :  { %v1007_v2 = vadd.f32 %v2886_v53, %v815_v29  ;;  %v1039_v63 = vadd.f32 %v1685_v20, %v847_v52  ;;  %v1769_v54 = vpack.c.bf16 %v1010_v49, %v1009_v37  ;;  %v1040_v4 = vadd.f32 %v1686_v51, %v848_v56 }
 0x148   :  { %v1849_v38 = vpack.c.bf16 %v1042_v1, %v1041_v0 }
 0x149   :  { %v1764_v57 = vpack.c.bf16 %v1008_v48, %v1007_v2  ;;  %1896 = vst [vmem:[%s2837_s4 + $0x78] sm:$0xff] %v1769_v54   ;;  %v1844_v18 = vpack.c.bf16 %v1040_v4, %v1039_v63 }
 0x14a   :  { %1912 = vst [vmem:[%s2837_s4 + $0xf8] sm:$0xff] %v1849_v38  }
 0x14b   :  { %1895 = vst [vmem:[%s2837_s4 + $0x70] sm:$0xff] %v1764_v57   ;;  %1911 = vst [vmem:[%s2837_s4 + $0xf0] sm:$0xff] %v1844_v18  }

// kernel: _lambda_.43
= control target key start
LH: loop header
LB: loop body
LE: loop exit
PB: predicated region body
PF: predicated region fallthrough
CT: control target
= control target key end

     0   :  { %vm114_vm0 = vcmask 588800   ;;  %vm139_vm1 = vcmask 1043456   ;;  %s653_s1 = inlined_call_operand.vmem [shape: bf16[72,128], index: 1, kind: input, shape index: {}]   ;;  %s654_s0 = inlined_call_operand.vmem [shape: bf16[128,72], index: 0, kind: input, shape index: {}]   ;;  %s655_s2 = inlined_call_operand.vmem [shape: f32[1,128], index: 2, kind: input, shape index: {}]   ;;  %s656_s3 = inlined_call_operand.vmem [shape: bf16[128,128], index: 3, kind: output, shape index: {}]  }
   0x1   :  { %v524_v0 = vld [vmem:[%s653_s1] sm:$0xff]   ;;  %v525_v1 = vld [vmem:[%s653_s1 + $0x8] sm:$0xff]   ;;  %v526_v2 = vld [vmem:[%s653_s1 + $0x10] sm:$0xff]  }
   0x2   :  { %486 = vmatprep.subr.bf16.mxu0 %v524_v0  ;;  %512 = vmatprep.subr.bf16.mxu1 %v524_v0  ;;  %v529_v3 = vld [vmem:[%s654_s0] sm:$0xff]   ;;  %v527_v5 = vld [vmem:[%s653_s1 + $0x18] sm:$0xff]   ;;  %v531_v8 = vld [vmem:[%s654_s0 + $0x8] sm:$0xff]  }
   0x3   :  { %487 = vmatpush3.bf16.msra.mxu0 %v524_v0  ;;  %517 = vmatpush3.bf16.msra.mxu1 %v524_v0  ;;  %v530_v4 = vld [vmem:[%s654_s0 + $0x20] sm:$0xff]   ;;  %v532_v9 = vld [vmem:[%s654_s0 + $0x28] sm:$0xff]   ;;  %v533_v10 = vld [vmem:[%s654_s0 + $0x10] sm:$0xff]  }
   0x4   :  { %488 = vmatprep.subr.bf16.mxu0 %v525_v1  ;;  %513 = vmatprep.subr.bf16.mxu1 %v525_v1  ;;  %v528_v6 = vld [vmem:[%s653_s1 + $0x20] ss:$0 sps:$4 sm:$0xff]   ;;  %v534_v11 = vld [vmem:[%s654_s0 + $0x30] sm:$0xff]   ;;  %v535_v12 = vld [vmem:[%s654_s0 + $0x18] sm:$0xff]  }
   0x5   :  { %496 = vmatprep.mubr.msk.bf16.mxu0 %vm114_vm0, %v529_v3  ;;  %504 = vmatprep.mubr.msk.bf16.mxu1 %vm114_vm0, %v530_v4  ;;  %v141_v7 = vsel %vm139_vm1, %v528_v6, 0  ;;  %v536_v13 = vld [vmem:[%s654_s0 + $0x38] sm:$0xff]   ;;  %v607_v14 = vld [vmem:[%s655_s2] ss:$0 sm:$0xff] }
   0x7   :  { %489 = vmatpush3.bf16.msra.mxu0 %v525_v1  ;;  %518 = vmatpush3.bf16.msra.mxu1 %v525_v1 }
   0x8   :  { %490 = vmatprep.subr.bf16.mxu0 %v526_v2  ;;  %514 = vmatprep.subr.bf16.mxu1 %v526_v2 }
   0xb   :  { %491 = vmatpush3.bf16.msra.mxu0 %v526_v2  ;;  %519 = vmatpush3.bf16.msra.mxu1 %v526_v2 }
   0xc   :  { %492 = vmatprep.subr.bf16.mxu0 %v527_v5  ;;  %515 = vmatprep.subr.bf16.mxu1 %v527_v5 }
   0xf   :  { %493 = vmatpush3.bf16.msra.mxu0 %v527_v5  ;;  %520 = vmatpush3.bf16.msra.mxu1 %v527_v5 }
  0x10   :  { %522 = vmatprep.subr.msk.bf16.mxu0 %vm139_vm1, %v528_v6  ;;  %523 = vmatprep.subr.msk.bf16.mxu1 %vm139_vm1, %v528_v6 }
  0x13   :  { %495 = vmatpush3.bf16.msra.mxu0 %v141_v7  ;;  %521 = vmatpush3.bf16.msra.mxu1 %v141_v7 }
  0x16   :  { %497 = vmatmul.mubr.msk.bf16.vlgmr.msra.gmra.mrb[0].mxu0 %vm114_vm0, %v531_v8  ;;  %505 = vmatmul.mubr.msk.bf16.vlgmr.msra.gmra.mrb[0].mxu1 %vm114_vm0, %v532_v9 }
  0x17   :  { %500 = vmatprep.mubr.msk.bf16.mxu0 %vm114_vm0, %v533_v10  ;;  %508 = vmatprep.mubr.msk.bf16.mxu1 %vm114_vm0, %v534_v11 }
  0x1e   :  { %501 = vmatmul.mubr.msk.bf16.gmra.mrb[4].mxu0 %vm114_vm0, %v535_v12  ;;  %509 = vmatmul.mubr.msk.bf16.gmra.mrb[4].mxu1 %vm114_vm0, %v536_v13 }
  0xe9   :  { %v498_v15 = vpop.f32.mrb[0].mxu0  ;;  %v506_v16 = vpop.f32.mrb[0].mxu1 }
  0xea   :  { %v186_v17 = vadd.f32 %v498_v15, %v607_v14  ;;  %v218_v18 = vadd.f32 %v506_v16, %v607_v14  ;;  %v177_v19 = vpop.f32.mrb[1].mxu0  ;;  %v209_v20 = vpop.f32.mrb[1].mxu1 }
  0xeb   :  { %v178_v21 = vadd.f32 %v607_v14, %v177_v19  ;;  %v210_v22 = vadd.f32 %v607_v14, %v209_v20  ;;  %v499_v23 = vpop.f32.mrb[2].mxu0  ;;  %v507_v24 = vpop.f32.mrb[2].mxu1 }
  0xec   :  { %vm242_vm2 = vcmp.ge.f32.partialorder %v186_v17, 0.0  ;;  %v258_v25 = vmul.f32 0.1, %v186_v17  ;;  %vm250_vm3 = vcmp.ge.f32.partialorder %v218_v18, 0.0  ;;  %v266_v26 = vmul.f32 0.1, %v218_v18 }
  0xed   :  { %vm240_vm4 = vcmp.ge.f32.partialorder %v178_v21, 0.0  ;;  %v256_v27 = vmul.f32 0.1, %v178_v21  ;;  %vm248_vm5 = vcmp.ge.f32.partialorder %v210_v22, 0.0  ;;  %v264_v28 = vmul.f32 0.1, %v210_v22 }
  0xee   :  { %v189_v29 = vadd.f32 %v499_v23, %v607_v14  ;;  %v221_v30 = vadd.f32 %v507_v24, %v607_v14  ;;  %v180_v31 = vpop.f32.mrb[3].mxu0  ;;  %v212_v32 = vpop.f32.mrb[3].mxu1  ;;  %v274_v33 = vsel %vm242_vm2, %v186_v17, %v258_v25  ;;  %v282_v34 = vsel %vm250_vm3, %v218_v18, %v266_v26 }
  0xef   :  { %v181_v35 = vadd.f32 %v607_v14, %v180_v31  ;;  %v213_v36 = vadd.f32 %v607_v14, %v212_v32  ;;  %v272_v41 = vsel %vm240_vm4, %v178_v21, %v256_v27  ;;  %v280_v42 = vsel %vm248_vm5, %v210_v22, %v264_v28 }
  0xf0   :  { %vm243_vm6 = vcmp.ge.f32.partialorder %v189_v29, 0.0  ;;  %v259_v37 = vmul.f32 0.1, %v189_v29  ;;  %vm251_vm7 = vcmp.ge.f32.partialorder %v221_v30, 0.0  ;;  %v267_v38 = vmul.f32 0.1, %v221_v30 }
  0xf1   :  { %vm241_vm8 = vcmp.ge.f32.partialorder %v181_v35, 0.0  ;;  %v257_v39 = vmul.f32 0.1, %v181_v35  ;;  %vm249_vm9 = vcmp.ge.f32.partialorder %v213_v36, 0.0  ;;  %v265_v40 = vmul.f32 0.1, %v213_v36 }
  0xf2   :  { %v275_v43 = vsel %vm243_vm6, %v189_v29, %v259_v37  ;;  %v283_v44 = vsel %vm251_vm7, %v221_v30, %v267_v38  ;;  %v502_v45 = vpop.f32.mrb[4].mxu0  ;;  %v510_v46 = vpop.f32.mrb[4].mxu1 }
  0xf3   :  { %v434_v47 = vpack.c.bf16 %v275_v43, %v274_v33  ;;  %v454_v48 = vpack.c.bf16 %v283_v44, %v282_v34  ;;  %v273_v49 = vsel %vm241_vm8, %v181_v35, %v257_v39  ;;  %v281_v50 = vsel %vm249_vm9, %v213_v36, %v265_v40  ;;  %v193_v51 = vpop.f32.mrb[5].mxu0  ;;  %v225_v52 = vpop.f32.mrb[5].mxu1 }
  0xf4   :  { %v429_v53 = vpack.c.bf16 %v273_v49, %v272_v41  ;;  %v449_v54 = vpack.c.bf16 %v281_v50, %v280_v42  ;;  %v202_v55 = vadd.f32 %v502_v45, %v607_v14  ;;  %v234_v56 = vadd.f32 %v510_v46, %v607_v14  ;;  %v503_v57 = vpop.f32.mrb[6].mxu0  ;;  %v511_v58 = vpop.f32.mrb[6].mxu1 }
  0xf5   :  { %466 = vst [vmem:[%s656_s3 + $0x8] sm:$0xff] %v434_v47   ;;  %470 = vst [vmem:[%s656_s3 + $0x28] sm:$0xff] %v454_v48   ;;  %v194_v59 = vadd.f32 %v607_v14, %v193_v51  ;;  %v226_v60 = vadd.f32 %v607_v14, %v225_v52  ;;  %v205_v61 = vadd.f32 %v503_v57, %v607_v14  ;;  %v196_v63 = vpop.f32.mrb[7].mxu0  ;;  %v228_v0 = vpop.f32.mrb[7].mxu1 }
  0xf6   :  { %v237_v62 = vadd.f32 %v511_v58, %v607_v14  ;;  %430 = vst [vmem:[%s656_s3] sm:$0xff] %v429_v53   ;;  %469 = vst [vmem:[%s656_s3 + $0x20] sm:$0xff] %v449_v54   ;;  %v262_v1 = vmul.f32 0.1, %v202_v55  ;;  %vm246_vm10 = vcmp.ge.f32.partialorder %v202_v55, 0.0  ;;  %v270_v2 = vmul.f32 0.1, %v234_v56 }
  0xf7   :  { %vm254_vm11 = vcmp.ge.f32.partialorder %v234_v56, 0.0  ;;  %vm244_vm12 = vcmp.ge.f32.partialorder %v194_v59, 0.0  ;;  %vm247_vm13 = vcmp.ge.f32.partialorder %v205_v61, 0.0  ;;  %v263_v3 = vmul.f32 0.1, %v205_v61 }
  0xf8   :  { %v260_v4 = vmul.f32 0.1, %v194_v59  ;;  %vm252_vm14 = vcmp.ge.f32.partialorder %v226_v60, 0.0  ;;  %vm255_vm15 = vcmp.ge.f32.partialorder %v237_v62, 0.0  ;;  %v271_v5 = vmul.f32 0.1, %v237_v62 }
  0xf9   :  { %v278_v6 = vsel %vm246_vm10, %v202_v55, %v262_v1  ;;  %v279_v7 = vsel %vm247_vm13, %v205_v61, %v263_v3  ;;  %v197_v8 = vadd.f32 %v607_v14, %v196_v63  ;;  %v229_v9 = vadd.f32 %v607_v14, %v228_v0 }
  0xfa   :  { %v286_v10 = vsel %vm254_vm11, %v234_v56, %v270_v2  ;;  %v268_v11 = vmul.f32 0.1, %v226_v60  ;;  %v444_v12 = vpack.c.bf16 %v279_v7, %v278_v6  ;;  %v287_v13 = vsel %vm255_vm15, %v237_v62, %v271_v5 }
  0xfb   :  { %v464_v15 = vpack.c.bf16 %v287_v13, %v286_v10  ;;  %vm245_vm0 = vcmp.ge.f32.partialorder %v197_v8, 0.0  ;;  %v261_v16 = vmul.f32 0.1, %v197_v8  ;;  %vm253_vm1 = vcmp.ge.f32.partialorder %v229_v9, 0.0 }
  0xfc   :  { %468 = vst [vmem:[%s656_s3 + $0x18] sm:$0xff] %v444_v12   ;;  %v269_v17 = vmul.f32 0.1, %v229_v9  ;;  %v276_v18 = vsel %vm244_vm12, %v194_v59, %v260_v4  ;;  %v284_v19 = vsel %vm252_vm14, %v226_v60, %v268_v11 }
  0xfd   :  { %472 = vst [vmem:[%s656_s3 + $0x38] sm:$0xff] %v464_v15   ;;  %v277_v14 = vsel %vm245_vm0, %v197_v8, %v261_v16 }
  0xfe   :  { %v439_v20 = vpack.c.bf16 %v277_v14, %v276_v18  ;;  %v285_v21 = vsel %vm253_vm1, %v229_v9, %v269_v17 }
  0xff   :  { %v459_v22 = vpack.c.bf16 %v285_v21, %v284_v19 }
 0x100   :  { %467 = vst [vmem:[%s656_s3 + $0x10] sm:$0xff] %v439_v20  }
 0x101   :  { %471 = vst [vmem:[%s656_s3 + $0x30] sm:$0xff] %v459_v22  }

// kernel: _lambda_.44
= control target key start
LH: loop header
LB: loop body
LE: loop exit
PB: predicated region body
PF: predicated region fallthrough
CT: control target
= control target key end

     0   :  { %vm86_vm0 = vcmask 130048   ;;  %s579_s1 = inlined_call_operand.vmem [shape: bf16[16,128], index: 1, kind: input, shape index: {}]   ;;  %s580_s0 = inlined_call_operand.vmem [shape: bf16[128,16], index: 0, kind: input, shape index: {}]   ;;  %s581_s2 = inlined_call_operand.vmem [shape: f32[1,128], index: 2, kind: input, shape index: {}]   ;;  %s582_s3 = inlined_call_operand.vmem [shape: bf16[128,128], index: 3, kind: output, shape index: {}]  }
   0x1   :  { %v466_v0 = vld [vmem:[%s579_s1] sm:$0xff]   ;;  %v469_v3 = vld [vmem:[%s580_s0 + $0x8] sm:$0xff]   ;;  %v471_v5 = vld [vmem:[%s580_s0 + $0x10] sm:$0xff]  }
   0x2   :  { %v467_v1 = vld [vmem:[%s580_s0] sm:$0xff]   ;;  %446 = vmatprep.subr.bf16.mxu0 %v466_v0  ;;  %464 = vmatprep.subr.bf16.mxu1 %v466_v0  ;;  %v470_v4 = vld [vmem:[%s580_s0 + $0x28] sm:$0xff]   ;;  %v472_v6 = vld [vmem:[%s580_s0 + $0x30] sm:$0xff]  }
   0x3   :  { %v468_v2 = vld [vmem:[%s580_s0 + $0x20] sm:$0xff]   ;;  %447 = vmatpush3.bf16.msra.mxu0 %v466_v0  ;;  %465 = vmatpush3.bf16.msra.mxu1 %v466_v0  ;;  %v473_v7 = vld [vmem:[%s580_s0 + $0x18] sm:$0xff]  }
   0x4   :  { %448 = vmatprep.mubr.msk.bf16.mxu0 %vm86_vm0, %v467_v1  ;;  %456 = vmatprep.mubr.msk.bf16.mxu1 %vm86_vm0, %v468_v2  ;;  %v474_v8 = vld [vmem:[%s580_s0 + $0x38] sm:$0xff]   ;;  %v533_v9 = vld [vmem:[%s581_s2] ss:$0 sm:$0xff] }
   0x6   :  { %449 = vmatmul.mubr.msk.bf16.vlgmr.msra.gmra.mrb[0].mxu0 %vm86_vm0, %v469_v3  ;;  %457 = vmatmul.mubr.msk.bf16.vlgmr.msra.gmra.mrb[0].mxu1 %vm86_vm0, %v470_v4 }
   0x7   :  { %452 = vmatprep.mubr.msk.bf16.mxu0 %vm86_vm0, %v471_v5  ;;  %460 = vmatprep.mubr.msk.bf16.mxu1 %vm86_vm0, %v472_v6 }
   0xe   :  { %453 = vmatmul.mubr.msk.bf16.gmra.mrb[4].mxu0 %vm86_vm0, %v473_v7  ;;  %461 = vmatmul.mubr.msk.bf16.gmra.mrb[4].mxu1 %vm86_vm0, %v474_v8 }
  0xd9   :  { %v450_v10 = vpop.f32.mrb[0].mxu0  ;;  %v458_v11 = vpop.f32.mrb[0].mxu1 }
  0xda   :  { %v154_v12 = vadd.f32 %v450_v10, %v533_v9  ;;  %v186_v13 = vadd.f32 %v458_v11, %v533_v9  ;;  %v145_v14 = vpop.f32.mrb[1].mxu0  ;;  %v177_v15 = vpop.f32.mrb[1].mxu1 }
  0xdb   :  { %v146_v16 = vadd.f32 %v533_v9, %v145_v14  ;;  %v178_v17 = vadd.f32 %v533_v9, %v177_v15  ;;  %v451_v18 = vpop.f32.mrb[2].mxu0  ;;  %v459_v19 = vpop.f32.mrb[2].mxu1 }
  0xdc   :  { %vm210_vm1 = vcmp.ge.f32.partialorder %v154_v12, 0.0  ;;  %v226_v20 = vmul.f32 0.1, %v154_v12  ;;  %vm218_vm2 = vcmp.ge.f32.partialorder %v186_v13, 0.0  ;;  %v234_v21 = vmul.f32 0.1, %v186_v13 }
  0xdd   :  { %vm208_vm3 = vcmp.ge.f32.partialorder %v146_v16, 0.0  ;;  %v224_v22 = vmul.f32 0.1, %v146_v16  ;;  %vm216_vm4 = vcmp.ge.f32.partialorder %v178_v17, 0.0  ;;  %v232_v23 = vmul.f32 0.1, %v178_v17 }
  0xde   :  { %v157_v24 = vadd.f32 %v451_v18, %v533_v9  ;;  %v189_v25 = vadd.f32 %v459_v19, %v533_v9  ;;  %v148_v26 = vpop.f32.mrb[3].mxu0  ;;  %v180_v27 = vpop.f32.mrb[3].mxu1  ;;  %v242_v28 = vsel %vm210_vm1, %v154_v12, %v226_v20  ;;  %v250_v29 = vsel %vm218_vm2, %v186_v13, %v234_v21 }
  0xdf   :  { %v149_v30 = vadd.f32 %v533_v9, %v148_v26  ;;  %v181_v31 = vadd.f32 %v533_v9, %v180_v27  ;;  %v240_v36 = vsel %vm208_vm3, %v146_v16, %v224_v22  ;;  %v248_v37 = vsel %vm216_vm4, %v178_v17, %v232_v23 }
  0xe0   :  { %vm211_vm5 = vcmp.ge.f32.partialorder %v157_v24, 0.0  ;;  %v227_v32 = vmul.f32 0.1, %v157_v24  ;;  %vm219_vm6 = vcmp.ge.f32.partialorder %v189_v25, 0.0  ;;  %v235_v33 = vmul.f32 0.1, %v189_v25 }
  0xe1   :  { %vm209_vm7 = vcmp.ge.f32.partialorder %v149_v30, 0.0  ;;  %v225_v34 = vmul.f32 0.1, %v149_v30  ;;  %vm217_vm8 = vcmp.ge.f32.partialorder %v181_v31, 0.0  ;;  %v233_v35 = vmul.f32 0.1, %v181_v31 }
  0xe2   :  { %v243_v38 = vsel %vm211_vm5, %v157_v24, %v227_v32  ;;  %v251_v39 = vsel %vm219_vm6, %v189_v25, %v235_v33  ;;  %v454_v40 = vpop.f32.mrb[4].mxu0  ;;  %v462_v41 = vpop.f32.mrb[4].mxu1 }
  0xe3   :  { %v398_v42 = vpack.c.bf16 %v243_v38, %v242_v28  ;;  %v418_v43 = vpack.c.bf16 %v251_v39, %v250_v29  ;;  %v241_v44 = vsel %vm209_vm7, %v149_v30, %v225_v34  ;;  %v249_v45 = vsel %vm217_vm8, %v181_v31, %v233_v35  ;;  %v161_v46 = vpop.f32.mrb[5].mxu0  ;;  %v193_v47 = vpop.f32.mrb[5].mxu1 }
  0xe4   :  { %v393_v48 = vpack.c.bf16 %v241_v44, %v240_v36  ;;  %v413_v49 = vpack.c.bf16 %v249_v45, %v248_v37  ;;  %v170_v50 = vadd.f32 %v454_v40, %v533_v9  ;;  %v202_v51 = vadd.f32 %v462_v41, %v533_v9  ;;  %v455_v52 = vpop.f32.mrb[6].mxu0  ;;  %v463_v53 = vpop.f32.mrb[6].mxu1 }
  0xe5   :  { %430 = vst [vmem:[%s582_s3 + $0x8] sm:$0xff] %v398_v42   ;;  %434 = vst [vmem:[%s582_s3 + $0x28] sm:$0xff] %v418_v43   ;;  %v162_v54 = vadd.f32 %v533_v9, %v161_v46  ;;  %v194_v55 = vadd.f32 %v533_v9, %v193_v47  ;;  %v173_v56 = vadd.f32 %v455_v52, %v533_v9  ;;  %v164_v58 = vpop.f32.mrb[7].mxu0  ;;  %v196_v59 = vpop.f32.mrb[7].mxu1 }
  0xe6   :  { %v205_v57 = vadd.f32 %v463_v53, %v533_v9  ;;  %394 = vst [vmem:[%s582_s3] sm:$0xff] %v393_v48   ;;  %433 = vst [vmem:[%s582_s3 + $0x20] sm:$0xff] %v413_v49   ;;  %v230_v60 = vmul.f32 0.1, %v170_v50  ;;  %vm214_vm9 = vcmp.ge.f32.partialorder %v170_v50, 0.0  ;;  %v238_v61 = vmul.f32 0.1, %v202_v51 }
  0xe7   :  { %vm222_vm10 = vcmp.ge.f32.partialorder %v202_v51, 0.0  ;;  %vm212_vm11 = vcmp.ge.f32.partialorder %v162_v54, 0.0  ;;  %vm215_vm12 = vcmp.ge.f32.partialorder %v173_v56, 0.0  ;;  %v231_v62 = vmul.f32 0.1, %v173_v56 }
  0xe8   :  { %v228_v63 = vmul.f32 0.1, %v162_v54  ;;  %vm220_vm13 = vcmp.ge.f32.partialorder %v194_v55, 0.0  ;;  %vm223_vm14 = vcmp.ge.f32.partialorder %v205_v57, 0.0  ;;  %v239_v0 = vmul.f32 0.1, %v205_v57 }
  0xe9   :  { %v246_v1 = vsel %vm214_vm9, %v170_v50, %v230_v60  ;;  %v247_v2 = vsel %vm215_vm12, %v173_v56, %v231_v62  ;;  %v165_v3 = vadd.f32 %v533_v9, %v164_v58  ;;  %v197_v4 = vadd.f32 %v533_v9, %v196_v59 }
  0xea   :  { %v254_v5 = vsel %vm222_vm10, %v202_v51, %v238_v61  ;;  %v236_v6 = vmul.f32 0.1, %v194_v55  ;;  %v408_v7 = vpack.c.bf16 %v247_v2, %v246_v1  ;;  %v255_v8 = vsel %vm223_vm14, %v205_v57, %v239_v0 }
  0xeb   :  { %v428_v10 = vpack.c.bf16 %v255_v8, %v254_v5  ;;  %vm213_vm15 = vcmp.ge.f32.partialorder %v165_v3, 0.0  ;;  %v229_v11 = vmul.f32 0.1, %v165_v3  ;;  %vm221_vm0 = vcmp.ge.f32.partialorder %v197_v4, 0.0 }
  0xec   :  { %432 = vst [vmem:[%s582_s3 + $0x18] sm:$0xff] %v408_v7   ;;  %v237_v12 = vmul.f32 0.1, %v197_v4  ;;  %v244_v13 = vsel %vm212_vm11, %v162_v54, %v228_v63  ;;  %v252_v14 = vsel %vm220_vm13, %v194_v55, %v236_v6 }
  0xed   :  { %436 = vst [vmem:[%s582_s3 + $0x38] sm:$0xff] %v428_v10   ;;  %v245_v9 = vsel %vm213_vm15, %v165_v3, %v229_v11 }
  0xee   :  { %v403_v15 = vpack.c.bf16 %v245_v9, %v244_v13  ;;  %v253_v16 = vsel %vm221_vm0, %v197_v4, %v237_v12 }
  0xef   :  { %v423_v17 = vpack.c.bf16 %v253_v16, %v252_v14 }
  0xf0   :  { %431 = vst [vmem:[%s582_s3 + $0x10] sm:$0xff] %v403_v15  }
  0xf1   :  { %435 = vst [vmem:[%s582_s3 + $0x30] sm:$0xff] %v423_v17  }

// kernel: _lambda_.45
= control target key start
LH: loop header
LB: loop body
LE: loop exit
PB: predicated region body
PF: predicated region fallthrough
CT: control target
= control target key end

     0   :  { %vm117_vm0 = vcmask 588800   ;;  %vm142_vm1 = vcmask 1043456   ;;  %s823_s1 = inlined_call_operand.vmem [shape: bf16[72,128], index: 1, kind: input, shape index: {}]   ;;  %s824_s0 = inlined_call_operand.vmem [shape: bf16[128,72], index: 0, kind: input, shape index: {}]   ;;  %s825_s3 = inlined_call_operand.vmem [shape: bf16[128,128], index: 3, kind: input, shape index: {}]   ;;  %s826_s2 = inlined_call_operand.vmem [shape: f32[1,128], index: 2, kind: input, shape index: {}]   ;;  %s827_s4 = inlined_call_operand.vmem [shape: bf16[128,128], index: 4, kind: output, shape index: {}]  }
   0x1   :  { %v614_v0 = vld [vmem:[%s823_s1] sm:$0xff]   ;;  %v615_v1 = vld [vmem:[%s823_s1 + $0x8] sm:$0xff]   ;;  %v616_v2 = vld [vmem:[%s823_s1 + $0x10] sm:$0xff]  }
   0x2   :  { %576 = vmatprep.subr.bf16.mxu0 %v614_v0  ;;  %602 = vmatprep.subr.bf16.mxu1 %v614_v0  ;;  %v619_v3 = vld [vmem:[%s824_s0] sm:$0xff]   ;;  %v617_v5 = vld [vmem:[%s823_s1 + $0x18] sm:$0xff]   ;;  %v621_v8 = vld [vmem:[%s824_s0 + $0x8] sm:$0xff]  }
   0x3   :  { %577 = vmatpush3.bf16.msra.mxu0 %v614_v0  ;;  %607 = vmatpush3.bf16.msra.mxu1 %v614_v0  ;;  %v620_v4 = vld [vmem:[%s824_s0 + $0x20] sm:$0xff]   ;;  %v622_v9 = vld [vmem:[%s824_s0 + $0x28] sm:$0xff]   ;;  %v623_v10 = vld [vmem:[%s824_s0 + $0x10] sm:$0xff]  }
   0x4   :  { %578 = vmatprep.subr.bf16.mxu0 %v615_v1  ;;  %603 = vmatprep.subr.bf16.mxu1 %v615_v1  ;;  %v618_v6 = vld [vmem:[%s823_s1 + $0x20] ss:$0 sps:$4 sm:$0xff]   ;;  %v624_v11 = vld [vmem:[%s824_s0 + $0x30] sm:$0xff]   ;;  %v625_v12 = vld [vmem:[%s824_s0 + $0x18] sm:$0xff]  }
   0x5   :  { %586 = vmatprep.mubr.msk.bf16.mxu0 %vm117_vm0, %v619_v3  ;;  %594 = vmatprep.mubr.msk.bf16.mxu1 %vm117_vm0, %v620_v4  ;;  %v144_v7 = vsel %vm142_vm1, %v618_v6, 0  ;;  %v626_v13 = vld [vmem:[%s824_s0 + $0x38] sm:$0xff]   ;;  %v702_v14 = vld [vmem:[%s825_s3 + $0x8] sm:$0xff]   ;;  %v712_v16 = vld [vmem:[%s825_s3] sm:$0xff]  }
   0x6   :  { %v707_v15 = vld [vmem:[%s825_s3 + $0x28] sm:$0xff]   ;;  %v717_v17 = vld [vmem:[%s825_s3 + $0x20] sm:$0xff]   ;;  %v727_v19 = vld [vmem:[%s825_s3 + $0x18] sm:$0xff]   ;;  %v483_v20 = vunpack.c.l.bf16 %v702_v14  ;;  %v479_v22 = vunpack.c.l.bf16 %v712_v16  ;;  %v484_v28 = vunpack.c.h.bf16 %v702_v14  ;;  %v480_v30 = vunpack.c.h.bf16 %v712_v16 }
   0x7   :  { %579 = vmatpush3.bf16.msra.mxu0 %v615_v1  ;;  %608 = vmatpush3.bf16.msra.mxu1 %v615_v1  ;;  %v722_v18 = vld [vmem:[%s826_s2] ss:$0 sm:$0xff]  ;;  %v499_v21 = vunpack.c.l.bf16 %v707_v15  ;;  %v735_v23 = vld [vmem:[%s825_s3 + $0x38] sm:$0xff]   ;;  %v740_v24 = vld [vmem:[%s825_s3 + $0x10] sm:$0xff]   ;;  %v495_v27 = vunpack.c.l.bf16 %v717_v17  ;;  %v500_v29 = vunpack.c.h.bf16 %v707_v15  ;;  %v496_v35 = vunpack.c.h.bf16 %v717_v17 }
   0x8   :  { %580 = vmatprep.subr.bf16.mxu0 %v616_v2  ;;  %604 = vmatprep.subr.bf16.mxu1 %v616_v2  ;;  %v491_v36 = vunpack.c.l.bf16 %v727_v19  ;;  %v753_v37 = vld [vmem:[%s825_s3 + $0x30] sm:$0xff]   ;;  %v507_v42 = vunpack.c.l.bf16 %v735_v23  ;;  %v487_v43 = vunpack.c.l.bf16 %v740_v24  ;;  %v492_v49 = vunpack.c.h.bf16 %v727_v19 }
   0x9   :  { %v503_v48 = vunpack.c.l.bf16 %v753_v37  ;;  %v508_v56 = vunpack.c.h.bf16 %v735_v23  ;;  %v488_v57 = vunpack.c.h.bf16 %v740_v24 }
   0xb   :  { %581 = vmatpush3.bf16.msra.mxu0 %v616_v2  ;;  %609 = vmatpush3.bf16.msra.mxu1 %v616_v2 }
   0xc   :  { %582 = vmatprep.subr.bf16.mxu0 %v617_v5  ;;  %605 = vmatprep.subr.bf16.mxu1 %v617_v5 }
   0xf   :  { %583 = vmatpush3.bf16.msra.mxu0 %v617_v5  ;;  %610 = vmatpush3.bf16.msra.mxu1 %v617_v5 }
  0x10   :  { %612 = vmatprep.subr.msk.bf16.mxu0 %vm142_vm1, %v618_v6  ;;  %613 = vmatprep.subr.msk.bf16.mxu1 %vm142_vm1, %v618_v6 }
  0x13   :  { %585 = vmatpush3.bf16.msra.mxu0 %v144_v7  ;;  %611 = vmatpush3.bf16.msra.mxu1 %v144_v7 }
  0x16   :  { %587 = vmatmul.mubr.msk.bf16.vlgmr.msra.gmra.mrb[0].mxu0 %vm117_vm0, %v621_v8  ;;  %595 = vmatmul.mubr.msk.bf16.vlgmr.msra.gmra.mrb[0].mxu1 %vm117_vm0, %v622_v9 }
  0x17   :  { %590 = vmatprep.mubr.msk.bf16.mxu0 %vm117_vm0, %v623_v10  ;;  %598 = vmatprep.mubr.msk.bf16.mxu1 %vm117_vm0, %v624_v11 }
  0x1e   :  { %591 = vmatmul.mubr.msk.bf16.gmra.mrb[4].mxu0 %vm117_vm0, %v625_v12  ;;  %599 = vmatmul.mubr.msk.bf16.gmra.mrb[4].mxu1 %vm117_vm0, %v626_v13 }
  0xe9   :  { %v588_v25 = vpop.f32.mrb[0].mxu0  ;;  %v596_v26 = vpop.f32.mrb[0].mxu1 }
  0xea   :  { %v189_v31 = vadd.f32 %v588_v25, %v722_v18  ;;  %v221_v32 = vadd.f32 %v596_v26, %v722_v18  ;;  %v180_v33 = vpop.f32.mrb[1].mxu0  ;;  %v212_v34 = vpop.f32.mrb[1].mxu1 }
  0xeb   :  { %v181_v38 = vadd.f32 %v722_v18, %v180_v33  ;;  %v213_v39 = vadd.f32 %v722_v18, %v212_v34  ;;  %v589_v40 = vpop.f32.mrb[2].mxu0  ;;  %v597_v41 = vpop.f32.mrb[2].mxu1 }
  0xec   :  { %vm245_vm2 = vcmp.ge.f32.partialorder %v189_v31, 0.0  ;;  %v261_v44 = vmul.f32 0.1, %v189_v31  ;;  %vm253_vm3 = vcmp.ge.f32.partialorder %v221_v32, 0.0  ;;  %v269_v45 = vmul.f32 0.1, %v221_v32 }
  0xed   :  { %v259_v46 = vmul.f32 0.1, %v181_v38  ;;  %v267_v47 = vmul.f32 0.1, %v213_v39  ;;  %v192_v52 = vadd.f32 %v589_v40, %v722_v18  ;;  %v224_v53 = vadd.f32 %v597_v41, %v722_v18  ;;  %v183_v54 = vpop.f32.mrb[3].mxu0  ;;  %v215_v55 = vpop.f32.mrb[3].mxu1 }
  0xee   :  { %v277_v50 = vsel %vm245_vm2, %v189_v31, %v261_v44  ;;  %v285_v51 = vsel %vm253_vm3, %v221_v32, %v269_v45  ;;  %vm243_vm4 = vcmp.ge.f32.partialorder %v181_v38, 0.0  ;;  %vm251_vm5 = vcmp.ge.f32.partialorder %v213_v39, 0.0 }
  0xef   :  { %v325_v58 = vadd.f32 %v483_v20, %v277_v50  ;;  %v333_v59 = vadd.f32 %v499_v21, %v285_v51  ;;  %vm246_vm6 = vcmp.ge.f32.partialorder %v192_v52, 0.0  ;;  %v262_v60 = vmul.f32 0.1, %v192_v52 }
  0xf0   :  { %vm254_vm7 = vcmp.ge.f32.partialorder %v224_v53, 0.0  ;;  %v270_v61 = vmul.f32 0.1, %v224_v53  ;;  %v184_v62 = vadd.f32 %v722_v18, %v183_v54  ;;  %v216_v63 = vadd.f32 %v722_v18, %v215_v55 }
  0xf1   :  { %v592_v0 = vpop.f32.mrb[4].mxu0  ;;  %v600_v1 = vpop.f32.mrb[4].mxu1  ;;  %v275_v2 = vsel %vm243_vm4, %v181_v38, %v259_v46  ;;  %v283_v3 = vsel %vm251_vm5, %v213_v39, %v267_v47  ;;  %v278_v4 = vsel %vm246_vm6, %v192_v52, %v262_v60  ;;  %v504_v50 = vunpack.c.h.bf16 %v753_v37 }
  0xf2   :  { %v205_v5 = vadd.f32 %v592_v0, %v722_v18  ;;  %v196_v6 = vpop.f32.mrb[5].mxu0  ;;  %v228_v7 = vpop.f32.mrb[5].mxu1  ;;  %v326_v8 = vadd.f32 %v484_v28, %v278_v4  ;;  %v286_v9 = vsel %vm254_vm7, %v224_v53, %v270_v61  ;;  %vm244_vm8 = vcmp.ge.f32.partialorder %v184_v62, 0.0 }
  0xf3   :  { %v260_v10 = vmul.f32 0.1, %v184_v62  ;;  %v593_v11 = vpop.f32.mrb[6].mxu0  ;;  %v601_v12 = vpop.f32.mrb[6].mxu1  ;;  %v334_v13 = vadd.f32 %v500_v29, %v286_v9  ;;  %vm252_vm9 = vcmp.ge.f32.partialorder %v216_v63, 0.0  ;;  %v237_v15 = vadd.f32 %v600_v1, %v722_v18 }
  0xf4   :  { %v268_v14 = vmul.f32 0.1, %v216_v63  ;;  %v199_v20 = vpop.f32.mrb[7].mxu0  ;;  %v231_v21 = vpop.f32.mrb[7].mxu1  ;;  %v323_v25 = vadd.f32 %v479_v22, %v275_v2  ;;  %v517_v26 = vpack.c.bf16 %v326_v8, %v325_v58  ;;  %v265_v32 = vmul.f32 0.1, %v205_v5 }
  0xf5   :  { %v276_v31 = vsel %vm244_vm8, %v184_v62, %v260_v10  ;;  %v537_v33 = vpack.c.bf16 %v334_v13, %v333_v59  ;;  %vm249_vm10 = vcmp.ge.f32.partialorder %v205_v5, 0.0  ;;  %v331_v29 = vadd.f32 %v495_v27, %v283_v3 }
  0xf6   :  { %v324_v28 = vadd.f32 %v480_v30, %v276_v31  ;;  %v284_v34 = vsel %vm252_vm9, %v216_v63, %v268_v14  ;;  %556 = vst [vmem:[%s827_s4 + $0x8] sm:$0xff] %v517_v26   ;;  %v197_v22 = vadd.f32 %v722_v18, %v196_v6  ;;  %v229_v39 = vadd.f32 %v722_v18, %v228_v7 }
  0xf7   :  { %v332_v38 = vadd.f32 %v496_v35, %v284_v34  ;;  %560 = vst [vmem:[%s827_s4 + $0x28] sm:$0xff] %v537_v33   ;;  %vm257_vm11 = vcmp.ge.f32.partialorder %v237_v15, 0.0  ;;  %v273_v30 = vmul.f32 0.1, %v237_v15  ;;  %v208_v27 = vadd.f32 %v593_v11, %v722_v18 }
  0xf8   :  { %v512_v16 = vpack.c.bf16 %v324_v28, %v323_v25  ;;  %v281_v41 = vsel %vm249_vm10, %v205_v5, %v265_v32  ;;  %vm247_vm12 = vcmp.ge.f32.partialorder %v197_v22, 0.0  ;;  %v263_v44 = vmul.f32 0.1, %v197_v22 }
  0xf9   :  { %v532_v40 = vpack.c.bf16 %v332_v38, %v331_v29  ;;  %vm255_vm13 = vcmp.ge.f32.partialorder %v229_v39, 0.0  ;;  %v271_v17 = vmul.f32 0.1, %v229_v39  ;;  %vm250_vm14 = vcmp.ge.f32.partialorder %v208_v27, 0.0 }
  0xfa   :  { %513 = vst [vmem:[%s827_s4] sm:$0xff] %v512_v16   ;;  %v266_v35 = vmul.f32 0.1, %v208_v27  ;;  %v240_v45 = vadd.f32 %v601_v12, %v722_v18  ;;  %v200_v46 = vadd.f32 %v722_v18, %v199_v20  ;;  %v232_v47 = vadd.f32 %v722_v18, %v231_v21 }
  0xfb   :  { %559 = vst [vmem:[%s827_s4 + $0x20] sm:$0xff] %v532_v40   ;;  %v329_v51 = vadd.f32 %v491_v36, %v281_v41  ;;  %v289_v52 = vsel %vm257_vm11, %v237_v15, %v273_v30  ;;  %v279_v53 = vsel %vm247_vm12, %v197_v22, %v263_v44  ;;  %v287_v55 = vsel %vm255_vm13, %v229_v39, %v271_v17 }
  0xfc   :  { %v282_v54 = vsel %vm250_vm14, %v208_v27, %v266_v35  ;;  %vm258_vm15 = vcmp.ge.f32.partialorder %v240_v45, 0.0  ;;  %v274_v59 = vmul.f32 0.1, %v240_v45  ;;  %vm248_vm0 = vcmp.ge.f32.partialorder %v200_v46, 0.0 }
  0xfd   :  { %v330_v58 = vadd.f32 %v492_v49, %v282_v54  ;;  %v264_v60 = vmul.f32 0.1, %v200_v46  ;;  %vm256_vm1 = vcmp.ge.f32.partialorder %v232_v47, 0.0  ;;  %v272_v61 = vmul.f32 0.1, %v232_v47 }
  0xfe   :  { %v290_v62 = vsel %vm258_vm15, %v240_v45, %v274_v59  ;;  %v337_v63 = vadd.f32 %v507_v42, %v289_v52  ;;  %v327_v19 = vadd.f32 %v487_v43, %v279_v53  ;;  %v335_v49 = vadd.f32 %v503_v48, %v287_v55 }
  0xff   :  { %v527_v18 = vpack.c.bf16 %v330_v58, %v329_v51  ;;  %v338_v36 = vadd.f32 %v508_v56, %v290_v62  ;;  %v280_v0 = vsel %vm248_vm0, %v200_v46, %v264_v60  ;;  %v288_v1 = vsel %vm256_vm1, %v232_v47, %v272_v61 }
 0x100   :  { %v328_v2 = vadd.f32 %v488_v57, %v280_v0  ;;  %v336_v3 = vadd.f32 %v504_v50, %v288_v1 }
 0x101   :  { %558 = vst [vmem:[%s827_s4 + $0x18] sm:$0xff] %v527_v18   ;;  %v547_v42 = vpack.c.bf16 %v338_v36, %v337_v63 }
 0x102   :  { %v522_v4 = vpack.c.bf16 %v328_v2, %v327_v19  ;;  %v542_v23 = vpack.c.bf16 %v336_v3, %v335_v49 }
 0x103   :  { %562 = vst [vmem:[%s827_s4 + $0x38] sm:$0xff] %v547_v42  }
 0x104   :  { %557 = vst [vmem:[%s827_s4 + $0x10] sm:$0xff] %v522_v4   ;;  %561 = vst [vmem:[%s827_s4 + $0x30] sm:$0xff] %v542_v23  }

// kernel: _lambda_.47
= control target key start
LH: loop header
LB: loop body
LE: loop exit
PB: predicated region body
PF: predicated region fallthrough
CT: control target
= control target key end

     0   :  { %vm52_vm0 = vcmask 261120   ;;  %s227_s1 = inlined_call_operand.vmem [shape: bf16[32,128], index: 1, kind: input, shape index: {}]   ;;  %s228_s0 = inlined_call_operand.vmem [shape: bf16[32,32], index: 0, kind: input, shape index: {}]   ;;  %s229_s2 = inlined_call_operand.vmem [shape: f32[1,128], index: 2, kind: input, shape index: {}]   ;;  %s230_s3 = inlined_call_operand.vmem [shape: bf16[32,128], index: 3, kind: output, shape index: {}]  }
   0x1   :  { %v182_v0 = vld [vmem:[%s227_s1] sm:$0xff]   ;;  %v183_v1 = vld [vmem:[%s227_s1 + $0x8] sm:$0xff]  }
   0x2   :  { %174 = vmatprep.subr.bf16.mxu0 %v182_v0  ;;  %v184_v2 = vld [vmem:[%s228_s0] sm:$0xff]   ;;  %v185_v3 = vld [vmem:[%s228_s0 + $0x8] sm:$0xff]  }
   0x3   :  { %175 = vmatpush3.bf16.msra.mxu0 %v182_v0  ;;  %178 = vmatprep.mubr.msk.bf16.mxu0 %vm52_vm0, %v184_v2  ;;  %v144_v4 = vld [vmem:[%s229_s2] ss:$0 sm:$0xff] }
   0x4   :  { %176 = vmatprep.subr.bf16.mxu0 %v183_v1 }
   0x7   :  { %177 = vmatpush3.bf16.msra.mxu0 %v183_v1 }
   0xa   :  { %179 = vmatmul.mubr.msk.bf16.vlgmr.msra.gmra.mrb[0].mxu0 %vm52_vm0, %v185_v3 }
  0xdd   :  { %v180_v5 = vpop.f32.mrb[0].mxu0 }
  0xde   :  { %v102_v6 = vadd.f32 %v180_v5, %v144_v4  ;;  %v93_v7 = vpop.f32.mrb[1].mxu0 }
  0xdf   :  { %v94_v8 = vadd.f32 %v144_v4, %v93_v7  ;;  %v181_v9 = vpop.f32.mrb[2].mxu0 }
  0xe0   :  { %v114_v10 = vmul.f32 0.1, %v102_v6  ;;  %v105_v11 = vadd.f32 %v181_v9, %v144_v4  ;;  %v96_v12 = vpop.f32.mrb[3].mxu0  ;;  %vm110_vm1 = vcmp.ge.f32.partialorder %v102_v6, 0.0 }
  0xe1   :  { %v112_v13 = vmul.f32 0.1, %v94_v8  ;;  %v97_v14 = vadd.f32 %v144_v4, %v96_v12  ;;  %vm108_vm2 = vcmp.ge.f32.partialorder %v94_v8, 0.0 }
  0xe2   :  { %vm111_vm3 = vcmp.ge.f32.partialorder %v105_v11, 0.0  ;;  %v115_v15 = vmul.f32 0.1, %v105_v11  ;;  %v118_v17 = vsel %vm110_vm1, %v102_v6, %v114_v10 }
  0xe3   :  { %vm109_vm4 = vcmp.ge.f32.partialorder %v97_v14, 0.0  ;;  %v113_v16 = vmul.f32 0.1, %v97_v14  ;;  %v116_v19 = vsel %vm108_vm2, %v94_v8, %v112_v13 }
  0xe4   :  { %v119_v18 = vsel %vm111_vm3, %v105_v11, %v115_v15 }
  0xe5   :  { %v167_v20 = vpack.c.bf16 %v119_v18, %v118_v17  ;;  %v117_v21 = vsel %vm109_vm4, %v97_v14, %v113_v16 }
  0xe6   :  { %v162_v22 = vpack.c.bf16 %v117_v21, %v116_v19 }
  0xe7   :  { %169 = vst [vmem:[%s230_s3 + $0x8] sm:$0xff] %v167_v20  }
  0xe8   :  { %163 = vst [vmem:[%s230_s3] sm:$0xff] %v162_v22  }

// kernel: _lambda_.46
= control target key start
LH: loop header
LB: loop body
LE: loop exit
PB: predicated region body
PF: predicated region fallthrough
CT: control target
= control target key end

     0   :  { %v277_v0 = vmov 0   ;;  %vm116_vm0 = vcmask 130048   ;;  %s346_s1 = inlined_call_operand.vmem [shape: bf16[144,128], index: 1, kind: input, shape index: {}]   ;;  %s347_s0 = inlined_call_operand.vmem [shape: bf16[32,144], index: 0, kind: input, shape index: {}]   ;;  %s348_s2 = inlined_call_operand.vmem [shape: f32[1,128], index: 2, kind: input, shape index: {}]   ;;  %s349_s3 = inlined_call_operand.vmem [shape: bf16[32,128], index: 3, kind: output, shape index: {}]  }
   0x1   :  { %123 = vmatprep.subr.bf16.mxu0 %v277_v0  ;;  %243 = vmatprep.subr.bf16.mxu1 %v277_v0  ;;  %v262_v1 = vld [vmem:[%s346_s1] sm:$0xff]   ;;  %v263_v2 = vld [vmem:[%s346_s1 + $0x8] sm:$0xff]   ;;  %v264_v3 = vld [vmem:[%s346_s1 + $0x10] sm:$0xff]  }
   0x2   :  { %124 = vmatpush1.bf16.msra.mxu0 %v262_v1  ;;  %252 = vmatpush1.bf16.msra.mxu1 %v262_v1  ;;  %v265_v4 = vld [vmem:[%s346_s1 + $0x18] sm:$0xff]   ;;  %v273_v5 = vld [vmem:[%s347_s0 + $0x4] ss:$8 sps:$4 sm:$0xff]   ;;  %v268_v9 = vld [vmem:[%s346_s1 + $0x30] sm:$0xff]  }
   0x3   :  { %125 = vmatprep.subr.bf16.mxu0 %v277_v0  ;;  %244 = vmatprep.subr.bf16.mxu1 %v277_v0  ;;  %v276_v6 = vld [vmem:[%s347_s0 + $0x14] ss:$8 sps:$4 sm:$0xff]   ;;  %v266_v7 = vld [vmem:[%s346_s1 + $0x20] sm:$0xff]   ;;  %v267_v8 = vld [vmem:[%s346_s1 + $0x28] sm:$0xff]  }
   0x4   :  { %222 = vmatprep.mubr.msk.bf16.mxu0 %vm116_vm0, %v273_v5  ;;  %223 = vmatprep.mubr.msk.bf16.mxu1 %vm116_vm0, %v276_v6  ;;  %v269_v10 = vld [vmem:[%s346_s1 + $0x38] sm:$0xff]   ;;  %v270_v11 = vld [vmem:[%s346_s1 + $0x40] sm:$0xff]  }
   0x5   :  { %v271_v12 = vld [vmem:[%s347_s0] ss:$8 sps:$4 sm:$0xff]   ;;  %v274_v13 = vld [vmem:[%s347_s0 + $0x10] ss:$8 sps:$4 sm:$0xff]  }
   0x6   :  { %126 = vmatpush1.bf16.msra.mxu0 %v263_v2  ;;  %253 = vmatpush1.bf16.msra.mxu1 %v263_v2  ;;  %v208_v14 = vld [vmem:[%s348_s2] ss:$0 sm:$0xff] }
   0x7   :  { %127 = vmatprep.subr.bf16.mxu0 %v277_v0  ;;  %245 = vmatprep.subr.bf16.mxu1 %v277_v0 }
   0xa   :  { %128 = vmatpush1.bf16.msra.mxu0 %v264_v3  ;;  %254 = vmatpush1.bf16.msra.mxu1 %v264_v3 }
   0xb   :  { %129 = vmatprep.subr.bf16.mxu0 %v277_v0  ;;  %246 = vmatprep.subr.bf16.mxu1 %v277_v0 }
   0xe   :  { %130 = vmatpush1.bf16.msra.mxu0 %v265_v4  ;;  %255 = vmatpush1.bf16.msra.mxu1 %v265_v4 }
   0xf   :  { %131 = vmatprep.subr.bf16.mxu0 %v277_v0  ;;  %247 = vmatprep.subr.bf16.mxu1 %v277_v0 }
  0x12   :  { %132 = vmatpush1.bf16.msra.mxu0 %v266_v7  ;;  %256 = vmatpush1.bf16.msra.mxu1 %v266_v7 }
  0x13   :  { %133 = vmatprep.subr.bf16.mxu0 %v277_v0  ;;  %248 = vmatprep.subr.bf16.mxu1 %v277_v0 }
  0x16   :  { %134 = vmatpush1.bf16.msra.mxu0 %v267_v8  ;;  %257 = vmatpush1.bf16.msra.mxu1 %v267_v8 }
  0x17   :  { %135 = vmatprep.subr.bf16.mxu0 %v277_v0  ;;  %249 = vmatprep.subr.bf16.mxu1 %v277_v0 }
  0x1a   :  { %136 = vmatpush1.bf16.msra.mxu0 %v268_v9  ;;  %258 = vmatpush1.bf16.msra.mxu1 %v268_v9 }
  0x1b   :  { %137 = vmatprep.subr.bf16.mxu0 %v277_v0  ;;  %250 = vmatprep.subr.bf16.mxu1 %v277_v0 }
  0x1e   :  { %138 = vmatpush1.bf16.msra.mxu0 %v269_v10  ;;  %259 = vmatpush1.bf16.msra.mxu1 %v269_v10 }
  0x1f   :  { %139 = vmatprep.subr.bf16.mxu0 %v277_v0  ;;  %251 = vmatprep.subr.bf16.mxu1 %v277_v0 }
  0x22   :  { %140 = vmatpush1.bf16.msra.mxu0 %v270_v11  ;;  %260 = vmatpush1.bf16.msra.mxu1 %v270_v11 }
  0x25   :  { %156 = vmatmul.mubr.bf16.vlgmr.msra.gmra.mrb[0].mxu0 %v271_v12  ;;  %164 = vmatmul.mubr.bf16.vlgmr.msra.gmra.mrb[0].mxu1 %v274_v13 }
  0xf8   :  { %v157_v15 = vpop.f32.mrb[0].mxu0  ;;  %v165_v16 = vpop.f32.mrb[0].mxu1 }
  0xf9   :  { %v158_v17 = vadd.f32 %v208_v14, %v157_v15  ;;  %v166_v18 = vadd.f32 %v208_v14, %v165_v16  ;;  %v159_v19 = vpop.f32.mrb[1].mxu0  ;;  %v167_v20 = vpop.f32.mrb[1].mxu1 }
  0xfa   :  { %v160_v21 = vpop.f32.mrb[2].mxu0  ;;  %v168_v22 = vpop.f32.mrb[2].mxu1 }
  0xfb   :  { %v176_v23 = vmul.f32 0.1, %v158_v17  ;;  %v178_v24 = vmul.f32 0.1, %v166_v18  ;;  %v161_v25 = vadd.f32 %v208_v14, %v160_v21  ;;  %v169_v26 = vadd.f32 %v208_v14, %v168_v22  ;;  %v162_v27 = vpop.f32.mrb[3].mxu0  ;;  %v170_v28 = vpop.f32.mrb[3].mxu1 }
  0xfc   :  { %vm172_vm1 = vcmp.ge.f32.partialorder %v158_v17, 0.0  ;;  %vm174_vm2 = vcmp.ge.f32.partialorder %v166_v18, 0.0 }
  0xfd   :  { %vm173_vm3 = vcmp.ge.f32.partialorder %v161_v25, 0.0  ;;  %v177_v29 = vmul.f32 0.1, %v161_v25  ;;  %vm175_vm4 = vcmp.ge.f32.partialorder %v169_v26, 0.0  ;;  %v179_v30 = vmul.f32 0.1, %v169_v26 }
  0xfe   :  { %v180_v31 = vsel %vm172_vm1, %v158_v17, %v176_v23  ;;  %v182_v32 = vsel %vm174_vm2, %v166_v18, %v178_v24 }
  0xff   :  { %v181_v33 = vsel %vm173_vm3, %v161_v25, %v177_v29  ;;  %v183_v34 = vsel %vm175_vm4, %v169_v26, %v179_v30 }
 0x100   :  { %v235_v35 = vpack.c.bf16 %v181_v33, %v180_v31  ;;  %v240_v36 = vpack.c.bf16 %v183_v34, %v182_v32 }
 0x102   :  { %236 = vst [vmem:[%s349_s3] sm:$0xff] %v235_v35   ;;  %242 = vst [vmem:[%s349_s3 + $0x8] sm:$0xff] %v240_v36  }

// kernel: _lambda_.48
= control target key start
LH: loop header
LB: loop body
LE: loop exit
PB: predicated region body
PF: predicated region fallthrough
CT: control target
= control target key end

     0   :  { %v301_v0 = vmov 0   ;;  %vm119_vm0 = vcmask 130048   ;;  %s381_s1 = inlined_call_operand.vmem [shape: bf16[144,128], index: 1, kind: input, shape index: {}]   ;;  %s382_s0 = inlined_call_operand.vmem [shape: bf16[32,144], index: 0, kind: input, shape index: {}]   ;;  %s383_s2 = inlined_call_operand.vmem [shape: f32[1,128], index: 2, kind: input, shape index: {}]   ;;  %s384_s3 = inlined_call_operand.vmem [shape: bf16[32,128], index: 3, kind: input, shape index: {}]   ;;  %s385_s4 = inlined_call_operand.vmem [shape: bf16[32,128], index: 4, kind: output, shape index: {}]  }
   0x1   :  { %126 = vmatprep.subr.bf16.mxu0 %v301_v0  ;;  %267 = vmatprep.subr.bf16.mxu1 %v301_v0  ;;  %v286_v1 = vld [vmem:[%s381_s1] sm:$0xff]   ;;  %v287_v2 = vld [vmem:[%s381_s1 + $0x8] sm:$0xff]   ;;  %v288_v3 = vld [vmem:[%s381_s1 + $0x10] sm:$0xff]  }
   0x2   :  { %127 = vmatpush1.bf16.msra.mxu0 %v286_v1  ;;  %276 = vmatpush1.bf16.msra.mxu1 %v286_v1  ;;  %v289_v4 = vld [vmem:[%s381_s1 + $0x18] sm:$0xff]   ;;  %v297_v5 = vld [vmem:[%s382_s0 + $0x4] ss:$8 sps:$4 sm:$0xff]   ;;  %v292_v9 = vld [vmem:[%s381_s1 + $0x30] sm:$0xff]  }
   0x3   :  { %128 = vmatprep.subr.bf16.mxu0 %v301_v0  ;;  %268 = vmatprep.subr.bf16.mxu1 %v301_v0  ;;  %v300_v6 = vld [vmem:[%s382_s0 + $0x14] ss:$8 sps:$4 sm:$0xff]   ;;  %v290_v7 = vld [vmem:[%s381_s1 + $0x20] sm:$0xff]   ;;  %v291_v8 = vld [vmem:[%s381_s1 + $0x28] sm:$0xff]  }
   0x4   :  { %237 = vmatprep.mubr.msk.bf16.mxu0 %vm119_vm0, %v297_v5  ;;  %238 = vmatprep.mubr.msk.bf16.mxu1 %vm119_vm0, %v300_v6  ;;  %v293_v10 = vld [vmem:[%s381_s1 + $0x38] sm:$0xff]   ;;  %v294_v11 = vld [vmem:[%s381_s1 + $0x40] sm:$0xff]   ;;  %v265_v22 = vld [vmem:[%s384_s3 + $0x8] sm:$0xff]  }
   0x5   :  { %v295_v12 = vld [vmem:[%s382_s0] ss:$8 sps:$4 sm:$0xff]   ;;  %v298_v13 = vld [vmem:[%s382_s0 + $0x10] ss:$8 sps:$4 sm:$0xff]   ;;  %v253_v32 = vunpack.c.l.bf16 %v265_v22  ;;  %v254_v36 = vunpack.c.h.bf16 %v265_v22 }
   0x6   :  { %129 = vmatpush1.bf16.msra.mxu0 %v287_v2  ;;  %277 = vmatpush1.bf16.msra.mxu1 %v287_v2  ;;  %v223_v14 = vld [vmem:[%s383_s2] ss:$0 sm:$0xff] }
   0x7   :  { %130 = vmatprep.subr.bf16.mxu0 %v301_v0  ;;  %269 = vmatprep.subr.bf16.mxu1 %v301_v0  ;;  %v248_v21 = vld [vmem:[%s384_s3] sm:$0xff]  }
   0x8   :  { %v249_v31 = vunpack.c.l.bf16 %v248_v21  ;;  %v250_v33 = vunpack.c.h.bf16 %v248_v21 }
   0xa   :  { %131 = vmatpush1.bf16.msra.mxu0 %v288_v3  ;;  %278 = vmatpush1.bf16.msra.mxu1 %v288_v3 }
   0xb   :  { %132 = vmatprep.subr.bf16.mxu0 %v301_v0  ;;  %270 = vmatprep.subr.bf16.mxu1 %v301_v0 }
   0xe   :  { %133 = vmatpush1.bf16.msra.mxu0 %v289_v4  ;;  %279 = vmatpush1.bf16.msra.mxu1 %v289_v4 }
   0xf   :  { %134 = vmatprep.subr.bf16.mxu0 %v301_v0  ;;  %271 = vmatprep.subr.bf16.mxu1 %v301_v0 }
  0x12   :  { %135 = vmatpush1.bf16.msra.mxu0 %v290_v7  ;;  %280 = vmatpush1.bf16.msra.mxu1 %v290_v7 }
  0x13   :  { %136 = vmatprep.subr.bf16.mxu0 %v301_v0  ;;  %272 = vmatprep.subr.bf16.mxu1 %v301_v0 }
  0x16   :  { %137 = vmatpush1.bf16.msra.mxu0 %v291_v8  ;;  %281 = vmatpush1.bf16.msra.mxu1 %v291_v8 }
  0x17   :  { %138 = vmatprep.subr.bf16.mxu0 %v301_v0  ;;  %273 = vmatprep.subr.bf16.mxu1 %v301_v0 }
  0x1a   :  { %139 = vmatpush1.bf16.msra.mxu0 %v292_v9  ;;  %282 = vmatpush1.bf16.msra.mxu1 %v292_v9 }
  0x1b   :  { %140 = vmatprep.subr.bf16.mxu0 %v301_v0  ;;  %274 = vmatprep.subr.bf16.mxu1 %v301_v0 }
  0x1e   :  { %141 = vmatpush1.bf16.msra.mxu0 %v293_v10  ;;  %283 = vmatpush1.bf16.msra.mxu1 %v293_v10 }
  0x1f   :  { %142 = vmatprep.subr.bf16.mxu0 %v301_v0  ;;  %275 = vmatprep.subr.bf16.mxu1 %v301_v0 }
  0x22   :  { %143 = vmatpush1.bf16.msra.mxu0 %v294_v11  ;;  %284 = vmatpush1.bf16.msra.mxu1 %v294_v11 }
  0x25   :  { %159 = vmatmul.mubr.bf16.vlgmr.msra.gmra.mrb[0].mxu0 %v295_v12  ;;  %167 = vmatmul.mubr.bf16.vlgmr.msra.gmra.mrb[0].mxu1 %v298_v13 }
  0xf8   :  { %v160_v15 = vpop.f32.mrb[0].mxu0  ;;  %v168_v16 = vpop.f32.mrb[0].mxu1 }
  0xf9   :  { %v161_v17 = vadd.f32 %v223_v14, %v160_v15  ;;  %v169_v18 = vadd.f32 %v223_v14, %v168_v16  ;;  %v162_v19 = vpop.f32.mrb[1].mxu0  ;;  %v170_v20 = vpop.f32.mrb[1].mxu1 }
  0xfa   :  { %v163_v23 = vpop.f32.mrb[2].mxu0  ;;  %v171_v24 = vpop.f32.mrb[2].mxu1 }
  0xfb   :  { %vm175_vm1 = vcmp.ge.f32.partialorder %v161_v17, 0.0  ;;  %v179_v25 = vmul.f32 0.1, %v161_v17  ;;  %v181_v26 = vmul.f32 0.1, %v169_v18  ;;  %vm177_vm2 = vcmp.ge.f32.partialorder %v169_v18, 0.0 }
  0xfc   :  { %v164_v27 = vadd.f32 %v223_v14, %v163_v23  ;;  %v172_v28 = vadd.f32 %v223_v14, %v171_v24  ;;  %v165_v29 = vpop.f32.mrb[3].mxu0  ;;  %v173_v30 = vpop.f32.mrb[3].mxu1 }
  0xfd   :  { %v183_v34 = vsel %vm175_vm1, %v161_v17, %v179_v25  ;;  %v185_v37 = vsel %vm177_vm2, %v169_v18, %v181_v26 }
  0xfe   :  { %vm176_vm3 = vcmp.ge.f32.partialorder %v164_v27, 0.0  ;;  %v180_v35 = vmul.f32 0.1, %v164_v27  ;;  %vm178_vm4 = vcmp.ge.f32.partialorder %v172_v28, 0.0  ;;  %v182_v38 = vmul.f32 0.1, %v172_v28 }
  0xff   :  { %v195_v40 = vadd.f32 %v249_v31, %v183_v34  ;;  %v197_v43 = vadd.f32 %v253_v32, %v185_v37 }
 0x100   :  { %v184_v39 = vsel %vm176_vm3, %v164_v27, %v180_v35  ;;  %v186_v42 = vsel %vm178_vm4, %v172_v28, %v182_v38 }
 0x101   :  { %v196_v41 = vadd.f32 %v250_v33, %v184_v39  ;;  %v198_v44 = vadd.f32 %v254_v36, %v186_v42 }
 0x103   :  { %v258_v45 = vpack.c.bf16 %v196_v41, %v195_v40  ;;  %v263_v46 = vpack.c.bf16 %v198_v44, %v197_v43 }
 0x105   :  { %259 = vst [vmem:[%s385_s4] sm:$0xff] %v258_v45   ;;  %266 = vst [vmem:[%s385_s4 + $0x8] sm:$0xff] %v263_v46  }

// kernel: _lambda_.49
= control target key start
LH: loop header
LB: loop body
LE: loop exit
PB: predicated region body
PF: predicated region fallthrough
CT: control target
= control target key end

     0   :  { %v350_v1 = vmov 0.0   ;;  %vm351_vm0 = vmmov 0   ;;  %vm178_vm1 = vcmask 261120   ;;  %s438_s1 = inlined_call_operand.vmem [shape: bf16[288,128], index: 1, kind: input, shape index: {}]   ;;  %s439_s0 = inlined_call_operand.vmem [shape: bf16[8,288], index: 0, kind: input, shape index: {}]   ;;  %s440_s2 = inlined_call_operand.vmem [shape: f32[1,128], index: 2, kind: input, shape index: {}]   ;;  %s441_s3 = inlined_call_operand.vmem [shape: bf16[8,128], index: 3, kind: output, shape index: {}]  }
   0x1   :  { %v329_v0 = vld [vmem:[%s438_s1 + $0x40] sm:$0xff]   ;;  %319 = vmatprep.subr.bf16.mxu1 %v350_v1  ;;  %323 = vmatprep.mubr.msk.bf16.mxu1 %vm351_vm0, %v350_v1  ;;  %v331_v3 = vld [vmem:[%s438_s1 + $0x48] sm:$0xff]   ;;  %v333_v5 = vld [vmem:[%s438_s1 + $0x50] sm:$0xff]  }
   0x2   :  { %v330_v2 = vld [vmem:[%s438_s1] sm:$0xff]   ;;  %294 = vmatprep.subr.bf16.mxu0 %v329_v0  ;;  %v332_v4 = vld [vmem:[%s438_s1 + $0x8] sm:$0xff]   ;;  %v334_v6 = vld [vmem:[%s438_s1 + $0x10] sm:$0xff]  }
   0x3   :  { %295 = vmatpush3.bf16.msra.mxu0 %v330_v2  ;;  %v335_v7 = vld [vmem:[%s438_s1 + $0x58] sm:$0xff]   ;;  %v337_v9 = vld [vmem:[%s438_s1 + $0x60] sm:$0xff]   ;;  %v339_v12 = vld [vmem:[%s438_s1 + $0x68] sm:$0xff]  }
   0x4   :  { %296 = vmatprep.subr.bf16.mxu0 %v331_v3  ;;  %v336_v8 = vld [vmem:[%s438_s1 + $0x18] sm:$0xff]   ;;  %v343_v10 = vld [vmem:[%s438_s1 + $0x80] sm:$0xff]   ;;  %v349_v15 = vld [vmem:[%s438_s1 + $0x88] sm:$0xff]  }
   0x5   :  { %v338_v11 = vld [vmem:[%s438_s1 + $0x20] sm:$0xff]   ;;  %320 = vmatpush3.bf16.msra.mxu1 %v343_v10  ;;  %v340_v16 = vld [vmem:[%s438_s1 + $0x28] sm:$0xff]   ;;  %v341_v17 = vld [vmem:[%s438_s1 + $0x70] sm:$0xff]  }
   0x6   :  { %321 = vmatprep.subr.bf16.mxu1 %v350_v1  ;;  %v15_v13 = vld [vmem:[%s439_s0] sm:$0xff]  ;;  %v348_v18 = vld [vmem:[%s439_s0 + $0x8] ss:$0 sps:$4 sm:$0xff]   ;;  %v342_v19 = vld [vmem:[%s438_s1 + $0x30] sm:$0xff]  }
   0x7   :  { %297 = vmatpush3.bf16.msra.mxu0 %v332_v4  ;;  %v273_v14 = vcombine.high %v15_v13, %v15_v13  ;;  %v344_v20 = vld [vmem:[%s438_s1 + $0x78] sm:$0xff]   ;;  %v272_v22 = vcombine.low %v15_v13, %v15_v13  ;;  %v271_v29 = vld [vmem:[%s440_s2] ss:$0 sm:$0xff] }
   0x8   :  { %298 = vmatprep.subr.bf16.mxu0 %v333_v5  ;;  %v345_v21 = vld [vmem:[%s438_s1 + $0x38] sm:$0xff]  }
   0x9   :  { %214 = vmatprep.mubr.bf16.mxu0 %v273_v14  ;;  %322 = vmatpush3.bf16.msra.mxu1 %v349_v15 }
   0xb   :  { %299 = vmatpush3.bf16.msra.mxu0 %v334_v6 }
   0xc   :  { %300 = vmatprep.subr.bf16.mxu0 %v335_v7  ;;  %324 = vmatmul.mubr.msk.bf16.vlgmr.msra.gmra.mrb[0].mxu1 %vm178_vm1, %v348_v18 }
   0xf   :  { %301 = vmatpush3.bf16.msra.mxu0 %v336_v8 }
  0x10   :  { %302 = vmatprep.subr.bf16.mxu0 %v337_v9 }
  0x13   :  { %303 = vmatpush3.bf16.msra.mxu0 %v338_v11 }
  0x14   :  { %304 = vmatprep.subr.bf16.mxu0 %v339_v12 }
  0x17   :  { %305 = vmatpush3.bf16.msra.mxu0 %v340_v16 }
  0x18   :  { %306 = vmatprep.subr.bf16.mxu0 %v341_v17 }
  0x1b   :  { %307 = vmatpush3.bf16.msra.mxu0 %v342_v19 }
  0x1c   :  { %308 = vmatprep.subr.bf16.mxu0 %v344_v20 }
  0x1f   :  { %309 = vmatpush3.bf16.msra.mxu0 %v345_v21 }
  0x22   :  { %215 = vmatmul.mubr.bf16.vlgmr.msra.gmra.mrb[0].mxu0 %v272_v22 }
  0xdf   :  { %v256_v23 = vpop.f32.mrb[0].mxu1 }
  0xe0   :  { %v325_v24 = vpop.f32.mrb[1].mxu1 }
  0xe1   :  { %v259_v25 = vpop.f32.mrb[2].mxu1 }
  0xe2   :  { %v326_v26 = vpop.f32.mrb[3].mxu1 }
  0xf5   :  { %v310_v27 = vpop.f32.mrb[0].mxu0 }
  0xf6   :  { %v311_v28 = vpop.f32.mrb[1].mxu0 }
  0xf7   :  { %v312_v30 = vadd.f32 %v311_v28, %v310_v27  ;;  %v313_v31 = vpop.f32.mrb[2].mxu0 }
  0xf8   :  { %v314_v32 = vpop.f32.mrb[3].mxu0 }
  0xf9   :  { %v217_v33 = vadd.f32 %v312_v30, %v271_v29 }
  0xfb   :  { %v257_v34 = vadd.f32 %v256_v23, %v217_v33 }
  0xfd   :  { %vm262_vm2 = vcmp.ge.f32.partialorder %v257_v34, 0.0  ;;  %v263_v35 = vmul.f32 0.1, %v257_v34 }
  0xff   :  { %v264_v36 = vsel %vm262_vm2, %v257_v34, %v263_v35 }
 0x100   :  { %v265_v37 = vpack.c.bf16 %v264_v36, %v264_v36 }
 0x102   :  { %266 = vst [vmem:[%s441_s3] sm:$0xf] %v265_v37 }

// kernel: _lambda_.50
= control target key start
LH: loop header
LB: loop body
LE: loop exit
PB: predicated region body
PF: predicated region fallthrough
CT: control target
= control target key end

     0   :  { %v137_v0 = vmov 0.0   ;;  %vm138_vm0 = vmmov 0   ;;  %vm55_vm1 = vcmask 523264   ;;  %s180_s1 = inlined_call_operand.vmem [shape: bf16[64,128], index: 1, kind: input, shape index: {}]   ;;  %s181_s0 = inlined_call_operand.vmem [shape: bf16[8,64], index: 0, kind: input, shape index: {}]   ;;  %s182_s2 = inlined_call_operand.vmem [shape: f32[1,128], index: 2, kind: input, shape index: {}]   ;;  %s183_s3 = inlined_call_operand.vmem [shape: bf16[8,128], index: 3, kind: output, shape index: {}]  }
   0x1   :  { %119 = vmatprep.subr.bf16.mxu0 %v137_v0  ;;  %v133_v1 = vld [vmem:[%s180_s1] sm:$0xff]   ;;  %127 = vmatprep.mubr.msk.bf16.mxu0 %vm138_vm0, %v137_v0  ;;  %v134_v2 = vld [vmem:[%s180_s1 + $0x8] sm:$0xff]   ;;  %v135_v3 = vld [vmem:[%s180_s1 + $0x10] sm:$0xff]  }
   0x2   :  { %120 = vmatpush3.bf16.msra.mxu0 %v133_v1  ;;  %v136_v4 = vld [vmem:[%s180_s1 + $0x18] sm:$0xff]   ;;  %v15_v5 = vld [vmem:[%s181_s0] sm:$0xf] }
   0x3   :  { %121 = vmatprep.subr.bf16.mxu0 %v137_v0  ;;  %v108_v6 = vld [vmem:[%s182_s2] ss:$0 sm:$0xff] }
   0x6   :  { %122 = vmatpush3.bf16.msra.mxu0 %v134_v2 }
   0x7   :  { %123 = vmatprep.subr.bf16.mxu0 %v137_v0 }
   0xa   :  { %124 = vmatpush3.bf16.msra.mxu0 %v135_v3 }
   0xb   :  { %125 = vmatprep.subr.bf16.mxu0 %v137_v0 }
   0xe   :  { %126 = vmatpush3.bf16.msra.mxu0 %v136_v4 }
  0x11   :  { %128 = vmatmul.mubr.msk.bf16.vlgmr.msra.gmra.mrb[0].mxu0 %vm55_vm1, %v15_v5 }
  0xe4   :  { %v93_v7 = vpop.f32.mrb[0].mxu0 }
  0xe5   :  { %v94_v8 = vadd.f32 %v108_v6, %v93_v7  ;;  %v129_v9 = vpop.f32.mrb[1].mxu0 }
  0xe6   :  { %v96_v10 = vpop.f32.mrb[2].mxu0 }
  0xe7   :  { %vm99_vm2 = vcmp.ge.f32.partialorder %v94_v8, 0.0  ;;  %v100_v11 = vmul.f32 0.1, %v94_v8  ;;  %v130_v12 = vpop.f32.mrb[3].mxu0 }
  0xe9   :  { %v101_v13 = vsel %vm99_vm2, %v94_v8, %v100_v11 }
  0xea   :  { %v102_v14 = vpack.c.bf16 %v101_v13, %v101_v13 }
  0xec   :  { %103 = vst [vmem:[%s183_s3] sm:$0xf] %v102_v14 }

// kernel: _lambda_.51
= control target key start
LH: loop header
LB: loop body
LE: loop exit
PB: predicated region body
PF: predicated region fallthrough
CT: control target
= control target key end

     0   :  { %v356_v1 = vmov 0.0   ;;  %vm357_vm0 = vmmov 0   ;;  %vm181_vm1 = vcmask 261120   ;;  %s452_s1 = inlined_call_operand.vmem [shape: bf16[288,128], index: 1, kind: input, shape index: {}]   ;;  %s453_s0 = inlined_call_operand.vmem [shape: bf16[8,288], index: 0, kind: input, shape index: {}]   ;;  %s454_s2 = inlined_call_operand.vmem [shape: f32[1,128], index: 2, kind: input, shape index: {}]   ;;  %s455_s3 = inlined_call_operand.vmem [shape: bf16[8,128], index: 3, kind: input, shape index: {}]   ;;  %s456_s4 = inlined_call_operand.vmem [shape: bf16[8,128], index: 4, kind: output, shape index: {}]  }
   0x1   :  { %v335_v0 = vld [vmem:[%s452_s1 + $0x40] sm:$0xff]   ;;  %325 = vmatprep.subr.bf16.mxu1 %v356_v1  ;;  %329 = vmatprep.mubr.msk.bf16.mxu1 %vm357_vm0, %v356_v1  ;;  %v337_v3 = vld [vmem:[%s452_s1 + $0x48] sm:$0xff]   ;;  %v339_v5 = vld [vmem:[%s452_s1 + $0x50] sm:$0xff]  }
   0x2   :  { %v336_v2 = vld [vmem:[%s452_s1] sm:$0xff]   ;;  %300 = vmatprep.subr.bf16.mxu0 %v335_v0  ;;  %v338_v4 = vld [vmem:[%s452_s1 + $0x8] sm:$0xff]   ;;  %v340_v6 = vld [vmem:[%s452_s1 + $0x10] sm:$0xff]  }
   0x3   :  { %301 = vmatpush3.bf16.msra.mxu0 %v336_v2  ;;  %v341_v7 = vld [vmem:[%s452_s1 + $0x58] sm:$0xff]   ;;  %v343_v9 = vld [vmem:[%s452_s1 + $0x60] sm:$0xff]   ;;  %v345_v12 = vld [vmem:[%s452_s1 + $0x68] sm:$0xff]  }
   0x4   :  { %302 = vmatprep.subr.bf16.mxu0 %v337_v3  ;;  %v342_v8 = vld [vmem:[%s452_s1 + $0x18] sm:$0xff]   ;;  %v349_v10 = vld [vmem:[%s452_s1 + $0x80] sm:$0xff]   ;;  %v355_v15 = vld [vmem:[%s452_s1 + $0x88] sm:$0xff]  }
   0x5   :  { %v344_v11 = vld [vmem:[%s452_s1 + $0x20] sm:$0xff]   ;;  %326 = vmatpush3.bf16.msra.mxu1 %v349_v10  ;;  %v346_v16 = vld [vmem:[%s452_s1 + $0x28] sm:$0xff]   ;;  %v347_v17 = vld [vmem:[%s452_s1 + $0x70] sm:$0xff]  }
   0x6   :  { %327 = vmatprep.subr.bf16.mxu1 %v356_v1  ;;  %v18_v13 = vld [vmem:[%s453_s0] sm:$0xff]  ;;  %v354_v18 = vld [vmem:[%s453_s0 + $0x8] ss:$0 sps:$4 sm:$0xff]   ;;  %v348_v19 = vld [vmem:[%s452_s1 + $0x30] sm:$0xff]  }
   0x7   :  { %303 = vmatpush3.bf16.msra.mxu0 %v338_v4  ;;  %v279_v14 = vcombine.high %v18_v13, %v18_v13  ;;  %v350_v20 = vld [vmem:[%s452_s1 + $0x78] sm:$0xff]   ;;  %v278_v22 = vcombine.low %v18_v13, %v18_v13  ;;  %v277_v29 = vld [vmem:[%s454_s2] ss:$0 sm:$0xff] }
   0x8   :  { %304 = vmatprep.subr.bf16.mxu0 %v339_v5  ;;  %v351_v21 = vld [vmem:[%s452_s1 + $0x38] sm:$0xff]   ;;  %v268_v34 = vld [vmem:[%s455_s3] sm:$0xf] }
   0x9   :  { %217 = vmatprep.mubr.bf16.mxu0 %v279_v14  ;;  %328 = vmatpush3.bf16.msra.mxu1 %v355_v15  ;;  %v269_v36 = vunpack.c.l.bf16 %v268_v34 }
   0xb   :  { %305 = vmatpush3.bf16.msra.mxu0 %v340_v6 }
   0xc   :  { %306 = vmatprep.subr.bf16.mxu0 %v341_v7  ;;  %330 = vmatmul.mubr.msk.bf16.vlgmr.msra.gmra.mrb[0].mxu1 %vm181_vm1, %v354_v18 }
   0xf   :  { %307 = vmatpush3.bf16.msra.mxu0 %v342_v8 }
  0x10   :  { %308 = vmatprep.subr.bf16.mxu0 %v343_v9 }
  0x13   :  { %309 = vmatpush3.bf16.msra.mxu0 %v344_v11 }
  0x14   :  { %310 = vmatprep.subr.bf16.mxu0 %v345_v12 }
  0x17   :  { %311 = vmatpush3.bf16.msra.mxu0 %v346_v16 }
  0x18   :  { %312 = vmatprep.subr.bf16.mxu0 %v347_v17 }
  0x1b   :  { %313 = vmatpush3.bf16.msra.mxu0 %v348_v19 }
  0x1c   :  { %314 = vmatprep.subr.bf16.mxu0 %v350_v20 }
  0x1f   :  { %315 = vmatpush3.bf16.msra.mxu0 %v351_v21 }
  0x22   :  { %218 = vmatmul.mubr.bf16.vlgmr.msra.gmra.mrb[0].mxu0 %v278_v22 }
  0xdf   :  { %v259_v23 = vpop.f32.mrb[0].mxu1 }
  0xe0   :  { %v331_v24 = vpop.f32.mrb[1].mxu1 }
  0xe1   :  { %v262_v25 = vpop.f32.mrb[2].mxu1 }
  0xe2   :  { %v332_v26 = vpop.f32.mrb[3].mxu1 }
  0xf5   :  { %v316_v27 = vpop.f32.mrb[0].mxu0 }
  0xf6   :  { %v317_v28 = vpop.f32.mrb[1].mxu0 }
  0xf7   :  { %v318_v30 = vadd.f32 %v317_v28, %v316_v27  ;;  %v319_v31 = vpop.f32.mrb[2].mxu0 }
  0xf8   :  { %v320_v32 = vpop.f32.mrb[3].mxu0 }
  0xf9   :  { %v220_v33 = vadd.f32 %v318_v30, %v277_v29 }
  0xfb   :  { %v260_v35 = vadd.f32 %v259_v23, %v220_v33 }
  0xfd   :  { %vm265_vm2 = vcmp.ge.f32.partialorder %v260_v35, 0.0  ;;  %v266_v37 = vmul.f32 0.1, %v260_v35 }
  0xff   :  { %v267_v38 = vsel %vm265_vm2, %v260_v35, %v266_v37 }
 0x100   :  { %v270_v39 = vadd.f32 %v269_v36, %v267_v38 }
 0x102   :  { %v271_v40 = vpack.c.bf16 %v270_v39, %v270_v39 }
 0x104   :  { %272 = vst [vmem:[%s456_s4] sm:$0xf] %v271_v40 }

// kernel: _lambda_.53
= control target key start
LH: loop header
LB: loop body
LE: loop exit
PB: predicated region body
PF: predicated region fallthrough
CT: control target
= control target key end

     0   :  { %v184_v0 = vmov 0.0   ;;  %vm185_vm0 = vmmov 0   ;;  %s239_s1 = inlined_call_operand.vmem [shape: bf16[128,128], index: 1, kind: input, shape index: {}]   ;;  %s240_s0 = inlined_call_operand.vmem [shape: bf16[2,128], index: 0, kind: input, shape index: {}]   ;;  %s241_s2 = inlined_call_operand.vmem [shape: f32[1,128], index: 2, kind: input, shape index: {}]   ;;  %s242_s3 = inlined_call_operand.vmem [shape: bf16[2,128], index: 3, kind: output, shape index: {}]  }
   0x1   :  { %154 = vmatprep.subr.bf16.mxu0 %v184_v0  ;;  %v176_v1 = vld [vmem:[%s239_s1] sm:$0xff]   ;;  %170 = vmatprep.mubr.msk.bf16.mxu0 %vm185_vm0, %v184_v0  ;;  %v177_v2 = vld [vmem:[%s239_s1 + $0x8] sm:$0xff]   ;;  %v178_v3 = vld [vmem:[%s239_s1 + $0x10] sm:$0xff]  }
   0x2   :  { %155 = vmatpush3.bf16.msra.mxu0 %v176_v1  ;;  %v179_v4 = vld [vmem:[%s239_s1 + $0x18] sm:$0xff]   ;;  %v180_v5 = vld [vmem:[%s239_s1 + $0x20] sm:$0xff]   ;;  %v181_v6 = vld [vmem:[%s239_s1 + $0x28] sm:$0xff]  }
   0x3   :  { %156 = vmatprep.subr.bf16.mxu0 %v184_v0  ;;  %v182_v7 = vld [vmem:[%s239_s1 + $0x30] sm:$0xff]   ;;  %v183_v8 = vld [vmem:[%s239_s1 + $0x38] sm:$0xff]   ;;  %v15_v9 = vld [vmem:[%s240_s0] sm:$0x1] }
   0x4   :  { %v136_v10 = vld [vmem:[%s241_s2] ss:$0 sm:$0xff] }
   0x6   :  { %157 = vmatpush3.bf16.msra.mxu0 %v177_v2 }
   0x7   :  { %158 = vmatprep.subr.bf16.mxu0 %v184_v0 }
   0xa   :  { %159 = vmatpush3.bf16.msra.mxu0 %v178_v3 }
   0xb   :  { %160 = vmatprep.subr.bf16.mxu0 %v184_v0 }
   0xe   :  { %161 = vmatpush3.bf16.msra.mxu0 %v179_v4 }
   0xf   :  { %162 = vmatprep.subr.bf16.mxu0 %v184_v0 }
  0x12   :  { %163 = vmatpush3.bf16.msra.mxu0 %v180_v5 }
  0x13   :  { %164 = vmatprep.subr.bf16.mxu0 %v184_v0 }
  0x16   :  { %165 = vmatpush3.bf16.msra.mxu0 %v181_v6 }
  0x17   :  { %166 = vmatprep.subr.bf16.mxu0 %v184_v0 }
  0x1a   :  { %167 = vmatpush3.bf16.msra.mxu0 %v182_v7 }
  0x1b   :  { %168 = vmatprep.subr.bf16.mxu0 %v184_v0 }
  0x1e   :  { %169 = vmatpush3.bf16.msra.mxu0 %v183_v8 }
  0x21   :  { %171 = vmatmul.mubr.bf16.vlgmr.msra.gmra.mrb[0].mxu0 %v15_v9 }
  0xf4   :  { %v121_v11 = vpop.f32.mrb[0].mxu0 }
  0xf5   :  { %v122_v12 = vadd.f32 %v136_v10, %v121_v11  ;;  %v172_v13 = vpop.f32.mrb[1].mxu0 }
  0xf6   :  { %v124_v14 = vpop.f32.mrb[2].mxu0 }
  0xf7   :  { %vm127_vm1 = vcmp.ge.f32.partialorder %v122_v12, 0.0  ;;  %v128_v15 = vmul.f32 0.1, %v122_v12  ;;  %v173_v16 = vpop.f32.mrb[3].mxu0 }
  0xf9   :  { %v129_v17 = vsel %vm127_vm1, %v122_v12, %v128_v15 }
  0xfa   :  { %v130_v18 = vpack.c.bf16 %v129_v17, %v129_v17 }
  0xfc   :  { %131 = vst [vmem:[%s242_s3] sm:$0x1] %v130_v18 }

// kernel: _lambda_.52
= control target key start
LH: loop header
LB: loop body
LE: loop exit
PB: predicated region body
PF: predicated region fallthrough
CT: control target
= control target key end

     0   :  { %v627_v21 = vmov 1966171168   ;;  %v100_v23 = vlaneseq  ;;  %v628_v40 = vmov 0.0   ;;  %vm629_vm0 = vmmov 0   ;;  %s767_s1 = inlined_call_operand.vmem [shape: bf16[576,128], index: 1, kind: input, shape index: {}]   ;;  %s768_s0 = inlined_call_operand.vmem [shape: bf16[2,576], index: 0, kind: input, shape index: {}]   ;;  %s769_s2 = inlined_call_operand.vmem [shape: f32[1,128], index: 2, kind: input, shape index: {}]   ;;  %s770_s3 = inlined_call_operand.vmem [shape: bf16[2,128], index: 3, kind: output, shape index: {}]  }
   0x1   :  { %v590_v0 = vld [vmem:[%s767_s1 + $0x40] sm:$0xff]   ;;  %v594_v4 = vld [vmem:[%s767_s1 + $0x48] sm:$0xff]   ;;  %v598_v8 = vld [vmem:[%s767_s1 + $0x50] sm:$0xff]   ;;  %v98_v22 = vunpack.c.l.s4 %v627_v21  ;;  %vm355_vm1 = vcmask 523264  }
   0x2   :  { %v591_v1 = vld [vmem:[%s767_s1] sm:$0xff]   ;;  %526 = vmatprep.subr.bf16.mxu0 %v590_v0  ;;  %v595_v5 = vld [vmem:[%s767_s1 + $0x8] sm:$0xff]   ;;  %v599_v9 = vld [vmem:[%s767_s1 + $0x10] sm:$0xff]   ;;  %v101_v29 = vshrl.u32 %v100_v23, 7 }
   0x3   :  { %v592_v2 = vld [vmem:[%s767_s1 + $0xc0] sm:$0xff]   ;;  %527 = vmatpush3.bf16.msra.mxu0 %v591_v1  ;;  %v596_v6 = vld [vmem:[%s767_s1 + $0xc8] sm:$0xff]   ;;  %v600_v10 = vld [vmem:[%s767_s1 + $0xd0] sm:$0xff]   ;;  %v99_v28 = vunpack.c.0.s8 %v98_v22 }
   0x4   :  { %v593_v3 = vld [vmem:[%s767_s1 + $0x80] sm:$0xff]   ;;  %548 = vmatprep.subr.bf16.mxu1 %v592_v2  ;;  %528 = vmatprep.subr.bf16.mxu0 %v594_v4  ;;  %v597_v7 = vld [vmem:[%s767_s1 + $0x88] sm:$0xff]   ;;  %v601_v11 = vld [vmem:[%s767_s1 + $0x90] sm:$0xff]  }
   0x5   :  { %549 = vmatpush3.bf16.msra.mxu1 %v593_v3  ;;  %v602_v12 = vld [vmem:[%s767_s1 + $0x58] sm:$0xff]   ;;  %v606_v16 = vld [vmem:[%s767_s1 + $0x60] sm:$0xff]   ;;  %v610_v20 = vld [vmem:[%s767_s1 + $0x68] sm:$0xff]   ;;  %v102_v34 = vsub.s32 %v99_v28, %v101_v29 }
   0x6   :  { %550 = vmatprep.subr.bf16.mxu1 %v596_v6  ;;  %v603_v13 = vld [vmem:[%s767_s1 + $0x18] sm:$0xff]   ;;  %v607_v17 = vld [vmem:[%s767_s1 + $0x20] sm:$0xff]   ;;  %v611_v24 = vld [vmem:[%s767_s1 + $0x28] sm:$0xff]  }
   0x7   :  { %529 = vmatpush3.bf16.msra.mxu0 %v595_v5  ;;  %v604_v14 = vld [vmem:[%s767_s1 + $0xd8] sm:$0xff]   ;;  %v608_v18 = vld [vmem:[%s767_s1 + $0xe0] sm:$0xff]   ;;  %v612_v25 = vld [vmem:[%s767_s1 + $0xe8] sm:$0xff]  }
   0x8   :  { %530 = vmatprep.subr.bf16.mxu0 %v598_v8  ;;  %v605_v15 = vld [vmem:[%s767_s1 + $0x98] sm:$0xff]   ;;  %v609_v19 = vld [vmem:[%s767_s1 + $0xa0] sm:$0xff]   ;;  %v613_v26 = vld [vmem:[%s767_s1 + $0xa8] sm:$0xff]  }
   0x9   :  { %551 = vmatpush3.bf16.msra.mxu1 %v597_v7  ;;  %v614_v27 = vld [vmem:[%s767_s1 + $0x70] sm:$0xff]   ;;  %v618_v33 = vld [vmem:[%s767_s1 + $0x78] sm:$0xff]   ;;  %v15_v37 = vld [vmem:[%s768_s0] sm:$0x1f] }
   0xa   :  { %552 = vmatprep.subr.bf16.mxu1 %v600_v10  ;;  %v615_v30 = vld [vmem:[%s767_s1 + $0x30] sm:$0xff]   ;;  %v619_v35 = vld [vmem:[%s767_s1 + $0x38] sm:$0xff]   ;;  %v103_v38 = vrot.slane %v15_v37, %v102_v34  ;;  %v623_v44 = vld [vmem:[%s767_s1 + $0x100] sm:$0xff]   ;;  %v96_v48 = vcombine.high %v15_v37, %v15_v37 }
   0xb   :  { %531 = vmatpush3.bf16.msra.mxu0 %v599_v9  ;;  %v616_v31 = vld [vmem:[%s767_s1 + $0xf0] sm:$0xff]   ;;  %v620_v36 = vld [vmem:[%s767_s1 + $0xf8] sm:$0xff]   ;;  %v624_v47 = vld [vmem:[%s767_s1 + $0x108] sm:$0xff]  }
   0xc   :  { %532 = vmatprep.subr.bf16.mxu0 %v602_v12  ;;  %v617_v32 = vld [vmem:[%s767_s1 + $0xb0] sm:$0xff]   ;;  %v622_v39 = vld [vmem:[%s767_s1 + $0xb8] sm:$0xff]   ;;  %v111_v41 = vcombine.high %v103_v38, %v103_v38  ;;  %v118_v42 = vrot.slane %v103_v38, %v102_v34  ;;  %v110_v50 = vrot.slane %v96_v48, %v102_v34  ;;  %v488_v54 = vld [vmem:[%s769_s2] ss:$0 sm:$0xff] }
   0xd   :  { %553 = vmatpush3.bf16.msra.mxu1 %v601_v11  ;;  %v625_v49 = vld [vmem:[%s767_s1 + $0x110] sm:$0xff]   ;;  %v626_v51 = vld [vmem:[%s767_s1 + $0x118] sm:$0xff]  }
   0xe   :  { %554 = vmatprep.subr.bf16.mxu1 %v604_v14  ;;  %v132_v43 = vrot.slane %v111_v41, %v102_v34  ;;  %v133_v45 = vcombine.high %v118_v42, %v118_v42  ;;  %v125_v52 = vrot.slane %v110_v50, %v102_v34 }
   0xf   :  { %533 = vmatpush3.bf16.msra.mxu0 %v603_v13 }
  0x10   :  { %534 = vmatprep.subr.bf16.mxu0 %v606_v16  ;;  %391 = vmatprep.mubr.bf16.mxu0 %v132_v43  ;;  %v134_v46 = vcombine.high %v132_v43, %v132_v43 }
  0x11   :  { %555 = vmatpush3.bf16.msra.mxu1 %v605_v15 }
  0x12   :  { %556 = vmatprep.subr.bf16.mxu1 %v608_v18  ;;  %431 = vmatprep.mubr.bf16.mxu1 %v134_v46 }
  0x13   :  { %535 = vmatpush3.bf16.msra.mxu0 %v607_v17 }
  0x14   :  { %536 = vmatprep.subr.bf16.mxu0 %v610_v20 }
  0x15   :  { %557 = vmatpush3.bf16.msra.mxu1 %v609_v19 }
  0x16   :  { %558 = vmatprep.subr.bf16.mxu1 %v612_v25 }
  0x17   :  { %537 = vmatpush3.bf16.msra.mxu0 %v611_v24 }
  0x18   :  { %538 = vmatprep.subr.bf16.mxu0 %v614_v27 }
  0x19   :  { %559 = vmatpush3.bf16.msra.mxu1 %v613_v26 }
  0x1a   :  { %560 = vmatprep.subr.bf16.mxu1 %v616_v31 }
  0x1b   :  { %539 = vmatpush3.bf16.msra.mxu0 %v615_v30 }
  0x1c   :  { %540 = vmatprep.subr.bf16.mxu0 %v618_v33 }
  0x1d   :  { %561 = vmatpush3.bf16.msra.mxu1 %v617_v32 }
  0x1e   :  { %562 = vmatprep.subr.bf16.mxu1 %v620_v36 }
  0x1f   :  { %541 = vmatpush3.bf16.msra.mxu0 %v619_v35 }
  0x20   :  { %575 = vmatprep.subr.bf16.mxu0 %v628_v40 }
  0x21   :  { %563 = vmatpush3.bf16.msra.mxu1 %v622_v39 }
  0x22   :  { %392 = vmatmul.mubr.bf16.vlgmr.msra.gmra.mrb[0].mxu0 %v118_v42 }
  0x23   :  { %576 = vmatpush3.bf16.msra.mxu0 %v623_v44  ;;  %583 = vmatprep.mubr.msk.bf16.mxu0 %vm629_vm0, %v628_v40 }
  0x24   :  { %432 = vmatmul.mubr.bf16.vlgmr.msra.gmra.mrb[0].mxu1 %v133_v45  ;;  %577 = vmatprep.subr.bf16.mxu0 %v628_v40 }
  0x27   :  { %578 = vmatpush3.bf16.msra.mxu0 %v624_v47 }
  0x28   :  { %579 = vmatprep.subr.bf16.mxu0 %v628_v40 }
  0x2b   :  { %580 = vmatpush3.bf16.msra.mxu0 %v625_v49 }
  0x2c   :  { %581 = vmatprep.subr.bf16.mxu0 %v628_v40 }
  0x2f   :  { %582 = vmatpush3.bf16.msra.mxu0 %v626_v51 }
  0x32   :  { %584 = vmatmul.mubr.msk.bf16.vlgmr.msra.gmra.mrb[4].mxu0 %vm355_vm1, %v125_v52 }
  0xf5   :  { %v542_v53 = vpop.f32.mrb[0].mxu0 }
  0xf6   :  { %v543_v55 = vpop.f32.mrb[1].mxu0 }
  0xf7   :  { %v544_v56 = vadd.f32 %v543_v55, %v542_v53  ;;  %v545_v57 = vpop.f32.mrb[2].mxu0  ;;  %v564_v58 = vpop.f32.mrb[0].mxu1 }
  0xf8   :  { %v546_v59 = vpop.f32.mrb[3].mxu0  ;;  %v565_v60 = vpop.f32.mrb[1].mxu1 }
  0xf9   :  { %v394_v61 = vadd.f32 %v544_v56, %v488_v54  ;;  %v566_v62 = vadd.f32 %v565_v60, %v564_v58  ;;  %v567_v63 = vpop.f32.mrb[2].mxu1 }
  0xfa   :  { %v568_v0 = vpop.f32.mrb[3].mxu1 }
  0xfb   :  { %v434_v1 = vadd.f32 %v566_v62, %v394_v61 }
 0x105   :  { %v473_v2 = vpop.f32.mrb[4].mxu0 }
 0x106   :  { %v474_v3 = vadd.f32 %v473_v2, %v434_v1  ;;  %v585_v4 = vpop.f32.mrb[5].mxu0 }
 0x107   :  { %v476_v5 = vpop.f32.mrb[6].mxu0 }
 0x108   :  { %vm479_vm2 = vcmp.ge.f32.partialorder %v474_v3, 0.0  ;;  %v480_v6 = vmul.f32 0.1, %v474_v3  ;;  %v586_v7 = vpop.f32.mrb[7].mxu0 }
 0x10a   :  { %v481_v8 = vsel %vm479_vm2, %v474_v3, %v480_v6 }
 0x10b   :  { %v482_v9 = vpack.c.bf16 %v481_v8, %v481_v8 }
 0x10d   :  { %483 = vst [vmem:[%s770_s3] sm:$0x1] %v482_v9 }

// kernel: _lambda_.60
= control target key start
LH: loop header
LB: loop body
LE: loop exit
PB: predicated region body
PF: predicated region fallthrough
CT: control target
= control target key end

     0   :  { %v137_v0 = vmov 0.0   ;;  %vm138_vm0 = vmmov 0   ;;  %vm55_vm1 = vcmask 523264   ;;  %s180_s1 = inlined_call_operand.vmem [shape: bf16[64,128], index: 1, kind: input, shape index: {}]   ;;  %s181_s0 = inlined_call_operand.vmem [shape: bf16[2,64], index: 0, kind: input, shape index: {}]   ;;  %s182_s2 = inlined_call_operand.vmem [shape: f32[1,128], index: 2, kind: input, shape index: {}]   ;;  %s183_s3 = inlined_call_operand.vmem [shape: bf16[2,128], index: 3, kind: output, shape index: {}]  }
   0x1   :  { %119 = vmatprep.subr.bf16.mxu0 %v137_v0  ;;  %v133_v1 = vld [vmem:[%s180_s1] sm:$0xff]   ;;  %127 = vmatprep.mubr.msk.bf16.mxu0 %vm138_vm0, %v137_v0  ;;  %v134_v2 = vld [vmem:[%s180_s1 + $0x8] sm:$0xff]   ;;  %v135_v3 = vld [vmem:[%s180_s1 + $0x10] sm:$0xff]  }
   0x2   :  { %120 = vmatpush3.bf16.msra.mxu0 %v133_v1  ;;  %v136_v4 = vld [vmem:[%s180_s1 + $0x18] sm:$0xff]   ;;  %v15_v5 = vld [vmem:[%s181_s0] sm:$0x1] }
   0x3   :  { %121 = vmatprep.subr.bf16.mxu0 %v137_v0  ;;  %v108_v6 = vld [vmem:[%s182_s2] ss:$0 sm:$0xff] }
   0x6   :  { %122 = vmatpush3.bf16.msra.mxu0 %v134_v2 }
   0x7   :  { %123 = vmatprep.subr.bf16.mxu0 %v137_v0 }
   0xa   :  { %124 = vmatpush3.bf16.msra.mxu0 %v135_v3 }
   0xb   :  { %125 = vmatprep.subr.bf16.mxu0 %v137_v0 }
   0xe   :  { %126 = vmatpush3.bf16.msra.mxu0 %v136_v4 }
  0x11   :  { %128 = vmatmul.mubr.msk.bf16.vlgmr.msra.gmra.mrb[0].mxu0 %vm55_vm1, %v15_v5 }
  0xe4   :  { %v93_v7 = vpop.f32.mrb[0].mxu0 }
  0xe5   :  { %v94_v8 = vadd.f32 %v108_v6, %v93_v7  ;;  %v129_v9 = vpop.f32.mrb[1].mxu0 }
  0xe6   :  { %v96_v10 = vpop.f32.mrb[2].mxu0 }
  0xe7   :  { %vm99_vm2 = vcmp.ge.f32.partialorder %v94_v8, 0.0  ;;  %v100_v11 = vmul.f32 0.1, %v94_v8  ;;  %v130_v12 = vpop.f32.mrb[3].mxu0 }
  0xe9   :  { %v101_v13 = vsel %vm99_vm2, %v94_v8, %v100_v11 }
  0xea   :  { %v102_v14 = vpack.c.bf16 %v101_v13, %v101_v13 }
  0xec   :  { %103 = vst [vmem:[%s183_s3] sm:$0x1] %v102_v14 }

// kernel: _lambda_.54
= control target key start
LH: loop header
LB: loop body
LE: loop exit
PB: predicated region body
PF: predicated region fallthrough
CT: control target
= control target key end

     0   :  { %v633_v21 = vmov 1966171168   ;;  %v103_v23 = vlaneseq  ;;  %v634_v40 = vmov 0.0   ;;  %vm635_vm0 = vmmov 0   ;;  %s781_s1 = inlined_call_operand.vmem [shape: bf16[576,128], index: 1, kind: input, shape index: {}]   ;;  %s782_s0 = inlined_call_operand.vmem [shape: bf16[2,576], index: 0, kind: input, shape index: {}]   ;;  %s783_s2 = inlined_call_operand.vmem [shape: f32[1,128], index: 2, kind: input, shape index: {}]   ;;  %s784_s3 = inlined_call_operand.vmem [shape: bf16[2,128], index: 3, kind: input, shape index: {}]   ;;  %s785_s4 = inlined_call_operand.vmem [shape: bf16[2,128], index: 4, kind: output, shape index: {}]  }
   0x1   :  { %v596_v0 = vld [vmem:[%s781_s1 + $0x40] sm:$0xff]   ;;  %v600_v4 = vld [vmem:[%s781_s1 + $0x48] sm:$0xff]   ;;  %v604_v8 = vld [vmem:[%s781_s1 + $0x50] sm:$0xff]   ;;  %v101_v22 = vunpack.c.l.s4 %v633_v21  ;;  %vm358_vm1 = vcmask 523264  }
   0x2   :  { %v597_v1 = vld [vmem:[%s781_s1] sm:$0xff]   ;;  %532 = vmatprep.subr.bf16.mxu0 %v596_v0  ;;  %v601_v5 = vld [vmem:[%s781_s1 + $0x8] sm:$0xff]   ;;  %v605_v9 = vld [vmem:[%s781_s1 + $0x10] sm:$0xff]   ;;  %v104_v29 = vshrl.u32 %v103_v23, 7 }
   0x3   :  { %v598_v2 = vld [vmem:[%s781_s1 + $0xc0] sm:$0xff]   ;;  %533 = vmatpush3.bf16.msra.mxu0 %v597_v1  ;;  %v602_v6 = vld [vmem:[%s781_s1 + $0xc8] sm:$0xff]   ;;  %v606_v10 = vld [vmem:[%s781_s1 + $0xd0] sm:$0xff]   ;;  %v102_v28 = vunpack.c.0.s8 %v101_v22 }
   0x4   :  { %v599_v3 = vld [vmem:[%s781_s1 + $0x80] sm:$0xff]   ;;  %554 = vmatprep.subr.bf16.mxu1 %v598_v2  ;;  %534 = vmatprep.subr.bf16.mxu0 %v600_v4  ;;  %v603_v7 = vld [vmem:[%s781_s1 + $0x88] sm:$0xff]   ;;  %v607_v11 = vld [vmem:[%s781_s1 + $0x90] sm:$0xff]  }
   0x5   :  { %555 = vmatpush3.bf16.msra.mxu1 %v599_v3  ;;  %v608_v12 = vld [vmem:[%s781_s1 + $0x58] sm:$0xff]   ;;  %v612_v16 = vld [vmem:[%s781_s1 + $0x60] sm:$0xff]   ;;  %v616_v20 = vld [vmem:[%s781_s1 + $0x68] sm:$0xff]   ;;  %v105_v34 = vsub.s32 %v102_v28, %v104_v29 }
   0x6   :  { %556 = vmatprep.subr.bf16.mxu1 %v602_v6  ;;  %v609_v13 = vld [vmem:[%s781_s1 + $0x18] sm:$0xff]   ;;  %v613_v17 = vld [vmem:[%s781_s1 + $0x20] sm:$0xff]   ;;  %v617_v24 = vld [vmem:[%s781_s1 + $0x28] sm:$0xff]  }
   0x7   :  { %535 = vmatpush3.bf16.msra.mxu0 %v601_v5  ;;  %v610_v14 = vld [vmem:[%s781_s1 + $0xd8] sm:$0xff]   ;;  %v614_v18 = vld [vmem:[%s781_s1 + $0xe0] sm:$0xff]   ;;  %v618_v25 = vld [vmem:[%s781_s1 + $0xe8] sm:$0xff]  }
   0x8   :  { %536 = vmatprep.subr.bf16.mxu0 %v604_v8  ;;  %v611_v15 = vld [vmem:[%s781_s1 + $0x98] sm:$0xff]   ;;  %v615_v19 = vld [vmem:[%s781_s1 + $0xa0] sm:$0xff]   ;;  %v619_v26 = vld [vmem:[%s781_s1 + $0xa8] sm:$0xff]  }
   0x9   :  { %557 = vmatpush3.bf16.msra.mxu1 %v603_v7  ;;  %v620_v27 = vld [vmem:[%s781_s1 + $0x70] sm:$0xff]   ;;  %v624_v33 = vld [vmem:[%s781_s1 + $0x78] sm:$0xff]   ;;  %v18_v37 = vld [vmem:[%s782_s0] sm:$0x1f] }
   0xa   :  { %558 = vmatprep.subr.bf16.mxu1 %v606_v10  ;;  %v621_v30 = vld [vmem:[%s781_s1 + $0x30] sm:$0xff]   ;;  %v625_v35 = vld [vmem:[%s781_s1 + $0x38] sm:$0xff]   ;;  %v106_v38 = vrot.slane %v18_v37, %v105_v34  ;;  %v629_v44 = vld [vmem:[%s781_s1 + $0x100] sm:$0xff]   ;;  %v99_v48 = vcombine.high %v18_v37, %v18_v37 }
   0xb   :  { %537 = vmatpush3.bf16.msra.mxu0 %v605_v9  ;;  %v622_v31 = vld [vmem:[%s781_s1 + $0xf0] sm:$0xff]   ;;  %v626_v36 = vld [vmem:[%s781_s1 + $0xf8] sm:$0xff]   ;;  %v630_v47 = vld [vmem:[%s781_s1 + $0x108] sm:$0xff]  }
   0xc   :  { %538 = vmatprep.subr.bf16.mxu0 %v608_v12  ;;  %v623_v32 = vld [vmem:[%s781_s1 + $0xb0] sm:$0xff]   ;;  %v628_v39 = vld [vmem:[%s781_s1 + $0xb8] sm:$0xff]   ;;  %v114_v41 = vcombine.high %v106_v38, %v106_v38  ;;  %v121_v42 = vrot.slane %v106_v38, %v105_v34  ;;  %v113_v50 = vrot.slane %v99_v48, %v105_v34  ;;  %v494_v54 = vld [vmem:[%s783_s2] ss:$0 sm:$0xff] }
   0xd   :  { %559 = vmatpush3.bf16.msra.mxu1 %v607_v11  ;;  %v631_v49 = vld [vmem:[%s781_s1 + $0x110] sm:$0xff]   ;;  %v632_v51 = vld [vmem:[%s781_s1 + $0x118] sm:$0xff]   ;;  %v485_v2 = vld [vmem:[%s784_s3] sm:$0x1] }
   0xe   :  { %560 = vmatprep.subr.bf16.mxu1 %v610_v14  ;;  %v135_v43 = vrot.slane %v114_v41, %v105_v34  ;;  %v136_v45 = vcombine.high %v121_v42, %v121_v42  ;;  %v128_v52 = vrot.slane %v113_v50, %v105_v34  ;;  %v486_v6 = vunpack.c.l.bf16 %v485_v2 }
   0xf   :  { %539 = vmatpush3.bf16.msra.mxu0 %v609_v13 }
  0x10   :  { %540 = vmatprep.subr.bf16.mxu0 %v612_v16  ;;  %394 = vmatprep.mubr.bf16.mxu0 %v135_v43  ;;  %v137_v46 = vcombine.high %v135_v43, %v135_v43 }
  0x11   :  { %561 = vmatpush3.bf16.msra.mxu1 %v611_v15 }
  0x12   :  { %562 = vmatprep.subr.bf16.mxu1 %v614_v18  ;;  %434 = vmatprep.mubr.bf16.mxu1 %v137_v46 }
  0x13   :  { %541 = vmatpush3.bf16.msra.mxu0 %v613_v17 }
  0x14   :  { %542 = vmatprep.subr.bf16.mxu0 %v616_v20 }
  0x15   :  { %563 = vmatpush3.bf16.msra.mxu1 %v615_v19 }
  0x16   :  { %564 = vmatprep.subr.bf16.mxu1 %v618_v25 }
  0x17   :  { %543 = vmatpush3.bf16.msra.mxu0 %v617_v24 }
  0x18   :  { %544 = vmatprep.subr.bf16.mxu0 %v620_v27 }
  0x19   :  { %565 = vmatpush3.bf16.msra.mxu1 %v619_v26 }
  0x1a   :  { %566 = vmatprep.subr.bf16.mxu1 %v622_v31 }
  0x1b   :  { %545 = vmatpush3.bf16.msra.mxu0 %v621_v30 }
  0x1c   :  { %546 = vmatprep.subr.bf16.mxu0 %v624_v33 }
  0x1d   :  { %567 = vmatpush3.bf16.msra.mxu1 %v623_v32 }
  0x1e   :  { %568 = vmatprep.subr.bf16.mxu1 %v626_v36 }
  0x1f   :  { %547 = vmatpush3.bf16.msra.mxu0 %v625_v35 }
  0x20   :  { %581 = vmatprep.subr.bf16.mxu0 %v634_v40 }
  0x21   :  { %569 = vmatpush3.bf16.msra.mxu1 %v628_v39 }
  0x22   :  { %395 = vmatmul.mubr.bf16.vlgmr.msra.gmra.mrb[0].mxu0 %v121_v42 }
  0x23   :  { %582 = vmatpush3.bf16.msra.mxu0 %v629_v44  ;;  %589 = vmatprep.mubr.msk.bf16.mxu0 %vm635_vm0, %v634_v40 }
  0x24   :  { %435 = vmatmul.mubr.bf16.vlgmr.msra.gmra.mrb[0].mxu1 %v136_v45  ;;  %583 = vmatprep.subr.bf16.mxu0 %v634_v40 }
  0x27   :  { %584 = vmatpush3.bf16.msra.mxu0 %v630_v47 }
  0x28   :  { %585 = vmatprep.subr.bf16.mxu0 %v634_v40 }
  0x2b   :  { %586 = vmatpush3.bf16.msra.mxu0 %v631_v49 }
  0x2c   :  { %587 = vmatprep.subr.bf16.mxu0 %v634_v40 }
  0x2f   :  { %588 = vmatpush3.bf16.msra.mxu0 %v632_v51 }
  0x32   :  { %590 = vmatmul.mubr.msk.bf16.vlgmr.msra.gmra.mrb[4].mxu0 %vm358_vm1, %v128_v52 }
  0xf5   :  { %v548_v53 = vpop.f32.mrb[0].mxu0 }
  0xf6   :  { %v549_v55 = vpop.f32.mrb[1].mxu0 }
  0xf7   :  { %v550_v56 = vadd.f32 %v549_v55, %v548_v53  ;;  %v551_v57 = vpop.f32.mrb[2].mxu0  ;;  %v570_v58 = vpop.f32.mrb[0].mxu1 }
  0xf8   :  { %v552_v59 = vpop.f32.mrb[3].mxu0  ;;  %v571_v60 = vpop.f32.mrb[1].mxu1 }
  0xf9   :  { %v397_v61 = vadd.f32 %v550_v56, %v494_v54  ;;  %v572_v62 = vadd.f32 %v571_v60, %v570_v58  ;;  %v573_v63 = vpop.f32.mrb[2].mxu1 }
  0xfa   :  { %v574_v0 = vpop.f32.mrb[3].mxu1 }
  0xfb   :  { %v437_v1 = vadd.f32 %v572_v62, %v397_v61 }
 0x105   :  { %v476_v3 = vpop.f32.mrb[4].mxu0 }
 0x106   :  { %v477_v4 = vadd.f32 %v476_v3, %v437_v1  ;;  %v591_v5 = vpop.f32.mrb[5].mxu0 }
 0x107   :  { %v479_v7 = vpop.f32.mrb[6].mxu0 }
 0x108   :  { %vm482_vm2 = vcmp.ge.f32.partialorder %v477_v4, 0.0  ;;  %v483_v8 = vmul.f32 0.1, %v477_v4  ;;  %v592_v9 = vpop.f32.mrb[7].mxu0 }
 0x10a   :  { %v484_v10 = vsel %vm482_vm2, %v477_v4, %v483_v8 }
 0x10b   :  { %v487_v11 = vadd.f32 %v486_v6, %v484_v10 }
 0x10d   :  { %v488_v12 = vpack.c.bf16 %v487_v11, %v487_v11 }
 0x10f   :  { %489 = vst [vmem:[%s785_s4] sm:$0x1] %v488_v12 }

// kernel: _lambda_.61
= control target key start
LH: loop header
LB: loop body
LE: loop exit
PB: predicated region body
PF: predicated region fallthrough
CT: control target
= control target key end

     0   :  { %v221_v0 = vmov 0.0   ;;  %vm222_vm0 = vmmov 0   ;;  %vm115_vm1 = vcmask 261120   ;;  %vm59_vm2 = vcmask 523264   ;;  %s283_s3 = inlined_call_operand.vmem [shape: bf16[64,128], index: 3, kind: input, shape index: {}]   ;;  %s284_s2 = inlined_call_operand.vmem [shape: bf16[32,128], index: 2, kind: input, shape index: {}]   ;;  %s285_s0 = inlined_call_operand.vmem [shape: bf16[8,32], index: 0, kind: input, shape index: {}]   ;;  %s286_s1 = inlined_call_operand.vmem [shape: bf16[8,64], index: 1, kind: input, shape index: {}]   ;;  %s287_s4 = inlined_call_operand.vmem [shape: f32[1,128], index: 4, kind: input, shape index: {}]   ;;  %s288_s5 = inlined_call_operand.vmem [shape: bf16[8,128], index: 5, kind: output, shape index: {}]  }
   0x1   :  { %193 = vmatprep.subr.bf16.mxu0 %v221_v0  ;;  %v215_v1 = vld [vmem:[%s283_s3] sm:$0xff]   ;;  %205 = vmatprep.subr.bf16.mxu1 %v221_v0  ;;  %v216_v2 = vld [vmem:[%s283_s3 + $0x8] sm:$0xff]   ;;  %v218_v5 = vld [vmem:[%s283_s3 + $0x10] sm:$0xff]  }
   0x2   :  { %209 = vmatprep.mubr.msk.bf16.mxu1 %vm222_vm0, %v221_v0  ;;  %201 = vmatprep.mubr.msk.bf16.mxu0 %vm222_vm0, %v221_v0  ;;  %v217_v3 = vld [vmem:[%s284_s2] sm:$0xff]   ;;  %v219_v4 = vld [vmem:[%s284_s2 + $0x8] sm:$0xff]   ;;  %v220_v7 = vld [vmem:[%s283_s3 + $0x18] sm:$0xff]  }
   0x3   :  { %194 = vmatpush3.bf16.msra.mxu0 %v215_v1  ;;  %206 = vmatpush3.bf16.msra.mxu1 %v217_v3  ;;  %v21_v6 = vld [vmem:[%s285_s0] sm:$0xf] }
   0x4   :  { %195 = vmatprep.subr.bf16.mxu0 %v221_v0  ;;  %207 = vmatprep.subr.bf16.mxu1 %v221_v0  ;;  %v26_v8 = vld [vmem:[%s286_s1] sm:$0xf] }
   0x5   :  { %v184_v14 = vld [vmem:[%s287_s4] ss:$0 sm:$0xff] }
   0x7   :  { %196 = vmatpush3.bf16.msra.mxu0 %v216_v2  ;;  %208 = vmatpush3.bf16.msra.mxu1 %v219_v4 }
   0x8   :  { %197 = vmatprep.subr.bf16.mxu0 %v221_v0 }
   0xa   :  { %210 = vmatmul.mubr.msk.bf16.vlgmr.msra.gmra.mrb[0].mxu1 %vm115_vm1, %v21_v6 }
   0xb   :  { %198 = vmatpush3.bf16.msra.mxu0 %v218_v5 }
   0xc   :  { %199 = vmatprep.subr.bf16.mxu0 %v221_v0 }
   0xf   :  { %200 = vmatpush3.bf16.msra.mxu0 %v220_v7 }
  0x12   :  { %202 = vmatmul.mubr.msk.bf16.vlgmr.msra.gmra.mrb[0].mxu0 %vm59_vm2, %v26_v8 }
  0xdd   :  { %v153_v9 = vpop.f32.mrb[0].mxu1 }
  0xde   :  { %v211_v10 = vpop.f32.mrb[1].mxu1 }
  0xdf   :  { %v156_v11 = vpop.f32.mrb[2].mxu1 }
  0xe0   :  { %v212_v12 = vpop.f32.mrb[3].mxu1 }
  0xe5   :  { %v97_v13 = vpop.f32.mrb[0].mxu0 }
  0xe6   :  { %v154_v15 = vadd.f32 %v153_v9, %v97_v13  ;;  %v203_v16 = vpop.f32.mrb[1].mxu0 }
  0xe7   :  { %v100_v17 = vpop.f32.mrb[2].mxu0 }
  0xe8   :  { %v166_v18 = vadd.f32 %v184_v14, %v154_v15  ;;  %v204_v19 = vpop.f32.mrb[3].mxu0 }
  0xea   :  { %vm167_vm3 = vcmp.ge.f32.partialorder %v166_v18, 0.0  ;;  %v168_v20 = vmul.f32 0.1, %v166_v18 }
  0xec   :  { %v169_v21 = vsel %vm167_vm3, %v166_v18, %v168_v20 }
  0xed   :  { %v170_v22 = vpack.c.bf16 %v169_v21, %v169_v21 }
  0xef   :  { %171 = vst [vmem:[%s288_s5] sm:$0xf] %v170_v22 }

// kernel: _lambda_.66
= control target key start
LH: loop header
LB: loop body
LE: loop exit
PB: predicated region body
PF: predicated region fallthrough
CT: control target
= control target key end

     0   :  { %v111_v0 = vmov 0.0   ;;  %vm112_vm0 = vmmov 0   ;;  %vm39_vm1 = vcmask 261120   ;;  %s148_s1 = inlined_call_operand.vmem [shape: bf16[32,128], index: 1, kind: input, shape index: {}]   ;;  %s149_s0 = inlined_call_operand.vmem [shape: bf16[8,32], index: 0, kind: input, shape index: {}]   ;;  %s150_s2 = inlined_call_operand.vmem [shape: f32[1,128], index: 2, kind: input, shape index: {}]   ;;  %s151_s3 = inlined_call_operand.vmem [shape: bf16[8,128], index: 3, kind: output, shape index: {}]  }
   0x1   :  { %99 = vmatprep.subr.bf16.mxu0 %v111_v0  ;;  %v109_v1 = vld [vmem:[%s148_s1] sm:$0xff]   ;;  %103 = vmatprep.mubr.msk.bf16.mxu0 %vm112_vm0, %v111_v0  ;;  %v110_v2 = vld [vmem:[%s148_s1 + $0x8] sm:$0xff]  }
   0x2   :  { %100 = vmatpush3.bf16.msra.mxu0 %v109_v1  ;;  %v15_v3 = vld [vmem:[%s149_s0] sm:$0xf] }
   0x3   :  { %101 = vmatprep.subr.bf16.mxu0 %v111_v0  ;;  %v92_v4 = vld [vmem:[%s150_s2] ss:$0 sm:$0xff] }
   0x6   :  { %102 = vmatpush3.bf16.msra.mxu0 %v110_v2 }
   0x9   :  { %104 = vmatmul.mubr.msk.bf16.vlgmr.msra.gmra.mrb[0].mxu0 %vm39_vm1, %v15_v3 }
  0xdc   :  { %v77_v5 = vpop.f32.mrb[0].mxu0 }
  0xdd   :  { %v78_v6 = vadd.f32 %v92_v4, %v77_v5  ;;  %v105_v7 = vpop.f32.mrb[1].mxu0 }
  0xde   :  { %v80_v8 = vpop.f32.mrb[2].mxu0 }
  0xdf   :  { %vm83_vm2 = vcmp.ge.f32.partialorder %v78_v6, 0.0  ;;  %v84_v9 = vmul.f32 0.1, %v78_v6  ;;  %v106_v10 = vpop.f32.mrb[3].mxu0 }
  0xe1   :  { %v85_v11 = vsel %vm83_vm2, %v78_v6, %v84_v9 }
  0xe2   :  { %v86_v12 = vpack.c.bf16 %v85_v11, %v85_v11 }
  0xe4   :  { %87 = vst [vmem:[%s151_s3] sm:$0xf] %v86_v12 }

// kernel: _lambda_.67
= control target key start
LH: loop header
LB: loop body
LE: loop exit
PB: predicated region body
PF: predicated region fallthrough
CT: control target
= control target key end

     0   :  { %vm129_vm0 = vcmask 130048   ;;  %vm57_vm1 = vcmask 261120   ;;  %s355_s3 = inlined_call_operand.vmem [shape: bf16[32,128], index: 3, kind: input, shape index: {}]   ;;  %s356_s2 = inlined_call_operand.vmem [shape: bf16[16,128], index: 2, kind: input, shape index: {}]   ;;  %s357_s0 = inlined_call_operand.vmem [shape: bf16[32,16], index: 0, kind: input, shape index: {}]   ;;  %s358_s1 = inlined_call_operand.vmem [shape: bf16[32,32], index: 1, kind: input, shape index: {}]   ;;  %s359_s4 = inlined_call_operand.vmem [shape: f32[1,128], index: 4, kind: input, shape index: {}]   ;;  %s360_s5 = inlined_call_operand.vmem [shape: bf16[32,128], index: 5, kind: output, shape index: {}]  }
   0x1   :  { %v288_v0 = vld [vmem:[%s355_s3] sm:$0xff]   ;;  %v290_v2 = vld [vmem:[%s355_s3 + $0x8] sm:$0xff]  }
   0x2   :  { %v289_v1 = vld [vmem:[%s356_s2] sm:$0xff]   ;;  %270 = vmatprep.subr.bf16.mxu1 %v288_v0  ;;  %v292_v4 = vld [vmem:[%s357_s0 + $0x8] sm:$0xff]  }
   0x3   :  { %271 = vmatpush3.bf16.msra.mxu1 %v288_v0  ;;  %278 = vmatprep.subr.bf16.mxu0 %v289_v1  ;;  %v291_v3 = vld [vmem:[%s357_s0] sm:$0xff]   ;;  %v294_v6 = vld [vmem:[%s358_s1 + $0x8] sm:$0xff]  }
   0x4   :  { %279 = vmatpush3.bf16.msra.mxu0 %v289_v1  ;;  %272 = vmatprep.subr.bf16.mxu1 %v290_v2  ;;  %v293_v5 = vld [vmem:[%s358_s1] sm:$0xff]  }
   0x5   :  { %280 = vmatprep.mubr.msk.bf16.mxu0 %vm129_vm0, %v291_v3  ;;  %274 = vmatprep.mubr.msk.bf16.mxu1 %vm57_vm1, %v293_v5  ;;  %v243_v11 = vld [vmem:[%s359_s4] ss:$0 sm:$0xff] }
   0x7   :  { %273 = vmatpush3.bf16.msra.mxu1 %v290_v2  ;;  %281 = vmatmul.mubr.msk.bf16.vlgmr.msra.gmra.mrb[0].mxu0 %vm129_vm0, %v292_v4 }
   0xa   :  { %275 = vmatmul.mubr.msk.bf16.vlgmr.msra.gmra.mrb[0].mxu1 %vm57_vm1, %v294_v6 }
  0xda   :  { %v282_v7 = vpop.f32.mrb[0].mxu0 }
  0xdb   :  { %v170_v8 = vpop.f32.mrb[1].mxu0 }
  0xdc   :  { %v283_v9 = vpop.f32.mrb[2].mxu0 }
  0xdd   :  { %v276_v10 = vpop.f32.mrb[0].mxu1  ;;  %v173_v12 = vpop.f32.mrb[3].mxu0 }
  0xde   :  { %v179_v13 = vadd.f32 %v282_v7, %v276_v10  ;;  %v98_v14 = vpop.f32.mrb[1].mxu1 }
  0xdf   :  { %v171_v15 = vadd.f32 %v170_v8, %v98_v14  ;;  %v277_v16 = vpop.f32.mrb[2].mxu1 }
  0xe0   :  { %v194_v17 = vadd.f32 %v243_v11, %v179_v13  ;;  %v182_v18 = vadd.f32 %v283_v9, %v277_v16  ;;  %v101_v19 = vpop.f32.mrb[3].mxu1 }
  0xe1   :  { %v192_v20 = vadd.f32 %v243_v11, %v171_v15  ;;  %v174_v21 = vadd.f32 %v173_v12, %v101_v19 }
  0xe2   :  { %v202_v22 = vmul.f32 0.1, %v194_v17  ;;  %v195_v23 = vadd.f32 %v243_v11, %v182_v18  ;;  %vm198_vm2 = vcmp.ge.f32.partialorder %v194_v17, 0.0 }
  0xe3   :  { %v200_v24 = vmul.f32 0.1, %v192_v20  ;;  %v193_v25 = vadd.f32 %v243_v11, %v174_v21  ;;  %vm196_vm3 = vcmp.ge.f32.partialorder %v192_v20, 0.0 }
  0xe4   :  { %vm199_vm4 = vcmp.ge.f32.partialorder %v195_v23, 0.0  ;;  %v203_v26 = vmul.f32 0.1, %v195_v23  ;;  %v206_v28 = vsel %vm198_vm2, %v194_v17, %v202_v22 }
  0xe5   :  { %vm197_vm5 = vcmp.ge.f32.partialorder %v193_v25, 0.0  ;;  %v201_v27 = vmul.f32 0.1, %v193_v25  ;;  %v204_v30 = vsel %vm196_vm3, %v192_v20, %v200_v24 }
  0xe6   :  { %v207_v29 = vsel %vm199_vm4, %v195_v23, %v203_v26 }
  0xe7   :  { %v260_v31 = vpack.c.bf16 %v207_v29, %v206_v28  ;;  %v205_v32 = vsel %vm197_vm5, %v193_v25, %v201_v27 }
  0xe8   :  { %v255_v33 = vpack.c.bf16 %v205_v32, %v204_v30 }
  0xe9   :  { %262 = vst [vmem:[%s360_s5 + $0x8] sm:$0xff] %v260_v31  }
  0xea   :  { %256 = vst [vmem:[%s360_s5] sm:$0xff] %v255_v33  }

// kernel: _lambda_.75
= control target key start
LH: loop header
LB: loop body
LE: loop exit
PB: predicated region body
PF: predicated region fallthrough
CT: control target
= control target key end

     0   :  { %v169_v1 = vmov 0.0   ;;  %vm170_vm0 = vmmov 0   ;;  %s222_s0 = inlined_call_operand.vmem [shape: bf16[8,64], index: 0, kind: input, shape index: {}]   ;;  %s223_s1 = inlined_call_operand.vmem [shape: bf16[64,128], index: 1, kind: input, shape index: {}]   ;;  %s224_s2 = inlined_call_operand.vmem [shape: f32[1,128], index: 2, kind: input, shape index: {}]   ;;  %s225_s3 = inlined_call_operand.hbm [shape: f32[8,128], index: 3, kind: output, shape index: {}]  }
   0x1   :  { %v141_v0 = vld [vmem:[%s223_s1] sm:$0xff]   ;;  %126 = vmatprep.subr.bf16.mxu0 %v169_v1  ;;  %v142_v2 = vld [vmem:[%s223_s1 + $0x8] sm:$0xff]   ;;  %134 = vmatprep.mubr.msk.bf16.mxu0 %vm170_vm0, %v169_v1 }
   0x2   :  { %127 = vmatpush3.bf16.msra.mxu0 %v141_v0 }
   0x3   :  { %128 = vmatprep.subr.bf16.mxu0 %v169_v1 }
   0x4   :  { %8 = vsyncpa [#allocation3], 0  ;;  %v143_v3 = vld [vmem:[%s223_s1 + $0x10] sm:$0xff]   ;;  %v144_v4 = vld [vmem:[%s223_s1 + $0x18] sm:$0xff]   ;;  %vm56_vm1 = vcmask 523264   ;;  %s171_s24 = smov [#allocation2]  }
   0x5   :  { %v16_v5 = vld [vmem:[%s222_s0] sm:$0xf]  ;;  %s107_s25 = sshll.u32 %s171_s24, 4  ;;  %s108_s25 = int_to_ptr.vmem [resolvable:$true] %s107_s25 }
   0x6   :  { %129 = vmatpush3.bf16.msra.mxu0 %v142_v2  ;;  %v115_v6 = vld [vmem:[%s224_s2] ss:$0 sm:$0xff]  ;;  %s145_s1 = scalar_lea.vmem %s108_s25, 128  ;;  %p150_p1 = scmp.lt.s32.totalorder %s108_s25, %s108_s25 }
   0x7   :  { %130 = vmatprep.subr.bf16.mxu0 %v169_v1  ;;  %p146_p0 = scmp.ne.s32.totalorder %s108_s25, %s145_s1  ;;  %p151_p2 = scmp.lt.s32.totalorder %s145_s1, %s145_s1 }
   0x9   :  { %p152_p3 = por %p151_p2, %p150_p1 }
   0xa   :  { %131 = vmatpush3.bf16.msra.mxu0 %v143_v3 }
   0xb   :  { %132 = vmatprep.subr.bf16.mxu0 %v169_v1  ;;  %p153_p4 = pnand %p152_p3, %p146_p0 }
   0xe   :  { %133 = vmatpush3.bf16.msra.mxu0 %v144_v4 }
  0x11   :  { %135 = vmatmul.mubr.msk.bf16.vlgmr.msra.gmra.mrb[0].mxu0 %vm56_vm1, %v16_v5 }
  0xe4   :  { %v94_v7 = vpop.f32.mrb[0].mxu0 }
  0xe5   :  { %v95_v8 = vadd.f32 %v115_v6, %v94_v7  ;;  %v136_v9 = vpop.f32.mrb[1].mxu0 }
  0xe6   :  { %v97_v10 = vpop.f32.mrb[2].mxu0 }
  0xe7   :  { %100 = vst [vmem:[#allocation2] sm:$0xff] %v95_v8  ;;  %v137_v11 = vpop.f32.mrb[3].mxu0 }
  0xe8   :  { %156 = shalt.err (!%p153_p4)
}
  0xe9   :  { %s157_s2 = scalar_lea.hbm %s225_s3, 128 }
  0xea   :  { %p158_p5 = scmp.ne.s32.totalorder %s225_s3, %s157_s2  ;;  %p161_p6 = scmp.lt.u32.totalorder %s157_s2, %s225_s3 }
  0xec   :  { %p163_p7 = pnand %p161_p6, %p158_p5 }
  0xee   :  { %166 = shalt.err (!%p163_p7)
}
  0xef   :  { %110 = dma.vmem_to_hbm [thread:$0]  %s108_s25, 128, %s225_s3, [#allocation3]  }
  0xf0   :  { %167 = dma.done.wait [#allocation3], 128  }
  0xf1   :  { %168 = vsyncadd [#allocation3], 4294967168 }
  0xf2   :  { %114 = vsyncpa [#allocation3], 1 }

// kernel: _lambda_.73
= control target key start
LH: loop header
LB: loop body
LE: loop exit
PB: predicated region body
PF: predicated region fallthrough
CT: control target
= control target key end

     0   :  { %v216_v1 = vmov 0.0   ;;  %vm217_vm0 = vmmov 0   ;;  %s281_s0 = inlined_call_operand.vmem [shape: bf16[2,128], index: 0, kind: input, shape index: {}]   ;;  %s282_s1 = inlined_call_operand.vmem [shape: bf16[128,128], index: 1, kind: input, shape index: {}]   ;;  %s283_s2 = inlined_call_operand.vmem [shape: f32[1,128], index: 2, kind: input, shape index: {}]   ;;  %s284_s3 = inlined_call_operand.hbm [shape: f32[2,128], index: 3, kind: output, shape index: {}]  }
   0x1   :  { %v184_v0 = vld [vmem:[%s282_s1] sm:$0xff]   ;;  %161 = vmatprep.subr.bf16.mxu0 %v216_v1  ;;  %v185_v2 = vld [vmem:[%s282_s1 + $0x8] sm:$0xff]   ;;  %177 = vmatprep.mubr.msk.bf16.mxu0 %vm217_vm0, %v216_v1  ;;  %v186_v3 = vld [vmem:[%s282_s1 + $0x10] sm:$0xff]  }
   0x2   :  { %162 = vmatpush3.bf16.msra.mxu0 %v184_v0 }
   0x3   :  { %163 = vmatprep.subr.bf16.mxu0 %v216_v1 }
   0x6   :  { %164 = vmatpush3.bf16.msra.mxu0 %v185_v2 }
   0x7   :  { %165 = vmatprep.subr.bf16.mxu0 %v216_v1 }
   0x8   :  { %8 = vsyncpa [#allocation3], 0  ;;  %v187_v4 = vld [vmem:[%s282_s1 + $0x18] sm:$0xff]   ;;  %v188_v5 = vld [vmem:[%s282_s1 + $0x20] sm:$0xff]   ;;  %s218_s5 = smov [#allocation2]  }
   0x9   :  { %v189_v6 = vld [vmem:[%s282_s1 + $0x28] sm:$0xff]   ;;  %v190_v7 = vld [vmem:[%s282_s1 + $0x30] sm:$0xff]   ;;  %v191_v8 = vld [vmem:[%s282_s1 + $0x38] sm:$0xff]   ;;  %s135_s6 = sshll.u32 %s218_s5, 4  ;;  %s136_s6 = int_to_ptr.vmem [resolvable:$true] %s135_s6 }
   0xa   :  { %166 = vmatpush3.bf16.msra.mxu0 %v186_v3  ;;  %v16_v9 = vld [vmem:[%s281_s0] sm:$0x1]  ;;  %s192_s1 = scalar_lea.vmem %s136_s6, 32  ;;  %p197_p1 = scmp.lt.s32.totalorder %s136_s6, %s136_s6 }
   0xb   :  { %167 = vmatprep.subr.bf16.mxu0 %v216_v1  ;;  %v143_v10 = vld [vmem:[%s283_s2] ss:$0 sm:$0xff]  ;;  %p193_p0 = scmp.ne.s32.totalorder %s136_s6, %s192_s1  ;;  %p198_p2 = scmp.lt.s32.totalorder %s192_s1, %s192_s1 }
   0xd   :  { %p199_p3 = por %p198_p2, %p197_p1 }
   0xe   :  { %168 = vmatpush3.bf16.msra.mxu0 %v187_v4 }
   0xf   :  { %169 = vmatprep.subr.bf16.mxu0 %v216_v1  ;;  %p200_p4 = pnand %p199_p3, %p193_p0 }
  0x12   :  { %170 = vmatpush3.bf16.msra.mxu0 %v188_v5 }
  0x13   :  { %171 = vmatprep.subr.bf16.mxu0 %v216_v1 }
  0x16   :  { %172 = vmatpush3.bf16.msra.mxu0 %v189_v6 }
  0x17   :  { %173 = vmatprep.subr.bf16.mxu0 %v216_v1 }
  0x1a   :  { %174 = vmatpush3.bf16.msra.mxu0 %v190_v7 }
  0x1b   :  { %175 = vmatprep.subr.bf16.mxu0 %v216_v1 }
  0x1e   :  { %176 = vmatpush3.bf16.msra.mxu0 %v191_v8 }
  0x21   :  { %178 = vmatmul.mubr.bf16.vlgmr.msra.gmra.mrb[0].mxu0 %v16_v9 }
  0xf4   :  { %v122_v11 = vpop.f32.mrb[0].mxu0 }
  0xf5   :  { %v123_v12 = vadd.f32 %v143_v10, %v122_v11  ;;  %v179_v13 = vpop.f32.mrb[1].mxu0 }
  0xf6   :  { %v125_v14 = vpop.f32.mrb[2].mxu0 }
  0xf7   :  { %128 = vst [vmem:[#allocation2] sm:$0x3] %v123_v12  ;;  %v180_v15 = vpop.f32.mrb[3].mxu0 }
  0xf8   :  { %203 = shalt.err (!%p200_p4)
}
  0xf9   :  { %s204_s2 = scalar_lea.hbm %s284_s3, 32 }
  0xfa   :  { %p205_p5 = scmp.ne.s32.totalorder %s284_s3, %s204_s2  ;;  %p208_p6 = scmp.lt.u32.totalorder %s204_s2, %s284_s3 }
  0xfc   :  { %p210_p7 = pnand %p208_p6, %p205_p5 }
  0xfe   :  { %213 = shalt.err (!%p210_p7)
}
  0xff   :  { %138 = dma.vmem_to_hbm [thread:$0]  %s136_s6, 32, %s284_s3, [#allocation3]  }
 0x100   :  { %214 = dma.done.wait [#allocation3], 32  }
 0x101   :  { %215 = vsyncadd [#allocation3], 4294967264 }
 0x102   :  { %142 = vsyncpa [#allocation3], 1 }

// kernel: _lambda_.77
= control target key start
LH: loop header
LB: loop body
LE: loop exit
PB: predicated region body
PF: predicated region fallthrough
CT: control target
= control target key end

     0   :  { %vm53_vm0 = vcmask 261120   ;;  %s229_s0 = inlined_call_operand.vmem [shape: bf16[32,32], index: 0, kind: input, shape index: {}]   ;;  %s230_s1 = inlined_call_operand.vmem [shape: bf16[32,128], index: 1, kind: input, shape index: {}]   ;;  %s231_s2 = inlined_call_operand.vmem [shape: f32[1,128], index: 2, kind: input, shape index: {}]   ;;  %s232_s3 = inlined_call_operand.hbm [shape: f32[32,128], index: 3, kind: output, shape index: {}]  }
   0x1   :  { %v151_v0 = vld [vmem:[%s230_s1] sm:$0xff]   ;;  %v152_v1 = vld [vmem:[%s230_s1 + $0x8] sm:$0xff]  }
   0x2   :  { %140 = vmatprep.subr.bf16.mxu0 %v151_v0  ;;  %v153_v2 = vld [vmem:[%s229_s0] sm:$0xff]  }
   0x3   :  { %141 = vmatpush3.bf16.msra.mxu0 %v151_v0  ;;  %144 = vmatprep.mubr.msk.bf16.mxu0 %vm53_vm0, %v153_v2 }
   0x4   :  { %142 = vmatprep.subr.bf16.mxu0 %v152_v1 }
   0x5   :  { %8 = vsyncpa [#allocation3], 0  ;;  %v154_v3 = vld [vmem:[%s229_s0 + $0x8] sm:$0xff]   ;;  %v129_v4 = vld [vmem:[%s231_s2] ss:$0 sm:$0xff]  ;;  %s179_s1 = smov [#allocation2]  }
   0x6   :  { %s118_s22 = sshll.u32 %s179_s1, 4  ;;  %s119_s22 = int_to_ptr.vmem [resolvable:$true] %s118_s22 }
   0x7   :  { %143 = vmatpush3.bf16.msra.mxu0 %v152_v1  ;;  %s155_s0 = scalar_lea.vmem %s119_s22, 512  ;;  %p160_p1 = scmp.lt.s32.totalorder %s119_s22, %s119_s22 }
   0x8   :  { %p156_p0 = scmp.ne.s32.totalorder %s119_s22, %s155_s0  ;;  %p161_p2 = scmp.lt.s32.totalorder %s155_s0, %s155_s0 }
   0xa   :  { %145 = vmatmul.mubr.msk.bf16.vlgmr.msra.gmra.mrb[0].mxu0 %vm53_vm0, %v154_v3  ;;  %p162_p3 = por %p161_p2, %p160_p1 }
   0xc   :  { %p163_p4 = pnand %p162_p3, %p156_p0 }
  0xdd   :  { %v146_v5 = vpop.f32.mrb[0].mxu0 }
  0xde   :  { %v103_v6 = vadd.f32 %v146_v5, %v129_v4  ;;  %v94_v7 = vpop.f32.mrb[1].mxu0 }
  0xdf   :  { %v95_v8 = vadd.f32 %v129_v4, %v94_v7  ;;  %v147_v9 = vpop.f32.mrb[2].mxu0 }
  0xe0   :  { %111 = vst [vmem:[#allocation2 + $0x10] sm:$0xff] %v103_v6  ;;  %v106_v10 = vadd.f32 %v147_v9, %v129_v4  ;;  %v97_v11 = vpop.f32.mrb[3].mxu0 }
  0xe1   :  { %109 = vst [vmem:[#allocation2] sm:$0xff] %v95_v8  ;;  %v98_v12 = vadd.f32 %v129_v4, %v97_v11 }
  0xe2   :  { %112 = vst [vmem:[#allocation2 + $0x18] sm:$0xff] %v106_v10 }
  0xe3   :  { %110 = vst [vmem:[#allocation2 + $0x8] sm:$0xff] %v98_v12 }
  0xe4   :  { %166 = shalt.err (!%p163_p4)
}
  0xe5   :  { %s167_s24 = scalar_lea.hbm %s232_s3, 512 }
  0xe6   :  { %p168_p5 = scmp.ne.s32.totalorder %s232_s3, %s167_s24  ;;  %p171_p6 = scmp.lt.u32.totalorder %s167_s24, %s232_s3 }
  0xe8   :  { %p173_p7 = pnand %p171_p6, %p168_p5 }
  0xea   :  { %176 = shalt.err (!%p173_p7)
}
  0xeb   :  { %s180_s29 = smov 128   ;;  %s181_s30 = smov 8  }
  0xec   :  { %124 = dma.vmem_to_hbm [thread:$0]  %s119_s22, 512, %s232_s3, [#allocation3], %s180_s29, %s180_s29, %s181_s30  }
  0xed   :  { %177 = dma.done.wait [#allocation3], 512  }
  0xee   :  { %178 = vsyncadd [#allocation3], 4294966784 }
  0xef   :  { %128 = vsyncpa [#allocation3], 1 }

</bundles_post_ra>
